<compile_context>
chip_gen: v7x
topology: tpu7x:2x2x1
jax: 0.10.0
libtpu: 0.0.40
codegen_flags: <defaults>
</compile_context>

<pallas_src>
import functools

import jax
import jax.numpy as jnp
from jax.experimental import pallas as pl
from jax.experimental.pallas import tpu as pltpu


_LANE = 128  # minimum (lane-dense) channel width


def _cpad(c):
    return max(_LANE, c)


# -----------------------------------------------------------------------------
# Kernel: one grid step = one output row (n, i) x one Cout tile j.
# The 3x3 taps are folded into the kernel: 9 accumulating (Wo,Cin)@(Cin,tn)
# MXU matmuls into an f32 accumulator; bias + ReLU on the f32 accumulator.
# -----------------------------------------------------------------------------
def _conv3x3_row_kernel(*refs, stride, Hp, Wo, relu):
    if stride == 1:
        x_ref, w_ref, b_ref, o_ref = refs
    else:
        xe_ref, xo_ref, w_ref, b_ref, o_ref = refs

    n = pl.program_id(1)          # image index
    i = pl.program_id(2)          # output row index
    tn = o_ref.shape[-1]

    acc = jnp.zeros((Wo, tn), jnp.float32)
    for dy in range(3):
        row = n * Hp + stride * i + dy          # row in padded activation
        if stride == 1:
            xrow = x_ref[row]                   # (Wp, Cin_pad) bf16
            segs = (xrow[0:Wo], xrow[1:1 + Wo], xrow[2:2 + Wo])
        else:
            erow = xe_ref[row]                  # even columns (Wo+1, Cin_pad)
            orow = xo_ref[row]                  # odd  columns (Wo+1, Cin_pad)
            segs = (erow[0:Wo], orow[0:Wo], erow[1:1 + Wo])
        for dx in range(3):
            acc = acc + jnp.dot(segs[dx], w_ref[dy * 3 + dx],
                                preferred_element_type=jnp.float32)

    acc = acc + b_ref[...]                      # (1, tn) f32, broadcast over rows
    if relu:
        acc = jnp.maximum(acc, 0.0)
    o_ref[0] = acc.astype(o_ref.dtype)


def sparse_conv(x, w9, b2, *, stride, relu, out_dtype, tn=128):
    """Dense analogue of SparseConv(kernel=3, stride) [+ ReLU].

    x:  (N, H, W, Cin_pad)      bf16 channel-padded NHWC activation
    w9: (9, Cin_pad, Cout_pad)  bf16 per-tap weights
    b2: (1, Cout_pad)           f32 bias
    """
    N, H, W, Cp = x.shape
    Cop = w9.shape[-1]
    Ho, Wo = H // stride, W // stride
    Hp, Wp = H + 2, W + 2

    xp = jnp.pad(x, ((0, 0), (1, 1), (1, 1), (0, 0)))        # "same" zero border

    if stride == 1:
        acts = [xp.reshape(N * Hp, Wp, Cp)]
        act_specs = [pl.BlockSpec((N * Hp, Wp, Cp), lambda j, n, i: (0, 0, 0))]
    else:
        xe = xp[:, :, 0::2, :].reshape(N * Hp, Wo + 1, Cp)   # even columns
        xo = xp[:, :, 1::2, :].reshape(N * Hp, Wo + 1, Cp)   # odd  columns
        acts = [xe, xo]
        act_specs = [
            pl.BlockSpec((N * Hp, Wo + 1, Cp), lambda j, n, i: (0, 0, 0)),
            pl.BlockSpec((N * Hp, Wo + 1, Cp), lambda j, n, i: (0, 0, 0)),
        ]

    tn = min(tn, Cop)
    grid = (Cop // tn, N, Ho)     # Cout tiles outermost: each weight tile DMA'd once

    kernel = functools.partial(_conv3x3_row_kernel,
                               stride=stride, Hp=Hp, Wo=Wo, relu=relu)
    out = pl.pallas_call(
        kernel,
        out_shape=jax.ShapeDtypeStruct((N * Ho, Wo, Cop), out_dtype),
        grid_spec=pltpu.PrefetchScalarGridSpec(
            num_scalar_prefetch=0,
            grid=grid,
            in_specs=act_specs + [
                pl.BlockSpec((9, Cp, tn), lambda j, n, i: (0, 0, j)),
                pl.BlockSpec((1, tn), lambda j, n, i: (0, j)),
            ],
            out_specs=pl.BlockSpec((1, Wo, tn), lambda j, n, i: (n * Ho + i, 0, j)),
        ),
        compiler_params=pltpu.CompilerParams(
            dimension_semantics=("parallel", "parallel", "parallel"),
        ),
    )(*acts, w9, b2)
    return out.reshape(N, Ho, Wo, Cop)


# (Cin, Cout, stride, relu) for the 6 convs of layer1/layer2/layer3.
_LAYER_CFG = [
    (1, 32, 1, True),
    (32, 64, 2, True),
    (64, 128, 1, True),
    (128, 256, 2, True),
    (256, 512, 1, True),
    (512, 1024, 2, False),    # no ReLU after the last conv of layer3
]


def init_encoder_params(key):
    params = []
    for l, (cin, cout, _s, _r) in enumerate(_LAYER_CFG):
        kw, kb = jax.random.split(jax.random.fold_in(key, l))
        std = (2.0 / (9 * cin)) ** 0.5
        w = std * jax.random.normal(kw, (3, 3, cin, cout), dtype=jnp.float32)
        b = 0.01 * jax.random.normal(kb, (cout,), dtype=jnp.float32)
        params.append((w, b))
    return params


def prepare_params(params):
    """Zero-pad channels to lane-dense widths, flatten taps, cast weights to bf16.

    Zero-padded input channels hit zero weight rows and zero-padded output
    channels get zero weights + zero bias, so the real channels are bit-exact
    w.r.t. the unpadded convolution (up to bf16 rounding of the real weights).
    """
    prepped = []
    for (w, b), (cin, cout, _s, _r) in zip(params, _LAYER_CFG):
        cip, cop = _cpad(cin), _cpad(cout)
        wp = jnp.zeros((3, 3, cip, cop), jnp.float32).at[:, :, :cin, :cout].set(w)
        w9 = wp.reshape(9, cip, cop).astype(jnp.bfloat16)
        bp = jnp.zeros((1, cop), jnp.float32).at[0, :cout].set(b)
        prepped.append((w9, bp))
    return prepped


@jax.jit
def encoder_forward(prepped_params, x_nchw):
    # PyTorch NCHW -> NHWC, channel-pad to lane-dense width, bf16 activations.
    x = jnp.transpose(x_nchw, (0, 2, 3, 1))
    cin = x.shape[-1]
    x = jnp.pad(x, ((0, 0), (0, 0), (0, 0), (0, _cpad(cin) - cin)))
    x = x.astype(jnp.bfloat16)

    n_layers = len(_LAYER_CFG)
    for l, ((w9, bp), (_ci, _co, stride, relu)) in enumerate(
            zip(prepped_params, _LAYER_CFG)):
        out_dtype = jnp.float32 if l == n_layers - 1 else jnp.bfloat16
        x = sparse_conv(x, w9, bp, stride=stride, relu=relu, out_dtype=out_dtype)

    # final Cout (1024) is already lane-dense / unpadded; return NCHW like PyTorch.
    return jnp.transpose(x, (0, 3, 1, 2))


if __name__ == "__main__":
    key = jax.random.PRNGKey(0)
    k_x, k_p = jax.random.split(key)
    # Encoder's first conv has in_channels=1; small dense "voxel grid" input.
    x = jax.random.normal(k_x, (2, 1, 16, 16), dtype=jnp.float32)    # NCHW
    params = init_encoder_params(k_p)
    prepped = prepare_params(params)

    out = encoder_forward(prepped, x)
    out = jax.block_until_ready(out)

    assert out.shape == (2, 1024, 2, 2), out.shape
    assert bool(jnp.all(jnp.isfinite(out)))
    print("KERNEL_OK")
</pallas_src>

<mosaic_0001>
module attributes {stable_mosaic.version = 11 : i64} {
  func.func @_conv3x3_row_kernel(%arg0: i32, %arg1: i32, %arg2: i32, %arg3: memref<36x18x128xbf16, #tpu.memory_space<vmem>>, %arg4: memref<9x128x128xbf16, #tpu.memory_space<vmem>>, %arg5: memref<1x128xf32, #tpu.memory_space<vmem>>, %arg6: memref<1x16x128xbf16, #tpu.memory_space<vmem>>) attributes {dimension_semantics = [#tpu.dimension_semantics<parallel>, #tpu.dimension_semantics<parallel>, #tpu.dimension_semantics<parallel>], iteration_bounds = array<i64: 1, 2, 16>, scalar_prefetch = 0 : i64, scratch_operands = 0 : i64, tpu.core_type = #tpu.core_type<tc>, window_params = [{pipeline_mode = #tpu.pipeline_mode<synchronous>, transform_indices = @transform_0, window_bounds = array<i64: 36, 18, 128>}, {transform_indices = @transform_1, window_bounds = array<i64: 9, 128, 128>}, {transform_indices = @transform_2, window_bounds = array<i64: 1, 128>}, {transform_indices = @transform_3, window_bounds = array<i64: 1, 16, 128>}]} {
    %cst = arith.constant 0.000000e+00 : f32
    %0 = vector.broadcast %cst : f32 to vector<16x128xf32>
    %c18_i32 = arith.constant 18 : i32
    %1 = arith.muli %arg1, %c18_i32 : i32
    %c1_i32 = arith.constant 1 : i32
    %2 = arith.muli %c1_i32, %arg2 : i32
    %3 = arith.addi %1, %2 : i32
    %c0_i32 = arith.constant 0 : i32
    %4 = arith.addi %3, %c0_i32 : i32
    %5 = arith.index_cast %4 : i32 to index
    %c0 = arith.constant 0 : index
    %c0_0 = arith.constant 0 : index
    %6 = vector.load %arg3[%5, %c0, %c0_0] : memref<36x18x128xbf16, #tpu.memory_space<vmem>>, vector<1x18x128xbf16>
    %7 = vector.shape_cast %6 : vector<1x18x128xbf16> to vector<18x128xbf16>
    %8 = vector.extract_strided_slice %7 {offsets = [0, 0], sizes = [16, 128], strides = [1, 1]} : vector<18x128xbf16> to vector<16x128xbf16>
    %9 = vector.extract_strided_slice %7 {offsets = [1, 0], sizes = [16, 128], strides = [1, 1]} : vector<18x128xbf16> to vector<16x128xbf16>
    %10 = vector.extract_strided_slice %7 {offsets = [2, 0], sizes = [16, 128], strides = [1, 1]} : vector<18x128xbf16> to vector<16x128xbf16>
    %c0_1 = arith.constant 0 : index
    %c0_2 = arith.constant 0 : index
    %c0_3 = arith.constant 0 : index
    %11 = vector.load %arg4[%c0_1, %c0_2, %c0_3] : memref<9x128x128xbf16, #tpu.memory_space<vmem>>, vector<1x128x128xbf16>
    %12 = vector.shape_cast %11 : vector<1x128x128xbf16> to vector<128x128xbf16>
    %cst_4 = arith.constant dense<0.000000e+00> : vector<16x128xf32>
    %13 = tpu.matmul %8, %12, %cst_4 {dimension_numbers = #tpu.dot_dimension_numbers<[1], [0], [0], [1], [0, 0, 1, 1], [], []>} : vector<16x128xbf16>, vector<128x128xbf16>, vector<16x128xf32> -> vector<16x128xf32>
    %14 = arith.addf %0, %13 : vector<16x128xf32>
    %c1 = arith.constant 1 : index
    %c0_5 = arith.constant 0 : index
    %c0_6 = arith.constant 0 : index
    %15 = vector.load %arg4[%c1, %c0_5, %c0_6] : memref<9x128x128xbf16, #tpu.memory_space<vmem>>, vector<1x128x128xbf16>
    %16 = vector.shape_cast %15 : vector<1x128x128xbf16> to vector<128x128xbf16>
    %cst_7 = arith.constant dense<0.000000e+00> : vector<16x128xf32>
    %17 = tpu.matmul %9, %16, %cst_7 {dimension_numbers = #tpu.dot_dimension_numbers<[1], [0], [0], [1], [0, 0, 1, 1], [], []>} : vector<16x128xbf16>, vector<128x128xbf16>, vector<16x128xf32> -> vector<16x128xf32>
    %18 = arith.addf %14, %17 : vector<16x128xf32>
    %c2 = arith.constant 2 : index
    %c0_8 = arith.constant 0 : index
    %c0_9 = arith.constant 0 : index
    %19 = vector.load %arg4[%c2, %c0_8, %c0_9] : memref<9x128x128xbf16, #tpu.memory_space<vmem>>, vector<1x128x128xbf16>
    %20 = vector.shape_cast %19 : vector<1x128x128xbf16> to vector<128x128xbf16>
    %cst_10 = arith.constant dense<0.000000e+00> : vector<16x128xf32>
    %21 = tpu.matmul %10, %20, %cst_10 {dimension_numbers = #tpu.dot_dimension_numbers<[1], [0], [0], [1], [0, 0, 1, 1], [], []>} : vector<16x128xbf16>, vector<128x128xbf16>, vector<16x128xf32> -> vector<16x128xf32>
    %22 = arith.addf %18, %21 : vector<16x128xf32>
    %c18_i32_11 = arith.constant 18 : i32
    %23 = arith.muli %arg1, %c18_i32_11 : i32
    %c1_i32_12 = arith.constant 1 : i32
    %24 = arith.muli %c1_i32_12, %arg2 : i32
    %25 = arith.addi %23, %24 : i32
    %c1_i32_13 = arith.constant 1 : i32
    %26 = arith.addi %25, %c1_i32_13 : i32
    %27 = arith.index_cast %26 : i32 to index
    %c0_14 = arith.constant 0 : index
    %c0_15 = arith.constant 0 : index
    %28 = vector.load %arg3[%27, %c0_14, %c0_15] : memref<36x18x128xbf16, #tpu.memory_space<vmem>>, vector<1x18x128xbf16>
    %29 = vector.shape_cast %28 : vector<1x18x128xbf16> to vector<18x128xbf16>
    %30 = vector.extract_strided_slice %29 {offsets = [0, 0], sizes = [16, 128], strides = [1, 1]} : vector<18x128xbf16> to vector<16x128xbf16>
    %31 = vector.extract_strided_slice %29 {offsets = [1, 0], sizes = [16, 128], strides = [1, 1]} : vector<18x128xbf16> to vector<16x128xbf16>
    %32 = vector.extract_strided_slice %29 {offsets = [2, 0], sizes = [16, 128], strides = [1, 1]} : vector<18x128xbf16> to vector<16x128xbf16>
    %c3 = arith.constant 3 : index
    %c0_16 = arith.constant 0 : index
    %c0_17 = arith.constant 0 : index
    %33 = vector.load %arg4[%c3, %c0_16, %c0_17] : memref<9x128x128xbf16, #tpu.memory_space<vmem>>, vector<1x128x128xbf16>
    %34 = vector.shape_cast %33 : vector<1x128x128xbf16> to vector<128x128xbf16>
    %cst_18 = arith.constant dense<0.000000e+00> : vector<16x128xf32>
    %35 = tpu.matmul %30, %34, %cst_18 {dimension_numbers = #tpu.dot_dimension_numbers<[1], [0], [0], [1], [0, 0, 1, 1], [], []>} : vector<16x128xbf16>, vector<128x128xbf16>, vector<16x128xf32> -> vector<16x128xf32>
    %36 = arith.addf %22, %35 : vector<16x128xf32>
    %c4 = arith.constant 4 : index
    %c0_19 = arith.constant 0 : index
    %c0_20 = arith.constant 0 : index
    %37 = vector.load %arg4[%c4, %c0_19, %c0_20] : memref<9x128x128xbf16, #tpu.memory_space<vmem>>, vector<1x128x128xbf16>
    %38 = vector.shape_cast %37 : vector<1x128x128xbf16> to vector<128x128xbf16>
    %cst_21 = arith.constant dense<0.000000e+00> : vector<16x128xf32>
    %39 = tpu.matmul %31, %38, %cst_21 {dimension_numbers = #tpu.dot_dimension_numbers<[1], [0], [0], [1], [0, 0, 1, 1], [], []>} : vector<16x128xbf16>, vector<128x128xbf16>, vector<16x128xf32> -> vector<16x128xf32>
    %40 = arith.addf %36, %39 : vector<16x128xf32>
    %c5 = arith.constant 5 : index
    %c0_22 = arith.constant 0 : index
    %c0_23 = arith.constant 0 : index
    %41 = vector.load %arg4[%c5, %c0_22, %c0_23] : memref<9x128x128xbf16, #tpu.memory_space<vmem>>, vector<1x128x128xbf16>
    %42 = vector.shape_cast %41 : vector<1x128x128xbf16> to vector<128x128xbf16>
    %cst_24 = arith.constant dense<0.000000e+00> : vector<16x128xf32>
    %43 = tpu.matmul %32, %42, %cst_24 {dimension_numbers = #tpu.dot_dimension_numbers<[1], [0], [0], [1], [0, 0, 1, 1], [], []>} : vector<16x128xbf16>, vector<128x128xbf16>, vector<16x128xf32> -> vector<16x128xf32>
    %44 = arith.addf %40, %43 : vector<16x128xf32>
    %c18_i32_25 = arith.constant 18 : i32
    %45 = arith.muli %arg1, %c18_i32_25 : i32
    %c1_i32_26 = arith.constant 1 : i32
    %46 = arith.muli %c1_i32_26, %arg2 : i32
    %47 = arith.addi %45, %46 : i32
    %c2_i32 = arith.constant 2 : i32
    %48 = arith.addi %47, %c2_i32 : i32
    %49 = arith.index_cast %48 : i32 to index
    %c0_27 = arith.constant 0 : index
    %c0_28 = arith.constant 0 : index
    %50 = vector.load %arg3[%49, %c0_27, %c0_28] : memref<36x18x128xbf16, #tpu.memory_space<vmem>>, vector<1x18x128xbf16>
    %51 = vector.shape_cast %50 : vector<1x18x128xbf16> to vector<18x128xbf16>
    %52 = vector.extract_strided_slice %51 {offsets = [0, 0], sizes = [16, 128], strides = [1, 1]} : vector<18x128xbf16> to vector<16x128xbf16>
    %53 = vector.extract_strided_slice %51 {offsets = [1, 0], sizes = [16, 128], strides = [1, 1]} : vector<18x128xbf16> to vector<16x128xbf16>
    %54 = vector.extract_strided_slice %51 {offsets = [2, 0], sizes = [16, 128], strides = [1, 1]} : vector<18x128xbf16> to vector<16x128xbf16>
    %c6 = arith.constant 6 : index
    %c0_29 = arith.constant 0 : index
    %c0_30 = arith.constant 0 : index
    %55 = vector.load %arg4[%c6, %c0_29, %c0_30] : memref<9x128x128xbf16, #tpu.memory_space<vmem>>, vector<1x128x128xbf16>
    %56 = vector.shape_cast %55 : vector<1x128x128xbf16> to vector<128x128xbf16>
    %cst_31 = arith.constant dense<0.000000e+00> : vector<16x128xf32>
    %57 = tpu.matmul %52, %56, %cst_31 {dimension_numbers = #tpu.dot_dimension_numbers<[1], [0], [0], [1], [0, 0, 1, 1], [], []>} : vector<16x128xbf16>, vector<128x128xbf16>, vector<16x128xf32> -> vector<16x128xf32>
    %58 = arith.addf %44, %57 : vector<16x128xf32>
    %c7 = arith.constant 7 : index
    %c0_32 = arith.constant 0 : index
    %c0_33 = arith.constant 0 : index
    %59 = vector.load %arg4[%c7, %c0_32, %c0_33] : memref<9x128x128xbf16, #tpu.memory_space<vmem>>, vector<1x128x128xbf16>
    %60 = vector.shape_cast %59 : vector<1x128x128xbf16> to vector<128x128xbf16>
    %cst_34 = arith.constant dense<0.000000e+00> : vector<16x128xf32>
    %61 = tpu.matmul %53, %60, %cst_34 {dimension_numbers = #tpu.dot_dimension_numbers<[1], [0], [0], [1], [0, 0, 1, 1], [], []>} : vector<16x128xbf16>, vector<128x128xbf16>, vector<16x128xf32> -> vector<16x128xf32>
    %62 = arith.addf %58, %61 : vector<16x128xf32>
    %c8 = arith.constant 8 : index
    %c0_35 = arith.constant 0 : index
    %c0_36 = arith.constant 0 : index
    %63 = vector.load %arg4[%c8, %c0_35, %c0_36] : memref<9x128x128xbf16, #tpu.memory_space<vmem>>, vector<1x128x128xbf16>
    %64 = vector.shape_cast %63 : vector<1x128x128xbf16> to vector<128x128xbf16>
    %cst_37 = arith.constant dense<0.000000e+00> : vector<16x128xf32>
    %65 = tpu.matmul %54, %64, %cst_37 {dimension_numbers = #tpu.dot_dimension_numbers<[1], [0], [0], [1], [0, 0, 1, 1], [], []>} : vector<16x128xbf16>, vector<128x128xbf16>, vector<16x128xf32> -> vector<16x128xf32>
    %66 = arith.addf %62, %65 : vector<16x128xf32>
    %c0_38 = arith.constant 0 : index
    %c0_39 = arith.constant 0 : index
    %67 = vector.load %arg5[%c0_38, %c0_39] : memref<1x128xf32, #tpu.memory_space<vmem>>, vector<1x128xf32>
    %68 = vector.broadcast %67 : vector<1x128xf32> to vector<16x128xf32>
    %69 = arith.addf %66, %68 : vector<16x128xf32>
    %cst_40 = arith.constant 0.000000e+00 : f32
    %70 = vector.broadcast %cst_40 : f32 to vector<16x128xf32>
    %71 = arith.maximumf %69, %70 : vector<16x128xf32>
    %72 = arith.truncf %71 : vector<16x128xf32> to vector<16x128xbf16>
    %c0_41 = arith.constant 0 : index
    %c0_42 = arith.constant 0 : index
    %c0_43 = arith.constant 0 : index
    %73 = vector.load %arg6[%c0_41, %c0_42, %c0_43] : memref<1x16x128xbf16, #tpu.memory_space<vmem>>, vector<1x16x128xbf16>
    %74 = vector.shape_cast %73 : vector<1x16x128xbf16> to vector<16x128xbf16>
    %75 = vector.shape_cast %72 : vector<16x128xbf16> to vector<1x16x128xbf16>
    tpu.vector_store %arg6[%c0_41, %c0_42, %c0_43], %75 {strides = array<i32>} : memref<1x16x128xbf16, #tpu.memory_space<vmem>>, vector<1x16x128xbf16>,
    return
  }
  func.func @transform_0(%arg0: i32, %arg1: i32, %arg2: i32) -> (i32, i32, i32) {
    %c0_i32 = arith.constant 0 : i32
    %c0_i32_0 = arith.constant 0 : i32
    %c0_i32_1 = arith.constant 0 : i32
    %c0_i32_2 = arith.constant 0 : i32
    return %c0_i32, %c0_i32_0, %c0_i32_1 : i32, i32, i32
  }
  func.func @transform_1(%arg0: i32, %arg1: i32, %arg2: i32) -> (i32, i32, i32) {
    %c0_i32 = arith.constant 0 : i32
    %c0_i32_0 = arith.constant 0 : i32
    %c0_i32_1 = arith.constant 0 : i32
    return %c0_i32, %c0_i32_0, %arg0 : i32, i32, i32
  }
  func.func @transform_2(%arg0: i32, %arg1: i32, %arg2: i32) -> (i32, i32) {
    %c0_i32 = arith.constant 0 : i32
    %c0_i32_0 = arith.constant 0 : i32
    return %c0_i32, %arg0 : i32, i32
  }
  func.func @transform_3(%arg0: i32, %arg1: i32, %arg2: i32) -> (i32, i32, i32) {
    %c16_i32 = arith.constant 16 : i32
    %0 = arith.muli %arg1, %c16_i32 : i32
    %1 = arith.addi %0, %arg2 : i32
    %c0_i32 = arith.constant 0 : i32
    %c0_i32_0 = arith.constant 0 : i32
    return %1, %c0_i32, %arg0 : i32, i32, i32
  }
}

module attributes {stable_mosaic.version = 11 : i64} {
  func.func @_conv3x3_row_kernel(%arg0: i32, %arg1: i32, %arg2: i32, %arg3: memref<36x9x128xbf16, #tpu.memory_space<vmem>>, %arg4: memref<36x9x128xbf16, #tpu.memory_space<vmem>>, %arg5: memref<9x128x128xbf16, #tpu.memory_space<vmem>>, %arg6: memref<1x128xf32, #tpu.memory_space<vmem>>, %arg7: memref<1x8x128xbf16, #tpu.memory_space<vmem>>) attributes {dimension_semantics = [#tpu.dimension_semantics<parallel>, #tpu.dimension_semantics<parallel>, #tpu.dimension_semantics<parallel>], iteration_bounds = array<i64: 1, 2, 8>, scalar_prefetch = 0 : i64, scratch_operands = 0 : i64, tpu.core_type = #tpu.core_type<tc>, window_params = [{pipeline_mode = #tpu.pipeline_mode<synchronous>, transform_indices = @transform_0, window_bounds = array<i64: 36, 9, 128>}, {pipeline_mode = #tpu.pipeline_mode<synchronous>, transform_indices = @transform_1, window_bounds = array<i64: 36, 9, 128>}, {transform_indices = @transform_2, window_bounds = array<i64: 9, 128, 128>}, {transform_indices = @transform_3, window_bounds = array<i64: 1, 128>}, {transform_indices = @transform_4, window_bounds = array<i64: 1, 8, 128>}]} {
    %cst = arith.constant 0.000000e+00 : f32
    %0 = vector.broadcast %cst : f32 to vector<8x128xf32>
    %c18_i32 = arith.constant 18 : i32
    %1 = arith.muli %arg1, %c18_i32 : i32
    %c2_i32 = arith.constant 2 : i32
    %2 = arith.muli %c2_i32, %arg2 : i32
    %3 = arith.addi %1, %2 : i32
    %c0_i32 = arith.constant 0 : i32
    %4 = arith.addi %3, %c0_i32 : i32
    %5 = arith.index_cast %4 : i32 to index
    %c0 = arith.constant 0 : index
    %c0_0 = arith.constant 0 : index
    %6 = vector.load %arg3[%5, %c0, %c0_0] : memref<36x9x128xbf16, #tpu.memory_space<vmem>>, vector<1x9x128xbf16>
    %7 = vector.shape_cast %6 : vector<1x9x128xbf16> to vector<9x128xbf16>
    %8 = arith.index_cast %4 : i32 to index
    %c0_1 = arith.constant 0 : index
    %c0_2 = arith.constant 0 : index
    %9 = vector.load %arg4[%8, %c0_1, %c0_2] : memref<36x9x128xbf16, #tpu.memory_space<vmem>>, vector<1x9x128xbf16>
    %10 = vector.shape_cast %9 : vector<1x9x128xbf16> to vector<9x128xbf16>
    %11 = vector.extract_strided_slice %7 {offsets = [0, 0], sizes = [8, 128], strides = [1, 1]} : vector<9x128xbf16> to vector<8x128xbf16>
    %12 = vector.extract_strided_slice %10 {offsets = [0, 0], sizes = [8, 128], strides = [1, 1]} : vector<9x128xbf16> to vector<8x128xbf16>
    %13 = vector.extract_strided_slice %7 {offsets = [1, 0], sizes = [8, 128], strides = [1, 1]} : vector<9x128xbf16> to vector<8x128xbf16>
    %c0_3 = arith.constant 0 : index
    %c0_4 = arith.constant 0 : index
    %c0_5 = arith.constant 0 : index
    %14 = vector.load %arg5[%c0_3, %c0_4, %c0_5] : memref<9x128x128xbf16, #tpu.memory_space<vmem>>, vector<1x128x128xbf16>
    %15 = vector.shape_cast %14 : vector<1x128x128xbf16> to vector<128x128xbf16>
    %cst_6 = arith.constant dense<0.000000e+00> : vector<8x128xf32>
    %16 = tpu.matmul %11, %15, %cst_6 {dimension_numbers = #tpu.dot_dimension_numbers<[1], [0], [0], [1], [0, 0, 1, 1], [], []>} : vector<8x128xbf16>, vector<128x128xbf16>, vector<8x128xf32> -> vector<8x128xf32>
    %17 = arith.addf %0, %16 : vector<8x128xf32>
    %c1 = arith.constant 1 : index
    %c0_7 = arith.constant 0 : index
    %c0_8 = arith.constant 0 : index
    %18 = vector.load %arg5[%c1, %c0_7, %c0_8] : memref<9x128x128xbf16, #tpu.memory_space<vmem>>, vector<1x128x128xbf16>
    %19 = vector.shape_cast %18 : vector<1x128x128xbf16> to vector<128x128xbf16>
    %cst_9 = arith.constant dense<0.000000e+00> : vector<8x128xf32>
    %20 = tpu.matmul %12, %19, %cst_9 {dimension_numbers = #tpu.dot_dimension_numbers<[1], [0], [0], [1], [0, 0, 1, 1], [], []>} : vector<8x128xbf16>, vector<128x128xbf16>, vector<8x128xf32> -> vector<8x128xf32>
    %21 = arith.addf %17, %20 : vector<8x128xf32>
    %c2 = arith.constant 2 : index
    %c0_10 = arith.constant 0 : index
    %c0_11 = arith.constant 0 : index
    %22 = vector.load %arg5[%c2, %c0_10, %c0_11] : memref<9x128x128xbf16, #tpu.memory_space<vmem>>, vector<1x128x128xbf16>
    %23 = vector.shape_cast %22 : vector<1x128x128xbf16> to vector<128x128xbf16>
    %cst_12 = arith.constant dense<0.000000e+00> : vector<8x128xf32>
    %24 = tpu.matmul %13, %23, %cst_12 {dimension_numbers = #tpu.dot_dimension_numbers<[1], [0], [0], [1], [0, 0, 1, 1], [], []>} : vector<8x128xbf16>, vector<128x128xbf16>, vector<8x128xf32> -> vector<8x128xf32>
    %25 = arith.addf %21, %24 : vector<8x128xf32>
    %c18_i32_13 = arith.constant 18 : i32
    %26 = arith.muli %arg1, %c18_i32_13 : i32
    %c2_i32_14 = arith.constant 2 : i32
    %27 = arith.muli %c2_i32_14, %arg2 : i32
    %28 = arith.addi %26, %27 : i32
    %c1_i32 = arith.constant 1 : i32
    %29 = arith.addi %28, %c1_i32 : i32
    %30 = arith.index_cast %29 : i32 to index
    %c0_15 = arith.constant 0 : index
    %c0_16 = arith.constant 0 : index
    %31 = vector.load %arg3[%30, %c0_15, %c0_16] : memref<36x9x128xbf16, #tpu.memory_space<vmem>>, vector<1x9x128xbf16>
    %32 = vector.shape_cast %31 : vector<1x9x128xbf16> to vector<9x128xbf16>
    %33 = arith.index_cast %29 : i32 to index
    %c0_17 = arith.constant 0 : index
    %c0_18 = arith.constant 0 : index
    %34 = vector.load %arg4[%33, %c0_17, %c0_18] : memref<36x9x128xbf16, #tpu.memory_space<vmem>>, vector<1x9x128xbf16>
    %35 = vector.shape_cast %34 : vector<1x9x128xbf16> to vector<9x128xbf16>
    %36 = vector.extract_strided_slice %32 {offsets = [0, 0], sizes = [8, 128], strides = [1, 1]} : vector<9x128xbf16> to vector<8x128xbf16>
    %37 = vector.extract_strided_slice %35 {offsets = [0, 0], sizes = [8, 128], strides = [1, 1]} : vector<9x128xbf16> to vector<8x128xbf16>
    %38 = vector.extract_strided_slice %32 {offsets = [1, 0], sizes = [8, 128], strides = [1, 1]} : vector<9x128xbf16> to vector<8x128xbf16>
    %c3 = arith.constant 3 : index
    %c0_19 = arith.constant 0 : index
    %c0_20 = arith.constant 0 : index
    %39 = vector.load %arg5[%c3, %c0_19, %c0_20] : memref<9x128x128xbf16, #tpu.memory_space<vmem>>, vector<1x128x128xbf16>
    %40 = vector.shape_cast %39 : vector<1x128x128xbf16> to vector<128x128xbf16>
    %cst_21 = arith.constant dense<0.000000e+00> : vector<8x128xf32>
    %41 = tpu.matmul %36, %40, %cst_21 {dimension_numbers = #tpu.dot_dimension_numbers<[1], [0], [0], [1], [0, 0, 1, 1], [], []>} : vector<8x128xbf16>, vector<128x128xbf16>, vector<8x128xf32> -> vector<8x128xf32>
    %42 = arith.addf %25, %41 : vector<8x128xf32>
    %c4 = arith.constant 4 : index
    %c0_22 = arith.constant 0 : index
    %c0_23 = arith.constant 0 : index
    %43 = vector.load %arg5[%c4, %c0_22, %c0_23] : memref<9x128x128xbf16, #tpu.memory_space<vmem>>, vector<1x128x128xbf16>
    %44 = vector.shape_cast %43 : vector<1x128x128xbf16> to vector<128x128xbf16>
    %cst_24 = arith.constant dense<0.000000e+00> : vector<8x128xf32>
    %45 = tpu.matmul %37, %44, %cst_24 {dimension_numbers = #tpu.dot_dimension_numbers<[1], [0], [0], [1], [0, 0, 1, 1], [], []>} : vector<8x128xbf16>, vector<128x128xbf16>, vector<8x128xf32> -> vector<8x128xf32>
    %46 = arith.addf %42, %45 : vector<8x128xf32>
    %c5 = arith.constant 5 : index
    %c0_25 = arith.constant 0 : index
    %c0_26 = arith.constant 0 : index
    %47 = vector.load %arg5[%c5, %c0_25, %c0_26] : memref<9x128x128xbf16, #tpu.memory_space<vmem>>, vector<1x128x128xbf16>
    %48 = vector.shape_cast %47 : vector<1x128x128xbf16> to vector<128x128xbf16>
    %cst_27 = arith.constant dense<0.000000e+00> : vector<8x128xf32>
    %49 = tpu.matmul %38, %48, %cst_27 {dimension_numbers = #tpu.dot_dimension_numbers<[1], [0], [0], [1], [0, 0, 1, 1], [], []>} : vector<8x128xbf16>, vector<128x128xbf16>, vector<8x128xf32> -> vector<8x128xf32>
    %50 = arith.addf %46, %49 : vector<8x128xf32>
    %c18_i32_28 = arith.constant 18 : i32
    %51 = arith.muli %arg1, %c18_i32_28 : i32
    %c2_i32_29 = arith.constant 2 : i32
    %52 = arith.muli %c2_i32_29, %arg2 : i32
    %53 = arith.addi %51, %52 : i32
    %c2_i32_30 = arith.constant 2 : i32
    %54 = arith.addi %53, %c2_i32_30 : i32
    %55 = arith.index_cast %54 : i32 to index
    %c0_31 = arith.constant 0 : index
    %c0_32 = arith.constant 0 : index
    %56 = vector.load %arg3[%55, %c0_31, %c0_32] : memref<36x9x128xbf16, #tpu.memory_space<vmem>>, vector<1x9x128xbf16>
    %57 = vector.shape_cast %56 : vector<1x9x128xbf16> to vector<9x128xbf16>
    %58 = arith.index_cast %54 : i32 to index
    %c0_33 = arith.constant 0 : index
    %c0_34 = arith.constant 0 : index
    %59 = vector.load %arg4[%58, %c0_33, %c0_34] : memref<36x9x128xbf16, #tpu.memory_space<vmem>>, vector<1x9x128xbf16>
    %60 = vector.shape_cast %59 : vector<1x9x128xbf16> to vector<9x128xbf16>
    %61 = vector.extract_strided_slice %57 {offsets = [0, 0], sizes = [8, 128], strides = [1, 1]} : vector<9x128xbf16> to vector<8x128xbf16>
    %62 = vector.extract_strided_slice %60 {offsets = [0, 0], sizes = [8, 128], strides = [1, 1]} : vector<9x128xbf16> to vector<8x128xbf16>
    %63 = vector.extract_strided_slice %57 {offsets = [1, 0], sizes = [8, 128], strides = [1, 1]} : vector<9x128xbf16> to vector<8x128xbf16>
    %c6 = arith.constant 6 : index
    %c0_35 = arith.constant 0 : index
    %c0_36 = arith.constant 0 : index
    %64 = vector.load %arg5[%c6, %c0_35, %c0_36] : memref<9x128x128xbf16, #tpu.memory_space<vmem>>, vector<1x128x128xbf16>
    %65 = vector.shape_cast %64 : vector<1x128x128xbf16> to vector<128x128xbf16>
    %cst_37 = arith.constant dense<0.000000e+00> : vector<8x128xf32>
    %66 = tpu.matmul %61, %65, %cst_37 {dimension_numbers = #tpu.dot_dimension_numbers<[1], [0], [0], [1], [0, 0, 1, 1], [], []>} : vector<8x128xbf16>, vector<128x128xbf16>, vector<8x128xf32> -> vector<8x128xf32>
    %67 = arith.addf %50, %66 : vector<8x128xf32>
    %c7 = arith.constant 7 : index
    %c0_38 = arith.constant 0 : index
    %c0_39 = arith.constant 0 : index
    %68 = vector.load %arg5[%c7, %c0_38, %c0_39] : memref<9x128x128xbf16, #tpu.memory_space<vmem>>, vector<1x128x128xbf16>
    %69 = vector.shape_cast %68 : vector<1x128x128xbf16> to vector<128x128xbf16>
    %cst_40 = arith.constant dense<0.000000e+00> : vector<8x128xf32>
    %70 = tpu.matmul %62, %69, %cst_40 {dimension_numbers = #tpu.dot_dimension_numbers<[1], [0], [0], [1], [0, 0, 1, 1], [], []>} : vector<8x128xbf16>, vector<128x128xbf16>, vector<8x128xf32> -> vector<8x128xf32>
    %71 = arith.addf %67, %70 : vector<8x128xf32>
    %c8 = arith.constant 8 : index
    %c0_41 = arith.constant 0 : index
    %c0_42 = arith.constant 0 : index
    %72 = vector.load %arg5[%c8, %c0_41, %c0_42] : memref<9x128x128xbf16, #tpu.memory_space<vmem>>, vector<1x128x128xbf16>
    %73 = vector.shape_cast %72 : vector<1x128x128xbf16> to vector<128x128xbf16>
    %cst_43 = arith.constant dense<0.000000e+00> : vector<8x128xf32>
    %74 = tpu.matmul %63, %73, %cst_43 {dimension_numbers = #tpu.dot_dimension_numbers<[1], [0], [0], [1], [0, 0, 1, 1], [], []>} : vector<8x128xbf16>, vector<128x128xbf16>, vector<8x128xf32> -> vector<8x128xf32>
    %75 = arith.addf %71, %74 : vector<8x128xf32>
    %c0_44 = arith.constant 0 : index
    %c0_45 = arith.constant 0 : index
    %76 = vector.load %arg6[%c0_44, %c0_45] : memref<1x128xf32, #tpu.memory_space<vmem>>, vector<1x128xf32>
    %77 = vector.broadcast %76 : vector<1x128xf32> to vector<8x128xf32>
    %78 = arith.addf %75, %77 : vector<8x128xf32>
    %cst_46 = arith.constant 0.000000e+00 : f32
    %79 = vector.broadcast %cst_46 : f32 to vector<8x128xf32>
    %80 = arith.maximumf %78, %79 : vector<8x128xf32>
    %81 = arith.truncf %80 : vector<8x128xf32> to vector<8x128xbf16>
    %c0_47 = arith.constant 0 : index
    %c0_48 = arith.constant 0 : index
    %c0_49 = arith.constant 0 : index
    %82 = vector.load %arg7[%c0_47, %c0_48, %c0_49] : memref<1x8x128xbf16, #tpu.memory_space<vmem>>, vector<1x8x128xbf16>
    %83 = vector.shape_cast %82 : vector<1x8x128xbf16> to vector<8x128xbf16>
    %84 = vector.shape_cast %81 : vector<8x128xbf16> to vector<1x8x128xbf16>
    tpu.vector_store %arg7[%c0_47, %c0_48, %c0_49], %84 {strides = array<i32>} : memref<1x8x128xbf16, #tpu.memory_space<vmem>>, vector<1x8x128xbf16>,
    return
  }
  func.func @transform_0(%arg0: i32, %arg1: i32, %arg2: i32) -> (i32, i32, i32) {
    %c0_i32 = arith.constant 0 : i32
    %c0_i32_0 = arith.constant 0 : i32
    %c0_i32_1 = arith.constant 0 : i32
    %c0_i32_2 = arith.constant 0 : i32
    return %c0_i32, %c0_i32_0, %c0_i32_1 : i32, i32, i32
  }
  func.func @transform_1(%arg0: i32, %arg1: i32, %arg2: i32) -> (i32, i32, i32) {
    %c0_i32 = arith.constant 0 : i32
    %c0_i32_0 = arith.constant 0 : i32
    %c0_i32_1 = arith.constant 0 : i32
    %c0_i32_2 = arith.constant 0 : i32
    return %c0_i32, %c0_i32_0, %c0_i32_1 : i32, i32, i32
  }
  func.func @transform_2(%arg0: i32, %arg1: i32, %arg2: i32) -> (i32, i32, i32) {
    %c0_i32 = arith.constant 0 : i32
    %c0_i32_0 = arith.constant 0 : i32
    %c0_i32_1 = arith.constant 0 : i32
    return %c0_i32, %c0_i32_0, %arg0 : i32, i32, i32
  }
  func.func @transform_3(%arg0: i32, %arg1: i32, %arg2: i32) -> (i32, i32) {
    %c0_i32 = arith.constant 0 : i32
    %c0_i32_0 = arith.constant 0 : i32
    return %c0_i32, %arg0 : i32, i32
  }
  func.func @transform_4(%arg0: i32, %arg1: i32, %arg2: i32) -> (i32, i32, i32) {
    %c8_i32 = arith.constant 8 : i32
    %0 = arith.muli %arg1, %c8_i32 : i32
    %1 = arith.addi %0, %arg2 : i32
    %c0_i32 = arith.constant 0 : i32
    %c0_i32_0 = arith.constant 0 : i32
    return %1, %c0_i32, %arg0 : i32, i32, i32
  }
}

module attributes {stable_mosaic.version = 11 : i64} {
  func.func @_conv3x3_row_kernel(%arg0: i32, %arg1: i32, %arg2: i32, %arg3: memref<20x10x128xbf16, #tpu.memory_space<vmem>>, %arg4: memref<9x128x128xbf16, #tpu.memory_space<vmem>>, %arg5: memref<1x128xf32, #tpu.memory_space<vmem>>, %arg6: memref<1x8x128xbf16, #tpu.memory_space<vmem>>) attributes {dimension_semantics = [#tpu.dimension_semantics<parallel>, #tpu.dimension_semantics<parallel>, #tpu.dimension_semantics<parallel>], iteration_bounds = array<i64: 1, 2, 8>, scalar_prefetch = 0 : i64, scratch_operands = 0 : i64, tpu.core_type = #tpu.core_type<tc>, window_params = [{pipeline_mode = #tpu.pipeline_mode<synchronous>, transform_indices = @transform_0, window_bounds = array<i64: 20, 10, 128>}, {transform_indices = @transform_1, window_bounds = array<i64: 9, 128, 128>}, {transform_indices = @transform_2, window_bounds = array<i64: 1, 128>}, {transform_indices = @transform_3, window_bounds = array<i64: 1, 8, 128>}]} {
    %cst = arith.constant 0.000000e+00 : f32
    %0 = vector.broadcast %cst : f32 to vector<8x128xf32>
    %c10_i32 = arith.constant 10 : i32
    %1 = arith.muli %arg1, %c10_i32 : i32
    %c1_i32 = arith.constant 1 : i32
    %2 = arith.muli %c1_i32, %arg2 : i32
    %3 = arith.addi %1, %2 : i32
    %c0_i32 = arith.constant 0 : i32
    %4 = arith.addi %3, %c0_i32 : i32
    %5 = arith.index_cast %4 : i32 to index
    %c0 = arith.constant 0 : index
    %c0_0 = arith.constant 0 : index
    %6 = vector.load %arg3[%5, %c0, %c0_0] : memref<20x10x128xbf16, #tpu.memory_space<vmem>>, vector<1x10x128xbf16>
    %7 = vector.shape_cast %6 : vector<1x10x128xbf16> to vector<10x128xbf16>
    %8 = vector.extract_strided_slice %7 {offsets = [0, 0], sizes = [8, 128], strides = [1, 1]} : vector<10x128xbf16> to vector<8x128xbf16>
    %9 = vector.extract_strided_slice %7 {offsets = [1, 0], sizes = [8, 128], strides = [1, 1]} : vector<10x128xbf16> to vector<8x128xbf16>
    %10 = vector.extract_strided_slice %7 {offsets = [2, 0], sizes = [8, 128], strides = [1, 1]} : vector<10x128xbf16> to vector<8x128xbf16>
    %c0_1 = arith.constant 0 : index
    %c0_2 = arith.constant 0 : index
    %c0_3 = arith.constant 0 : index
    %11 = vector.load %arg4[%c0_1, %c0_2, %c0_3] : memref<9x128x128xbf16, #tpu.memory_space<vmem>>, vector<1x128x128xbf16>
    %12 = vector.shape_cast %11 : vector<1x128x128xbf16> to vector<128x128xbf16>
    %cst_4 = arith.constant dense<0.000000e+00> : vector<8x128xf32>
    %13 = tpu.matmul %8, %12, %cst_4 {dimension_numbers = #tpu.dot_dimension_numbers<[1], [0], [0], [1], [0, 0, 1, 1], [], []>} : vector<8x128xbf16>, vector<128x128xbf16>, vector<8x128xf32> -> vector<8x128xf32>
    %14 = arith.addf %0, %13 : vector<8x128xf32>
    %c1 = arith.constant 1 : index
    %c0_5 = arith.constant 0 : index
    %c0_6 = arith.constant 0 : index
    %15 = vector.load %arg4[%c1, %c0_5, %c0_6] : memref<9x128x128xbf16, #tpu.memory_space<vmem>>, vector<1x128x128xbf16>
    %16 = vector.shape_cast %15 : vector<1x128x128xbf16> to vector<128x128xbf16>
    %cst_7 = arith.constant dense<0.000000e+00> : vector<8x128xf32>
    %17 = tpu.matmul %9, %16, %cst_7 {dimension_numbers = #tpu.dot_dimension_numbers<[1], [0], [0], [1], [0, 0, 1, 1], [], []>} : vector<8x128xbf16>, vector<128x128xbf16>, vector<8x128xf32> -> vector<8x128xf32>
    %18 = arith.addf %14, %17 : vector<8x128xf32>
    %c2 = arith.constant 2 : index
    %c0_8 = arith.constant 0 : index
    %c0_9 = arith.constant 0 : index
    %19 = vector.load %arg4[%c2, %c0_8, %c0_9] : memref<9x128x128xbf16, #tpu.memory_space<vmem>>, vector<1x128x128xbf16>
    %20 = vector.shape_cast %19 : vector<1x128x128xbf16> to vector<128x128xbf16>
    %cst_10 = arith.constant dense<0.000000e+00> : vector<8x128xf32>
    %21 = tpu.matmul %10, %20, %cst_10 {dimension_numbers = #tpu.dot_dimension_numbers<[1], [0], [0], [1], [0, 0, 1, 1], [], []>} : vector<8x128xbf16>, vector<128x128xbf16>, vector<8x128xf32> -> vector<8x128xf32>
    %22 = arith.addf %18, %21 : vector<8x128xf32>
    %c10_i32_11 = arith.constant 10 : i32
    %23 = arith.muli %arg1, %c10_i32_11 : i32
    %c1_i32_12 = arith.constant 1 : i32
    %24 = arith.muli %c1_i32_12, %arg2 : i32
    %25 = arith.addi %23, %24 : i32
    %c1_i32_13 = arith.constant 1 : i32
    %26 = arith.addi %25, %c1_i32_13 : i32
    %27 = arith.index_cast %26 : i32 to index
    %c0_14 = arith.constant 0 : index
    %c0_15 = arith.constant 0 : index
    %28 = vector.load %arg3[%27, %c0_14, %c0_15] : memref<20x10x128xbf16, #tpu.memory_space<vmem>>, vector<1x10x128xbf16>
    %29 = vector.shape_cast %28 : vector<1x10x128xbf16> to vector<10x128xbf16>
    %30 = vector.extract_strided_slice %29 {offsets = [0, 0], sizes = [8, 128], strides = [1, 1]} : vector<10x128xbf16> to vector<8x128xbf16>
    %31 = vector.extract_strided_slice %29 {offsets = [1, 0], sizes = [8, 128], strides = [1, 1]} : vector<10x128xbf16> to vector<8x128xbf16>
    %32 = vector.extract_strided_slice %29 {offsets = [2, 0], sizes = [8, 128], strides = [1, 1]} : vector<10x128xbf16> to vector<8x128xbf16>
    %c3 = arith.constant 3 : index
    %c0_16 = arith.constant 0 : index
    %c0_17 = arith.constant 0 : index
    %33 = vector.load %arg4[%c3, %c0_16, %c0_17] : memref<9x128x128xbf16, #tpu.memory_space<vmem>>, vector<1x128x128xbf16>
    %34 = vector.shape_cast %33 : vector<1x128x128xbf16> to vector<128x128xbf16>
    %cst_18 = arith.constant dense<0.000000e+00> : vector<8x128xf32>
    %35 = tpu.matmul %30, %34, %cst_18 {dimension_numbers = #tpu.dot_dimension_numbers<[1], [0], [0], [1], [0, 0, 1, 1], [], []>} : vector<8x128xbf16>, vector<128x128xbf16>, vector<8x128xf32> -> vector<8x128xf32>
    %36 = arith.addf %22, %35 : vector<8x128xf32>
    %c4 = arith.constant 4 : index
    %c0_19 = arith.constant 0 : index
    %c0_20 = arith.constant 0 : index
    %37 = vector.load %arg4[%c4, %c0_19, %c0_20] : memref<9x128x128xbf16, #tpu.memory_space<vmem>>, vector<1x128x128xbf16>
    %38 = vector.shape_cast %37 : vector<1x128x128xbf16> to vector<128x128xbf16>
    %cst_21 = arith.constant dense<0.000000e+00> : vector<8x128xf32>
    %39 = tpu.matmul %31, %38, %cst_21 {dimension_numbers = #tpu.dot_dimension_numbers<[1], [0], [0], [1], [0, 0, 1, 1], [], []>} : vector<8x128xbf16>, vector<128x128xbf16>, vector<8x128xf32> -> vector<8x128xf32>
    %40 = arith.addf %36, %39 : vector<8x128xf32>
    %c5 = arith.constant 5 : index
    %c0_22 = arith.constant 0 : index
    %c0_23 = arith.constant 0 : index
    %41 = vector.load %arg4[%c5, %c0_22, %c0_23] : memref<9x128x128xbf16, #tpu.memory_space<vmem>>, vector<1x128x128xbf16>
    %42 = vector.shape_cast %41 : vector<1x128x128xbf16> to vector<128x128xbf16>
    %cst_24 = arith.constant dense<0.000000e+00> : vector<8x128xf32>
    %43 = tpu.matmul %32, %42, %cst_24 {dimension_numbers = #tpu.dot_dimension_numbers<[1], [0], [0], [1], [0, 0, 1, 1], [], []>} : vector<8x128xbf16>, vector<128x128xbf16>, vector<8x128xf32> -> vector<8x128xf32>
    %44 = arith.addf %40, %43 : vector<8x128xf32>
    %c10_i32_25 = arith.constant 10 : i32
    %45 = arith.muli %arg1, %c10_i32_25 : i32
    %c1_i32_26 = arith.constant 1 : i32
    %46 = arith.muli %c1_i32_26, %arg2 : i32
    %47 = arith.addi %45, %46 : i32
    %c2_i32 = arith.constant 2 : i32
    %48 = arith.addi %47, %c2_i32 : i32
    %49 = arith.index_cast %48 : i32 to index
    %c0_27 = arith.constant 0 : index
    %c0_28 = arith.constant 0 : index
    %50 = vector.load %arg3[%49, %c0_27, %c0_28] : memref<20x10x128xbf16, #tpu.memory_space<vmem>>, vector<1x10x128xbf16>
    %51 = vector.shape_cast %50 : vector<1x10x128xbf16> to vector<10x128xbf16>
    %52 = vector.extract_strided_slice %51 {offsets = [0, 0], sizes = [8, 128], strides = [1, 1]} : vector<10x128xbf16> to vector<8x128xbf16>
    %53 = vector.extract_strided_slice %51 {offsets = [1, 0], sizes = [8, 128], strides = [1, 1]} : vector<10x128xbf16> to vector<8x128xbf16>
    %54 = vector.extract_strided_slice %51 {offsets = [2, 0], sizes = [8, 128], strides = [1, 1]} : vector<10x128xbf16> to vector<8x128xbf16>
    %c6 = arith.constant 6 : index
    %c0_29 = arith.constant 0 : index
    %c0_30 = arith.constant 0 : index
    %55 = vector.load %arg4[%c6, %c0_29, %c0_30] : memref<9x128x128xbf16, #tpu.memory_space<vmem>>, vector<1x128x128xbf16>
    %56 = vector.shape_cast %55 : vector<1x128x128xbf16> to vector<128x128xbf16>
    %cst_31 = arith.constant dense<0.000000e+00> : vector<8x128xf32>
    %57 = tpu.matmul %52, %56, %cst_31 {dimension_numbers = #tpu.dot_dimension_numbers<[1], [0], [0], [1], [0, 0, 1, 1], [], []>} : vector<8x128xbf16>, vector<128x128xbf16>, vector<8x128xf32> -> vector<8x128xf32>
    %58 = arith.addf %44, %57 : vector<8x128xf32>
    %c7 = arith.constant 7 : index
    %c0_32 = arith.constant 0 : index
    %c0_33 = arith.constant 0 : index
    %59 = vector.load %arg4[%c7, %c0_32, %c0_33] : memref<9x128x128xbf16, #tpu.memory_space<vmem>>, vector<1x128x128xbf16>
    %60 = vector.shape_cast %59 : vector<1x128x128xbf16> to vector<128x128xbf16>
    %cst_34 = arith.constant dense<0.000000e+00> : vector<8x128xf32>
    %61 = tpu.matmul %53, %60, %cst_34 {dimension_numbers = #tpu.dot_dimension_numbers<[1], [0], [0], [1], [0, 0, 1, 1], [], []>} : vector<8x128xbf16>, vector<128x128xbf16>, vector<8x128xf32> -> vector<8x128xf32>
    %62 = arith.addf %58, %61 : vector<8x128xf32>
    %c8 = arith.constant 8 : index
    %c0_35 = arith.constant 0 : index
    %c0_36 = arith.constant 0 : index
    %63 = vector.load %arg4[%c8, %c0_35, %c0_36] : memref<9x128x128xbf16, #tpu.memory_space<vmem>>, vector<1x128x128xbf16>
    %64 = vector.shape_cast %63 : vector<1x128x128xbf16> to vector<128x128xbf16>
    %cst_37 = arith.constant dense<0.000000e+00> : vector<8x128xf32>
    %65 = tpu.matmul %54, %64, %cst_37 {dimension_numbers = #tpu.dot_dimension_numbers<[1], [0], [0], [1], [0, 0, 1, 1], [], []>} : vector<8x128xbf16>, vector<128x128xbf16>, vector<8x128xf32> -> vector<8x128xf32>
    %66 = arith.addf %62, %65 : vector<8x128xf32>
    %c0_38 = arith.constant 0 : index
    %c0_39 = arith.constant 0 : index
    %67 = vector.load %arg5[%c0_38, %c0_39] : memref<1x128xf32, #tpu.memory_space<vmem>>, vector<1x128xf32>
    %68 = vector.broadcast %67 : vector<1x128xf32> to vector<8x128xf32>
    %69 = arith.addf %66, %68 : vector<8x128xf32>
    %cst_40 = arith.constant 0.000000e+00 : f32
    %70 = vector.broadcast %cst_40 : f32 to vector<8x128xf32>
    %71 = arith.maximumf %69, %70 : vector<8x128xf32>
    %72 = arith.truncf %71 : vector<8x128xf32> to vector<8x128xbf16>
    %c0_41 = arith.constant 0 : index
    %c0_42 = arith.constant 0 : index
    %c0_43 = arith.constant 0 : index
    %73 = vector.load %arg6[%c0_41, %c0_42, %c0_43] : memref<1x8x128xbf16, #tpu.memory_space<vmem>>, vector<1x8x128xbf16>
    %74 = vector.shape_cast %73 : vector<1x8x128xbf16> to vector<8x128xbf16>
    %75 = vector.shape_cast %72 : vector<8x128xbf16> to vector<1x8x128xbf16>
    tpu.vector_store %arg6[%c0_41, %c0_42, %c0_43], %75 {strides = array<i32>} : memref<1x8x128xbf16, #tpu.memory_space<vmem>>, vector<1x8x128xbf16>,
    return
  }
  func.func @transform_0(%arg0: i32, %arg1: i32, %arg2: i32) -> (i32, i32, i32) {
    %c0_i32 = arith.constant 0 : i32
    %c0_i32_0 = arith.constant 0 : i32
    %c0_i32_1 = arith.constant 0 : i32
    %c0_i32_2 = arith.constant 0 : i32
    return %c0_i32, %c0_i32_0, %c0_i32_1 : i32, i32, i32
  }
  func.func @transform_1(%arg0: i32, %arg1: i32, %arg2: i32) -> (i32, i32, i32) {
    %c0_i32 = arith.constant 0 : i32
    %c0_i32_0 = arith.constant 0 : i32
    %c0_i32_1 = arith.constant 0 : i32
    return %c0_i32, %c0_i32_0, %arg0 : i32, i32, i32
  }
  func.func @transform_2(%arg0: i32, %arg1: i32, %arg2: i32) -> (i32, i32) {
    %c0_i32 = arith.constant 0 : i32
    %c0_i32_0 = arith.constant 0 : i32
    return %c0_i32, %arg0 : i32, i32
  }
  func.func @transform_3(%arg0: i32, %arg1: i32, %arg2: i32) -> (i32, i32, i32) {
    %c8_i32 = arith.constant 8 : i32
    %0 = arith.muli %arg1, %c8_i32 : i32
    %1 = arith.addi %0, %arg2 : i32
    %c0_i32 = arith.constant 0 : i32
    %c0_i32_0 = arith.constant 0 : i32
    return %1, %c0_i32, %arg0 : i32, i32, i32
  }
}

module attributes {stable_mosaic.version = 11 : i64} {
  func.func @_conv3x3_row_kernel(%arg0: i32, %arg1: i32, %arg2: i32, %arg3: memref<20x5x128xbf16, #tpu.memory_space<vmem>>, %arg4: memref<20x5x128xbf16, #tpu.memory_space<vmem>>, %arg5: memref<9x128x128xbf16, #tpu.memory_space<vmem>>, %arg6: memref<1x128xf32, #tpu.memory_space<vmem>>, %arg7: memref<1x4x128xbf16, #tpu.memory_space<vmem>>) attributes {dimension_semantics = [#tpu.dimension_semantics<parallel>, #tpu.dimension_semantics<parallel>, #tpu.dimension_semantics<parallel>], iteration_bounds = array<i64: 2, 2, 4>, scalar_prefetch = 0 : i64, scratch_operands = 0 : i64, tpu.core_type = #tpu.core_type<tc>, window_params = [{pipeline_mode = #tpu.pipeline_mode<synchronous>, transform_indices = @transform_0, window_bounds = array<i64: 20, 5, 128>}, {pipeline_mode = #tpu.pipeline_mode<synchronous>, transform_indices = @transform_1, window_bounds = array<i64: 20, 5, 128>}, {transform_indices = @transform_2, window_bounds = array<i64: 9, 128, 128>}, {transform_indices = @transform_3, window_bounds = array<i64: 1, 128>}, {transform_indices = @transform_4, window_bounds = array<i64: 1, 4, 128>}]} {
    %cst = arith.constant 0.000000e+00 : f32
    %0 = vector.broadcast %cst : f32 to vector<4x128xf32>
    %c10_i32 = arith.constant 10 : i32
    %1 = arith.muli %arg1, %c10_i32 : i32
    %c2_i32 = arith.constant 2 : i32
    %2 = arith.muli %c2_i32, %arg2 : i32
    %3 = arith.addi %1, %2 : i32
    %c0_i32 = arith.constant 0 : i32
    %4 = arith.addi %3, %c0_i32 : i32
    %5 = arith.index_cast %4 : i32 to index
    %c0 = arith.constant 0 : index
    %c0_0 = arith.constant 0 : index
    %6 = vector.load %arg3[%5, %c0, %c0_0] : memref<20x5x128xbf16, #tpu.memory_space<vmem>>, vector<1x5x128xbf16>
    %7 = vector.shape_cast %6 : vector<1x5x128xbf16> to vector<5x128xbf16>
    %8 = arith.index_cast %4 : i32 to index
    %c0_1 = arith.constant 0 : index
    %c0_2 = arith.constant 0 : index
    %9 = vector.load %arg4[%8, %c0_1, %c0_2] : memref<20x5x128xbf16, #tpu.memory_space<vmem>>, vector<1x5x128xbf16>
    %10 = vector.shape_cast %9 : vector<1x5x128xbf16> to vector<5x128xbf16>
    %11 = vector.extract_strided_slice %7 {offsets = [0, 0], sizes = [4, 128], strides = [1, 1]} : vector<5x128xbf16> to vector<4x128xbf16>
    %12 = vector.extract_strided_slice %10 {offsets = [0, 0], sizes = [4, 128], strides = [1, 1]} : vector<5x128xbf16> to vector<4x128xbf16>
    %13 = vector.extract_strided_slice %7 {offsets = [1, 0], sizes = [4, 128], strides = [1, 1]} : vector<5x128xbf16> to vector<4x128xbf16>
    %c0_3 = arith.constant 0 : index
    %c0_4 = arith.constant 0 : index
    %c0_5 = arith.constant 0 : index
    %14 = vector.load %arg5[%c0_3, %c0_4, %c0_5] : memref<9x128x128xbf16, #tpu.memory_space<vmem>>, vector<1x128x128xbf16>
    %15 = vector.shape_cast %14 : vector<1x128x128xbf16> to vector<128x128xbf16>
    %cst_6 = arith.constant dense<0.000000e+00> : vector<4x128xf32>
    %16 = tpu.matmul %11, %15, %cst_6 {dimension_numbers = #tpu.dot_dimension_numbers<[1], [0], [0], [1], [0, 0, 1, 1], [], []>} : vector<4x128xbf16>, vector<128x128xbf16>, vector<4x128xf32> -> vector<4x128xf32>
    %17 = arith.addf %0, %16 : vector<4x128xf32>
    %c1 = arith.constant 1 : index
    %c0_7 = arith.constant 0 : index
    %c0_8 = arith.constant 0 : index
    %18 = vector.load %arg5[%c1, %c0_7, %c0_8] : memref<9x128x128xbf16, #tpu.memory_space<vmem>>, vector<1x128x128xbf16>
    %19 = vector.shape_cast %18 : vector<1x128x128xbf16> to vector<128x128xbf16>
    %cst_9 = arith.constant dense<0.000000e+00> : vector<4x128xf32>
    %20 = tpu.matmul %12, %19, %cst_9 {dimension_numbers = #tpu.dot_dimension_numbers<[1], [0], [0], [1], [0, 0, 1, 1], [], []>} : vector<4x128xbf16>, vector<128x128xbf16>, vector<4x128xf32> -> vector<4x128xf32>
    %21 = arith.addf %17, %20 : vector<4x128xf32>
    %c2 = arith.constant 2 : index
    %c0_10 = arith.constant 0 : index
    %c0_11 = arith.constant 0 : index
    %22 = vector.load %arg5[%c2, %c0_10, %c0_11] : memref<9x128x128xbf16, #tpu.memory_space<vmem>>, vector<1x128x128xbf16>
    %23 = vector.shape_cast %22 : vector<1x128x128xbf16> to vector<128x128xbf16>
    %cst_12 = arith.constant dense<0.000000e+00> : vector<4x128xf32>
    %24 = tpu.matmul %13, %23, %cst_12 {dimension_numbers = #tpu.dot_dimension_numbers<[1], [0], [0], [1], [0, 0, 1, 1], [], []>} : vector<4x128xbf16>, vector<128x128xbf16>, vector<4x128xf32> -> vector<4x128xf32>
    %25 = arith.addf %21, %24 : vector<4x128xf32>
    %c10_i32_13 = arith.constant 10 : i32
    %26 = arith.muli %arg1, %c10_i32_13 : i32
    %c2_i32_14 = arith.constant 2 : i32
    %27 = arith.muli %c2_i32_14, %arg2 : i32
    %28 = arith.addi %26, %27 : i32
    %c1_i32 = arith.constant 1 : i32
    %29 = arith.addi %28, %c1_i32 : i32
    %30 = arith.index_cast %29 : i32 to index
    %c0_15 = arith.constant 0 : index
    %c0_16 = arith.constant 0 : index
    %31 = vector.load %arg3[%30, %c0_15, %c0_16] : memref<20x5x128xbf16, #tpu.memory_space<vmem>>, vector<1x5x128xbf16>
    %32 = vector.shape_cast %31 : vector<1x5x128xbf16> to vector<5x128xbf16>
    %33 = arith.index_cast %29 : i32 to index
    %c0_17 = arith.constant 0 : index
    %c0_18 = arith.constant 0 : index
    %34 = vector.load %arg4[%33, %c0_17, %c0_18] : memref<20x5x128xbf16, #tpu.memory_space<vmem>>, vector<1x5x128xbf16>
    %35 = vector.shape_cast %34 : vector<1x5x128xbf16> to vector<5x128xbf16>
    %36 = vector.extract_strided_slice %32 {offsets = [0, 0], sizes = [4, 128], strides = [1, 1]} : vector<5x128xbf16> to vector<4x128xbf16>
    %37 = vector.extract_strided_slice %35 {offsets = [0, 0], sizes = [4, 128], strides = [1, 1]} : vector<5x128xbf16> to vector<4x128xbf16>
    %38 = vector.extract_strided_slice %32 {offsets = [1, 0], sizes = [4, 128], strides = [1, 1]} : vector<5x128xbf16> to vector<4x128xbf16>
    %c3 = arith.constant 3 : index
    %c0_19 = arith.constant 0 : index
    %c0_20 = arith.constant 0 : index
    %39 = vector.load %arg5[%c3, %c0_19, %c0_20] : memref<9x128x128xbf16, #tpu.memory_space<vmem>>, vector<1x128x128xbf16>
    %40 = vector.shape_cast %39 : vector<1x128x128xbf16> to vector<128x128xbf16>
    %cst_21 = arith.constant dense<0.000000e+00> : vector<4x128xf32>
    %41 = tpu.matmul %36, %40, %cst_21 {dimension_numbers = #tpu.dot_dimension_numbers<[1], [0], [0], [1], [0, 0, 1, 1], [], []>} : vector<4x128xbf16>, vector<128x128xbf16>, vector<4x128xf32> -> vector<4x128xf32>
    %42 = arith.addf %25, %41 : vector<4x128xf32>
    %c4 = arith.constant 4 : index
    %c0_22 = arith.constant 0 : index
    %c0_23 = arith.constant 0 : index
    %43 = vector.load %arg5[%c4, %c0_22, %c0_23] : memref<9x128x128xbf16, #tpu.memory_space<vmem>>, vector<1x128x128xbf16>
    %44 = vector.shape_cast %43 : vector<1x128x128xbf16> to vector<128x128xbf16>
    %cst_24 = arith.constant dense<0.000000e+00> : vector<4x128xf32>
    %45 = tpu.matmul %37, %44, %cst_24 {dimension_numbers = #tpu.dot_dimension_numbers<[1], [0], [0], [1], [0, 0, 1, 1], [], []>} : vector<4x128xbf16>, vector<128x128xbf16>, vector<4x128xf32> -> vector<4x128xf32>
    %46 = arith.addf %42, %45 : vector<4x128xf32>
    %c5 = arith.constant 5 : index
    %c0_25 = arith.constant 0 : index
    %c0_26 = arith.constant 0 : index
    %47 = vector.load %arg5[%c5, %c0_25, %c0_26] : memref<9x128x128xbf16, #tpu.memory_space<vmem>>, vector<1x128x128xbf16>
    %48 = vector.shape_cast %47 : vector<1x128x128xbf16> to vector<128x128xbf16>
    %cst_27 = arith.constant dense<0.000000e+00> : vector<4x128xf32>
    %49 = tpu.matmul %38, %48, %cst_27 {dimension_numbers = #tpu.dot_dimension_numbers<[1], [0], [0], [1], [0, 0, 1, 1], [], []>} : vector<4x128xbf16>, vector<128x128xbf16>, vector<4x128xf32> -> vector<4x128xf32>
    %50 = arith.addf %46, %49 : vector<4x128xf32>
    %c10_i32_28 = arith.constant 10 : i32
    %51 = arith.muli %arg1, %c10_i32_28 : i32
    %c2_i32_29 = arith.constant 2 : i32
    %52 = arith.muli %c2_i32_29, %arg2 : i32
    %53 = arith.addi %51, %52 : i32
    %c2_i32_30 = arith.constant 2 : i32
    %54 = arith.addi %53, %c2_i32_30 : i32
    %55 = arith.index_cast %54 : i32 to index
    %c0_31 = arith.constant 0 : index
    %c0_32 = arith.constant 0 : index
    %56 = vector.load %arg3[%55, %c0_31, %c0_32] : memref<20x5x128xbf16, #tpu.memory_space<vmem>>, vector<1x5x128xbf16>
    %57 = vector.shape_cast %56 : vector<1x5x128xbf16> to vector<5x128xbf16>
    %58 = arith.index_cast %54 : i32 to index
    %c0_33 = arith.constant 0 : index
    %c0_34 = arith.constant 0 : index
    %59 = vector.load %arg4[%58, %c0_33, %c0_34] : memref<20x5x128xbf16, #tpu.memory_space<vmem>>, vector<1x5x128xbf16>
    %60 = vector.shape_cast %59 : vector<1x5x128xbf16> to vector<5x128xbf16>
    %61 = vector.extract_strided_slice %57 {offsets = [0, 0], sizes = [4, 128], strides = [1, 1]} : vector<5x128xbf16> to vector<4x128xbf16>
    %62 = vector.extract_strided_slice %60 {offsets = [0, 0], sizes = [4, 128], strides = [1, 1]} : vector<5x128xbf16> to vector<4x128xbf16>
    %63 = vector.extract_strided_slice %57 {offsets = [1, 0], sizes = [4, 128], strides = [1, 1]} : vector<5x128xbf16> to vector<4x128xbf16>
    %c6 = arith.constant 6 : index
    %c0_35 = arith.constant 0 : index
    %c0_36 = arith.constant 0 : index
    %64 = vector.load %arg5[%c6, %c0_35, %c0_36] : memref<9x128x128xbf16, #tpu.memory_space<vmem>>, vector<1x128x128xbf16>
    %65 = vector.shape_cast %64 : vector<1x128x128xbf16> to vector<128x128xbf16>
    %cst_37 = arith.constant dense<0.000000e+00> : vector<4x128xf32>
    %66 = tpu.matmul %61, %65, %cst_37 {dimension_numbers = #tpu.dot_dimension_numbers<[1], [0], [0], [1], [0, 0, 1, 1], [], []>} : vector<4x128xbf16>, vector<128x128xbf16>, vector<4x128xf32> -> vector<4x128xf32>
    %67 = arith.addf %50, %66 : vector<4x128xf32>
    %c7 = arith.constant 7 : index
    %c0_38 = arith.constant 0 : index
    %c0_39 = arith.constant 0 : index
    %68 = vector.load %arg5[%c7, %c0_38, %c0_39] : memref<9x128x128xbf16, #tpu.memory_space<vmem>>, vector<1x128x128xbf16>
    %69 = vector.shape_cast %68 : vector<1x128x128xbf16> to vector<128x128xbf16>
    %cst_40 = arith.constant dense<0.000000e+00> : vector<4x128xf32>
    %70 = tpu.matmul %62, %69, %cst_40 {dimension_numbers = #tpu.dot_dimension_numbers<[1], [0], [0], [1], [0, 0, 1, 1], [], []>} : vector<4x128xbf16>, vector<128x128xbf16>, vector<4x128xf32> -> vector<4x128xf32>
    %71 = arith.addf %67, %70 : vector<4x128xf32>
    %c8 = arith.constant 8 : index
    %c0_41 = arith.constant 0 : index
    %c0_42 = arith.constant 0 : index
    %72 = vector.load %arg5[%c8, %c0_41, %c0_42] : memref<9x128x128xbf16, #tpu.memory_space<vmem>>, vector<1x128x128xbf16>
    %73 = vector.shape_cast %72 : vector<1x128x128xbf16> to vector<128x128xbf16>
    %cst_43 = arith.constant dense<0.000000e+00> : vector<4x128xf32>
    %74 = tpu.matmul %63, %73, %cst_43 {dimension_numbers = #tpu.dot_dimension_numbers<[1], [0], [0], [1], [0, 0, 1, 1], [], []>} : vector<4x128xbf16>, vector<128x128xbf16>, vector<4x128xf32> -> vector<4x128xf32>
    %75 = arith.addf %71, %74 : vector<4x128xf32>
    %c0_44 = arith.constant 0 : index
    %c0_45 = arith.constant 0 : index
    %76 = vector.load %arg6[%c0_44, %c0_45] : memref<1x128xf32, #tpu.memory_space<vmem>>, vector<1x128xf32>
    %77 = vector.broadcast %76 : vector<1x128xf32> to vector<4x128xf32>
    %78 = arith.addf %75, %77 : vector<4x128xf32>
    %cst_46 = arith.constant 0.000000e+00 : f32
    %79 = vector.broadcast %cst_46 : f32 to vector<4x128xf32>
    %80 = arith.maximumf %78, %79 : vector<4x128xf32>
    %81 = arith.truncf %80 : vector<4x128xf32> to vector<4x128xbf16>
    %c0_47 = arith.constant 0 : index
    %c0_48 = arith.constant 0 : index
    %c0_49 = arith.constant 0 : index
    %82 = vector.load %arg7[%c0_47, %c0_48, %c0_49] : memref<1x4x128xbf16, #tpu.memory_space<vmem>>, vector<1x4x128xbf16>
    %83 = vector.shape_cast %82 : vector<1x4x128xbf16> to vector<4x128xbf16>
    %84 = vector.shape_cast %81 : vector<4x128xbf16> to vector<1x4x128xbf16>
    tpu.vector_store %arg7[%c0_47, %c0_48, %c0_49], %84 {strides = array<i32>} : memref<1x4x128xbf16, #tpu.memory_space<vmem>>, vector<1x4x128xbf16>,
    return
  }
  func.func @transform_0(%arg0: i32, %arg1: i32, %arg2: i32) -> (i32, i32, i32) {
    %c0_i32 = arith.constant 0 : i32
    %c0_i32_0 = arith.constant 0 : i32
    %c0_i32_1 = arith.constant 0 : i32
    %c0_i32_2 = arith.constant 0 : i32
    return %c0_i32, %c0_i32_0, %c0_i32_1 : i32, i32, i32
  }
  func.func @transform_1(%arg0: i32, %arg1: i32, %arg2: i32) -> (i32, i32, i32) {
    %c0_i32 = arith.constant 0 : i32
    %c0_i32_0 = arith.constant 0 : i32
    %c0_i32_1 = arith.constant 0 : i32
    %c0_i32_2 = arith.constant 0 : i32
    return %c0_i32, %c0_i32_0, %c0_i32_1 : i32, i32, i32
  }
  func.func @transform_2(%arg0: i32, %arg1: i32, %arg2: i32) -> (i32, i32, i32) {
    %c0_i32 = arith.constant 0 : i32
    %c0_i32_0 = arith.constant 0 : i32
    %c0_i32_1 = arith.constant 0 : i32
    return %c0_i32, %c0_i32_0, %arg0 : i32, i32, i32
  }
  func.func @transform_3(%arg0: i32, %arg1: i32, %arg2: i32) -> (i32, i32) {
    %c0_i32 = arith.constant 0 : i32
    %c0_i32_0 = arith.constant 0 : i32
    return %c0_i32, %arg0 : i32, i32
  }
  func.func @transform_4(%arg0: i32, %arg1: i32, %arg2: i32) -> (i32, i32, i32) {
    %c4_i32 = arith.constant 4 : i32
    %0 = arith.muli %arg1, %c4_i32 : i32
    %1 = arith.addi %0, %arg2 : i32
    %c0_i32 = arith.constant 0 : i32
    %c0_i32_0 = arith.constant 0 : i32
    return %1, %c0_i32, %arg0 : i32, i32, i32
  }
}

module attributes {stable_mosaic.version = 11 : i64} {
  func.func @_conv3x3_row_kernel(%arg0: i32, %arg1: i32, %arg2: i32, %arg3: memref<12x6x256xbf16, #tpu.memory_space<vmem>>, %arg4: memref<9x256x128xbf16, #tpu.memory_space<vmem>>, %arg5: memref<1x128xf32, #tpu.memory_space<vmem>>, %arg6: memref<1x4x128xbf16, #tpu.memory_space<vmem>>) attributes {dimension_semantics = [#tpu.dimension_semantics<parallel>, #tpu.dimension_semantics<parallel>, #tpu.dimension_semantics<parallel>], iteration_bounds = array<i64: 4, 2, 4>, scalar_prefetch = 0 : i64, scratch_operands = 0 : i64, tpu.core_type = #tpu.core_type<tc>, window_params = [{pipeline_mode = #tpu.pipeline_mode<synchronous>, transform_indices = @transform_0, window_bounds = array<i64: 12, 6, 256>}, {transform_indices = @transform_1, window_bounds = array<i64: 9, 256, 128>}, {transform_indices = @transform_2, window_bounds = array<i64: 1, 128>}, {transform_indices = @transform_3, window_bounds = array<i64: 1, 4, 128>}]} {
    %cst = arith.constant 0.000000e+00 : f32
    %0 = vector.broadcast %cst : f32 to vector<4x128xf32>
    %c6_i32 = arith.constant 6 : i32
    %1 = arith.muli %arg1, %c6_i32 : i32
    %c1_i32 = arith.constant 1 : i32
    %2 = arith.muli %c1_i32, %arg2 : i32
    %3 = arith.addi %1, %2 : i32
    %c0_i32 = arith.constant 0 : i32
    %4 = arith.addi %3, %c0_i32 : i32
    %5 = arith.index_cast %4 : i32 to index
    %c0 = arith.constant 0 : index
    %c0_0 = arith.constant 0 : index
    %6 = vector.load %arg3[%5, %c0, %c0_0] : memref<12x6x256xbf16, #tpu.memory_space<vmem>>, vector<1x6x256xbf16>
    %7 = vector.shape_cast %6 : vector<1x6x256xbf16> to vector<6x256xbf16>
    %8 = vector.extract_strided_slice %7 {offsets = [0, 0], sizes = [4, 256], strides = [1, 1]} : vector<6x256xbf16> to vector<4x256xbf16>
    %9 = vector.extract_strided_slice %7 {offsets = [1, 0], sizes = [4, 256], strides = [1, 1]} : vector<6x256xbf16> to vector<4x256xbf16>
    %10 = vector.extract_strided_slice %7 {offsets = [2, 0], sizes = [4, 256], strides = [1, 1]} : vector<6x256xbf16> to vector<4x256xbf16>
    %c0_1 = arith.constant 0 : index
    %c0_2 = arith.constant 0 : index
    %c0_3 = arith.constant 0 : index
    %11 = vector.load %arg4[%c0_1, %c0_2, %c0_3] : memref<9x256x128xbf16, #tpu.memory_space<vmem>>, vector<1x256x128xbf16>
    %12 = vector.shape_cast %11 : vector<1x256x128xbf16> to vector<256x128xbf16>
    %cst_4 = arith.constant dense<0.000000e+00> : vector<4x128xf32>
    %13 = tpu.matmul %8, %12, %cst_4 {dimension_numbers = #tpu.dot_dimension_numbers<[1], [0], [0], [1], [0, 0, 1, 1], [], []>} : vector<4x256xbf16>, vector<256x128xbf16>, vector<4x128xf32> -> vector<4x128xf32>
    %14 = arith.addf %0, %13 : vector<4x128xf32>
    %c1 = arith.constant 1 : index
    %c0_5 = arith.constant 0 : index
    %c0_6 = arith.constant 0 : index
    %15 = vector.load %arg4[%c1, %c0_5, %c0_6] : memref<9x256x128xbf16, #tpu.memory_space<vmem>>, vector<1x256x128xbf16>
    %16 = vector.shape_cast %15 : vector<1x256x128xbf16> to vector<256x128xbf16>
    %cst_7 = arith.constant dense<0.000000e+00> : vector<4x128xf32>
    %17 = tpu.matmul %9, %16, %cst_7 {dimension_numbers = #tpu.dot_dimension_numbers<[1], [0], [0], [1], [0, 0, 1, 1], [], []>} : vector<4x256xbf16>, vector<256x128xbf16>, vector<4x128xf32> -> vector<4x128xf32>
    %18 = arith.addf %14, %17 : vector<4x128xf32>
    %c2 = arith.constant 2 : index
    %c0_8 = arith.constant 0 : index
    %c0_9 = arith.constant 0 : index
    %19 = vector.load %arg4[%c2, %c0_8, %c0_9] : memref<9x256x128xbf16, #tpu.memory_space<vmem>>, vector<1x256x128xbf16>
    %20 = vector.shape_cast %19 : vector<1x256x128xbf16> to vector<256x128xbf16>
    %cst_10 = arith.constant dense<0.000000e+00> : vector<4x128xf32>
    %21 = tpu.matmul %10, %20, %cst_10 {dimension_numbers = #tpu.dot_dimension_numbers<[1], [0], [0], [1], [0, 0, 1, 1], [], []>} : vector<4x256xbf16>, vector<256x128xbf16>, vector<4x128xf32> -> vector<4x128xf32>
    %22 = arith.addf %18, %21 : vector<4x128xf32>
    %c6_i32_11 = arith.constant 6 : i32
    %23 = arith.muli %arg1, %c6_i32_11 : i32
    %c1_i32_12 = arith.constant 1 : i32
    %24 = arith.muli %c1_i32_12, %arg2 : i32
    %25 = arith.addi %23, %24 : i32
    %c1_i32_13 = arith.constant 1 : i32
    %26 = arith.addi %25, %c1_i32_13 : i32
    %27 = arith.index_cast %26 : i32 to index
    %c0_14 = arith.constant 0 : index
    %c0_15 = arith.constant 0 : index
    %28 = vector.load %arg3[%27, %c0_14, %c0_15] : memref<12x6x256xbf16, #tpu.memory_space<vmem>>, vector<1x6x256xbf16>
    %29 = vector.shape_cast %28 : vector<1x6x256xbf16> to vector<6x256xbf16>
    %30 = vector.extract_strided_slice %29 {offsets = [0, 0], sizes = [4, 256], strides = [1, 1]} : vector<6x256xbf16> to vector<4x256xbf16>
    %31 = vector.extract_strided_slice %29 {offsets = [1, 0], sizes = [4, 256], strides = [1, 1]} : vector<6x256xbf16> to vector<4x256xbf16>
    %32 = vector.extract_strided_slice %29 {offsets = [2, 0], sizes = [4, 256], strides = [1, 1]} : vector<6x256xbf16> to vector<4x256xbf16>
    %c3 = arith.constant 3 : index
    %c0_16 = arith.constant 0 : index
    %c0_17 = arith.constant 0 : index
    %33 = vector.load %arg4[%c3, %c0_16, %c0_17] : memref<9x256x128xbf16, #tpu.memory_space<vmem>>, vector<1x256x128xbf16>
    %34 = vector.shape_cast %33 : vector<1x256x128xbf16> to vector<256x128xbf16>
    %cst_18 = arith.constant dense<0.000000e+00> : vector<4x128xf32>
    %35 = tpu.matmul %30, %34, %cst_18 {dimension_numbers = #tpu.dot_dimension_numbers<[1], [0], [0], [1], [0, 0, 1, 1], [], []>} : vector<4x256xbf16>, vector<256x128xbf16>, vector<4x128xf32> -> vector<4x128xf32>
    %36 = arith.addf %22, %35 : vector<4x128xf32>
    %c4 = arith.constant 4 : index
    %c0_19 = arith.constant 0 : index
    %c0_20 = arith.constant 0 : index
    %37 = vector.load %arg4[%c4, %c0_19, %c0_20] : memref<9x256x128xbf16, #tpu.memory_space<vmem>>, vector<1x256x128xbf16>
    %38 = vector.shape_cast %37 : vector<1x256x128xbf16> to vector<256x128xbf16>
    %cst_21 = arith.constant dense<0.000000e+00> : vector<4x128xf32>
    %39 = tpu.matmul %31, %38, %cst_21 {dimension_numbers = #tpu.dot_dimension_numbers<[1], [0], [0], [1], [0, 0, 1, 1], [], []>} : vector<4x256xbf16>, vector<256x128xbf16>, vector<4x128xf32> -> vector<4x128xf32>
    %40 = arith.addf %36, %39 : vector<4x128xf32>
    %c5 = arith.constant 5 : index
    %c0_22 = arith.constant 0 : index
    %c0_23 = arith.constant 0 : index
    %41 = vector.load %arg4[%c5, %c0_22, %c0_23] : memref<9x256x128xbf16, #tpu.memory_space<vmem>>, vector<1x256x128xbf16>
    %42 = vector.shape_cast %41 : vector<1x256x128xbf16> to vector<256x128xbf16>
    %cst_24 = arith.constant dense<0.000000e+00> : vector<4x128xf32>
    %43 = tpu.matmul %32, %42, %cst_24 {dimension_numbers = #tpu.dot_dimension_numbers<[1], [0], [0], [1], [0, 0, 1, 1], [], []>} : vector<4x256xbf16>, vector<256x128xbf16>, vector<4x128xf32> -> vector<4x128xf32>
    %44 = arith.addf %40, %43 : vector<4x128xf32>
    %c6_i32_25 = arith.constant 6 : i32
    %45 = arith.muli %arg1, %c6_i32_25 : i32
    %c1_i32_26 = arith.constant 1 : i32
    %46 = arith.muli %c1_i32_26, %arg2 : i32
    %47 = arith.addi %45, %46 : i32
    %c2_i32 = arith.constant 2 : i32
    %48 = arith.addi %47, %c2_i32 : i32
    %49 = arith.index_cast %48 : i32 to index
    %c0_27 = arith.constant 0 : index
    %c0_28 = arith.constant 0 : index
    %50 = vector.load %arg3[%49, %c0_27, %c0_28] : memref<12x6x256xbf16, #tpu.memory_space<vmem>>, vector<1x6x256xbf16>
    %51 = vector.shape_cast %50 : vector<1x6x256xbf16> to vector<6x256xbf16>
    %52 = vector.extract_strided_slice %51 {offsets = [0, 0], sizes = [4, 256], strides = [1, 1]} : vector<6x256xbf16> to vector<4x256xbf16>
    %53 = vector.extract_strided_slice %51 {offsets = [1, 0], sizes = [4, 256], strides = [1, 1]} : vector<6x256xbf16> to vector<4x256xbf16>
    %54 = vector.extract_strided_slice %51 {offsets = [2, 0], sizes = [4, 256], strides = [1, 1]} : vector<6x256xbf16> to vector<4x256xbf16>
    %c6 = arith.constant 6 : index
    %c0_29 = arith.constant 0 : index
    %c0_30 = arith.constant 0 : index
    %55 = vector.load %arg4[%c6, %c0_29, %c0_30] : memref<9x256x128xbf16, #tpu.memory_space<vmem>>, vector<1x256x128xbf16>
    %56 = vector.shape_cast %55 : vector<1x256x128xbf16> to vector<256x128xbf16>
    %cst_31 = arith.constant dense<0.000000e+00> : vector<4x128xf32>
    %57 = tpu.matmul %52, %56, %cst_31 {dimension_numbers = #tpu.dot_dimension_numbers<[1], [0], [0], [1], [0, 0, 1, 1], [], []>} : vector<4x256xbf16>, vector<256x128xbf16>, vector<4x128xf32> -> vector<4x128xf32>
    %58 = arith.addf %44, %57 : vector<4x128xf32>
    %c7 = arith.constant 7 : index
    %c0_32 = arith.constant 0 : index
    %c0_33 = arith.constant 0 : index
    %59 = vector.load %arg4[%c7, %c0_32, %c0_33] : memref<9x256x128xbf16, #tpu.memory_space<vmem>>, vector<1x256x128xbf16>
    %60 = vector.shape_cast %59 : vector<1x256x128xbf16> to vector<256x128xbf16>
    %cst_34 = arith.constant dense<0.000000e+00> : vector<4x128xf32>
    %61 = tpu.matmul %53, %60, %cst_34 {dimension_numbers = #tpu.dot_dimension_numbers<[1], [0], [0], [1], [0, 0, 1, 1], [], []>} : vector<4x256xbf16>, vector<256x128xbf16>, vector<4x128xf32> -> vector<4x128xf32>
    %62 = arith.addf %58, %61 : vector<4x128xf32>
    %c8 = arith.constant 8 : index
    %c0_35 = arith.constant 0 : index
    %c0_36 = arith.constant 0 : index
    %63 = vector.load %arg4[%c8, %c0_35, %c0_36] : memref<9x256x128xbf16, #tpu.memory_space<vmem>>, vector<1x256x128xbf16>
    %64 = vector.shape_cast %63 : vector<1x256x128xbf16> to vector<256x128xbf16>
    %cst_37 = arith.constant dense<0.000000e+00> : vector<4x128xf32>
    %65 = tpu.matmul %54, %64, %cst_37 {dimension_numbers = #tpu.dot_dimension_numbers<[1], [0], [0], [1], [0, 0, 1, 1], [], []>} : vector<4x256xbf16>, vector<256x128xbf16>, vector<4x128xf32> -> vector<4x128xf32>
    %66 = arith.addf %62, %65 : vector<4x128xf32>
    %c0_38 = arith.constant 0 : index
    %c0_39 = arith.constant 0 : index
    %67 = vector.load %arg5[%c0_38, %c0_39] : memref<1x128xf32, #tpu.memory_space<vmem>>, vector<1x128xf32>
    %68 = vector.broadcast %67 : vector<1x128xf32> to vector<4x128xf32>
    %69 = arith.addf %66, %68 : vector<4x128xf32>
    %cst_40 = arith.constant 0.000000e+00 : f32
    %70 = vector.broadcast %cst_40 : f32 to vector<4x128xf32>
    %71 = arith.maximumf %69, %70 : vector<4x128xf32>
    %72 = arith.truncf %71 : vector<4x128xf32> to vector<4x128xbf16>
    %c0_41 = arith.constant 0 : index
    %c0_42 = arith.constant 0 : index
    %c0_43 = arith.constant 0 : index
    %73 = vector.load %arg6[%c0_41, %c0_42, %c0_43] : memref<1x4x128xbf16, #tpu.memory_space<vmem>>, vector<1x4x128xbf16>
    %74 = vector.shape_cast %73 : vector<1x4x128xbf16> to vector<4x128xbf16>
    %75 = vector.shape_cast %72 : vector<4x128xbf16> to vector<1x4x128xbf16>
    tpu.vector_store %arg6[%c0_41, %c0_42, %c0_43], %75 {strides = array<i32>} : memref<1x4x128xbf16, #tpu.memory_space<vmem>>, vector<1x4x128xbf16>,
    return
  }
  func.func @transform_0(%arg0: i32, %arg1: i32, %arg2: i32) -> (i32, i32, i32) {
    %c0_i32 = arith.constant 0 : i32
    %c0_i32_0 = arith.constant 0 : i32
    %c0_i32_1 = arith.constant 0 : i32
    %c0_i32_2 = arith.constant 0 : i32
    return %c0_i32, %c0_i32_0, %c0_i32_1 : i32, i32, i32
  }
  func.func @transform_1(%arg0: i32, %arg1: i32, %arg2: i32) -> (i32, i32, i32) {
    %c0_i32 = arith.constant 0 : i32
    %c0_i32_0 = arith.constant 0 : i32
    %c0_i32_1 = arith.constant 0 : i32
    return %c0_i32, %c0_i32_0, %arg0 : i32, i32, i32
  }
  func.func @transform_2(%arg0: i32, %arg1: i32, %arg2: i32) -> (i32, i32) {
    %c0_i32 = arith.constant 0 : i32
    %c0_i32_0 = arith.constant 0 : i32
    return %c0_i32, %arg0 : i32, i32
  }
  func.func @transform_3(%arg0: i32, %arg1: i32, %arg2: i32) -> (i32, i32, i32) {
    %c4_i32 = arith.constant 4 : i32
    %0 = arith.muli %arg1, %c4_i32 : i32
    %1 = arith.addi %0, %arg2 : i32
    %c0_i32 = arith.constant 0 : i32
    %c0_i32_0 = arith.constant 0 : i32
    return %1, %c0_i32, %arg0 : i32, i32, i32
  }
}

module attributes {stable_mosaic.version = 11 : i64} {
  func.func @_conv3x3_row_kernel(%arg0: i32, %arg1: i32, %arg2: i32, %arg3: memref<12x3x512xbf16, #tpu.memory_space<vmem>>, %arg4: memref<12x3x512xbf16, #tpu.memory_space<vmem>>, %arg5: memref<9x512x128xbf16, #tpu.memory_space<vmem>>, %arg6: memref<1x128xf32, #tpu.memory_space<vmem>>, %arg7: memref<1x2x128xf32, #tpu.memory_space<vmem>>) attributes {dimension_semantics = [#tpu.dimension_semantics<parallel>, #tpu.dimension_semantics<parallel>, #tpu.dimension_semantics<parallel>], iteration_bounds = array<i64: 8, 2, 2>, scalar_prefetch = 0 : i64, scratch_operands = 0 : i64, tpu.core_type = #tpu.core_type<tc>, window_params = [{pipeline_mode = #tpu.pipeline_mode<synchronous>, transform_indices = @transform_0, window_bounds = array<i64: 12, 3, 512>}, {pipeline_mode = #tpu.pipeline_mode<synchronous>, transform_indices = @transform_1, window_bounds = array<i64: 12, 3, 512>}, {transform_indices = @transform_2, window_bounds = array<i64: 9, 512, 128>}, {transform_indices = @transform_3, window_bounds = array<i64: 1, 128>}, {transform_indices = @transform_4, window_bounds = array<i64: 1, 2, 128>}]} {
    %cst = arith.constant 0.000000e+00 : f32
    %0 = vector.broadcast %cst : f32 to vector<2x128xf32>
    %c6_i32 = arith.constant 6 : i32
    %1 = arith.muli %arg1, %c6_i32 : i32
    %c2_i32 = arith.constant 2 : i32
    %2 = arith.muli %c2_i32, %arg2 : i32
    %3 = arith.addi %1, %2 : i32
    %c0_i32 = arith.constant 0 : i32
    %4 = arith.addi %3, %c0_i32 : i32
    %5 = arith.index_cast %4 : i32 to index
    %c0 = arith.constant 0 : index
    %c0_0 = arith.constant 0 : index
    %6 = vector.load %arg3[%5, %c0, %c0_0] : memref<12x3x512xbf16, #tpu.memory_space<vmem>>, vector<1x3x512xbf16>
    %7 = vector.shape_cast %6 : vector<1x3x512xbf16> to vector<3x512xbf16>
    %8 = arith.index_cast %4 : i32 to index
    %c0_1 = arith.constant 0 : index
    %c0_2 = arith.constant 0 : index
    %9 = vector.load %arg4[%8, %c0_1, %c0_2] : memref<12x3x512xbf16, #tpu.memory_space<vmem>>, vector<1x3x512xbf16>
    %10 = vector.shape_cast %9 : vector<1x3x512xbf16> to vector<3x512xbf16>
    %11 = vector.extract_strided_slice %7 {offsets = [0, 0], sizes = [2, 512], strides = [1, 1]} : vector<3x512xbf16> to vector<2x512xbf16>
    %12 = vector.extract_strided_slice %10 {offsets = [0, 0], sizes = [2, 512], strides = [1, 1]} : vector<3x512xbf16> to vector<2x512xbf16>
    %13 = vector.extract_strided_slice %7 {offsets = [1, 0], sizes = [2, 512], strides = [1, 1]} : vector<3x512xbf16> to vector<2x512xbf16>
    %c0_3 = arith.constant 0 : index
    %c0_4 = arith.constant 0 : index
    %c0_5 = arith.constant 0 : index
    %14 = vector.load %arg5[%c0_3, %c0_4, %c0_5] : memref<9x512x128xbf16, #tpu.memory_space<vmem>>, vector<1x512x128xbf16>
    %15 = vector.shape_cast %14 : vector<1x512x128xbf16> to vector<512x128xbf16>
    %cst_6 = arith.constant dense<0.000000e+00> : vector<2x128xf32>
    %16 = tpu.matmul %11, %15, %cst_6 {dimension_numbers = #tpu.dot_dimension_numbers<[1], [0], [0], [1], [0, 0, 1, 1], [], []>} : vector<2x512xbf16>, vector<512x128xbf16>, vector<2x128xf32> -> vector<2x128xf32>
    %17 = arith.addf %0, %16 : vector<2x128xf32>
    %c1 = arith.constant 1 : index
    %c0_7 = arith.constant 0 : index
    %c0_8 = arith.constant 0 : index
    %18 = vector.load %arg5[%c1, %c0_7, %c0_8] : memref<9x512x128xbf16, #tpu.memory_space<vmem>>, vector<1x512x128xbf16>
    %19 = vector.shape_cast %18 : vector<1x512x128xbf16> to vector<512x128xbf16>
    %cst_9 = arith.constant dense<0.000000e+00> : vector<2x128xf32>
    %20 = tpu.matmul %12, %19, %cst_9 {dimension_numbers = #tpu.dot_dimension_numbers<[1], [0], [0], [1], [0, 0, 1, 1], [], []>} : vector<2x512xbf16>, vector<512x128xbf16>, vector<2x128xf32> -> vector<2x128xf32>
    %21 = arith.addf %17, %20 : vector<2x128xf32>
    %c2 = arith.constant 2 : index
    %c0_10 = arith.constant 0 : index
    %c0_11 = arith.constant 0 : index
    %22 = vector.load %arg5[%c2, %c0_10, %c0_11] : memref<9x512x128xbf16, #tpu.memory_space<vmem>>, vector<1x512x128xbf16>
    %23 = vector.shape_cast %22 : vector<1x512x128xbf16> to vector<512x128xbf16>
    %cst_12 = arith.constant dense<0.000000e+00> : vector<2x128xf32>
    %24 = tpu.matmul %13, %23, %cst_12 {dimension_numbers = #tpu.dot_dimension_numbers<[1], [0], [0], [1], [0, 0, 1, 1], [], []>} : vector<2x512xbf16>, vector<512x128xbf16>, vector<2x128xf32> -> vector<2x128xf32>
    %25 = arith.addf %21, %24 : vector<2x128xf32>
    %c6_i32_13 = arith.constant 6 : i32
    %26 = arith.muli %arg1, %c6_i32_13 : i32
    %c2_i32_14 = arith.constant 2 : i32
    %27 = arith.muli %c2_i32_14, %arg2 : i32
    %28 = arith.addi %26, %27 : i32
    %c1_i32 = arith.constant 1 : i32
    %29 = arith.addi %28, %c1_i32 : i32
    %30 = arith.index_cast %29 : i32 to index
    %c0_15 = arith.constant 0 : index
    %c0_16 = arith.constant 0 : index
    %31 = vector.load %arg3[%30, %c0_15, %c0_16] : memref<12x3x512xbf16, #tpu.memory_space<vmem>>, vector<1x3x512xbf16>
    %32 = vector.shape_cast %31 : vector<1x3x512xbf16> to vector<3x512xbf16>
    %33 = arith.index_cast %29 : i32 to index
    %c0_17 = arith.constant 0 : index
    %c0_18 = arith.constant 0 : index
    %34 = vector.load %arg4[%33, %c0_17, %c0_18] : memref<12x3x512xbf16, #tpu.memory_space<vmem>>, vector<1x3x512xbf16>
    %35 = vector.shape_cast %34 : vector<1x3x512xbf16> to vector<3x512xbf16>
    %36 = vector.extract_strided_slice %32 {offsets = [0, 0], sizes = [2, 512], strides = [1, 1]} : vector<3x512xbf16> to vector<2x512xbf16>
    %37 = vector.extract_strided_slice %35 {offsets = [0, 0], sizes = [2, 512], strides = [1, 1]} : vector<3x512xbf16> to vector<2x512xbf16>
    %38 = vector.extract_strided_slice %32 {offsets = [1, 0], sizes = [2, 512], strides = [1, 1]} : vector<3x512xbf16> to vector<2x512xbf16>
    %c3 = arith.constant 3 : index
    %c0_19 = arith.constant 0 : index
    %c0_20 = arith.constant 0 : index
    %39 = vector.load %arg5[%c3, %c0_19, %c0_20] : memref<9x512x128xbf16, #tpu.memory_space<vmem>>, vector<1x512x128xbf16>
    %40 = vector.shape_cast %39 : vector<1x512x128xbf16> to vector<512x128xbf16>
    %cst_21 = arith.constant dense<0.000000e+00> : vector<2x128xf32>
    %41 = tpu.matmul %36, %40, %cst_21 {dimension_numbers = #tpu.dot_dimension_numbers<[1], [0], [0], [1], [0, 0, 1, 1], [], []>} : vector<2x512xbf16>, vector<512x128xbf16>, vector<2x128xf32> -> vector<2x128xf32>
    %42 = arith.addf %25, %41 : vector<2x128xf32>
    %c4 = arith.constant 4 : index
    %c0_22 = arith.constant 0 : index
    %c0_23 = arith.constant 0 : index
    %43 = vector.load %arg5[%c4, %c0_22, %c0_23] : memref<9x512x128xbf16, #tpu.memory_space<vmem>>, vector<1x512x128xbf16>
    %44 = vector.shape_cast %43 : vector<1x512x128xbf16> to vector<512x128xbf16>
    %cst_24 = arith.constant dense<0.000000e+00> : vector<2x128xf32>
    %45 = tpu.matmul %37, %44, %cst_24 {dimension_numbers = #tpu.dot_dimension_numbers<[1], [0], [0], [1], [0, 0, 1, 1], [], []>} : vector<2x512xbf16>, vector<512x128xbf16>, vector<2x128xf32> -> vector<2x128xf32>
    %46 = arith.addf %42, %45 : vector<2x128xf32>
    %c5 = arith.constant 5 : index
    %c0_25 = arith.constant 0 : index
    %c0_26 = arith.constant 0 : index
    %47 = vector.load %arg5[%c5, %c0_25, %c0_26] : memref<9x512x128xbf16, #tpu.memory_space<vmem>>, vector<1x512x128xbf16>
    %48 = vector.shape_cast %47 : vector<1x512x128xbf16> to vector<512x128xbf16>
    %cst_27 = arith.constant dense<0.000000e+00> : vector<2x128xf32>
    %49 = tpu.matmul %38, %48, %cst_27 {dimension_numbers = #tpu.dot_dimension_numbers<[1], [0], [0], [1], [0, 0, 1, 1], [], []>} : vector<2x512xbf16>, vector<512x128xbf16>, vector<2x128xf32> -> vector<2x128xf32>
    %50 = arith.addf %46, %49 : vector<2x128xf32>
    %c6_i32_28 = arith.constant 6 : i32
    %51 = arith.muli %arg1, %c6_i32_28 : i32
    %c2_i32_29 = arith.constant 2 : i32
    %52 = arith.muli %c2_i32_29, %arg2 : i32
    %53 = arith.addi %51, %52 : i32
    %c2_i32_30 = arith.constant 2 : i32
    %54 = arith.addi %53, %c2_i32_30 : i32
    %55 = arith.index_cast %54 : i32 to index
    %c0_31 = arith.constant 0 : index
    %c0_32 = arith.constant 0 : index
    %56 = vector.load %arg3[%55, %c0_31, %c0_32] : memref<12x3x512xbf16, #tpu.memory_space<vmem>>, vector<1x3x512xbf16>
    %57 = vector.shape_cast %56 : vector<1x3x512xbf16> to vector<3x512xbf16>
    %58 = arith.index_cast %54 : i32 to index
    %c0_33 = arith.constant 0 : index
    %c0_34 = arith.constant 0 : index
    %59 = vector.load %arg4[%58, %c0_33, %c0_34] : memref<12x3x512xbf16, #tpu.memory_space<vmem>>, vector<1x3x512xbf16>
    %60 = vector.shape_cast %59 : vector<1x3x512xbf16> to vector<3x512xbf16>
    %61 = vector.extract_strided_slice %57 {offsets = [0, 0], sizes = [2, 512], strides = [1, 1]} : vector<3x512xbf16> to vector<2x512xbf16>
    %62 = vector.extract_strided_slice %60 {offsets = [0, 0], sizes = [2, 512], strides = [1, 1]} : vector<3x512xbf16> to vector<2x512xbf16>
    %63 = vector.extract_strided_slice %57 {offsets = [1, 0], sizes = [2, 512], strides = [1, 1]} : vector<3x512xbf16> to vector<2x512xbf16>
    %c6 = arith.constant 6 : index
    %c0_35 = arith.constant 0 : index
    %c0_36 = arith.constant 0 : index
    %64 = vector.load %arg5[%c6, %c0_35, %c0_36] : memref<9x512x128xbf16, #tpu.memory_space<vmem>>, vector<1x512x128xbf16>
    %65 = vector.shape_cast %64 : vector<1x512x128xbf16> to vector<512x128xbf16>
    %cst_37 = arith.constant dense<0.000000e+00> : vector<2x128xf32>
    %66 = tpu.matmul %61, %65, %cst_37 {dimension_numbers = #tpu.dot_dimension_numbers<[1], [0], [0], [1], [0, 0, 1, 1], [], []>} : vector<2x512xbf16>, vector<512x128xbf16>, vector<2x128xf32> -> vector<2x128xf32>
    %67 = arith.addf %50, %66 : vector<2x128xf32>
    %c7 = arith.constant 7 : index
    %c0_38 = arith.constant 0 : index
    %c0_39 = arith.constant 0 : index
    %68 = vector.load %arg5[%c7, %c0_38, %c0_39] : memref<9x512x128xbf16, #tpu.memory_space<vmem>>, vector<1x512x128xbf16>
    %69 = vector.shape_cast %68 : vector<1x512x128xbf16> to vector<512x128xbf16>
    %cst_40 = arith.constant dense<0.000000e+00> : vector<2x128xf32>
    %70 = tpu.matmul %62, %69, %cst_40 {dimension_numbers = #tpu.dot_dimension_numbers<[1], [0], [0], [1], [0, 0, 1, 1], [], []>} : vector<2x512xbf16>, vector<512x128xbf16>, vector<2x128xf32> -> vector<2x128xf32>
    %71 = arith.addf %67, %70 : vector<2x128xf32>
    %c8 = arith.constant 8 : index
    %c0_41 = arith.constant 0 : index
    %c0_42 = arith.constant 0 : index
    %72 = vector.load %arg5[%c8, %c0_41, %c0_42] : memref<9x512x128xbf16, #tpu.memory_space<vmem>>, vector<1x512x128xbf16>
    %73 = vector.shape_cast %72 : vector<1x512x128xbf16> to vector<512x128xbf16>
    %cst_43 = arith.constant dense<0.000000e+00> : vector<2x128xf32>
    %74 = tpu.matmul %63, %73, %cst_43 {dimension_numbers = #tpu.dot_dimension_numbers<[1], [0], [0], [1], [0, 0, 1, 1], [], []>} : vector<2x512xbf16>, vector<512x128xbf16>, vector<2x128xf32> -> vector<2x128xf32>
    %75 = arith.addf %71, %74 : vector<2x128xf32>
    %c0_44 = arith.constant 0 : index
    %c0_45 = arith.constant 0 : index
    %76 = vector.load %arg6[%c0_44, %c0_45] : memref<1x128xf32, #tpu.memory_space<vmem>>, vector<1x128xf32>
    %77 = vector.broadcast %76 : vector<1x128xf32> to vector<2x128xf32>
    %78 = arith.addf %75, %77 : vector<2x128xf32>
    %c0_46 = arith.constant 0 : index
    %c0_47 = arith.constant 0 : index
    %c0_48 = arith.constant 0 : index
    %79 = vector.load %arg7[%c0_46, %c0_47, %c0_48] : memref<1x2x128xf32, #tpu.memory_space<vmem>>, vector<1x2x128xf32>
    %80 = vector.shape_cast %79 : vector<1x2x128xf32> to vector<2x128xf32>
    %81 = vector.shape_cast %78 : vector<2x128xf32> to vector<1x2x128xf32>
    tpu.vector_store %arg7[%c0_46, %c0_47, %c0_48], %81 {strides = array<i32>} : memref<1x2x128xf32, #tpu.memory_space<vmem>>, vector<1x2x128xf32>,
    return
  }
  func.func @transform_0(%arg0: i32, %arg1: i32, %arg2: i32) -> (i32, i32, i32) {
    %c0_i32 = arith.constant 0 : i32
    %c0_i32_0 = arith.constant 0 : i32
    %c0_i32_1 = arith.constant 0 : i32
    %c0_i32_2 = arith.constant 0 : i32
    return %c0_i32, %c0_i32_0, %c0_i32_1 : i32, i32, i32
  }
  func.func @transform_1(%arg0: i32, %arg1: i32, %arg2: i32) -> (i32, i32, i32) {
    %c0_i32 = arith.constant 0 : i32
    %c0_i32_0 = arith.constant 0 : i32
    %c0_i32_1 = arith.constant 0 : i32
    %c0_i32_2 = arith.constant 0 : i32
    return %c0_i32, %c0_i32_0, %c0_i32_1 : i32, i32, i32
  }
  func.func @transform_2(%arg0: i32, %arg1: i32, %arg2: i32) -> (i32, i32, i32) {
    %c0_i32 = arith.constant 0 : i32
    %c0_i32_0 = arith.constant 0 : i32
    %c0_i32_1 = arith.constant 0 : i32
    return %c0_i32, %c0_i32_0, %arg0 : i32, i32, i32
  }
  func.func @transform_3(%arg0: i32, %arg1: i32, %arg2: i32) -> (i32, i32) {
    %c0_i32 = arith.constant 0 : i32
    %c0_i32_0 = arith.constant 0 : i32
    return %c0_i32, %arg0 : i32, i32
  }
  func.func @transform_4(%arg0: i32, %arg1: i32, %arg2: i32) -> (i32, i32, i32) {
    %c2_i32 = arith.constant 2 : i32
    %0 = arith.muli %arg1, %c2_i32 : i32
    %1 = arith.addi %0, %arg2 : i32
    %c0_i32 = arith.constant 0 : i32
    %c0_i32_0 = arith.constant 0 : i32
    return %1, %c0_i32, %arg0 : i32, i32, i32
  }
}

</mosaic_0001>

<bundles_post_ra>
// kernel: encoder_forward.6
= control target key start
LH: loop header
LB: loop body
LE: loop exit
PB: predicated region body
PF: predicated region fallthrough
CT: control target
= control target key end

     0   :  { %8 = vsyncpa [#allocation3], 0  ;;  %s2352_s0 = inlined_call_operand.vmem [shape: bf16[36,18,128], index: 0, kind: input, shape index: {}]   ;;  %s2353_s1 = inlined_call_operand.hbm [shape: bf16[9,128,128], index: 1, kind: input, shape index: {}]   ;;  %s2354_s2 = inlined_call_operand.hbm [shape: f32[1,128], index: 2, kind: input, shape index: {}]   ;;  %s2355_s3 = inlined_call_operand.vmem [shape: bf16[32,16,128], index: 3, kind: output, shape index: {}]  }
   0x1   :  { %9 = vsyncpa [#allocation5], 0  ;;  %s2085_s12 = smov 0   ;;  %s2087_s13 = smov 0  }
   0x2   :  { %s2089_s14 = smov 0   ;;  %s2091_s15 = smov 0  }
   0x3   :  { %s2093_s16 = smov 0  }
   0x4 LB: > { %s1439_s17 = sadd.s32 4294967295, %s2057_s16   ;;  %s27_s18 = sadd.s32 1, %s2049_s14  ;;  %s2057_s16 = sphi %s2093_s16, %s15_s16   ;;  %s2053_s15 = sphi %s2091_s15, %s2367_s15   ;;  %s2049_s14 = sphi %s2089_s14, %s2366_s14   ;;  %s2045_s13 = sphi %s2087_s13, %s2365_s13   ;;  %s2041_s12 = sphi %s2085_s12, %s2364_s12  }
   0x5   : > { %p28_p0 = scmp.ge.s32.totalorder %s27_s18, 16  ;;  %s30_s19 = sadd.s32 1, %s2053_s15 }
   0x6   : > { %p1443_p1 = scmp.ge.s32.totalorder %s2057_s16, 1  ;;  %p144_p2 = scmp.lt.s32.totalorder %s2057_s16, 33 }
   0x7   : > { %s2369_s18 = smov (%p28_p0, %s27_s18), 0  ;;  %s2371_s19 = smov (!%p28_p0, %s30_s19), %s2053_s15 }
   0x8   : > { %p2118_p3 = pnand %p1443_p1, %p144_p2  ;;  %p32_p4 = scmp.ge.s32.totalorder %s2371_s19, 2 }
   0x9   : > { %p2122_p5 = scmp.eq.s32.totalorder %s1439_s17, 0  ;;  %s2059_s22 = smov [#allocation2]  }
   0xa   : > { %s2359_s20 = scalar_select %p2118_p3, 1, 0 }
   0xb   : > { %s2360_s21 = scalar_select %p2122_p5, 1, 0 }
   0xc   : > { %p1820_p6 = pneg %p2118_p3  ;;  %s2373_s19 = smov (%p32_p4, %s2371_s19), 0 }
   0xd   : > { %s161_s23 = sshll.u32 %s2059_s22, 4  ;;  %s1955_s27 = scalar_lea.hbm %s2353_s1, 9216  ;;  %s162_s23 = int_to_ptr.vmem [resolvable:$true] %s161_s23 }
   0xe   : > { %p2132_p7 = pnand %p2122_p5, %p1820_p6  ;;  %p1956_p8 = scmp.ne.s32.totalorder %s2353_s1, %s1955_s27 }
   0xf   : > { %p1962_p12 = scmp.lt.u32.totalorder %s1955_s27, %s2353_s1 }
  0x10   : > { %p1957_p9 = pneg %p2132_p7 }
  0x12   : > { %p1958_p10 = pnand %p1957_p9, %p1956_p8 }
  0x14   : > { %p1959_p11 = pneg %p1958_p10 }
  0x16   : > { %p1964_p13 = pnand %p1962_p12, %p1959_p11 }
  0x18   : > { %1967 = shalt.err (!%p1964_p13)
}
  0x19   : > { %s1968_s5 = scalar_lea.vmem %s162_s23, 9216  ;;  %p1976_p4 = scmp.lt.s32.totalorder %s162_s23, %s162_s23 }
  0x1a   : > { %p1969_p0 = scmp.ne.s32.totalorder %s162_s23, %s1968_s5  ;;  %p1977_p6 = scmp.lt.s32.totalorder %s1968_s5, %s1968_s5 }
  0x1c   : > { %p1971_p1 = pnand %p1969_p0, %p1957_p9  ;;  %p1978_p5 = por %p1977_p6, %p1976_p4 }
  0x1e   : > { %p1972_p2 = pneg %p1971_p1 }
  0x20   : > { %p1979_p3 = pnand %p1978_p5, %p1972_p2 }
  0x22   : > { %1982 = shalt.err (!%p1979_p3)
}
  0x23   : > { %s2060_s6 = smov 64   ;;  %s2061_s7 = smov 4  }
  0x24   : > { %1823 = dma.hbm_to_vmem [thread:$0]  (!%p2132_p7), %s2353_s1, 9216, %s162_s23, [#allocation3], %s2060_s6, %s2060_s6, %s2061_s7  }
  0x25   : > { %s2062_s10 = smov [#allocation4]   ;;  %s1983_s25 = scalar_lea.hbm %s2354_s2, 16 }
  0x26   : > { %s177_s11 = sshll.u32 %s2062_s10, 4  ;;  %p1984_p3 = scmp.ne.s32.totalorder %s2354_s2, %s1983_s25  ;;  %s178_s11 = int_to_ptr.vmem [resolvable:$true] %s177_s11 }
  0x27   : > { %p1990_p10 = scmp.lt.u32.totalorder %s1983_s25, %s2354_s2 }
  0x28   : > { %p1986_p5 = pnand %p1984_p3, %p1957_p9 }
  0x2a   : > { %p1987_p8 = pneg %p1986_p5 }
  0x2c   : > { %p1992_p11 = pnand %p1990_p10, %p1987_p8 }
  0x2e   : > { %1995 = shalt.err (!%p1992_p11)
}
  0x2f   : > { %s1996_s23 = scalar_lea.vmem %s178_s11, 16  ;;  %s2003_s30 = scalar_lea.vmem %s178_s11, 32 }
  0x30   : > { %p1997_p12 = scmp.ne.s32.totalorder %s178_s11, %s1996_s23  ;;  %p2004_p1 = scmp.lt.s32.totalorder %s178_s11, %s178_s11 }
  0x31   : > { %p2005_p2 = scmp.lt.s32.totalorder %s2003_s30, %s1996_s23 }
  0x32   : > { %p1999_p13 = pnand %p1997_p12, %p1957_p9 }
  0x33   : > { %p2006_p4 = por %p2005_p2, %p2004_p1 }
  0x34   : > { %p2000_p0 = pneg %p1999_p13 }
  0x36   : > { %p2007_p6 = pnand %p2006_p4, %p2000_p0 }
  0x38   : > { %2010 = shalt.err (!%p2007_p6)
}
  0x39   : > { %1826 = dma.hbm_to_vmem [thread:$0]  (!%p2132_p7), %s2354_s2, 16, %s178_s11, [#allocation5]  }
  0x3a   : > { %p2362_p3 = scmp.ne.s32.totalorder %s2359_s20, 0 }
  0x3b   : > { %p2363_p5 = scmp.ne.s32.totalorder (!%p2362_p3), %s2360_s21, 0 }
  0x3c   : > { %190 = sbr.rel (%p2362_p3) target bundleno = 455 (0x1c7), region = 32 }
  0x43   : > { %2032 = dma.done.wait (%p2363_p5), [#allocation3], 9216  }
  0x44   : > { %2034 = vsyncadd (%p2363_p5), [#allocation3], 4294958080 }
  0x45   : > { %2036 = dma.done.wait (%p2363_p5), [#allocation5], 16  }
  0x46   : > { %2038 = vsyncadd (%p2363_p5), [#allocation5], 4294967280  ;;  %v2063_v0 = vmov 0.0   ;;  %vm2064_vm0 = vmmov 0   ;;  %v1877_v1 = vld [vmem:[#allocation2 + $0x40] sm:$0xff]   ;;  %v1879_v3 = vld [vmem:[#allocation2 + $0x48] sm:$0xff]  }
  0x47   : > { %1632 = vmatprep.subr.bf16.mxu0 %v2063_v0  ;;  %1652 = vmatprep.subr.bf16.mxu1 %v2063_v0  ;;  %v1878_v2 = vld [vmem:[#allocation2] sm:$0xff]   ;;  %v1880_v4 = vld [vmem:[#allocation2 + $0x8] sm:$0xff]   ;;  %s231_s20 = smul.u32 18, %s2045_s13  ;;  %v1881_v5 = vld [vmem:[#allocation2 + $0x50] sm:$0xff]   ;;  %vm280_vm1 = vsmask.f32 7424 }
  0x48   : > { %1648 = vmatprep.mubr.msk.bf16.mxu0 %vm2064_vm0, %v2063_v0  ;;  %1668 = vmatprep.mubr.msk.bf16.mxu1 %vm2064_vm0, %v2063_v0  ;;  %v1882_v6 = vld [vmem:[#allocation2 + $0x10] sm:$0xff]   ;;  %v1883_v7 = vld [vmem:[#allocation2 + $0x58] sm:$0xff]   ;;  %v1885_v9 = vld [vmem:[#allocation2 + $0x60] sm:$0xff]   ;;  %vm490_vm2 = vcmask 1046528   ;;  %s1449_s9 = sshll.u32 %s2045_s13, 4 }
  0x49   : > { %1633 = vmatpush3.bf16.msra.mxu0 %v1877_v1  ;;  %1653 = vmatpush3.bf16.msra.mxu1 %v1878_v2  ;;  %s232_s21 = sadd.s32 %s2041_s12, %s231_s20  ;;  %v1884_v8 = vld [vmem:[#allocation2 + $0x18] sm:$0xff]   ;;  %v1886_v10 = vld [vmem:[#allocation2 + $0x20] sm:$0xff]   ;;  %v1887_v13 = vld [vmem:[#allocation2 + $0x68] sm:$0xff]   ;;  %s219_s10 = sadd.s32 %s2041_s12, %s1449_s9 }
  0x4a   : > { %1634 = vmatprep.subr.bf16.mxu0 %v2063_v0  ;;  %1654 = vmatprep.subr.bf16.mxu1 %v2063_v0  ;;  %s1543_s24 = smul.u32 12, %s232_s21  ;;  %v1888_v14 = vld [vmem:[#allocation2 + $0x28] sm:$0xff]   ;;  %v1889_v16 = vld [vmem:[#allocation2 + $0x70] sm:$0xff]   ;;  %v1891_v21 = vld [vmem:[#allocation2 + $0x78] sm:$0xff]   ;;  %p220_p7 = scmp.lt.s32.totalorder %s219_s10, 31 }
  0x4b   : > { %v1890_v20 = vld [vmem:[#allocation2 + $0x30] sm:$0xff]   ;;  %v1892_v24 = vld [vmem:[#allocation2 + $0x38] sm:$0xff]   ;;  %v1895_v26 = vld [vmem:[#allocation2 + $0x80] sm:$0xff]  }
  0x4c   : > { %s2205_s8 = scalar_lea.vmem %s2352_s0, %s1543_s24  ;;  %v1896_v27 = vld [vmem:[#allocation2 + $0xc0] sm:$0xff]   ;;  %v1897_v28 = vld [vmem:[#allocation2 + $0x88] sm:$0xff]   ;;  %v1899_v30 = vld [vmem:[#allocation2 + $0x90] sm:$0xff]   ;;  %s2375_s10 = smov (!%p220_p7, %s219_s10), 31 }
  0x4d   : > { %1635 = vmatpush3.bf16.msra.mxu0 %v1879_v3  ;;  %1655 = vmatpush3.bf16.msra.mxu1 %v1880_v4  ;;  %v2210_v11 = vld [vmem:[%s2205_s8] sm:$0xff]   ;;  %v2213_v12 = vld [vmem:[%s2205_s8 + $0x8] ss:$0 sps:$4 sm:$0x11]   ;;  %v1900_v31 = vld [vmem:[#allocation2 + $0xd0] sm:$0xff]   ;;  %s1542_s11 = sshll.u32 %s2375_s10, 3 }
  0x4e   : > { %1636 = vmatprep.subr.bf16.mxu0 %v2063_v0  ;;  %1656 = vmatprep.subr.bf16.mxu1 %v2063_v0  ;;  %v284_v15 = vshll.u32 %v2210_v11, 16  ;;  %v282_v17 = vshrl.u32 %v2210_v11, 16  ;;  %v289_v19 = vshll.u32 %v2213_v12, 16  ;;  %v1898_v29 = vld [vmem:[#allocation2 + $0xc8] sm:$0xff]   ;;  %v1901_v32 = vld [vmem:[#allocation2 + $0x98] sm:$0xff]   ;;  %v1903_v36 = vld [vmem:[#allocation2 + $0xa0] sm:$0xff]   ;;  %s227_s25 = scalar_lea.vmem %s2355_s3, %s1542_s11 }
  0x4f   : > { %v1902_v33 = vld [vmem:[#allocation2 + $0xd8] sm:$0xff]   ;;  %v2238_v34 = vld [vmem:[%s2205_s8 + $0xc] sm:$0xff]   ;;  %v1904_v37 = vld [vmem:[#allocation2 + $0xe0] sm:$0xff]   ;;  %v491_v48 = vrot.slane %v2210_v11, 1  ;;  %v492_v51 = vrot.slane %v2213_v12, 1 }
  0x50   : > { %v286_v18 = vrot.slane %v284_v15, 1  ;;  %v291_v23 = vrot.slane %v289_v19, 1  ;;  %v730_v35 = vshll.u32 %v2238_v34, 16  ;;  %v728_v38 = vshrl.u32 %v2238_v34, 16  ;;  %v1905_v40 = vld [vmem:[#allocation2 + $0xa8] sm:$0xff]   ;;  %v1907_v45 = vld [vmem:[#allocation2 + $0xb0] sm:$0xff]  }
  0x51   : > { %1637 = vmatpush3.bf16.msra.mxu0 %v1881_v5  ;;  %1657 = vmatpush3.bf16.msra.mxu1 %v1882_v6  ;;  %v1906_v41 = vld [vmem:[#allocation2 + $0xe8] sm:$0xff]   ;;  %v2247_v42 = vld [vmem:[%s2205_s8 + $0x14] ss:$0 sps:$4 sm:$0x11]   ;;  %v1909_v50 = vld [vmem:[#allocation2 + $0xb8] sm:$0xff]   ;;  %v493_v53 = vsel %vm490_vm2, %v491_v48, %v492_v51  ;;  %v848_v19 = vrot.slane %v2238_v34, 1 }
  0x52   : > { %1638 = vmatprep.subr.bf16.mxu0 %v2063_v0  ;;  %1658 = vmatprep.subr.bf16.mxu1 %v2063_v0  ;;  %v287_v22 = vor.u32 %v286_v18, %v282_v17  ;;  %v732_v39 = vrot.slane %v730_v35, 1  ;;  %v735_v44 = vshll.u32 %v2247_v42, 16  ;;  %v1908_v46 = vld [vmem:[#allocation2 + $0xf0] sm:$0xff]   ;;  %v1910_v52 = vld [vmem:[#allocation2 + $0xf8] sm:$0xff]   ;;  %v1911_v54 = vld [vmem:[#allocation2 + $0x100] sm:$0xff]  }
  0x53   : > { %v1913_v55 = vld [vmem:[#allocation2 + $0x140] sm:$0xff]   ;;  %v1914_v56 = vld [vmem:[#allocation2 + $0x108] sm:$0xff]   ;;  %v1916_v58 = vld [vmem:[#allocation2 + $0x110] sm:$0xff]  }
  0x54   : > { %v292_v25 = vsel %vm280_vm1, %v287_v22, %v291_v23  ;;  %v733_v43 = vor.u32 %v732_v39, %v728_v38  ;;  %v737_v47 = vrot.slane %v735_v44, 1  ;;  %v1915_v57 = vld [vmem:[#allocation2 + $0x148] sm:$0xff]   ;;  %v2271_v59 = vld [vmem:[%s2205_s8 + $0x18] sm:$0xff]   ;;  %v1917_v60 = vld [vmem:[#allocation2 + $0x150] sm:$0xff]  }
  0x55   : > { %1639 = vmatpush3.bf16.msra.mxu0 %v1883_v7  ;;  %1659 = vmatpush3.bf16.msra.mxu1 %v1884_v8  ;;  %v1947_v61 = vld [vmem:[%s2205_s8 + $0x20] ss:$0 sps:$4 sm:$0x11]   ;;  %v1085_v62 = vshrl.u32 %v2271_v59, 16  ;;  %v1087_v63 = vshll.u32 %v2271_v59, 16  ;;  %v1918_v3 = vld [vmem:[#allocation2 + $0x118] sm:$0xff]  }
  0x56   : > { %1640 = vmatprep.subr.bf16.mxu0 %v2063_v0  ;;  %1660 = vmatprep.subr.bf16.mxu1 %v2063_v0  ;;  %v2255_v49 = vsel %vm280_vm1, %v733_v43, %v737_v47  ;;  %v1092_v1 = vshll.u32 %v1947_v61, 16  ;;  %v1919_v5 = vld [vmem:[#allocation2 + $0x158] sm:$0xff]   ;;  %v1205_v7 = vrot.slane %v2271_v59, 1  ;;  %v1206_v8 = vrot.slane %v1947_v61, 1  ;;  %v1921_v12 = vld [vmem:[#allocation2 + $0x160] sm:$0xff]   ;;  %v1924_v15 = vld [vmem:[#allocation2 + $0x130] sm:$0xff]  }
  0x57   : > { %v1089_v2 = vrot.slane %v1087_v63, 1  ;;  %v1926_v17 = vld [vmem:[#allocation2 + $0x138] sm:$0xff]   ;;  %v1930_v23 = vld [vmem:[#allocation2 + $0x1c0] sm:$0xff]   ;;  %v1942_v35 = vld [vmem:[#allocation2 + $0x1f0] sm:$0xff]  }
  0x58   : > { %v1094_v4 = vrot.slane %v1092_v1, 1  ;;  %v1927_v18 = vld [vmem:[#allocation2 + $0x178] sm:$0xff]   ;;  %v1946_v38 = vld [vmem:[#allocation2 + $0x200] sm:$0xff]   ;;  %v1948_v39 = vld [vmem:[#allocation2 + $0x208] sm:$0xff]  }
  0x59   : > { %1641 = vmatpush3.bf16.msra.mxu0 %v1885_v9  ;;  %1661 = vmatpush3.bf16.msra.mxu1 %v1886_v10  ;;  %v1090_v6 = vor.u32 %v1089_v2, %v1085_v62  ;;  %v1920_v10 = vld [vmem:[#allocation2 + $0x120] sm:$0xff]   ;;  %v1952_v43 = vld [vmem:[#allocation2 + $0x228] sm:$0xff]   ;;  %v1953_v44 = vld [vmem:[#allocation2 + $0x230] sm:$0xff]  }
  0x5a   : > { %1642 = vmatprep.subr.bf16.mxu0 %v2063_v0  ;;  %1662 = vmatprep.subr.bf16.mxu1 %v2063_v0 }
  0x5b   : > { %v2282_v9 = vsel %vm280_vm1, %v1090_v6, %v1094_v4 }
  0x5d   : > { %1643 = vmatpush3.bf16.msra.mxu0 %v1887_v13  ;;  %1663 = vmatpush3.bf16.msra.mxu1 %v1888_v14  ;;  %v1922_v13 = vld [vmem:[#allocation2 + $0x128] sm:$0xff]  }
  0x5e   : > { %1644 = vmatprep.subr.bf16.mxu0 %v2063_v0  ;;  %1664 = vmatprep.subr.bf16.mxu1 %v2063_v0  ;;  %v1923_v14 = vld [vmem:[#allocation2 + $0x168] sm:$0xff]  }
  0x61   : > { %1645 = vmatpush3.bf16.msra.mxu0 %v1889_v16  ;;  %1665 = vmatpush3.bf16.msra.mxu1 %v1890_v20  ;;  %v1925_v16 = vld [vmem:[#allocation2 + $0x170] sm:$0xff]   ;;  %v849_v20 = vrot.slane %v2247_v42, 1  ;;  %v1951_v42 = vld [vmem:[#allocation2 + $0x220] sm:$0xff]  }
  0x62   : > { %1646 = vmatprep.subr.bf16.mxu0 %v2063_v0  ;;  %1666 = vmatprep.subr.bf16.mxu1 %v2063_v0 }
  0x63   : > { %v850_v22 = vsel %vm490_vm2, %v848_v19, %v849_v20 }
  0x65   : > { %1647 = vmatpush3.bf16.msra.mxu0 %v1891_v21  ;;  %1667 = vmatpush3.bf16.msra.mxu1 %v1892_v24  ;;  %v1929_v21 = vld [vmem:[#allocation2 + $0x180] sm:$0xff]   ;;  %v1931_v24 = vld [vmem:[#allocation2 + $0x188] sm:$0xff]  }
  0x66   : > { %1672 = vmatprep.subr.bf16.mxu0 %v2063_v0  ;;  %1692 = vmatprep.subr.bf16.mxu1 %v2063_v0 }
  0x68   : > { %1649 = vmatmul.mubr.bf16.vlgmr.msra.gmra.mrb[0].mxu0 %v292_v25  ;;  %1669 = vmatmul.mubr.bf16.vlgmr.msra.gmra.mrb[0].mxu1 %v2210_v11  ;;  %v2285_v11 = vsel %vm490_vm2, %v1205_v7, %v1206_v8  ;;  %v1932_v25 = vld [vmem:[#allocation2 + $0x1c8] sm:$0xff]  }
  0x69   : > { %1673 = vmatpush3.bf16.msra.mxu0 %v1895_v26  ;;  %1693 = vmatpush3.bf16.msra.mxu1 %v1896_v27  ;;  %v1933_v26 = vld [vmem:[#allocation2 + $0x190] sm:$0xff]  }
  0x6a   : > { %1674 = vmatprep.subr.bf16.mxu0 %v2063_v0  ;;  %1694 = vmatprep.subr.bf16.mxu1 %v2063_v0  ;;  %v1934_v27 = vld [vmem:[#allocation2 + $0x1d0] sm:$0xff]  }
  0x6b   : > { %1688 = vmatprep.mubr.msk.bf16.mxu0 %vm2064_vm0, %v2063_v0  ;;  %1708 = vmatprep.mubr.msk.bf16.mxu1 %vm2064_vm0, %v2063_v0 }
  0x6d   : > { %1675 = vmatpush3.bf16.msra.mxu0 %v1897_v28  ;;  %1695 = vmatpush3.bf16.msra.mxu1 %v1898_v29  ;;  %v1935_v28 = vld [vmem:[#allocation2 + $0x198] sm:$0xff]  }
  0x6e   : > { %1676 = vmatprep.subr.bf16.mxu0 %v2063_v0  ;;  %1696 = vmatprep.subr.bf16.mxu1 %v2063_v0  ;;  %v1936_v29 = vld [vmem:[#allocation2 + $0x1d8] sm:$0xff]  }
  0x71   : > { %1677 = vmatpush3.bf16.msra.mxu0 %v1899_v30  ;;  %1697 = vmatpush3.bf16.msra.mxu1 %v1900_v31  ;;  %v1937_v30 = vld [vmem:[#allocation2 + $0x1a0] sm:$0xff]  }
  0x72   : > { %1678 = vmatprep.subr.bf16.mxu0 %v2063_v0  ;;  %1698 = vmatprep.subr.bf16.mxu1 %v2063_v0  ;;  %v1938_v31 = vld [vmem:[#allocation2 + $0x1e0] sm:$0xff]  }
  0x75   : > { %1679 = vmatpush3.bf16.msra.mxu0 %v1901_v32  ;;  %1699 = vmatpush3.bf16.msra.mxu1 %v1902_v33  ;;  %v1939_v32 = vld [vmem:[#allocation2 + $0x1a8] sm:$0xff]  }
  0x76   : > { %1680 = vmatprep.subr.bf16.mxu0 %v2063_v0  ;;  %1700 = vmatprep.subr.bf16.mxu1 %v2063_v0  ;;  %v1940_v33 = vld [vmem:[#allocation2 + $0x1e8] sm:$0xff]  }
  0x79   : > { %1681 = vmatpush3.bf16.msra.mxu0 %v1903_v36  ;;  %1701 = vmatpush3.bf16.msra.mxu1 %v1904_v37  ;;  %v1943_v36 = vld [vmem:[#allocation2 + $0x1b8] sm:$0xff]  }
  0x7a   : > { %1682 = vmatprep.subr.bf16.mxu0 %v2063_v0  ;;  %1702 = vmatprep.subr.bf16.mxu1 %v2063_v0  ;;  %v1944_v37 = vld [vmem:[#allocation2 + $0x1f8] sm:$0xff]  }
  0x7d   : > { %1683 = vmatpush3.bf16.msra.mxu0 %v1905_v40  ;;  %1703 = vmatpush3.bf16.msra.mxu1 %v1906_v41  ;;  %v1949_v40 = vld [vmem:[#allocation2 + $0x210] sm:$0xff]   ;;  %v1950_v41 = vld [vmem:[#allocation2 + $0x218] sm:$0xff]  }
  0x7e   : > { %1684 = vmatprep.subr.bf16.mxu0 %v2063_v0  ;;  %1704 = vmatprep.subr.bf16.mxu1 %v2063_v0 }
  0x81   : > { %1685 = vmatpush3.bf16.msra.mxu0 %v1907_v45  ;;  %1705 = vmatpush3.bf16.msra.mxu1 %v1908_v46  ;;  %v1954_v45 = vld [vmem:[#allocation2 + $0x238] sm:$0xff]  }
  0x82   : > { %1686 = vmatprep.subr.bf16.mxu0 %v2063_v0  ;;  %1706 = vmatprep.subr.bf16.mxu1 %v2063_v0 }
  0x85   : > { %1687 = vmatpush3.bf16.msra.mxu0 %v1909_v50  ;;  %1707 = vmatpush3.bf16.msra.mxu1 %v1910_v52 }
  0x86   : > { %1712 = vmatprep.subr.bf16.mxu0 %v2063_v0  ;;  %1732 = vmatprep.subr.bf16.mxu1 %v2063_v0 }
  0x88   : > { %1689 = vmatmul.mubr.bf16.vlgmr.msra.gmra.mrb[4].mxu0 %v493_v53  ;;  %1709 = vmatmul.mubr.bf16.vlgmr.msra.gmra.mrb[4].mxu1 %v2238_v34  ;;  %v1941_v34 = vld [vmem:[#allocation2 + $0x1b0] sm:$0xff]  }
  0x89   : > { %1713 = vmatpush3.bf16.msra.mxu0 %v1911_v54  ;;  %1733 = vmatpush3.bf16.msra.mxu1 %v1913_v55 }
  0x8a   : > { %1714 = vmatprep.subr.bf16.mxu0 %v2063_v0  ;;  %1734 = vmatprep.subr.bf16.mxu1 %v2063_v0 }
  0x8b   : > { %1728 = vmatprep.mubr.msk.bf16.mxu0 %vm2064_vm0, %v2063_v0  ;;  %1748 = vmatprep.mubr.msk.bf16.mxu1 %vm2064_vm0, %v2063_v0 }
  0x8d   : > { %1715 = vmatpush3.bf16.msra.mxu0 %v1914_v56  ;;  %1735 = vmatpush3.bf16.msra.mxu1 %v1915_v57 }
  0x8e   : > { %1716 = vmatprep.subr.bf16.mxu0 %v2063_v0  ;;  %1736 = vmatprep.subr.bf16.mxu1 %v2063_v0 }
  0x91   : > { %1717 = vmatpush3.bf16.msra.mxu0 %v1916_v58  ;;  %1737 = vmatpush3.bf16.msra.mxu1 %v1917_v60 }
  0x92   : > { %1718 = vmatprep.subr.bf16.mxu0 %v2063_v0  ;;  %1738 = vmatprep.subr.bf16.mxu1 %v2063_v0 }
  0x95   : > { %1719 = vmatpush3.bf16.msra.mxu0 %v1918_v3  ;;  %1739 = vmatpush3.bf16.msra.mxu1 %v1919_v5 }
  0x96   : > { %1720 = vmatprep.subr.bf16.mxu0 %v2063_v0  ;;  %1740 = vmatprep.subr.bf16.mxu1 %v2063_v0 }
  0x99   : > { %1721 = vmatpush3.bf16.msra.mxu0 %v1920_v10  ;;  %1741 = vmatpush3.bf16.msra.mxu1 %v1921_v12 }
  0x9a   : > { %1722 = vmatprep.subr.bf16.mxu0 %v2063_v0  ;;  %1742 = vmatprep.subr.bf16.mxu1 %v2063_v0 }
  0x9d   : > { %1723 = vmatpush3.bf16.msra.mxu0 %v1922_v13  ;;  %1743 = vmatpush3.bf16.msra.mxu1 %v1923_v14 }
  0x9e   : > { %1724 = vmatprep.subr.bf16.mxu0 %v2063_v0  ;;  %1744 = vmatprep.subr.bf16.mxu1 %v2063_v0 }
  0xa1   : > { %1725 = vmatpush3.bf16.msra.mxu0 %v1924_v15  ;;  %1745 = vmatpush3.bf16.msra.mxu1 %v1925_v16 }
  0xa2   : > { %1726 = vmatprep.subr.bf16.mxu0 %v2063_v0  ;;  %1746 = vmatprep.subr.bf16.mxu1 %v2063_v0 }
  0xa5   : > { %1727 = vmatpush3.bf16.msra.mxu0 %v1926_v17  ;;  %1747 = vmatpush3.bf16.msra.mxu1 %v1927_v18 }
  0xa6   : > { %1752 = vmatprep.subr.bf16.mxu0 %v2063_v0  ;;  %1772 = vmatprep.subr.bf16.mxu1 %v2063_v0 }
  0xa8   : > { %1729 = vmatmul.mubr.bf16.vlgmr.msra.gmra.mrb[8].mxu0 %v2255_v49  ;;  %1749 = vmatmul.mubr.bf16.vlgmr.msra.gmra.mrb[8].mxu1 %v850_v22 }
  0xa9   : > { %1753 = vmatpush3.bf16.msra.mxu0 %v1929_v21  ;;  %1773 = vmatpush3.bf16.msra.mxu1 %v1930_v23 }
  0xaa   : > { %1754 = vmatprep.subr.bf16.mxu0 %v2063_v0  ;;  %1774 = vmatprep.subr.bf16.mxu1 %v2063_v0 }
  0xab   : > { %1768 = vmatprep.mubr.msk.bf16.mxu0 %vm2064_vm0, %v2063_v0  ;;  %1788 = vmatprep.mubr.msk.bf16.mxu1 %vm2064_vm0, %v2063_v0 }
  0xad   : > { %1755 = vmatpush3.bf16.msra.mxu0 %v1931_v24  ;;  %1775 = vmatpush3.bf16.msra.mxu1 %v1932_v25 }
  0xae   : > { %1756 = vmatprep.subr.bf16.mxu0 %v2063_v0  ;;  %1776 = vmatprep.subr.bf16.mxu1 %v2063_v0 }
  0xb1   : > { %1757 = vmatpush3.bf16.msra.mxu0 %v1933_v26  ;;  %1777 = vmatpush3.bf16.msra.mxu1 %v1934_v27 }
  0xb2   : > { %1758 = vmatprep.subr.bf16.mxu0 %v2063_v0  ;;  %1778 = vmatprep.subr.bf16.mxu1 %v2063_v0 }
  0xb5   : > { %1759 = vmatpush3.bf16.msra.mxu0 %v1935_v28  ;;  %1779 = vmatpush3.bf16.msra.mxu1 %v1936_v29  ;;  %v1537_v29 = vld [vmem:[#allocation4] ss:$0 sm:$0xff] }
  0xb6   : > { %1760 = vmatprep.subr.bf16.mxu0 %v2063_v0  ;;  %1780 = vmatprep.subr.bf16.mxu1 %v2063_v0 }
  0xb9   : > { %1761 = vmatpush3.bf16.msra.mxu0 %v1937_v30  ;;  %1781 = vmatpush3.bf16.msra.mxu1 %v1938_v31 }
  0xba   : > { %1762 = vmatprep.subr.bf16.mxu0 %v2063_v0  ;;  %1782 = vmatprep.subr.bf16.mxu1 %v2063_v0 }
  0xbd   : > { %1763 = vmatpush3.bf16.msra.mxu0 %v1939_v32  ;;  %1783 = vmatpush3.bf16.msra.mxu1 %v1940_v33 }
  0xbe   : > { %1764 = vmatprep.subr.bf16.mxu0 %v2063_v0  ;;  %1784 = vmatprep.subr.bf16.mxu1 %v2063_v0 }
  0xc1   : > { %1765 = vmatpush3.bf16.msra.mxu0 %v1941_v34  ;;  %1785 = vmatpush3.bf16.msra.mxu1 %v1942_v35 }
  0xc2   : > { %1766 = vmatprep.subr.bf16.mxu0 %v2063_v0  ;;  %1786 = vmatprep.subr.bf16.mxu1 %v2063_v0 }
  0xc5   : > { %1767 = vmatpush3.bf16.msra.mxu0 %v1943_v36  ;;  %1787 = vmatpush3.bf16.msra.mxu1 %v1944_v37 }
  0xc6   : > { %1792 = vmatprep.subr.bf16.mxu0 %v2063_v0 }
  0xc8   : > { %1769 = vmatmul.mubr.bf16.vlgmr.msra.gmra.mrb[12].mxu0 %v2271_v59  ;;  %1789 = vmatmul.mubr.bf16.vlgmr.msra.gmra.mrb[12].mxu1 %v2282_v9 }
  0xc9   : > { %1793 = vmatpush3.bf16.msra.mxu0 %v1946_v38  ;;  %1808 = vmatprep.mubr.msk.bf16.mxu0 %vm2064_vm0, %v2063_v0 }
  0xca   : > { %1794 = vmatprep.subr.bf16.mxu0 %v2063_v0 }
  0xcd   : > { %1795 = vmatpush3.bf16.msra.mxu0 %v1948_v39 }
  0xce   : > { %1796 = vmatprep.subr.bf16.mxu0 %v2063_v0 }
  0xd1   : > { %1797 = vmatpush3.bf16.msra.mxu0 %v1949_v40 }
  0xd2   : > { %1798 = vmatprep.subr.bf16.mxu0 %v2063_v0 }
  0xd5   : > { %1799 = vmatpush3.bf16.msra.mxu0 %v1950_v41 }
  0xd6   : > { %1800 = vmatprep.subr.bf16.mxu0 %v2063_v0 }
  0xd9   : > { %1801 = vmatpush3.bf16.msra.mxu0 %v1951_v42 }
  0xda   : > { %1802 = vmatprep.subr.bf16.mxu0 %v2063_v0 }
  0xdd   : > { %1803 = vmatpush3.bf16.msra.mxu0 %v1952_v43 }
  0xde   : > { %1804 = vmatprep.subr.bf16.mxu0 %v2063_v0 }
  0xe1   : > { %1805 = vmatpush3.bf16.msra.mxu0 %v1953_v44 }
  0xe2   : > { %1806 = vmatprep.subr.bf16.mxu0 %v2063_v0 }
  0xe5   : > { %1807 = vmatpush3.bf16.msra.mxu0 %v1954_v45 }
  0xe8   : > { %1809 = vmatmul.mubr.bf16.vlgmr.msra.gmra.mrb[16].mxu0 %v2285_v11 }
 0x13b   : > { %v376_v46 = vpop.f32.mrb[0].mxu0  ;;  %v466_v47 = vpop.f32.mrb[0].mxu1 }
 0x13c   : > { %v1650_v48 = vpop.f32.mrb[1].mxu0  ;;  %v467_v49 = vadd.f32 %v466_v47, %v376_v46  ;;  %v1670_v50 = vpop.f32.mrb[1].mxu1 }
 0x13d   : > { %v379_v51 = vpop.f32.mrb[2].mxu0  ;;  %v469_v52 = vpop.f32.mrb[2].mxu1 }
 0x13e   : > { %v1651_v53 = vpop.f32.mrb[3].mxu0  ;;  %v470_v54 = vadd.f32 %v469_v52, %v379_v51  ;;  %v1671_v55 = vpop.f32.mrb[3].mxu1 }
 0x15b   : > { %v577_v56 = vpop.f32.mrb[4].mxu0  ;;  %v698_v59 = vpop.f32.mrb[4].mxu1 }
 0x15c   : > { %v584_v57 = vadd.f32 %v577_v56, %v467_v49  ;;  %v1690_v58 = vpop.f32.mrb[5].mxu0  ;;  %v1710_v61 = vpop.f32.mrb[5].mxu1 }
 0x15d   : > { %v580_v60 = vpop.f32.mrb[6].mxu0  ;;  %v701_v1 = vpop.f32.mrb[6].mxu1 }
 0x15e   : > { %v585_v0 = vadd.f32 %v580_v60, %v470_v54  ;;  %v705_v62 = vadd.f32 %v698_v59, %v584_v57  ;;  %v1691_v63 = vpop.f32.mrb[7].mxu0  ;;  %v1711_v2 = vpop.f32.mrb[7].mxu1 }
 0x160   : > { %v706_v3 = vadd.f32 %v701_v1, %v585_v0 }
 0x17b   : > { %v822_v4 = vpop.f32.mrb[8].mxu0  ;;  %v934_v7 = vpop.f32.mrb[8].mxu1 }
 0x17c   : > { %v829_v5 = vadd.f32 %v822_v4, %v705_v62  ;;  %v1730_v6 = vpop.f32.mrb[9].mxu0  ;;  %v1750_v9 = vpop.f32.mrb[9].mxu1 }
 0x17d   : > { %v825_v8 = vpop.f32.mrb[10].mxu0  ;;  %v937_v13 = vpop.f32.mrb[10].mxu1 }
 0x17e   : > { %v830_v10 = vadd.f32 %v825_v8, %v706_v3  ;;  %v941_v11 = vadd.f32 %v934_v7, %v829_v5  ;;  %v1731_v12 = vpop.f32.mrb[11].mxu0  ;;  %v1751_v14 = vpop.f32.mrb[11].mxu1 }
 0x180   : > { %v942_v15 = vadd.f32 %v937_v13, %v830_v10 }
 0x19b   : > { %v1055_v16 = vpop.f32.mrb[12].mxu0  ;;  %v1179_v19 = vpop.f32.mrb[12].mxu1 }
 0x19c   : > { %v1062_v17 = vadd.f32 %v1055_v16, %v941_v11  ;;  %v1770_v18 = vpop.f32.mrb[13].mxu0  ;;  %v1790_v21 = vpop.f32.mrb[13].mxu1 }
 0x19d   : > { %v1058_v20 = vpop.f32.mrb[14].mxu0  ;;  %v1182_v25 = vpop.f32.mrb[14].mxu1 }
 0x19e   : > { %v1063_v22 = vadd.f32 %v1058_v20, %v942_v15  ;;  %v1186_v23 = vadd.f32 %v1179_v19, %v1062_v17  ;;  %v1771_v24 = vpop.f32.mrb[15].mxu0  ;;  %v1791_v26 = vpop.f32.mrb[15].mxu1 }
 0x1a0   : > { %v1187_v27 = vadd.f32 %v1182_v25, %v1063_v22 }
 0x1bb   : > { %v1291_v28 = vpop.f32.mrb[16].mxu0 }
 0x1bc   : > { %v1298_v30 = vadd.f32 %v1291_v28, %v1186_v23  ;;  %v1810_v31 = vpop.f32.mrb[17].mxu0 }
 0x1bd   : > { %v1294_v32 = vpop.f32.mrb[18].mxu0 }
 0x1be   : > { %v1307_v33 = vadd.f32 %v1537_v29, %v1298_v30  ;;  %v1299_v34 = vadd.f32 %v1294_v32, %v1187_v27  ;;  %v1811_v35 = vpop.f32.mrb[19].mxu0 }
 0x1c0   : > { %v1308_v36 = vadd.f32 %v1537_v29, %v1299_v34  ;;  %v1309_v37 = vmax.f32 %v1307_v33, 0.0 }
 0x1c2   : > { %v1310_v38 = vmax.f32 %v1308_v36, 0.0 }
 0x1c4   : > { %v1549_v39 = vpack.c.bf16 %v1310_v38, %v1309_v37 }
 0x1c6   : > { %1550 = vst [vmem:[%s227_s25] sm:$0xff] %v1549_v39  }
 0x1c7 PF: > { %s15_s16 = sadd.s32 1, %s2057_s16   ;;  %s2364_s12 = smov %s2049_s14 }
 0x1c8   : > { %p12_p9 = scmp.ge.s32.totalorder %s15_s16, 34   ;;  %s2365_s13 = smov %s2053_s15 }
 0x1c9   : > { %s2366_s14 = smov %s2369_s18  ;;  %s2367_s15 = smov %s2373_s19 }
 0x1ca   :  { %14 = sbr.rel (!%p12_p9) target bundleno = 4 (0x4), region = 81 }
 0x1d1   :  { %1354 = vsyncpa [#allocation3], 1 }
 0x1d2   :  { %1356 = vsyncpa [#allocation3 + $0x1], 1 }
 0x1d3   :  { %1357 = vsyncpa [#allocation5], 1 }

// kernel: encoder_forward.7
= control target key start
LH: loop header
LB: loop body
LE: loop exit
PB: predicated region body
PF: predicated region fallthrough
CT: control target
= control target key end

     0   :  { %9 = vsyncpa [#allocation3], 0  ;;  %s2298_s0 = inlined_call_operand.vmem [shape: bf16[36,9,128], index: 0, kind: input, shape index: {}]   ;;  %s2299_s1 = inlined_call_operand.vmem [shape: bf16[36,9,128], index: 1, kind: input, shape index: {}]   ;;  %s2300_s2 = inlined_call_operand.hbm [shape: bf16[9,128,128], index: 2, kind: input, shape index: {}]   ;;  %s2301_s3 = inlined_call_operand.hbm [shape: f32[1,128], index: 3, kind: input, shape index: {}]   ;;  %s2302_s4 = inlined_call_operand.vmem [shape: bf16[16,8,128], index: 4, kind: output, shape index: {}]  }
   0x1   :  { %10 = vsyncpa [#allocation5], 0  ;;  %s2064_s15 = smov 0   ;;  %s2066_s16 = smov 0  }
   0x2   :  { %s2068_s17 = smov 0   ;;  %s2070_s18 = smov 0  }
   0x3   :  { %s2072_s19 = smov 0  }
   0x4 LB: > { %s1418_s20 = sadd.s32 4294967295, %s2031_s19   ;;  %s28_s21 = sadd.s32 1, %s2023_s17  ;;  %s2031_s19 = sphi %s2072_s19, %s16_s19   ;;  %s2027_s18 = sphi %s2070_s18, %s2314_s18   ;;  %s2023_s17 = sphi %s2068_s17, %s2313_s17   ;;  %s2019_s16 = sphi %s2066_s16, %s2312_s16   ;;  %s2015_s15 = sphi %s2064_s15, %s2311_s15  }
   0x5   : > { %p29_p0 = scmp.ge.s32.totalorder %s28_s21, 8  ;;  %s31_s22 = sadd.s32 1, %s2027_s18 }
   0x6   : > { %p1422_p1 = scmp.ge.s32.totalorder %s2031_s19, 1  ;;  %p166_p2 = scmp.lt.s32.totalorder %s2031_s19, 17 }
   0x7   : > { %s2316_s21 = smov (%p29_p0, %s28_s21), 0  ;;  %s2318_s22 = smov (!%p29_p0, %s31_s22), %s2027_s18 }
   0x8   : > { %p2097_p3 = pnand %p1422_p1, %p166_p2  ;;  %p33_p4 = scmp.ge.s32.totalorder %s2318_s22, 2 }
   0x9   : > { %p2101_p5 = scmp.eq.s32.totalorder %s1418_s20, 0  ;;  %s2033_s25 = smov [#allocation2]  }
   0xa   : > { %s2306_s23 = scalar_select %p2097_p3, 1, 0 }
   0xb   : > { %s2307_s24 = scalar_select %p2101_p5, 1, 0 }
   0xc   : > { %p1797_p6 = pneg %p2097_p3  ;;  %s2320_s22 = smov (%p33_p4, %s2318_s22), 0 }
   0xd   : > { %s186_s26 = sshll.u32 %s2033_s25, 4  ;;  %s1929_s30 = scalar_lea.hbm %s2300_s2, 9216  ;;  %s187_s26 = int_to_ptr.vmem [resolvable:$true] %s186_s26 }
   0xe   : > { %p2111_p7 = pnand %p2101_p5, %p1797_p6  ;;  %p1930_p8 = scmp.ne.s32.totalorder %s2300_s2, %s1929_s30 }
   0xf   : > { %p1936_p12 = scmp.lt.u32.totalorder %s1929_s30, %s2300_s2 }
  0x10   : > { %p1931_p9 = pneg %p2111_p7 }
  0x12   : > { %p1932_p10 = pnand %p1931_p9, %p1930_p8 }
  0x14   : > { %p1933_p11 = pneg %p1932_p10 }
  0x16   : > { %p1938_p13 = pnand %p1936_p12, %p1933_p11 }
  0x18   : > { %1941 = shalt.err (!%p1938_p13)
}
  0x19   : > { %s1942_s9 = scalar_lea.vmem %s187_s26, 9216  ;;  %p1950_p4 = scmp.lt.s32.totalorder %s187_s26, %s187_s26 }
  0x1a   : > { %p1943_p0 = scmp.ne.s32.totalorder %s187_s26, %s1942_s9  ;;  %p1951_p6 = scmp.lt.s32.totalorder %s1942_s9, %s1942_s9 }
  0x1c   : > { %p1945_p1 = pnand %p1943_p0, %p1931_p9  ;;  %p1952_p5 = por %p1951_p6, %p1950_p4 }
  0x1e   : > { %p1946_p2 = pneg %p1945_p1 }
  0x20   : > { %p1953_p3 = pnand %p1952_p5, %p1946_p2 }
  0x22   : > { %1956 = shalt.err (!%p1953_p3)
}
  0x23   : > { %s2034_s10 = smov 64   ;;  %s2035_s11 = smov 4  }
  0x24   : > { %1800 = dma.hbm_to_vmem [thread:$0]  (!%p2111_p7), %s2300_s2, 9216, %s187_s26, [#allocation3], %s2034_s10, %s2034_s10, %s2035_s11  }
  0x25   : > { %s2036_s14 = smov [#allocation4]   ;;  %s1957_s29 = scalar_lea.hbm %s2301_s3, 16 }
  0x26   : > { %s202_s20 = sshll.u32 %s2036_s14, 4  ;;  %p1958_p3 = scmp.ne.s32.totalorder %s2301_s3, %s1957_s29  ;;  %s203_s20 = int_to_ptr.vmem [resolvable:$true] %s202_s20 }
  0x27   : > { %p1964_p10 = scmp.lt.u32.totalorder %s1957_s29, %s2301_s3 }
  0x28   : > { %p1960_p5 = pnand %p1958_p3, %p1931_p9 }
  0x2a   : > { %p1961_p8 = pneg %p1960_p5 }
  0x2c   : > { %p1966_p11 = pnand %p1964_p10, %p1961_p8 }
  0x2e   : > { %1969 = shalt.err (!%p1966_p11)
}
  0x2f   : > { %s1970_s26 = scalar_lea.vmem %s203_s20, 16  ;;  %s1977_s8 = scalar_lea.vmem %s203_s20, 32 }
  0x30   : > { %p1971_p12 = scmp.ne.s32.totalorder %s203_s20, %s1970_s26  ;;  %p1978_p1 = scmp.lt.s32.totalorder %s203_s20, %s203_s20 }
  0x31   : > { %p1979_p2 = scmp.lt.s32.totalorder %s1977_s8, %s1970_s26 }
  0x32   : > { %p1973_p13 = pnand %p1971_p12, %p1931_p9 }
  0x33   : > { %p1980_p4 = por %p1979_p2, %p1978_p1 }
  0x34   : > { %p1974_p0 = pneg %p1973_p13 }
  0x36   : > { %p1981_p6 = pnand %p1980_p4, %p1974_p0 }
  0x38   : > { %1984 = shalt.err (!%p1981_p6)
}
  0x39   : > { %1803 = dma.hbm_to_vmem [thread:$0]  (!%p2111_p7), %s2301_s3, 16, %s203_s20, [#allocation5]  }
  0x3a   : > { %p2309_p3 = scmp.ne.s32.totalorder %s2306_s23, 0 }
  0x3b   : > { %p2310_p5 = scmp.ne.s32.totalorder (!%p2309_p3), %s2307_s24, 0 }
  0x3c   : > { %215 = sbr.rel (%p2309_p3) target bundleno = 453 (0x1c5), region = 36 }
  0x43   : > { %2006 = dma.done.wait (%p2310_p5), [#allocation3], 9216  }
  0x44   : > { %2008 = vsyncadd (%p2310_p5), [#allocation3], 4294958080 }
  0x45   : > { %2010 = dma.done.wait (%p2310_p5), [#allocation5], 16  }
  0x46   : > { %2012 = vsyncadd (%p2310_p5), [#allocation5], 4294967280  ;;  %v2037_v0 = vmov 0.0   ;;  %vm2038_vm0 = vmmov 0   ;;  %v1854_v1 = vld [vmem:[#allocation2 + $0x40] sm:$0xff]   ;;  %v1856_v3 = vld [vmem:[#allocation2 + $0x48] sm:$0xff]  }
  0x47   : > { %1609 = vmatprep.subr.bf16.mxu0 %v2037_v0  ;;  %1629 = vmatprep.subr.bf16.mxu1 %v2037_v0  ;;  %v1855_v2 = vld [vmem:[#allocation2] sm:$0xff]   ;;  %v1857_v4 = vld [vmem:[#allocation2 + $0x8] sm:$0xff]   ;;  %v1858_v5 = vld [vmem:[#allocation2 + $0x50] sm:$0xff]   ;;  %s256_s23 = smul.u32 18, %s2019_s16  ;;  %s1430_s24 = sshll.u32 %s2015_s15, 1 }
  0x48   : > { %1625 = vmatprep.mubr.msk.bf16.mxu0 %vm2038_vm0, %v2037_v0  ;;  %1645 = vmatprep.mubr.msk.bf16.mxu1 %vm2038_vm0, %v2037_v0  ;;  %v1859_v6 = vld [vmem:[#allocation2 + $0x10] sm:$0xff]   ;;  %v1860_v7 = vld [vmem:[#allocation2 + $0x58] sm:$0xff]   ;;  %v1862_v9 = vld [vmem:[#allocation2 + $0x60] sm:$0xff]   ;;  %s1428_s29 = sshll.u32 %s2019_s16, 3 }
  0x49   : > { %1610 = vmatpush3.bf16.msra.mxu0 %v1854_v1  ;;  %1630 = vmatpush3.bf16.msra.mxu1 %v1855_v2  ;;  %v1861_v8 = vld [vmem:[#allocation2 + $0x18] sm:$0xff]   ;;  %v1863_v10 = vld [vmem:[#allocation2 + $0x20] sm:$0xff]   ;;  %v1864_v11 = vld [vmem:[#allocation2 + $0x68] sm:$0xff]   ;;  %s258_s27 = sadd.s32 %s1430_s24, %s256_s23  ;;  %s245_s30 = sadd.s32 %s2015_s15, %s1428_s29 }
  0x4a   : > { %1611 = vmatprep.subr.bf16.mxu0 %v2037_v0  ;;  %1631 = vmatprep.subr.bf16.mxu1 %v2037_v0  ;;  %v1865_v12 = vld [vmem:[#allocation2 + $0x28] sm:$0xff]   ;;  %v1866_v13 = vld [vmem:[#allocation2 + $0x70] sm:$0xff]   ;;  %s1526_s11 = sshll.u32 %s258_s27, 3  ;;  %v1868_v15 = vld [vmem:[#allocation2 + $0x78] sm:$0xff]   ;;  %p246_p7 = scmp.lt.s32.totalorder %s245_s30, 15 }
  0x4b   : > { %v1867_v14 = vld [vmem:[#allocation2 + $0x30] sm:$0xff]   ;;  %s2190_s14 = scalar_lea.vmem %s2299_s1, %s1526_s11  ;;  %s2195_s28 = scalar_lea.vmem %s2298_s0, %s1526_s11  ;;  %v1869_v16 = vld [vmem:[#allocation2 + $0x38] sm:$0xff]   ;;  %v1871_v19 = vld [vmem:[#allocation2 + $0x80] sm:$0xff]  }
  0x4c   : > { %v266_v17 = vld [vmem:[%s2190_s14] sm:$0xf]  ;;  %v1873_v21 = vld [vmem:[#allocation2 + $0x88] sm:$0xff]   ;;  %v1875_v23 = vld [vmem:[#allocation2 + $0x90] sm:$0xff]   ;;  %s2322_s30 = smov (!%p246_p7, %s245_s30), 15 }
  0x4d   : > { %1612 = vmatpush3.bf16.msra.mxu0 %v1856_v3  ;;  %1632 = vmatpush3.bf16.msra.mxu1 %v1857_v4  ;;  %v262_v18 = vld [vmem:[%s2195_s28] sm:$0xf]  ;;  %v1874_v22 = vld [vmem:[#allocation2 + $0xc8] sm:$0xff]   ;;  %v1876_v24 = vld [vmem:[#allocation2 + $0xd0] sm:$0xff]   ;;  %s1429_s5 = sshll.u32 %s2322_s30, 2 }
  0x4e   : > { %1613 = vmatprep.subr.bf16.mxu0 %v2037_v0  ;;  %1633 = vmatprep.subr.bf16.mxu1 %v2037_v0  ;;  %v1872_v20 = vld [vmem:[#allocation2 + $0xc0] sm:$0xff]   ;;  %v1877_v25 = vld [vmem:[#allocation2 + $0x98] sm:$0xff]   ;;  %v1881_v31 = vld [vmem:[#allocation2 + $0xa8] sm:$0xff]   ;;  %s252_s26 = scalar_lea.vmem %s2302_s4, %s1429_s5 }
  0x4f   : > { %v1878_v26 = vld [vmem:[#allocation2 + $0xd8] sm:$0xff]   ;;  %v263_v27 = vld [vmem:[%s2195_s28 + $0x4] sm:$0x1]  ;;  %v1882_v32 = vld [vmem:[#allocation2 + $0xe8] sm:$0xff]  }
  0x50   : > { %v1879_v28 = vld [vmem:[#allocation2 + $0xa0] sm:$0xff]   ;;  %v1450_v30 = vcombine.low %v262_v18, %v263_v27  ;;  %v1883_v34 = vld [vmem:[#allocation2 + $0xb0] sm:$0xff]   ;;  %v1885_v38 = vld [vmem:[#allocation2 + $0xb8] sm:$0xff]  }
  0x51   : > { %1614 = vmatpush3.bf16.msra.mxu0 %v1858_v5  ;;  %1634 = vmatpush3.bf16.msra.mxu1 %v1859_v6  ;;  %v1880_v29 = vld [vmem:[#allocation2 + $0xe0] sm:$0xff]   ;;  %v1884_v35 = vld [vmem:[#allocation2 + $0xf0] sm:$0xff]   ;;  %v1886_v39 = vld [vmem:[#allocation2 + $0xf8] sm:$0xff]  }
  0x52   : > { %1615 = vmatprep.subr.bf16.mxu0 %v2037_v0  ;;  %1635 = vmatprep.subr.bf16.mxu1 %v2037_v0  ;;  %v501_v33 = vshll.u32 %v1450_v30, 16  ;;  %v499_v36 = vshrl.u32 %v1450_v30, 16  ;;  %v1887_v41 = vld [vmem:[#allocation2 + $0x100] sm:$0xff]   ;;  %v1461_v42 = vld [vmem:[%s2195_s28 + $0x8] sm:$0xf]  ;;  %v1892_v46 = vld [vmem:[#allocation2 + $0x110] sm:$0xff]  }
  0x53   : > { %v1889_v43 = vld [vmem:[#allocation2 + $0x140] sm:$0xff]   ;;  %v1890_v44 = vld [vmem:[#allocation2 + $0x108] sm:$0xff]   ;;  %v1893_v47 = vld [vmem:[#allocation2 + $0x150] sm:$0xff]  }
  0x54   : > { %v503_v37 = vrot.slane %v501_v33, 1  ;;  %v1891_v45 = vld [vmem:[#allocation2 + $0x148] sm:$0xff]   ;;  %v1894_v48 = vld [vmem:[#allocation2 + $0x118] sm:$0xff]   ;;  %v1896_v50 = vld [vmem:[#allocation2 + $0x120] sm:$0xff]  }
  0x55   : > { %1616 = vmatpush3.bf16.msra.mxu0 %v1860_v7  ;;  %1636 = vmatpush3.bf16.msra.mxu1 %v1861_v8  ;;  %v1895_v49 = vld [vmem:[#allocation2 + $0x158] sm:$0xff]   ;;  %v1462_v51 = vld [vmem:[%s2195_s28 + $0xc] sm:$0x1]  ;;  %v1897_v52 = vld [vmem:[#allocation2 + $0x160] sm:$0xff]  }
  0x56   : > { %1617 = vmatprep.subr.bf16.mxu0 %v2037_v0  ;;  %1637 = vmatprep.subr.bf16.mxu1 %v2037_v0  ;;  %v504_v40 = vor.u32 %v503_v37, %v499_v36  ;;  %v1482_v53 = vcombine.low %v1461_v42, %v1462_v51  ;;  %v1898_v54 = vld [vmem:[#allocation2 + $0x128] sm:$0xff]   ;;  %v1900_v57 = vld [vmem:[#allocation2 + $0x130] sm:$0xff]   ;;  %v1902_v61 = vld [vmem:[#allocation2 + $0x138] sm:$0xff]  }
  0x57   : > { %v1899_v55 = vld [vmem:[#allocation2 + $0x168] sm:$0xff]   ;;  %v1901_v58 = vld [vmem:[#allocation2 + $0x170] sm:$0xff]   ;;  %v1903_v62 = vld [vmem:[#allocation2 + $0x178] sm:$0xff]  }
  0x58   : > { %v841_v56 = vshll.u32 %v1482_v53, 16  ;;  %v839_v59 = vshrl.u32 %v1482_v53, 16  ;;  %v1465_v63 = vld [vmem:[%s2190_s14 + $0x8] sm:$0xf]  ;;  %v1904_v1 = vld [vmem:[#allocation2 + $0x180] sm:$0xff]   ;;  %v1908_v6 = vld [vmem:[#allocation2 + $0x190] sm:$0xff]  }
  0x59   : > { %1618 = vmatpush3.bf16.msra.mxu0 %v1862_v9  ;;  %1638 = vmatpush3.bf16.msra.mxu1 %v1863_v10  ;;  %v1905_v3 = vld [vmem:[#allocation2 + $0x1c0] sm:$0xff]   ;;  %v1906_v4 = vld [vmem:[#allocation2 + $0x188] sm:$0xff]   ;;  %v1909_v7 = vld [vmem:[#allocation2 + $0x1d0] sm:$0xff]  }
  0x5a   : > { %1619 = vmatprep.subr.bf16.mxu0 %v2037_v0  ;;  %1639 = vmatprep.subr.bf16.mxu1 %v2037_v0  ;;  %v843_v60 = vrot.slane %v841_v56, 1  ;;  %v1907_v5 = vld [vmem:[#allocation2 + $0x1c8] sm:$0xff]   ;;  %v1910_v8 = vld [vmem:[#allocation2 + $0x198] sm:$0xff]   ;;  %v1912_v10 = vld [vmem:[#allocation2 + $0x1a0] sm:$0xff]  }
  0x5b   : > { %v1911_v9 = vld [vmem:[#allocation2 + $0x1d8] sm:$0xff]   ;;  %v1926_v27 = vld [vmem:[#allocation2 + $0x228] sm:$0xff]  }
  0x5c   : > { %v844_v2 = vor.u32 %v843_v60, %v839_v59 }
  0x5d   : > { %1620 = vmatpush3.bf16.msra.mxu0 %v1864_v11  ;;  %1640 = vmatpush3.bf16.msra.mxu1 %v1865_v12  ;;  %v1913_v11 = vld [vmem:[#allocation2 + $0x1e0] sm:$0xff]   ;;  %v1914_v12 = vld [vmem:[#allocation2 + $0x1a8] sm:$0xff]  }
  0x5e   : > { %1621 = vmatprep.subr.bf16.mxu0 %v2037_v0  ;;  %1641 = vmatprep.subr.bf16.mxu1 %v2037_v0 }
  0x61   : > { %1622 = vmatpush3.bf16.msra.mxu0 %v1866_v13  ;;  %1642 = vmatpush3.bf16.msra.mxu1 %v1867_v14  ;;  %v1915_v13 = vld [vmem:[#allocation2 + $0x1e8] sm:$0xff]   ;;  %v1916_v14 = vld [vmem:[#allocation2 + $0x1b0] sm:$0xff]  }
  0x62   : > { %1623 = vmatprep.subr.bf16.mxu0 %v2037_v0  ;;  %1643 = vmatprep.subr.bf16.mxu1 %v2037_v0 }
  0x65   : > { %1624 = vmatpush3.bf16.msra.mxu0 %v1868_v15  ;;  %1644 = vmatpush3.bf16.msra.mxu1 %v1869_v16  ;;  %v1917_v15 = vld [vmem:[#allocation2 + $0x1f0] sm:$0xff]   ;;  %v1918_v16 = vld [vmem:[#allocation2 + $0x1b8] sm:$0xff]  }
  0x66   : > { %1649 = vmatprep.subr.bf16.mxu0 %v2037_v0  ;;  %1669 = vmatprep.subr.bf16.mxu1 %v2037_v0 }
  0x68   : > { %1626 = vmatmul.mubr.bf16.vlgmr.msra.gmra.mrb[0].mxu0 %v266_v17  ;;  %1646 = vmatmul.mubr.bf16.vlgmr.msra.gmra.mrb[0].mxu1 %v262_v18  ;;  %v1919_v17 = vld [vmem:[#allocation2 + $0x1f8] sm:$0xff]   ;;  %v1493_v18 = vld [vmem:[%s2195_s28 + $0x10] sm:$0xf] }
  0x69   : > { %1650 = vmatpush3.bf16.msra.mxu0 %v1871_v19  ;;  %1670 = vmatpush3.bf16.msra.mxu1 %v1872_v20  ;;  %v1921_v19 = vld [vmem:[#allocation2 + $0x200] sm:$0xff]   ;;  %v1497_v20 = vld [vmem:[%s2190_s14 + $0x10] sm:$0xf] }
  0x6a   : > { %1651 = vmatprep.subr.bf16.mxu0 %v2037_v0  ;;  %1671 = vmatprep.subr.bf16.mxu1 %v2037_v0 }
  0x6b   : > { %1665 = vmatprep.mubr.msk.bf16.mxu0 %vm2038_vm0, %v2037_v0  ;;  %1685 = vmatprep.mubr.msk.bf16.mxu1 %vm2038_vm0, %v2037_v0 }
  0x6d   : > { %1652 = vmatpush3.bf16.msra.mxu0 %v1873_v21  ;;  %1672 = vmatpush3.bf16.msra.mxu1 %v1874_v22  ;;  %v1922_v21 = vld [vmem:[#allocation2 + $0x208] sm:$0xff]   ;;  %v1923_v22 = vld [vmem:[#allocation2 + $0x210] sm:$0xff]  }
  0x6e   : > { %1653 = vmatprep.subr.bf16.mxu0 %v2037_v0  ;;  %1673 = vmatprep.subr.bf16.mxu1 %v2037_v0 }
  0x71   : > { %1654 = vmatpush3.bf16.msra.mxu0 %v1875_v23  ;;  %1674 = vmatpush3.bf16.msra.mxu1 %v1876_v24  ;;  %v1924_v23 = vld [vmem:[#allocation2 + $0x218] sm:$0xff]   ;;  %v1494_v24 = vld [vmem:[%s2195_s28 + $0x14] sm:$0x1] }
  0x72   : > { %1655 = vmatprep.subr.bf16.mxu0 %v2037_v0  ;;  %1675 = vmatprep.subr.bf16.mxu1 %v2037_v0 }
  0x75   : > { %1656 = vmatpush3.bf16.msra.mxu0 %v1877_v25  ;;  %1676 = vmatpush3.bf16.msra.mxu1 %v1878_v26  ;;  %v1925_v25 = vld [vmem:[#allocation2 + $0x220] sm:$0xff]   ;;  %v1514_v26 = vcombine.low %v1493_v18, %v1494_v24 }
  0x76   : > { %1657 = vmatprep.subr.bf16.mxu0 %v2037_v0  ;;  %1677 = vmatprep.subr.bf16.mxu1 %v2037_v0 }
  0x77   : > { %v1179_v30 = vshrl.u32 %v1514_v26, 16 }
  0x79   : > { %1658 = vmatpush3.bf16.msra.mxu0 %v1879_v28  ;;  %1678 = vmatpush3.bf16.msra.mxu1 %v1880_v29  ;;  %v1181_v28 = vshll.u32 %v1514_v26, 16  ;;  %v1927_v29 = vld [vmem:[#allocation2 + $0x230] sm:$0xff]  }
  0x7a   : > { %1659 = vmatprep.subr.bf16.mxu0 %v2037_v0  ;;  %1679 = vmatprep.subr.bf16.mxu1 %v2037_v0 }
  0x7d   : > { %1660 = vmatpush3.bf16.msra.mxu0 %v1881_v31  ;;  %1680 = vmatpush3.bf16.msra.mxu1 %v1882_v32  ;;  %v1183_v31 = vrot.slane %v1181_v28, 1  ;;  %v1928_v32 = vld [vmem:[#allocation2 + $0x238] sm:$0xff]  }
  0x7e   : > { %1661 = vmatprep.subr.bf16.mxu0 %v2037_v0  ;;  %1681 = vmatprep.subr.bf16.mxu1 %v2037_v0 }
  0x7f   : > { %v1184_v33 = vor.u32 %v1183_v31, %v1179_v30 }
  0x81   : > { %1662 = vmatpush3.bf16.msra.mxu0 %v1883_v34  ;;  %1682 = vmatpush3.bf16.msra.mxu1 %v1884_v35 }
  0x82   : > { %1663 = vmatprep.subr.bf16.mxu0 %v2037_v0  ;;  %1683 = vmatprep.subr.bf16.mxu1 %v2037_v0 }
  0x85   : > { %1664 = vmatpush3.bf16.msra.mxu0 %v1885_v38  ;;  %1684 = vmatpush3.bf16.msra.mxu1 %v1886_v39 }
  0x86   : > { %1689 = vmatprep.subr.bf16.mxu0 %v2037_v0  ;;  %1709 = vmatprep.subr.bf16.mxu1 %v2037_v0 }
  0x88   : > { %1666 = vmatmul.mubr.bf16.vlgmr.msra.gmra.mrb[4].mxu0 %v504_v40  ;;  %1686 = vmatmul.mubr.bf16.vlgmr.msra.gmra.mrb[4].mxu1 %v1461_v42 }
  0x89   : > { %1690 = vmatpush3.bf16.msra.mxu0 %v1887_v41  ;;  %1710 = vmatpush3.bf16.msra.mxu1 %v1889_v43 }
  0x8a   : > { %1691 = vmatprep.subr.bf16.mxu0 %v2037_v0  ;;  %1711 = vmatprep.subr.bf16.mxu1 %v2037_v0 }
  0x8b   : > { %1705 = vmatprep.mubr.msk.bf16.mxu0 %vm2038_vm0, %v2037_v0  ;;  %1725 = vmatprep.mubr.msk.bf16.mxu1 %vm2038_vm0, %v2037_v0 }
  0x8d   : > { %1692 = vmatpush3.bf16.msra.mxu0 %v1890_v44  ;;  %1712 = vmatpush3.bf16.msra.mxu1 %v1891_v45 }
  0x8e   : > { %1693 = vmatprep.subr.bf16.mxu0 %v2037_v0  ;;  %1713 = vmatprep.subr.bf16.mxu1 %v2037_v0 }
  0x91   : > { %1694 = vmatpush3.bf16.msra.mxu0 %v1892_v46  ;;  %1714 = vmatpush3.bf16.msra.mxu1 %v1893_v47 }
  0x92   : > { %1695 = vmatprep.subr.bf16.mxu0 %v2037_v0  ;;  %1715 = vmatprep.subr.bf16.mxu1 %v2037_v0 }
  0x95   : > { %1696 = vmatpush3.bf16.msra.mxu0 %v1894_v48  ;;  %1716 = vmatpush3.bf16.msra.mxu1 %v1895_v49 }
  0x96   : > { %1697 = vmatprep.subr.bf16.mxu0 %v2037_v0  ;;  %1717 = vmatprep.subr.bf16.mxu1 %v2037_v0 }
  0x99   : > { %1698 = vmatpush3.bf16.msra.mxu0 %v1896_v50  ;;  %1718 = vmatpush3.bf16.msra.mxu1 %v1897_v52 }
  0x9a   : > { %1699 = vmatprep.subr.bf16.mxu0 %v2037_v0  ;;  %1719 = vmatprep.subr.bf16.mxu1 %v2037_v0 }
  0x9d   : > { %1700 = vmatpush3.bf16.msra.mxu0 %v1898_v54  ;;  %1720 = vmatpush3.bf16.msra.mxu1 %v1899_v55 }
  0x9e   : > { %1701 = vmatprep.subr.bf16.mxu0 %v2037_v0  ;;  %1721 = vmatprep.subr.bf16.mxu1 %v2037_v0 }
  0xa1   : > { %1702 = vmatpush3.bf16.msra.mxu0 %v1900_v57  ;;  %1722 = vmatpush3.bf16.msra.mxu1 %v1901_v58 }
  0xa2   : > { %1703 = vmatprep.subr.bf16.mxu0 %v2037_v0  ;;  %1723 = vmatprep.subr.bf16.mxu1 %v2037_v0 }
  0xa5   : > { %1704 = vmatpush3.bf16.msra.mxu0 %v1902_v61  ;;  %1724 = vmatpush3.bf16.msra.mxu1 %v1903_v62 }
  0xa6   : > { %1729 = vmatprep.subr.bf16.mxu0 %v2037_v0  ;;  %1749 = vmatprep.subr.bf16.mxu1 %v2037_v0 }
  0xa8   : > { %1706 = vmatmul.mubr.bf16.vlgmr.msra.gmra.mrb[8].mxu0 %v1465_v63  ;;  %1726 = vmatmul.mubr.bf16.vlgmr.msra.gmra.mrb[8].mxu1 %v844_v2 }
  0xa9   : > { %1730 = vmatpush3.bf16.msra.mxu0 %v1904_v1  ;;  %1750 = vmatpush3.bf16.msra.mxu1 %v1905_v3 }
  0xaa   : > { %1731 = vmatprep.subr.bf16.mxu0 %v2037_v0  ;;  %1751 = vmatprep.subr.bf16.mxu1 %v2037_v0 }
  0xab   : > { %1745 = vmatprep.mubr.msk.bf16.mxu0 %vm2038_vm0, %v2037_v0  ;;  %1765 = vmatprep.mubr.msk.bf16.mxu1 %vm2038_vm0, %v2037_v0 }
  0xad   : > { %1732 = vmatpush3.bf16.msra.mxu0 %v1906_v4  ;;  %1752 = vmatpush3.bf16.msra.mxu1 %v1907_v5 }
  0xae   : > { %1733 = vmatprep.subr.bf16.mxu0 %v2037_v0  ;;  %1753 = vmatprep.subr.bf16.mxu1 %v2037_v0 }
  0xb1   : > { %1734 = vmatpush3.bf16.msra.mxu0 %v1908_v6  ;;  %1754 = vmatpush3.bf16.msra.mxu1 %v1909_v7 }
  0xb2   : > { %1735 = vmatprep.subr.bf16.mxu0 %v2037_v0  ;;  %1755 = vmatprep.subr.bf16.mxu1 %v2037_v0 }
  0xb5   : > { %1736 = vmatpush3.bf16.msra.mxu0 %v1910_v8  ;;  %1756 = vmatpush3.bf16.msra.mxu1 %v1911_v9 }
  0xb6   : > { %1737 = vmatprep.subr.bf16.mxu0 %v2037_v0  ;;  %1757 = vmatprep.subr.bf16.mxu1 %v2037_v0 }
  0xb9   : > { %1738 = vmatpush3.bf16.msra.mxu0 %v1912_v10  ;;  %1758 = vmatpush3.bf16.msra.mxu1 %v1913_v11  ;;  %v1523_v10 = vld [vmem:[#allocation4] ss:$0 sm:$0xff] }
  0xba   : > { %1739 = vmatprep.subr.bf16.mxu0 %v2037_v0  ;;  %1759 = vmatprep.subr.bf16.mxu1 %v2037_v0 }
  0xbd   : > { %1740 = vmatpush3.bf16.msra.mxu0 %v1914_v12  ;;  %1760 = vmatpush3.bf16.msra.mxu1 %v1915_v13 }
  0xbe   : > { %1741 = vmatprep.subr.bf16.mxu0 %v2037_v0  ;;  %1761 = vmatprep.subr.bf16.mxu1 %v2037_v0 }
  0xc1   : > { %1742 = vmatpush3.bf16.msra.mxu0 %v1916_v14  ;;  %1762 = vmatpush3.bf16.msra.mxu1 %v1917_v15 }
  0xc2   : > { %1743 = vmatprep.subr.bf16.mxu0 %v2037_v0  ;;  %1763 = vmatprep.subr.bf16.mxu1 %v2037_v0 }
  0xc5   : > { %1744 = vmatpush3.bf16.msra.mxu0 %v1918_v16  ;;  %1764 = vmatpush3.bf16.msra.mxu1 %v1919_v17 }
  0xc6   : > { %1769 = vmatprep.subr.bf16.mxu0 %v2037_v0 }
  0xc8   : > { %1746 = vmatmul.mubr.bf16.vlgmr.msra.gmra.mrb[12].mxu0 %v1493_v18  ;;  %1766 = vmatmul.mubr.bf16.vlgmr.msra.gmra.mrb[12].mxu1 %v1497_v20 }
  0xc9   : > { %1770 = vmatpush3.bf16.msra.mxu0 %v1921_v19  ;;  %1785 = vmatprep.mubr.msk.bf16.mxu0 %vm2038_vm0, %v2037_v0 }
  0xca   : > { %1771 = vmatprep.subr.bf16.mxu0 %v2037_v0 }
  0xcd   : > { %1772 = vmatpush3.bf16.msra.mxu0 %v1922_v21 }
  0xce   : > { %1773 = vmatprep.subr.bf16.mxu0 %v2037_v0 }
  0xd1   : > { %1774 = vmatpush3.bf16.msra.mxu0 %v1923_v22 }
  0xd2   : > { %1775 = vmatprep.subr.bf16.mxu0 %v2037_v0 }
  0xd5   : > { %1776 = vmatpush3.bf16.msra.mxu0 %v1924_v23 }
  0xd6   : > { %1777 = vmatprep.subr.bf16.mxu0 %v2037_v0 }
  0xd9   : > { %1778 = vmatpush3.bf16.msra.mxu0 %v1925_v25 }
  0xda   : > { %1779 = vmatprep.subr.bf16.mxu0 %v2037_v0 }
  0xdd   : > { %1780 = vmatpush3.bf16.msra.mxu0 %v1926_v27 }
  0xde   : > { %1781 = vmatprep.subr.bf16.mxu0 %v2037_v0 }
  0xe1   : > { %1782 = vmatpush3.bf16.msra.mxu0 %v1927_v29 }
  0xe2   : > { %1783 = vmatprep.subr.bf16.mxu0 %v2037_v0 }
  0xe5   : > { %1784 = vmatpush3.bf16.msra.mxu0 %v1928_v32 }
  0xe8   : > { %1786 = vmatmul.mubr.bf16.vlgmr.msra.gmra.mrb[16].mxu0 %v1184_v33 }
 0x13b   : > { %v382_v34 = vpop.f32.mrb[0].mxu0  ;;  %v470_v36 = vpop.f32.mrb[0].mxu1 }
 0x13c   : > { %v1627_v35 = vpop.f32.mrb[1].mxu0  ;;  %v471_v37 = vadd.f32 %v470_v36, %v382_v34  ;;  %v1647_v39 = vpop.f32.mrb[1].mxu1 }
 0x13d   : > { %v385_v38 = vpop.f32.mrb[2].mxu0  ;;  %v473_v41 = vpop.f32.mrb[2].mxu1 }
 0x13e   : > { %v1628_v40 = vpop.f32.mrb[3].mxu0  ;;  %v1648_v42 = vpop.f32.mrb[3].mxu1 }
 0x15b   : > { %v588_v43 = vpop.f32.mrb[4].mxu0  ;;  %v703_v46 = vpop.f32.mrb[4].mxu1 }
 0x15c   : > { %v594_v44 = vadd.f32 %v588_v43, %v471_v37  ;;  %v1667_v45 = vpop.f32.mrb[5].mxu0  ;;  %v1687_v48 = vpop.f32.mrb[5].mxu1 }
 0x15d   : > { %v591_v47 = vpop.f32.mrb[6].mxu0  ;;  %v706_v50 = vpop.f32.mrb[6].mxu1 }
 0x15e   : > { %v709_v49 = vadd.f32 %v703_v46, %v594_v44  ;;  %v1668_v0 = vpop.f32.mrb[7].mxu0  ;;  %v1688_v51 = vpop.f32.mrb[7].mxu1 }
 0x17b   : > { %v809_v52 = vpop.f32.mrb[8].mxu0  ;;  %v928_v55 = vpop.f32.mrb[8].mxu1 }
 0x17c   : > { %v815_v53 = vadd.f32 %v809_v52, %v709_v49  ;;  %v1707_v54 = vpop.f32.mrb[9].mxu0  ;;  %v1727_v57 = vpop.f32.mrb[9].mxu1 }
 0x17d   : > { %v812_v56 = vpop.f32.mrb[10].mxu0  ;;  %v931_v60 = vpop.f32.mrb[10].mxu1 }
 0x17e   : > { %v934_v58 = vadd.f32 %v928_v55, %v815_v53  ;;  %v1708_v59 = vpop.f32.mrb[11].mxu0  ;;  %v1728_v61 = vpop.f32.mrb[11].mxu1 }
 0x19b   : > { %v1043_v62 = vpop.f32.mrb[12].mxu0  ;;  %v1149_v2 = vpop.f32.mrb[12].mxu1 }
 0x19c   : > { %v1049_v63 = vadd.f32 %v1043_v62, %v934_v58  ;;  %v1747_v1 = vpop.f32.mrb[13].mxu0  ;;  %v1767_v4 = vpop.f32.mrb[13].mxu1 }
 0x19d   : > { %v1046_v3 = vpop.f32.mrb[14].mxu0  ;;  %v1152_v7 = vpop.f32.mrb[14].mxu1 }
 0x19e   : > { %v1155_v5 = vadd.f32 %v1149_v2, %v1049_v63  ;;  %v1748_v6 = vpop.f32.mrb[15].mxu0  ;;  %v1768_v8 = vpop.f32.mrb[15].mxu1 }
 0x1bb   : > { %v1268_v9 = vpop.f32.mrb[16].mxu0 }
 0x1bc   : > { %v1274_v11 = vadd.f32 %v1268_v9, %v1155_v5  ;;  %v1787_v12 = vpop.f32.mrb[17].mxu0 }
 0x1bd   : > { %v1271_v13 = vpop.f32.mrb[18].mxu0 }
 0x1be   : > { %v1282_v14 = vadd.f32 %v1523_v10, %v1274_v11  ;;  %v1788_v15 = vpop.f32.mrb[19].mxu0 }
 0x1c0   : > { %v1283_v16 = vmax.f32 %v1282_v14, 0.0 }
 0x1c2   : > { %v1284_v17 = vpack.c.bf16 %v1283_v16, %v1283_v16 }
 0x1c4   : > { %1285 = vst [vmem:[%s252_s26] sm:$0xf] %v1284_v17 }
 0x1c5 PF: > { %s16_s19 = sadd.s32 1, %s2031_s19   ;;  %s2311_s15 = smov %s2023_s17 }
 0x1c6   : > { %p13_p9 = scmp.ge.s32.totalorder %s16_s19, 18   ;;  %s2312_s16 = smov %s2027_s18 }
 0x1c7   : > { %s2313_s17 = smov %s2316_s21  ;;  %s2314_s18 = smov %s2320_s22 }
 0x1c8   :  { %15 = sbr.rel (!%p13_p9) target bundleno = 4 (0x4), region = 88 }
 0x1cf   :  { %1317 = vsyncpa [#allocation3], 1 }
 0x1d0   :  { %1319 = vsyncpa [#allocation3 + $0x1], 1 }
 0x1d1   :  { %1320 = vsyncpa [#allocation5], 1 }

// kernel: encoder_forward.8
= control target key start
LH: loop header
LB: loop body
LE: loop exit
PB: predicated region body
PF: predicated region fallthrough
CT: control target
= control target key end

     0   :  { %8 = vsyncpa [#allocation3], 0  ;;  %s2228_s0 = inlined_call_operand.vmem [shape: bf16[20,10,128], index: 0, kind: input, shape index: {}]   ;;  %s2229_s1 = inlined_call_operand.hbm [shape: bf16[9,128,128], index: 1, kind: input, shape index: {}]   ;;  %s2230_s2 = inlined_call_operand.hbm [shape: f32[1,128], index: 2, kind: input, shape index: {}]   ;;  %s2231_s3 = inlined_call_operand.vmem [shape: bf16[16,8,128], index: 3, kind: output, shape index: {}]  }
   0x1   :  { %9 = vsyncpa [#allocation5], 0  ;;  %s1997_s12 = smov 0   ;;  %s1999_s13 = smov 0  }
   0x2   :  { %s2001_s14 = smov 0   ;;  %s2003_s15 = smov 0  }
   0x3   :  { %s2005_s16 = smov 0  }
   0x4 LB: > { %s1367_s17 = sadd.s32 4294967295, %s1969_s16   ;;  %s27_s18 = sadd.s32 1, %s1961_s14  ;;  %s1969_s16 = sphi %s2005_s16, %s15_s16   ;;  %s1965_s15 = sphi %s2003_s15, %s2243_s15   ;;  %s1961_s14 = sphi %s2001_s14, %s2242_s14   ;;  %s1957_s13 = sphi %s1999_s13, %s2241_s13   ;;  %s1953_s12 = sphi %s1997_s12, %s2240_s12  }
   0x5   : > { %p28_p0 = scmp.ge.s32.totalorder %s27_s18, 8  ;;  %s30_s19 = sadd.s32 1, %s1965_s15 }
   0x6   : > { %p1371_p1 = scmp.ge.s32.totalorder %s1969_s16, 1  ;;  %p144_p2 = scmp.lt.s32.totalorder %s1969_s16, 17 }
   0x7   : > { %s2245_s18 = smov (%p28_p0, %s27_s18), 0  ;;  %s2247_s19 = smov (!%p28_p0, %s30_s19), %s1965_s15 }
   0x8   : > { %p2030_p3 = pnand %p1371_p1, %p144_p2  ;;  %p32_p4 = scmp.ge.s32.totalorder %s2247_s19, 2 }
   0x9   : > { %p2034_p5 = scmp.eq.s32.totalorder %s1367_s17, 0  ;;  %s1971_s22 = smov [#allocation2]  }
   0xa   : > { %s2235_s20 = scalar_select %p2030_p3, 1, 0 }
   0xb   : > { %s2236_s21 = scalar_select %p2034_p5, 1, 0 }
   0xc   : > { %p1735_p6 = pneg %p2030_p3  ;;  %s2249_s19 = smov (%p32_p4, %s2247_s19), 0 }
   0xd   : > { %s161_s23 = sshll.u32 %s1971_s22, 4  ;;  %s1867_s27 = scalar_lea.hbm %s2229_s1, 9216  ;;  %s162_s23 = int_to_ptr.vmem [resolvable:$true] %s161_s23 }
   0xe   : > { %p2044_p7 = pnand %p2034_p5, %p1735_p6  ;;  %p1868_p8 = scmp.ne.s32.totalorder %s2229_s1, %s1867_s27 }
   0xf   : > { %p1874_p12 = scmp.lt.u32.totalorder %s1867_s27, %s2229_s1 }
  0x10   : > { %p1869_p9 = pneg %p2044_p7 }
  0x12   : > { %p1870_p10 = pnand %p1869_p9, %p1868_p8 }
  0x14   : > { %p1871_p11 = pneg %p1870_p10 }
  0x16   : > { %p1876_p13 = pnand %p1874_p12, %p1871_p11 }
  0x18   : > { %1879 = shalt.err (!%p1876_p13)
}
  0x19   : > { %s1880_s5 = scalar_lea.vmem %s162_s23, 9216  ;;  %p1888_p4 = scmp.lt.s32.totalorder %s162_s23, %s162_s23 }
  0x1a   : > { %p1881_p0 = scmp.ne.s32.totalorder %s162_s23, %s1880_s5  ;;  %p1889_p6 = scmp.lt.s32.totalorder %s1880_s5, %s1880_s5 }
  0x1c   : > { %p1883_p1 = pnand %p1881_p0, %p1869_p9  ;;  %p1890_p5 = por %p1889_p6, %p1888_p4 }
  0x1e   : > { %p1884_p2 = pneg %p1883_p1 }
  0x20   : > { %p1891_p3 = pnand %p1890_p5, %p1884_p2 }
  0x22   : > { %1894 = shalt.err (!%p1891_p3)
}
  0x23   : > { %s1972_s6 = smov 64   ;;  %s1973_s7 = smov 4  }
  0x24   : > { %1738 = dma.hbm_to_vmem [thread:$0]  (!%p2044_p7), %s2229_s1, 9216, %s162_s23, [#allocation3], %s1972_s6, %s1972_s6, %s1973_s7  }
  0x25   : > { %s1974_s10 = smov [#allocation4]   ;;  %s1895_s25 = scalar_lea.hbm %s2230_s2, 16 }
  0x26   : > { %s177_s11 = sshll.u32 %s1974_s10, 4  ;;  %p1896_p3 = scmp.ne.s32.totalorder %s2230_s2, %s1895_s25  ;;  %s178_s11 = int_to_ptr.vmem [resolvable:$true] %s177_s11 }
  0x27   : > { %p1902_p10 = scmp.lt.u32.totalorder %s1895_s25, %s2230_s2 }
  0x28   : > { %p1898_p5 = pnand %p1896_p3, %p1869_p9 }
  0x2a   : > { %p1899_p8 = pneg %p1898_p5 }
  0x2c   : > { %p1904_p11 = pnand %p1902_p10, %p1899_p8 }
  0x2e   : > { %1907 = shalt.err (!%p1904_p11)
}
  0x2f   : > { %s1908_s23 = scalar_lea.vmem %s178_s11, 16  ;;  %s1915_s30 = scalar_lea.vmem %s178_s11, 32 }
  0x30   : > { %p1909_p12 = scmp.ne.s32.totalorder %s178_s11, %s1908_s23  ;;  %p1916_p1 = scmp.lt.s32.totalorder %s178_s11, %s178_s11 }
  0x31   : > { %p1917_p2 = scmp.lt.s32.totalorder %s1915_s30, %s1908_s23 }
  0x32   : > { %p1911_p13 = pnand %p1909_p12, %p1869_p9 }
  0x33   : > { %p1918_p4 = por %p1917_p2, %p1916_p1 }
  0x34   : > { %p1912_p0 = pneg %p1911_p13 }
  0x36   : > { %p1919_p6 = pnand %p1918_p4, %p1912_p0 }
  0x38   : > { %1922 = shalt.err (!%p1919_p6)
}
  0x39   : > { %1741 = dma.hbm_to_vmem [thread:$0]  (!%p2044_p7), %s2230_s2, 16, %s178_s11, [#allocation5]  }
  0x3a   : > { %p2238_p3 = scmp.ne.s32.totalorder %s2235_s20, 0 }
  0x3b   : > { %p2239_p5 = scmp.ne.s32.totalorder (!%p2238_p3), %s2236_s21, 0 }
  0x3c   : > { %190 = sbr.rel (%p2238_p3) target bundleno = 453 (0x1c5), region = 32 }
  0x43   : > { %1944 = dma.done.wait (%p2239_p5), [#allocation3], 9216  }
  0x44   : > { %1946 = vsyncadd (%p2239_p5), [#allocation3], 4294958080 }
  0x45   : > { %1948 = dma.done.wait (%p2239_p5), [#allocation5], 16  }
  0x46   : > { %1950 = vsyncadd (%p2239_p5), [#allocation5], 4294967280  ;;  %v1975_v0 = vmov 0.0   ;;  %vm1976_vm0 = vmmov 0   ;;  %v1792_v1 = vld [vmem:[#allocation2 + $0x40] sm:$0xff]   ;;  %v1794_v3 = vld [vmem:[#allocation2 + $0x48] sm:$0xff]  }
  0x47   : > { %1547 = vmatprep.subr.bf16.mxu0 %v1975_v0  ;;  %1567 = vmatprep.subr.bf16.mxu1 %v1975_v0  ;;  %v1793_v2 = vld [vmem:[#allocation2] sm:$0xff]   ;;  %v1795_v4 = vld [vmem:[#allocation2 + $0x8] sm:$0xff]   ;;  %s229_s20 = smul.u32 10, %s1957_s13  ;;  %v1796_v5 = vld [vmem:[#allocation2 + $0x50] sm:$0xff]   ;;  %s1377_s9 = sshll.u32 %s1957_s13, 3 }
  0x48   : > { %1563 = vmatprep.mubr.msk.bf16.mxu0 %vm1976_vm0, %v1975_v0  ;;  %1583 = vmatprep.mubr.msk.bf16.mxu1 %vm1976_vm0, %v1975_v0  ;;  %v1797_v6 = vld [vmem:[#allocation2 + $0x10] sm:$0xff]   ;;  %v1798_v7 = vld [vmem:[#allocation2 + $0x58] sm:$0xff]   ;;  %v1800_v9 = vld [vmem:[#allocation2 + $0x60] sm:$0xff]   ;;  %s218_s10 = sadd.s32 %s1953_s12, %s1377_s9 }
  0x49   : > { %1548 = vmatpush3.bf16.msra.mxu0 %v1792_v1  ;;  %1568 = vmatpush3.bf16.msra.mxu1 %v1793_v2  ;;  %s230_s21 = sadd.s32 %s1953_s12, %s229_s20  ;;  %v1799_v8 = vld [vmem:[#allocation2 + $0x18] sm:$0xff]   ;;  %v1801_v10 = vld [vmem:[#allocation2 + $0x20] sm:$0xff]   ;;  %v1802_v14 = vld [vmem:[#allocation2 + $0x68] sm:$0xff]   ;;  %p219_p7 = scmp.lt.s32.totalorder %s218_s10, 15 }
  0x4a   : > { %1549 = vmatprep.subr.bf16.mxu0 %v1975_v0  ;;  %1569 = vmatprep.subr.bf16.mxu1 %v1975_v0  ;;  %s1465_s24 = sshll.u32 %s230_s21, 3  ;;  %v1803_v15 = vld [vmem:[#allocation2 + $0x28] sm:$0xff]   ;;  %v1804_v17 = vld [vmem:[#allocation2 + $0x70] sm:$0xff]   ;;  %v1806_v21 = vld [vmem:[#allocation2 + $0x78] sm:$0xff]  }
  0x4b   : > { %s2117_s8 = scalar_lea.vmem %s2228_s0, %s1465_s24  ;;  %v1805_v18 = vld [vmem:[#allocation2 + $0x30] sm:$0xff]   ;;  %v1807_v22 = vld [vmem:[#allocation2 + $0x38] sm:$0xff]   ;;  %v1809_v24 = vld [vmem:[#allocation2 + $0x80] sm:$0xff]   ;;  %s2251_s10 = smov (!%p219_p7, %s218_s10), 15 }
  0x4c   : > { %v234_v11 = vld [vmem:[%s2117_s8] sm:$0xf]  ;;  %v235_v12 = vld [vmem:[%s2117_s8 + $0x4] sm:$0x1]  ;;  %v1811_v26 = vld [vmem:[#allocation2 + $0x88] sm:$0xff]   ;;  %s1378_s11 = sshll.u32 %s2251_s10, 2 }
  0x4d   : > { %1550 = vmatpush3.bf16.msra.mxu0 %v1794_v3  ;;  %1570 = vmatpush3.bf16.msra.mxu1 %v1795_v4  ;;  %v2123_v13 = vcombine.low %v234_v11, %v235_v12  ;;  %v1810_v25 = vld [vmem:[#allocation2 + $0xc0] sm:$0xff]   ;;  %v1812_v27 = vld [vmem:[#allocation2 + $0xc8] sm:$0xff]   ;;  %v1813_v28 = vld [vmem:[#allocation2 + $0x90] sm:$0xff]   ;;  %s225_s25 = scalar_lea.vmem %s2231_s3, %s1378_s11 }
  0x4e   : > { %1551 = vmatprep.subr.bf16.mxu0 %v1975_v0  ;;  %1571 = vmatprep.subr.bf16.mxu1 %v1975_v0  ;;  %v1814_v29 = vld [vmem:[#allocation2 + $0xd0] sm:$0xff]   ;;  %v1815_v30 = vld [vmem:[#allocation2 + $0x98] sm:$0xff]   ;;  %v1817_v32 = vld [vmem:[#allocation2 + $0xa0] sm:$0xff]  }
  0x4f   : > { %v277_v16 = vshll.u32 %v2123_v13, 16  ;;  %v275_v19 = vshrl.u32 %v2123_v13, 16  ;;  %v1816_v31 = vld [vmem:[#allocation2 + $0xd8] sm:$0xff]   ;;  %v1818_v33 = vld [vmem:[#allocation2 + $0xe0] sm:$0xff]   ;;  %v1819_v34 = vld [vmem:[#allocation2 + $0xa8] sm:$0xff]   ;;  %v475_v40 = vrot.slane %v2123_v13, 1 }
  0x50   : > { %v1820_v35 = vld [vmem:[#allocation2 + $0xe8] sm:$0xff]   ;;  %v1821_v36 = vld [vmem:[#allocation2 + $0xb0] sm:$0xff]   ;;  %v1823_v38 = vld [vmem:[#allocation2 + $0xb8] sm:$0xff]  }
  0x51   : > { %1552 = vmatpush3.bf16.msra.mxu0 %v1796_v5  ;;  %1572 = vmatpush3.bf16.msra.mxu1 %v1797_v6  ;;  %v279_v20 = vrot.slane %v277_v16, 1  ;;  %v1822_v37 = vld [vmem:[#allocation2 + $0xf0] sm:$0xff]   ;;  %v1824_v39 = vld [vmem:[#allocation2 + $0xf8] sm:$0xff]   ;;  %v1825_v41 = vld [vmem:[#allocation2 + $0x100] sm:$0xff]  }
  0x52   : > { %1553 = vmatprep.subr.bf16.mxu0 %v1975_v0  ;;  %1573 = vmatprep.subr.bf16.mxu1 %v1975_v0  ;;  %v1407_v42 = vld [vmem:[%s2117_s8 + $0x8] sm:$0xf]  ;;  %v1827_v43 = vld [vmem:[#allocation2 + $0x140] sm:$0xff]   ;;  %v1830_v46 = vld [vmem:[#allocation2 + $0x110] sm:$0xff]  }
  0x53   : > { %v280_v23 = vor.u32 %v279_v20, %v275_v19  ;;  %v1828_v44 = vld [vmem:[#allocation2 + $0x108] sm:$0xff]   ;;  %v1831_v47 = vld [vmem:[#allocation2 + $0x150] sm:$0xff]   ;;  %v1832_v48 = vld [vmem:[#allocation2 + $0x118] sm:$0xff]  }
  0x54   : > { %v1829_v45 = vld [vmem:[#allocation2 + $0x148] sm:$0xff]   ;;  %v1833_v49 = vld [vmem:[#allocation2 + $0x158] sm:$0xff]   ;;  %v1834_v51 = vld [vmem:[#allocation2 + $0x120] sm:$0xff]  }
  0x55   : > { %1554 = vmatpush3.bf16.msra.mxu0 %v1798_v7  ;;  %1574 = vmatpush3.bf16.msra.mxu1 %v1799_v8  ;;  %v1408_v50 = vld [vmem:[%s2117_s8 + $0xc] sm:$0x1]  ;;  %v1835_v52 = vld [vmem:[#allocation2 + $0x160] sm:$0xff]   ;;  %v1838_v57 = vld [vmem:[#allocation2 + $0x130] sm:$0xff]  }
  0x56   : > { %1555 = vmatprep.subr.bf16.mxu0 %v1975_v0  ;;  %1575 = vmatprep.subr.bf16.mxu1 %v1975_v0  ;;  %v1417_v53 = vcombine.low %v1407_v42, %v1408_v50  ;;  %v1836_v54 = vld [vmem:[#allocation2 + $0x128] sm:$0xff]   ;;  %v1839_v58 = vld [vmem:[#allocation2 + $0x170] sm:$0xff]   ;;  %v1840_v61 = vld [vmem:[#allocation2 + $0x138] sm:$0xff]  }
  0x57   : > { %v1837_v55 = vld [vmem:[#allocation2 + $0x168] sm:$0xff]   ;;  %v1841_v62 = vld [vmem:[#allocation2 + $0x178] sm:$0xff]   ;;  %v1842_v1 = vld [vmem:[#allocation2 + $0x180] sm:$0xff]  }
  0x58   : > { %v703_v56 = vshll.u32 %v1417_v53, 16  ;;  %v701_v59 = vshrl.u32 %v1417_v53, 16  ;;  %v814_v2 = vrot.slane %v1417_v53, 1  ;;  %v1843_v3 = vld [vmem:[#allocation2 + $0x1c0] sm:$0xff]   ;;  %v1844_v4 = vld [vmem:[#allocation2 + $0x188] sm:$0xff]   ;;  %v1846_v6 = vld [vmem:[#allocation2 + $0x190] sm:$0xff]  }
  0x59   : > { %1556 = vmatpush3.bf16.msra.mxu0 %v1800_v9  ;;  %1576 = vmatpush3.bf16.msra.mxu1 %v1801_v10  ;;  %v1845_v5 = vld [vmem:[#allocation2 + $0x1c8] sm:$0xff]   ;;  %v1847_v7 = vld [vmem:[#allocation2 + $0x1d0] sm:$0xff]   ;;  %v1848_v8 = vld [vmem:[#allocation2 + $0x198] sm:$0xff]  }
  0x5a   : > { %1557 = vmatprep.subr.bf16.mxu0 %v1975_v0  ;;  %1577 = vmatprep.subr.bf16.mxu1 %v1975_v0  ;;  %v705_v60 = vrot.slane %v703_v56, 1  ;;  %v1849_v9 = vld [vmem:[#allocation2 + $0x1d8] sm:$0xff]   ;;  %v1850_v10 = vld [vmem:[#allocation2 + $0x1a0] sm:$0xff]   ;;  %v1435_v12 = vld [vmem:[%s2117_s8 + $0x10] sm:$0xf] }
  0x5b   : > { %v1436_v13 = vld [vmem:[%s2117_s8 + $0x14] sm:$0x1]  ;;  %v1853_v16 = vld [vmem:[#allocation2 + $0x1e8] sm:$0xff]   ;;  %v1856_v20 = vld [vmem:[#allocation2 + $0x1b8] sm:$0xff]  }
  0x5c   : > { %v706_v63 = vor.u32 %v705_v60, %v701_v59  ;;  %v1855_v19 = vld [vmem:[#allocation2 + $0x1f0] sm:$0xff]  }
  0x5d   : > { %1558 = vmatpush3.bf16.msra.mxu0 %v1802_v14  ;;  %1578 = vmatpush3.bf16.msra.mxu1 %v1803_v15  ;;  %v1852_v14 = vld [vmem:[#allocation2 + $0x1a8] sm:$0xff]   ;;  %v1445_v15 = vcombine.low %v1435_v12, %v1436_v13 }
  0x5e   : > { %1559 = vmatprep.subr.bf16.mxu0 %v1975_v0  ;;  %1579 = vmatprep.subr.bf16.mxu1 %v1975_v0 }
  0x61   : > { %1560 = vmatpush3.bf16.msra.mxu0 %v1804_v17  ;;  %1580 = vmatpush3.bf16.msra.mxu1 %v1805_v18  ;;  %v1854_v17 = vld [vmem:[#allocation2 + $0x1b0] sm:$0xff]   ;;  %v1042_v18 = vshll.u32 %v1445_v15, 16 }
  0x62   : > { %1561 = vmatprep.subr.bf16.mxu0 %v1975_v0  ;;  %1581 = vmatprep.subr.bf16.mxu1 %v1975_v0 }
  0x65   : > { %1562 = vmatpush3.bf16.msra.mxu0 %v1806_v21  ;;  %1582 = vmatpush3.bf16.msra.mxu1 %v1807_v22  ;;  %v1040_v21 = vshrl.u32 %v1445_v15, 16  ;;  %v1044_v22 = vrot.slane %v1042_v18, 1 }
  0x66   : > { %1587 = vmatprep.subr.bf16.mxu0 %v1975_v0  ;;  %1607 = vmatprep.subr.bf16.mxu1 %v1975_v0 }
  0x68   : > { %1564 = vmatmul.mubr.bf16.vlgmr.msra.gmra.mrb[0].mxu0 %v280_v23  ;;  %1584 = vmatmul.mubr.bf16.vlgmr.msra.gmra.mrb[0].mxu1 %v234_v11  ;;  %v1851_v11 = vld [vmem:[#allocation2 + $0x1e0] sm:$0xff]   ;;  %v1857_v23 = vld [vmem:[#allocation2 + $0x1f8] sm:$0xff]  }
  0x69   : > { %1588 = vmatpush3.bf16.msra.mxu0 %v1809_v24  ;;  %1608 = vmatpush3.bf16.msra.mxu1 %v1810_v25  ;;  %v1859_v24 = vld [vmem:[#allocation2 + $0x200] sm:$0xff]   ;;  %v1045_v25 = vor.u32 %v1044_v22, %v1040_v21 }
  0x6a   : > { %1589 = vmatprep.subr.bf16.mxu0 %v1975_v0  ;;  %1609 = vmatprep.subr.bf16.mxu1 %v1975_v0 }
  0x6b   : > { %1603 = vmatprep.mubr.msk.bf16.mxu0 %vm1976_vm0, %v1975_v0  ;;  %1623 = vmatprep.mubr.msk.bf16.mxu1 %vm1976_vm0, %v1975_v0 }
  0x6d   : > { %1590 = vmatpush3.bf16.msra.mxu0 %v1811_v26  ;;  %1610 = vmatpush3.bf16.msra.mxu1 %v1812_v27  ;;  %v1860_v26 = vld [vmem:[#allocation2 + $0x208] sm:$0xff]   ;;  %v1861_v27 = vld [vmem:[#allocation2 + $0x210] sm:$0xff]  }
  0x6e   : > { %1591 = vmatprep.subr.bf16.mxu0 %v1975_v0  ;;  %1611 = vmatprep.subr.bf16.mxu1 %v1975_v0 }
  0x71   : > { %1592 = vmatpush3.bf16.msra.mxu0 %v1813_v28  ;;  %1612 = vmatpush3.bf16.msra.mxu1 %v1814_v29  ;;  %v1862_v28 = vld [vmem:[#allocation2 + $0x218] sm:$0xff]   ;;  %v1863_v29 = vld [vmem:[#allocation2 + $0x220] sm:$0xff]  }
  0x72   : > { %1593 = vmatprep.subr.bf16.mxu0 %v1975_v0  ;;  %1613 = vmatprep.subr.bf16.mxu1 %v1975_v0 }
  0x75   : > { %1594 = vmatpush3.bf16.msra.mxu0 %v1815_v30  ;;  %1614 = vmatpush3.bf16.msra.mxu1 %v1816_v31  ;;  %v1864_v30 = vld [vmem:[#allocation2 + $0x228] sm:$0xff]   ;;  %v1865_v31 = vld [vmem:[#allocation2 + $0x230] sm:$0xff]  }
  0x76   : > { %1595 = vmatprep.subr.bf16.mxu0 %v1975_v0  ;;  %1615 = vmatprep.subr.bf16.mxu1 %v1975_v0 }
  0x79   : > { %1596 = vmatpush3.bf16.msra.mxu0 %v1817_v32  ;;  %1616 = vmatpush3.bf16.msra.mxu1 %v1818_v33  ;;  %v1866_v32 = vld [vmem:[#allocation2 + $0x238] sm:$0xff]   ;;  %v1153_v33 = vrot.slane %v1445_v15, 1 }
  0x7a   : > { %1597 = vmatprep.subr.bf16.mxu0 %v1975_v0  ;;  %1617 = vmatprep.subr.bf16.mxu1 %v1975_v0 }
  0x7d   : > { %1598 = vmatpush3.bf16.msra.mxu0 %v1819_v34  ;;  %1618 = vmatpush3.bf16.msra.mxu1 %v1820_v35 }
  0x7e   : > { %1599 = vmatprep.subr.bf16.mxu0 %v1975_v0  ;;  %1619 = vmatprep.subr.bf16.mxu1 %v1975_v0 }
  0x81   : > { %1600 = vmatpush3.bf16.msra.mxu0 %v1821_v36  ;;  %1620 = vmatpush3.bf16.msra.mxu1 %v1822_v37 }
  0x82   : > { %1601 = vmatprep.subr.bf16.mxu0 %v1975_v0  ;;  %1621 = vmatprep.subr.bf16.mxu1 %v1975_v0 }
  0x85   : > { %1602 = vmatpush3.bf16.msra.mxu0 %v1823_v38  ;;  %1622 = vmatpush3.bf16.msra.mxu1 %v1824_v39 }
  0x86   : > { %1627 = vmatprep.subr.bf16.mxu0 %v1975_v0  ;;  %1647 = vmatprep.subr.bf16.mxu1 %v1975_v0 }
  0x88   : > { %1604 = vmatmul.mubr.bf16.vlgmr.msra.gmra.mrb[4].mxu0 %v475_v40  ;;  %1624 = vmatmul.mubr.bf16.vlgmr.msra.gmra.mrb[4].mxu1 %v1407_v42 }
  0x89   : > { %1628 = vmatpush3.bf16.msra.mxu0 %v1825_v41  ;;  %1648 = vmatpush3.bf16.msra.mxu1 %v1827_v43 }
  0x8a   : > { %1629 = vmatprep.subr.bf16.mxu0 %v1975_v0  ;;  %1649 = vmatprep.subr.bf16.mxu1 %v1975_v0 }
  0x8b   : > { %1643 = vmatprep.mubr.msk.bf16.mxu0 %vm1976_vm0, %v1975_v0  ;;  %1663 = vmatprep.mubr.msk.bf16.mxu1 %vm1976_vm0, %v1975_v0 }
  0x8d   : > { %1630 = vmatpush3.bf16.msra.mxu0 %v1828_v44  ;;  %1650 = vmatpush3.bf16.msra.mxu1 %v1829_v45 }
  0x8e   : > { %1631 = vmatprep.subr.bf16.mxu0 %v1975_v0  ;;  %1651 = vmatprep.subr.bf16.mxu1 %v1975_v0 }
  0x91   : > { %1632 = vmatpush3.bf16.msra.mxu0 %v1830_v46  ;;  %1652 = vmatpush3.bf16.msra.mxu1 %v1831_v47 }
  0x92   : > { %1633 = vmatprep.subr.bf16.mxu0 %v1975_v0  ;;  %1653 = vmatprep.subr.bf16.mxu1 %v1975_v0 }
  0x95   : > { %1634 = vmatpush3.bf16.msra.mxu0 %v1832_v48  ;;  %1654 = vmatpush3.bf16.msra.mxu1 %v1833_v49 }
  0x96   : > { %1635 = vmatprep.subr.bf16.mxu0 %v1975_v0  ;;  %1655 = vmatprep.subr.bf16.mxu1 %v1975_v0 }
  0x99   : > { %1636 = vmatpush3.bf16.msra.mxu0 %v1834_v51  ;;  %1656 = vmatpush3.bf16.msra.mxu1 %v1835_v52 }
  0x9a   : > { %1637 = vmatprep.subr.bf16.mxu0 %v1975_v0  ;;  %1657 = vmatprep.subr.bf16.mxu1 %v1975_v0 }
  0x9d   : > { %1638 = vmatpush3.bf16.msra.mxu0 %v1836_v54  ;;  %1658 = vmatpush3.bf16.msra.mxu1 %v1837_v55 }
  0x9e   : > { %1639 = vmatprep.subr.bf16.mxu0 %v1975_v0  ;;  %1659 = vmatprep.subr.bf16.mxu1 %v1975_v0 }
  0xa1   : > { %1640 = vmatpush3.bf16.msra.mxu0 %v1838_v57  ;;  %1660 = vmatpush3.bf16.msra.mxu1 %v1839_v58 }
  0xa2   : > { %1641 = vmatprep.subr.bf16.mxu0 %v1975_v0  ;;  %1661 = vmatprep.subr.bf16.mxu1 %v1975_v0 }
  0xa5   : > { %1642 = vmatpush3.bf16.msra.mxu0 %v1840_v61  ;;  %1662 = vmatpush3.bf16.msra.mxu1 %v1841_v62 }
  0xa6   : > { %1667 = vmatprep.subr.bf16.mxu0 %v1975_v0  ;;  %1687 = vmatprep.subr.bf16.mxu1 %v1975_v0 }
  0xa8   : > { %1644 = vmatmul.mubr.bf16.vlgmr.msra.gmra.mrb[8].mxu0 %v706_v63  ;;  %1664 = vmatmul.mubr.bf16.vlgmr.msra.gmra.mrb[8].mxu1 %v814_v2 }
  0xa9   : > { %1668 = vmatpush3.bf16.msra.mxu0 %v1842_v1  ;;  %1688 = vmatpush3.bf16.msra.mxu1 %v1843_v3 }
  0xaa   : > { %1669 = vmatprep.subr.bf16.mxu0 %v1975_v0  ;;  %1689 = vmatprep.subr.bf16.mxu1 %v1975_v0 }
  0xab   : > { %1683 = vmatprep.mubr.msk.bf16.mxu0 %vm1976_vm0, %v1975_v0  ;;  %1703 = vmatprep.mubr.msk.bf16.mxu1 %vm1976_vm0, %v1975_v0 }
  0xad   : > { %1670 = vmatpush3.bf16.msra.mxu0 %v1844_v4  ;;  %1690 = vmatpush3.bf16.msra.mxu1 %v1845_v5 }
  0xae   : > { %1671 = vmatprep.subr.bf16.mxu0 %v1975_v0  ;;  %1691 = vmatprep.subr.bf16.mxu1 %v1975_v0 }
  0xb1   : > { %1672 = vmatpush3.bf16.msra.mxu0 %v1846_v6  ;;  %1692 = vmatpush3.bf16.msra.mxu1 %v1847_v7 }
  0xb2   : > { %1673 = vmatprep.subr.bf16.mxu0 %v1975_v0  ;;  %1693 = vmatprep.subr.bf16.mxu1 %v1975_v0 }
  0xb5   : > { %1674 = vmatpush3.bf16.msra.mxu0 %v1848_v8  ;;  %1694 = vmatpush3.bf16.msra.mxu1 %v1849_v9 }
  0xb6   : > { %1675 = vmatprep.subr.bf16.mxu0 %v1975_v0  ;;  %1695 = vmatprep.subr.bf16.mxu1 %v1975_v0 }
  0xb9   : > { %1676 = vmatpush3.bf16.msra.mxu0 %v1850_v10  ;;  %1696 = vmatpush3.bf16.msra.mxu1 %v1851_v11  ;;  %v1462_v10 = vld [vmem:[#allocation4] ss:$0 sm:$0xff] }
  0xba   : > { %1677 = vmatprep.subr.bf16.mxu0 %v1975_v0  ;;  %1697 = vmatprep.subr.bf16.mxu1 %v1975_v0 }
  0xbd   : > { %1678 = vmatpush3.bf16.msra.mxu0 %v1852_v14  ;;  %1698 = vmatpush3.bf16.msra.mxu1 %v1853_v16 }
  0xbe   : > { %1679 = vmatprep.subr.bf16.mxu0 %v1975_v0  ;;  %1699 = vmatprep.subr.bf16.mxu1 %v1975_v0 }
  0xc1   : > { %1680 = vmatpush3.bf16.msra.mxu0 %v1854_v17  ;;  %1700 = vmatpush3.bf16.msra.mxu1 %v1855_v19 }
  0xc2   : > { %1681 = vmatprep.subr.bf16.mxu0 %v1975_v0  ;;  %1701 = vmatprep.subr.bf16.mxu1 %v1975_v0 }
  0xc5   : > { %1682 = vmatpush3.bf16.msra.mxu0 %v1856_v20  ;;  %1702 = vmatpush3.bf16.msra.mxu1 %v1857_v23 }
  0xc6   : > { %1707 = vmatprep.subr.bf16.mxu0 %v1975_v0 }
  0xc8   : > { %1684 = vmatmul.mubr.bf16.vlgmr.msra.gmra.mrb[12].mxu0 %v1435_v12  ;;  %1704 = vmatmul.mubr.bf16.vlgmr.msra.gmra.mrb[12].mxu1 %v1045_v25 }
  0xc9   : > { %1708 = vmatpush3.bf16.msra.mxu0 %v1859_v24  ;;  %1723 = vmatprep.mubr.msk.bf16.mxu0 %vm1976_vm0, %v1975_v0 }
  0xca   : > { %1709 = vmatprep.subr.bf16.mxu0 %v1975_v0 }
  0xcd   : > { %1710 = vmatpush3.bf16.msra.mxu0 %v1860_v26 }
  0xce   : > { %1711 = vmatprep.subr.bf16.mxu0 %v1975_v0 }
  0xd1   : > { %1712 = vmatpush3.bf16.msra.mxu0 %v1861_v27 }
  0xd2   : > { %1713 = vmatprep.subr.bf16.mxu0 %v1975_v0 }
  0xd5   : > { %1714 = vmatpush3.bf16.msra.mxu0 %v1862_v28 }
  0xd6   : > { %1715 = vmatprep.subr.bf16.mxu0 %v1975_v0 }
  0xd9   : > { %1716 = vmatpush3.bf16.msra.mxu0 %v1863_v29 }
  0xda   : > { %1717 = vmatprep.subr.bf16.mxu0 %v1975_v0 }
  0xdd   : > { %1718 = vmatpush3.bf16.msra.mxu0 %v1864_v30 }
  0xde   : > { %1719 = vmatprep.subr.bf16.mxu0 %v1975_v0 }
  0xe1   : > { %1720 = vmatpush3.bf16.msra.mxu0 %v1865_v31 }
  0xe2   : > { %1721 = vmatprep.subr.bf16.mxu0 %v1975_v0 }
  0xe5   : > { %1722 = vmatpush3.bf16.msra.mxu0 %v1866_v32 }
  0xe8   : > { %1724 = vmatmul.mubr.bf16.vlgmr.msra.gmra.mrb[16].mxu0 %v1153_v33 }
 0x13b   : > { %v364_v34 = vpop.f32.mrb[0].mxu0  ;;  %v452_v36 = vpop.f32.mrb[0].mxu1 }
 0x13c   : > { %v1565_v35 = vpop.f32.mrb[1].mxu0  ;;  %v453_v37 = vadd.f32 %v452_v36, %v364_v34  ;;  %v1585_v39 = vpop.f32.mrb[1].mxu1 }
 0x13d   : > { %v367_v38 = vpop.f32.mrb[2].mxu0  ;;  %v455_v41 = vpop.f32.mrb[2].mxu1 }
 0x13e   : > { %v1566_v40 = vpop.f32.mrb[3].mxu0  ;;  %v1586_v42 = vpop.f32.mrb[3].mxu1 }
 0x15b   : > { %v559_v43 = vpop.f32.mrb[4].mxu0  ;;  %v671_v46 = vpop.f32.mrb[4].mxu1 }
 0x15c   : > { %v565_v44 = vadd.f32 %v559_v43, %v453_v37  ;;  %v1605_v45 = vpop.f32.mrb[5].mxu0  ;;  %v1625_v48 = vpop.f32.mrb[5].mxu1 }
 0x15d   : > { %v562_v47 = vpop.f32.mrb[6].mxu0  ;;  %v674_v50 = vpop.f32.mrb[6].mxu1 }
 0x15e   : > { %v677_v49 = vadd.f32 %v671_v46, %v565_v44  ;;  %v1606_v0 = vpop.f32.mrb[7].mxu0  ;;  %v1626_v51 = vpop.f32.mrb[7].mxu1 }
 0x17b   : > { %v790_v52 = vpop.f32.mrb[8].mxu0  ;;  %v898_v55 = vpop.f32.mrb[8].mxu1 }
 0x17c   : > { %v796_v53 = vadd.f32 %v790_v52, %v677_v49  ;;  %v1645_v54 = vpop.f32.mrb[9].mxu0  ;;  %v1665_v57 = vpop.f32.mrb[9].mxu1 }
 0x17d   : > { %v793_v56 = vpop.f32.mrb[10].mxu0  ;;  %v901_v60 = vpop.f32.mrb[10].mxu1 }
 0x17e   : > { %v904_v58 = vadd.f32 %v898_v55, %v796_v53  ;;  %v1646_v59 = vpop.f32.mrb[11].mxu0  ;;  %v1666_v61 = vpop.f32.mrb[11].mxu1 }
 0x19b   : > { %v1010_v62 = vpop.f32.mrb[12].mxu0  ;;  %v1129_v2 = vpop.f32.mrb[12].mxu1 }
 0x19c   : > { %v1016_v63 = vadd.f32 %v1010_v62, %v904_v58  ;;  %v1685_v1 = vpop.f32.mrb[13].mxu0  ;;  %v1705_v4 = vpop.f32.mrb[13].mxu1 }
 0x19d   : > { %v1013_v3 = vpop.f32.mrb[14].mxu0  ;;  %v1132_v7 = vpop.f32.mrb[14].mxu1 }
 0x19e   : > { %v1135_v5 = vadd.f32 %v1129_v2, %v1016_v63  ;;  %v1686_v6 = vpop.f32.mrb[15].mxu0  ;;  %v1706_v8 = vpop.f32.mrb[15].mxu1 }
 0x1bb   : > { %v1237_v9 = vpop.f32.mrb[16].mxu0 }
 0x1bc   : > { %v1243_v11 = vadd.f32 %v1237_v9, %v1135_v5  ;;  %v1725_v12 = vpop.f32.mrb[17].mxu0 }
 0x1bd   : > { %v1240_v13 = vpop.f32.mrb[18].mxu0 }
 0x1be   : > { %v1251_v14 = vadd.f32 %v1462_v10, %v1243_v11  ;;  %v1726_v15 = vpop.f32.mrb[19].mxu0 }
 0x1c0   : > { %v1252_v16 = vmax.f32 %v1251_v14, 0.0 }
 0x1c2   : > { %v1253_v17 = vpack.c.bf16 %v1252_v16, %v1252_v16 }
 0x1c4   : > { %1254 = vst [vmem:[%s225_s25] sm:$0xf] %v1253_v17 }
 0x1c5 PF: > { %s15_s16 = sadd.s32 1, %s1969_s16   ;;  %s2240_s12 = smov %s1961_s14 }
 0x1c6   : > { %p12_p9 = scmp.ge.s32.totalorder %s15_s16, 18   ;;  %s2241_s13 = smov %s1965_s15 }
 0x1c7   : > { %s2242_s14 = smov %s2245_s18  ;;  %s2243_s15 = smov %s2249_s19 }
 0x1c8   :  { %14 = sbr.rel (!%p12_p9) target bundleno = 4 (0x4), region = 81 }
 0x1cf   :  { %1286 = vsyncpa [#allocation3], 1 }
 0x1d0   :  { %1288 = vsyncpa [#allocation3 + $0x1], 1 }
 0x1d1   :  { %1289 = vsyncpa [#allocation5], 1 }

// kernel: encoder_forward.9
= control target key start
LH: loop header
LB: loop body
LE: loop exit
PB: predicated region body
PF: predicated region fallthrough
CT: control target
= control target key end

     0   :  { %s2711_s0 = inlined_call_operand.vmem [shape: bf16[20,5,128], index: 0, kind: input, shape index: {}]   ;;  %s2712_s1 = inlined_call_operand.vmem [shape: bf16[20,5,128], index: 1, kind: input, shape index: {}]   ;;  %s2713_s2 = inlined_call_operand.hbm [shape: bf16[9,128,256], index: 2, kind: input, shape index: {}]   ;;  %s2714_s3 = inlined_call_operand.hbm [shape: f32[1,256], index: 3, kind: input, shape index: {}]   ;;  %s2715_s4 = inlined_call_operand.vmem [shape: bf16[8,4,256], index: 4, kind: output, shape index: {}]  }
   0x1   :  { %2718 = sst [smem:[#allocation10_spill]] %s2713_s2 }
   0x2   :  { %9 = vsyncpa [#allocation3], 0 }
   0x3   :  { %11 = vsyncpa [#allocation3 + $0x1], 0 }
   0x4   :  { %12 = vsyncpa [#allocation5], 0 }
   0x5   :  { %14 = vsyncpa [#allocation5 + $0x1], 0  ;;  %s2313_s15 = smov 0   ;;  %s2315_s16 = smov 0  }
   0x6   :  { %s2317_s17 = smov 0   ;;  %s2319_s18 = smov 0  }
   0x7   :  { %s2321_s19 = smov 0   ;;  %s2323_s20 = smov 0  }
   0x8   :  { %s2325_s21 = smov 0   ;;  %s2327_s22 = smov 0  }
   0x9   :  { %s2329_s23 = smov 0   ;;  %s2331_s24 = smov 0  }
   0xa LB: > { %s1465_s25 = sadd.s32 4294967295, %s2279_s24   ;;  %s32_s26 = sadd.s32 1, %s2267_s21  ;;  %s2279_s24 = sphi %s2331_s24, %s20_s24   ;;  %s2275_s23 = sphi %s2329_s23, %s2739_s23   ;;  %s2271_s22 = sphi %s2327_s22, %s2738_s22   ;;  %s2267_s21 = sphi %s2325_s21, %s2737_s21   ;;  %s2263_s20 = sphi %s2323_s20, %s2736_s20   ;;  %s2259_s19 = sphi %s2321_s19, %s2735_s19   ;;  %s2255_s18 = sphi %s2319_s18, %s2734_s18   ;;  %s2251_s17 = sphi %s2317_s17, %s2733_s17   ;;  %s2247_s16 = sphi %s2315_s16, %s2732_s16   ;;  %s2243_s15 = sphi %s2313_s15, %s2731_s15  }
   0xb   : > { %p33_p0 = scmp.ge.s32.totalorder %s32_s26, 4  ;;  %s35_s27 = sadd.s32 1, %s2271_s22 }
   0xc   : > { %s39_s28 = sadd.s32 1, %s2275_s23  ;;  %s88_s29 = sadd.s32 1, %s2251_s17 }
   0xd   : > { %s2741_s26 = smov (%p33_p0, %s32_s26), 0  ;;  %s2743_s27 = smov (!%p33_p0, %s35_s27), %s2271_s22 }
   0xe   : > { %p95_p1 = scmp.ne.s32.totalorder %s2251_s17, %s2247_s16  ;;  %p96_p2 = scmp.eq.s32.totalorder %s2279_s24, 0 }
   0xf   : > { %p37_p3 = scmp.ge.s32.totalorder %s2743_s27, 2  ;;  %p101_p4 = scmp.ne.s32.totalorder %s2247_s16, %s2243_s15 }
  0x10   : > { %p2373_p5 = por %p96_p2, %p95_p1  ;;  %p102_p6 = scmp.eq.s32.totalorder %s1465_s25, 0 }
  0x11   : > { %s2745_s27 = smov (%p37_p3, %s2743_s27), 0  ;;  %s2747_s28 = smov (!%p37_p3, %s39_s28), %s2275_s23 }
  0x12   : > { %2720 = sst [smem:[#allocation8_spill]] %s2745_s27  ;;  %p2380_p7 = por %p102_p6, %p101_p4 }
  0x13   : > { %p41_p8 = scmp.ge.s32.totalorder %s2747_s28, 2  ;;  %p1972_p9 = scmp.lt.s32.totalorder %s2279_s24, 16 }
  0x14   : > { %s2721_s5 = scalar_select %p2380_p7, 1, 0 }
  0x15   : > { %s2386_s6 = sand.u32 1, %s2251_s17   ;;  %s1471_s7 = sshll.u32 %s2275_s23, 6 }
  0x16   : > { %s2749_s28 = smov (%p41_p8, %s2747_s28), 0  ;;  %s1959_s8 = smul.u32 576, %s2386_s6 }
  0x17   : > { %2722 = sst [smem:[#allocation9_spill]] %s2749_s28  ;;  %s85_s9 = ssub.s32 %s2275_s23, %s2749_s28 }
  0x18   : > { %s2723_s2 = sld [smem:[#allocation10_spill]]  ;;  %p86_p10 = scmp.eq.s32.totalorder %s85_s9, 0 }
  0x19   : > { %s193_s13 = scalar_lea.vmem [#allocation2], %s1959_s8  ;;  %p2401_p11 = pnand %p1972_p9, %p2373_p5 }
  0x1a   : > { %s199_s14 = sshll.u32 %s193_s13, 4  ;;  %s2408_s14 = int_to_ptr.vmem [resolvable:$true] %s199_s14 }
  0x1b   : > { %s2406_s25 = scalar_select %p86_p10, %s2251_s17, %s88_s29  }
  0x1c   : > { %p2135_p0 = pneg %p2401_p11 }
  0x1e   : > { %s2397_s12 = scalar_lea.hbm %s2723_s2, %s1471_s7  ;;  %s190_s7 = scalar_lea.sflag [#allocation3], %s2386_s6 }
  0x1f   : > { %s2133_s10 = scalar_lea.hbm %s2397_s12, 9216  ;;  %s2138_s9 = scalar_lea.hbm %s2723_s2, 18432 }
  0x20   : > { %p2134_p13 = scmp.ne.s32.totalorder %s2397_s12, %s2133_s10  ;;  %p2139_p3 = scmp.lt.u32.totalorder %s2397_s12, %s2723_s2 }
  0x21   : > { %p2140_p4 = scmp.lt.u32.totalorder %s2138_s9, %s2133_s10  ;;  %p2142_p6 = scmp.lt.u32.totalorder %s2133_s10, %s2397_s12 }
  0x22   : > { %p2136_p1 = pnand %p2135_p0, %p2134_p13 }
  0x23   : > { %p2141_p5 = por %p2140_p4, %p2139_p3 }
  0x24   : > { %p2137_p2 = pneg %p2136_p1 }
  0x25   : > { %p2143_p8 = por %p2142_p6, %p2141_p5 }
  0x27   : > { %p2144_p9 = pnand %p2143_p8, %p2137_p2 }
  0x29   : > { %2147 = shalt.err (!%p2144_p9)
}
  0x2a   : > { %s2148_s29 = scalar_lea.vmem %s2408_s14, 9216  ;;  %s2281_s30 = smov [#allocation2]  }
  0x2b   : > { %p2149_p10 = scmp.ne.s32.totalorder %s2408_s14, %s2148_s29  ;;  %s2153_s8 = sshll.u32 %s2281_s30, 4  ;;  %s2154_s8 = int_to_ptr.vmem [resolvable:$false] %s2153_s8 }
  0x2c   : > { %s2155_s11 = scalar_lea.vmem %s2154_s8, 18432  ;;  %p2156_p12 = scmp.lt.s32.totalorder %s2408_s14, %s2154_s8 }
  0x2d   : > { %p2151_p13 = pnand %p2149_p10, %p2135_p0  ;;  %p2157_p3 = scmp.lt.s32.totalorder %s2155_s11, %s2148_s29 }
  0x2f   : > { %p2152_p1 = pneg %p2151_p13  ;;  %p2158_p4 = por %p2157_p3, %p2156_p12 }
  0x31   : > { %p2159_p5 = pnand %p2158_p4, %p2152_p1 }
  0x33   : > { %2162 = shalt.err (!%p2159_p5)
}
  0x34   : > { %s2282_s10 = smov 128   ;;  %s2283_s9 = smov 64  }
  0x35   : > { %s2284_s13 = smov 4   ;;  %p224_p2 = scmp.lt.s32.totalorder %s2279_s24, 17 }
  0x36   : > { %1968 = dma.hbm_to_vmem [thread:$0]  (!%p2401_p11), %s2397_s12, 9216, %s2408_s14, %s190_s7, %s2282_s10, %s2283_s9, %s2284_s13  }
  0x37   : > { %s1472_s29 = sshll.u32 %s2275_s23, 4  ;;  %p2725_p12 = scmp.ge.s32.totalorder %s2279_s24, 1 }
  0x38   : > { %s2450_s2 = scalar_lea.hbm %s2714_s3, %s1472_s29  ;;  %s212_s28 = scalar_lea.vmem [#allocation4], %s2386_s6 }
  0x39   : > { %p2443_p6 = pnand %p2725_p12, %p224_p2  ;;  %s219_s27 = sshll.u32 %s212_s28, 4  ;;  %s220_s27 = int_to_ptr.vmem [resolvable:$true] %s219_s27 }
  0x3a   : > { %s210_s12 = scalar_lea.sflag [#allocation5], %s2386_s6  ;;  %s2163_s14 = scalar_lea.hbm %s2450_s2, 16 }
  0x3b   : > { %s2726_s30 = scalar_select %p2443_p6, 1, 0 }
  0x3c   : > { %p2164_p8 = scmp.ne.s32.totalorder %s2450_s2, %s2163_s14  ;;  %s2168_s9 = scalar_lea.hbm %s2714_s3, 32 }
  0x3d   : > { %p2169_p13 = scmp.lt.u32.totalorder %s2450_s2, %s2714_s3  ;;  %p2170_p1 = scmp.lt.u32.totalorder %s2168_s9, %s2163_s14 }
  0x3e   : > { %p2166_p9 = pnand %p2164_p8, %p2135_p0  ;;  %p2172_p4 = scmp.lt.u32.totalorder %s2163_s14, %s2450_s2 }
  0x3f   : > { %p2171_p3 = por %p2170_p1, %p2169_p13 }
  0x40   : > { %p2167_p10 = pneg %p2166_p9 }
  0x41   : > { %p2173_p5 = por %p2172_p4, %p2171_p3 }
  0x43   : > { %p2174_p2 = pnand %p2173_p5, %p2167_p10 }
  0x45   : > { %2177 = shalt.err (!%p2174_p2)
}
  0x46   : > { %s2178_s28 = scalar_lea.vmem %s220_s27, 16  ;;  %s2285_s6 = smov [#allocation4]  }
  0x47   : > { %p2179_p12 = scmp.ne.s32.totalorder %s220_s27, %s2178_s28  ;;  %s2183_s8 = sshll.u32 %s2285_s6, 4  ;;  %s2184_s8 = int_to_ptr.vmem [resolvable:$false] %s2183_s8 }
  0x48   : > { %s2185_s11 = scalar_lea.vmem %s2184_s8, 32  ;;  %p2186_p7 = scmp.lt.s32.totalorder %s220_s27, %s2184_s8 }
  0x49   : > { %p2181_p8 = pnand %p2179_p12, %p2135_p0  ;;  %p2187_p6 = scmp.lt.s32.totalorder %s2185_s11, %s2178_s28 }
  0x4b   : > { %p2182_p9 = pneg %p2181_p8  ;;  %p2188_p1 = por %p2187_p6, %p2186_p7 }
  0x4d   : > { %p2189_p13 = pnand %p2188_p1, %p2182_p9 }
  0x4f   : > { %2192 = shalt.err (!%p2189_p13)
}
  0x50   : > { %1971 = dma.hbm_to_vmem [thread:$0]  (!%p2401_p11), %s2450_s2, 16, %s220_s27, %s210_s12  }
  0x51   : > { %p2727_p10 = scmp.ne.s32.totalorder %s2726_s30, 0 }
  0x52   : > { %s2476_s14 = sand.u32 (!%p2727_p10), 1, %s2247_s16   ;;  %p2728_p7 = scmp.ne.s32.totalorder (!%p2727_p10), %s2721_s5, 0 }
  0x53   : > { %228 = sbr.rel (%p2727_p10) target bundleno = 476 (0x1dc), region = 36  ;;  %s231_s10 = scalar_lea.sflag (!%p2727_p10), [#allocation3], %s2476_s14 }
  0x54   : > { %s1960_s7 = smul.u32 (!%p2727_p10), 576, %s2476_s14 }
  0x56   : > { %s2480_s9 = scalar_lea.vmem (!%p2727_p10), [#allocation2], %s1960_s7 }
  0x5a   : > { %2234 = dma.done.wait (%p2728_p7), %s231_s10, 9216  }
  0x5b   : > { %2236 = vsyncadd (%p2728_p7), %s231_s10, 4294958080  ;;  %s240_s2 = scalar_lea.sflag [#allocation5], %s2476_s14  ;;  %s242_s27 = scalar_lea.vmem [#allocation4], %s2476_s14 }
  0x5c   : > { %2238 = dma.done.wait (%p2728_p7), %s240_s2, 16  }
  0x5d   : > { %2240 = vsyncadd (%p2728_p7), %s240_s2, 4294967280  ;;  %v2286_v0 = vmov 0.0   ;;  %vm2287_vm0 = vmmov 0   ;;  %v2058_v1 = vld [vmem:[%s2480_s9 + $0x40] sm:$0xff]   ;;  %v2060_v3 = vld [vmem:[%s2480_s9 + $0x48] sm:$0xff]   ;;  %s289_s5 = smul.u32 10, %s2259_s19 }
  0x5e   : > { %1779 = vmatprep.subr.bf16.mxu0 %v2286_v0  ;;  %1799 = vmatprep.subr.bf16.mxu1 %v2286_v0  ;;  %v2059_v2 = vld [vmem:[%s2480_s9] sm:$0xff]   ;;  %v2061_v4 = vld [vmem:[%s2480_s9 + $0x8] sm:$0xff]   ;;  %v2062_v5 = vld [vmem:[%s2480_s9 + $0x50] sm:$0xff]   ;;  %s1477_s15 = sshll.u32 %s2255_s18, 1  ;;  %s1474_s7 = sshll.u32 %s2259_s19, 2 }
  0x5f   : > { %1795 = vmatprep.mubr.msk.bf16.mxu0 %vm2287_vm0, %v2286_v0  ;;  %1815 = vmatprep.mubr.msk.bf16.mxu1 %vm2287_vm0, %v2286_v0  ;;  %v2063_v6 = vld [vmem:[%s2480_s9 + $0x10] sm:$0xff]   ;;  %v2064_v7 = vld [vmem:[%s2480_s9 + $0x58] sm:$0xff]   ;;  %v2066_v9 = vld [vmem:[%s2480_s9 + $0x60] sm:$0xff]   ;;  %s291_s30 = sadd.s32 %s1477_s15, %s289_s5  ;;  %s277_s10 = sadd.s32 %s2255_s18, %s1474_s7 }
  0x60   : > { %1780 = vmatpush3.bf16.msra.mxu0 %v2058_v1  ;;  %1800 = vmatpush3.bf16.msra.mxu1 %v2059_v2  ;;  %v2065_v8 = vld [vmem:[%s2480_s9 + $0x18] sm:$0xff]   ;;  %v2067_v10 = vld [vmem:[%s2480_s9 + $0x20] sm:$0xff]   ;;  %v2068_v11 = vld [vmem:[%s2480_s9 + $0x68] sm:$0xff]   ;;  %s1478_s12 = sshll.u32 %s291_s30, 2  ;;  %p278_p11 = scmp.lt.s32.totalorder %s277_s10, 7 }
  0x61   : > { %1781 = vmatprep.subr.bf16.mxu0 %v2286_v0  ;;  %1801 = vmatprep.subr.bf16.mxu1 %v2286_v0  ;;  %v2069_v12 = vld [vmem:[%s2480_s9 + $0x28] sm:$0xff]   ;;  %v2070_v13 = vld [vmem:[%s2480_s9 + $0x70] sm:$0xff]   ;;  %s2529_s28 = scalar_lea.vmem %s2712_s1, %s1478_s12  ;;  %v2072_v15 = vld [vmem:[%s2480_s9 + $0x78] sm:$0xff]   ;;  %s2535_s11 = scalar_lea.vmem %s2711_s0, %s1478_s12 }
  0x62   : > { %v2071_v14 = vld [vmem:[%s2480_s9 + $0x30] sm:$0xff]   ;;  %v2073_v16 = vld [vmem:[%s2480_s9 + $0x38] sm:$0xff]   ;;  %v297_v17 = vld [vmem:[%s2529_s28] sm:$0x7]  ;;  %p280_p0 = scmp.lt.s32.totalorder %s2263_s20, 1  ;;  %s2751_s10 = smov (!%p278_p11, %s277_s10), 7 }
  0x63   : > { %v294_v18 = vld [vmem:[%s2535_s11] sm:$0x7]  ;;  %v2077_v21 = vld [vmem:[%s2480_s9 + $0x88] sm:$0xff]   ;;  %v2079_v23 = vld [vmem:[%s2480_s9 + $0x90] sm:$0xff]  }
  0x64   : > { %1782 = vmatpush3.bf16.msra.mxu0 %v2060_v3  ;;  %1802 = vmatpush3.bf16.msra.mxu1 %v2061_v4  ;;  %v2075_v19 = vld [vmem:[%s2480_s9 + $0x80] sm:$0xff]   ;;  %v2078_v22 = vld [vmem:[%s2480_s9 + $0xc8] sm:$0xff]   ;;  %v2080_v24 = vld [vmem:[%s2480_s9 + $0xd0] sm:$0xff]   ;;  %v1528_v29 = vcombine.low %v294_v18, %v294_v18  ;;  %s2753_s20 = smov (!%p280_p0, %s2263_s20), 1 }
  0x65   : > { %1783 = vmatprep.subr.bf16.mxu0 %v2286_v0  ;;  %1803 = vmatprep.subr.bf16.mxu1 %v2286_v0  ;;  %v2076_v20 = vld [vmem:[%s2480_s9 + $0xc0] sm:$0xff]   ;;  %v2081_v25 = vld [vmem:[%s2480_s9 + $0x98] sm:$0xff]   ;;  %v2085_v30 = vld [vmem:[%s2480_s9 + $0xa8] sm:$0xff]  }
  0x66   : > { %v2082_v26 = vld [vmem:[%s2480_s9 + $0xd8] sm:$0xff]   ;;  %v2083_v27 = vld [vmem:[%s2480_s9 + $0xa0] sm:$0xff]   ;;  %v2086_v31 = vld [vmem:[%s2480_s9 + $0xe8] sm:$0xff]   ;;  %v530_v32 = vshll.u32 %v1528_v29, 16  ;;  %v528_v35 = vshrl.u32 %v1528_v29, 16 }
  0x67   : > { %v2084_v28 = vld [vmem:[%s2480_s9 + $0xe0] sm:$0xff]   ;;  %v2087_v33 = vld [vmem:[%s2480_s9 + $0xb0] sm:$0xff]   ;;  %v2089_v37 = vld [vmem:[%s2480_s9 + $0xb8] sm:$0xff]  }
  0x68   : > { %1784 = vmatpush3.bf16.msra.mxu0 %v2062_v5  ;;  %1804 = vmatpush3.bf16.msra.mxu1 %v2063_v6  ;;  %v2088_v34 = vld [vmem:[%s2480_s9 + $0xf0] sm:$0xff]   ;;  %v532_v36 = vrot.slane %v530_v32, 1  ;;  %v2090_v38 = vld [vmem:[%s2480_s9 + $0xf8] sm:$0xff]   ;;  %v2091_v40 = vld [vmem:[%s2480_s9 + $0x100] sm:$0xff]  }
  0x69   : > { %1785 = vmatprep.subr.bf16.mxu0 %v2286_v0  ;;  %1805 = vmatprep.subr.bf16.mxu1 %v2286_v0  ;;  %v1539_v41 = vld [vmem:[%s2535_s11 + $0x4] sm:$0x7]  ;;  %v2094_v43 = vld [vmem:[%s2480_s9 + $0x108] sm:$0xff]   ;;  %v2096_v45 = vld [vmem:[%s2480_s9 + $0x110] sm:$0xff]  }
  0x6a   : > { %v533_v39 = vor.u32 %v532_v36, %v528_v35  ;;  %v2093_v42 = vld [vmem:[%s2480_s9 + $0x140] sm:$0xff]   ;;  %v2095_v44 = vld [vmem:[%s2480_s9 + $0x148] sm:$0xff]   ;;  %v2097_v46 = vld [vmem:[%s2480_s9 + $0x150] sm:$0xff]   ;;  %v1607_v51 = vcombine.low %v1539_v41, %v1539_v41 }
  0x6b   : > { %v2098_v47 = vld [vmem:[%s2480_s9 + $0x118] sm:$0xff]   ;;  %v2100_v49 = vld [vmem:[%s2480_s9 + $0x120] sm:$0xff]   ;;  %v2102_v52 = vld [vmem:[%s2480_s9 + $0x128] sm:$0xff]  }
  0x6c   : > { %1786 = vmatpush3.bf16.msra.mxu0 %v2064_v7  ;;  %1806 = vmatpush3.bf16.msra.mxu1 %v2065_v8  ;;  %v2099_v48 = vld [vmem:[%s2480_s9 + $0x158] sm:$0xff]   ;;  %v2101_v50 = vld [vmem:[%s2480_s9 + $0x160] sm:$0xff]   ;;  %v2103_v53 = vld [vmem:[%s2480_s9 + $0x168] sm:$0xff]   ;;  %v866_v54 = vshll.u32 %v1607_v51, 16  ;;  %v864_v57 = vshrl.u32 %v1607_v51, 16 }
  0x6d   : > { %1787 = vmatprep.subr.bf16.mxu0 %v2286_v0  ;;  %1807 = vmatprep.subr.bf16.mxu1 %v2286_v0  ;;  %v2104_v55 = vld [vmem:[%s2480_s9 + $0x130] sm:$0xff]   ;;  %v2106_v59 = vld [vmem:[%s2480_s9 + $0x138] sm:$0xff]   ;;  %v1542_v61 = vld [vmem:[%s2529_s28 + $0x4] sm:$0x7] }
  0x6e   : > { %v2105_v56 = vld [vmem:[%s2480_s9 + $0x170] sm:$0xff]   ;;  %v868_v58 = vrot.slane %v866_v54, 1  ;;  %v2107_v60 = vld [vmem:[%s2480_s9 + $0x178] sm:$0xff]   ;;  %v2108_v62 = vld [vmem:[%s2480_s9 + $0x180] sm:$0xff]  }
  0x6f   : > { %v2109_v1 = vld [vmem:[%s2480_s9 + $0x1c0] sm:$0xff]   ;;  %v2110_v2 = vld [vmem:[%s2480_s9 + $0x188] sm:$0xff]   ;;  %v2112_v4 = vld [vmem:[%s2480_s9 + $0x190] sm:$0xff]  }
  0x70   : > { %1788 = vmatpush3.bf16.msra.mxu0 %v2066_v9  ;;  %1808 = vmatpush3.bf16.msra.mxu1 %v2067_v10  ;;  %v869_v63 = vor.u32 %v868_v58, %v864_v57  ;;  %v2111_v3 = vld [vmem:[%s2480_s9 + $0x1c8] sm:$0xff]   ;;  %v2113_v5 = vld [vmem:[%s2480_s9 + $0x1d0] sm:$0xff]   ;;  %v2114_v6 = vld [vmem:[%s2480_s9 + $0x198] sm:$0xff]  }
  0x71   : > { %1789 = vmatprep.subr.bf16.mxu0 %v2286_v0  ;;  %1809 = vmatprep.subr.bf16.mxu1 %v2286_v0  ;;  %v2115_v7 = vld [vmem:[%s2480_s9 + $0x1d8] sm:$0xff]   ;;  %v2116_v8 = vld [vmem:[%s2480_s9 + $0x1a0] sm:$0xff]   ;;  %v2118_v10 = vld [vmem:[%s2480_s9 + $0x1a8] sm:$0xff]  }
  0x72   : > { %v2117_v9 = vld [vmem:[%s2480_s9 + $0x1e0] sm:$0xff]   ;;  %v2132_v29 = vld [vmem:[%s2480_s9 + $0x238] sm:$0xff]  }
  0x74   : > { %1790 = vmatpush3.bf16.msra.mxu0 %v2068_v11  ;;  %1810 = vmatpush3.bf16.msra.mxu1 %v2069_v12  ;;  %v2119_v11 = vld [vmem:[%s2480_s9 + $0x1e8] sm:$0xff]   ;;  %v2120_v12 = vld [vmem:[%s2480_s9 + $0x1b0] sm:$0xff]  }
  0x75   : > { %1791 = vmatprep.subr.bf16.mxu0 %v2286_v0  ;;  %1811 = vmatprep.subr.bf16.mxu1 %v2286_v0 }
  0x78   : > { %1792 = vmatpush3.bf16.msra.mxu0 %v2070_v13  ;;  %1812 = vmatpush3.bf16.msra.mxu1 %v2071_v14  ;;  %v2121_v13 = vld [vmem:[%s2480_s9 + $0x1f0] sm:$0xff]   ;;  %v2122_v14 = vld [vmem:[%s2480_s9 + $0x1b8] sm:$0xff]  }
  0x79   : > { %1793 = vmatprep.subr.bf16.mxu0 %v2286_v0  ;;  %1813 = vmatprep.subr.bf16.mxu1 %v2286_v0 }
  0x7c   : > { %1794 = vmatpush3.bf16.msra.mxu0 %v2072_v15  ;;  %1814 = vmatpush3.bf16.msra.mxu1 %v2073_v16  ;;  %v2123_v15 = vld [vmem:[%s2480_s9 + $0x1f8] sm:$0xff]   ;;  %v1618_v16 = vld [vmem:[%s2535_s11 + $0x8] sm:$0x7] }
  0x7d   : > { %1819 = vmatprep.subr.bf16.mxu0 %v2286_v0  ;;  %1839 = vmatprep.subr.bf16.mxu1 %v2286_v0 }
  0x7f   : > { %1796 = vmatmul.mubr.bf16.vlgmr.msra.gmra.mrb[0].mxu0 %v297_v17  ;;  %1816 = vmatmul.mubr.bf16.vlgmr.msra.gmra.mrb[0].mxu1 %v294_v18  ;;  %v2125_v17 = vld [vmem:[%s2480_s9 + $0x200] sm:$0xff]   ;;  %v1621_v18 = vld [vmem:[%s2529_s28 + $0x8] sm:$0x7] }
  0x80   : > { %1820 = vmatpush3.bf16.msra.mxu0 %v2075_v19  ;;  %1840 = vmatpush3.bf16.msra.mxu1 %v2076_v20  ;;  %v2126_v19 = vld [vmem:[%s2480_s9 + $0x208] sm:$0xff]   ;;  %v2127_v20 = vld [vmem:[%s2480_s9 + $0x210] sm:$0xff]  }
  0x81   : > { %1821 = vmatprep.subr.bf16.mxu0 %v2286_v0  ;;  %1841 = vmatprep.subr.bf16.mxu1 %v2286_v0 }
  0x82   : > { %1835 = vmatprep.mubr.msk.bf16.mxu0 %vm2287_vm0, %v2286_v0  ;;  %1855 = vmatprep.mubr.msk.bf16.mxu1 %vm2287_vm0, %v2286_v0 }
  0x84   : > { %1822 = vmatpush3.bf16.msra.mxu0 %v2077_v21  ;;  %1842 = vmatpush3.bf16.msra.mxu1 %v2078_v22  ;;  %v2128_v21 = vld [vmem:[%s2480_s9 + $0x218] sm:$0xff]   ;;  %v2129_v22 = vld [vmem:[%s2480_s9 + $0x220] sm:$0xff]  }
  0x85   : > { %1823 = vmatprep.subr.bf16.mxu0 %v2286_v0  ;;  %1843 = vmatprep.subr.bf16.mxu1 %v2286_v0 }
  0x88   : > { %1824 = vmatpush3.bf16.msra.mxu0 %v2079_v23  ;;  %1844 = vmatpush3.bf16.msra.mxu1 %v2080_v24  ;;  %v1686_v23 = vcombine.low %v1618_v16, %v1618_v16  ;;  %v2130_v24 = vld [vmem:[%s2480_s9 + $0x228] sm:$0xff]  }
  0x89   : > { %1825 = vmatprep.subr.bf16.mxu0 %v2286_v0  ;;  %1845 = vmatprep.subr.bf16.mxu1 %v2286_v0 }
  0x8c   : > { %1826 = vmatpush3.bf16.msra.mxu0 %v2081_v25  ;;  %1846 = vmatpush3.bf16.msra.mxu1 %v2082_v26  ;;  %v1202_v25 = vshll.u32 %v1686_v23, 16  ;;  %v2131_v26 = vld [vmem:[%s2480_s9 + $0x230] sm:$0xff]   ;;  %s1475_s9 = sshll.u32 %s2751_s10, 1 }
  0x8d   : > { %1827 = vmatprep.subr.bf16.mxu0 %v2286_v0  ;;  %1847 = vmatprep.subr.bf16.mxu1 %v2286_v0  ;;  %s283_s2 = sadd.s32 %s1475_s9, %s2753_s20 }
  0x8e   : > { %s1476_s5 = sshll.u32 %s283_s2, 1 }
  0x8f   : > { %s285_s18 = scalar_lea.vmem %s2715_s4, %s1476_s5 }
  0x90   : > { %1828 = vmatpush3.bf16.msra.mxu0 %v2083_v27  ;;  %1848 = vmatpush3.bf16.msra.mxu1 %v2084_v28  ;;  %v1200_v27 = vshrl.u32 %v1686_v23, 16  ;;  %v1204_v28 = vrot.slane %v1202_v25, 1 }
  0x91   : > { %1829 = vmatprep.subr.bf16.mxu0 %v2286_v0  ;;  %1849 = vmatprep.subr.bf16.mxu1 %v2286_v0 }
  0x94   : > { %1830 = vmatpush3.bf16.msra.mxu0 %v2085_v30  ;;  %1850 = vmatpush3.bf16.msra.mxu1 %v2086_v31  ;;  %v1205_v30 = vor.u32 %v1204_v28, %v1200_v27 }
  0x95   : > { %1831 = vmatprep.subr.bf16.mxu0 %v2286_v0  ;;  %1851 = vmatprep.subr.bf16.mxu1 %v2286_v0 }
  0x98   : > { %1832 = vmatpush3.bf16.msra.mxu0 %v2087_v33  ;;  %1852 = vmatpush3.bf16.msra.mxu1 %v2088_v34 }
  0x99   : > { %1833 = vmatprep.subr.bf16.mxu0 %v2286_v0  ;;  %1853 = vmatprep.subr.bf16.mxu1 %v2286_v0 }
  0x9c   : > { %1834 = vmatpush3.bf16.msra.mxu0 %v2089_v37  ;;  %1854 = vmatpush3.bf16.msra.mxu1 %v2090_v38 }
  0x9d   : > { %1859 = vmatprep.subr.bf16.mxu0 %v2286_v0  ;;  %1879 = vmatprep.subr.bf16.mxu1 %v2286_v0 }
  0x9f   : > { %1836 = vmatmul.mubr.bf16.vlgmr.msra.gmra.mrb[4].mxu0 %v533_v39  ;;  %1856 = vmatmul.mubr.bf16.vlgmr.msra.gmra.mrb[4].mxu1 %v1539_v41 }
  0xa0   : > { %1860 = vmatpush3.bf16.msra.mxu0 %v2091_v40  ;;  %1880 = vmatpush3.bf16.msra.mxu1 %v2093_v42 }
  0xa1   : > { %1861 = vmatprep.subr.bf16.mxu0 %v2286_v0  ;;  %1881 = vmatprep.subr.bf16.mxu1 %v2286_v0 }
  0xa2   : > { %1875 = vmatprep.mubr.msk.bf16.mxu0 %vm2287_vm0, %v2286_v0  ;;  %1895 = vmatprep.mubr.msk.bf16.mxu1 %vm2287_vm0, %v2286_v0 }
  0xa4   : > { %1862 = vmatpush3.bf16.msra.mxu0 %v2094_v43  ;;  %1882 = vmatpush3.bf16.msra.mxu1 %v2095_v44 }
  0xa5   : > { %1863 = vmatprep.subr.bf16.mxu0 %v2286_v0  ;;  %1883 = vmatprep.subr.bf16.mxu1 %v2286_v0 }
  0xa8   : > { %1864 = vmatpush3.bf16.msra.mxu0 %v2096_v45  ;;  %1884 = vmatpush3.bf16.msra.mxu1 %v2097_v46 }
  0xa9   : > { %1865 = vmatprep.subr.bf16.mxu0 %v2286_v0  ;;  %1885 = vmatprep.subr.bf16.mxu1 %v2286_v0 }
  0xac   : > { %1866 = vmatpush3.bf16.msra.mxu0 %v2098_v47  ;;  %1886 = vmatpush3.bf16.msra.mxu1 %v2099_v48 }
  0xad   : > { %1867 = vmatprep.subr.bf16.mxu0 %v2286_v0  ;;  %1887 = vmatprep.subr.bf16.mxu1 %v2286_v0 }
  0xb0   : > { %1868 = vmatpush3.bf16.msra.mxu0 %v2100_v49  ;;  %1888 = vmatpush3.bf16.msra.mxu1 %v2101_v50 }
  0xb1   : > { %1869 = vmatprep.subr.bf16.mxu0 %v2286_v0  ;;  %1889 = vmatprep.subr.bf16.mxu1 %v2286_v0 }
  0xb4   : > { %1870 = vmatpush3.bf16.msra.mxu0 %v2102_v52  ;;  %1890 = vmatpush3.bf16.msra.mxu1 %v2103_v53 }
  0xb5   : > { %1871 = vmatprep.subr.bf16.mxu0 %v2286_v0  ;;  %1891 = vmatprep.subr.bf16.mxu1 %v2286_v0 }
  0xb8   : > { %1872 = vmatpush3.bf16.msra.mxu0 %v2104_v55  ;;  %1892 = vmatpush3.bf16.msra.mxu1 %v2105_v56 }
  0xb9   : > { %1873 = vmatprep.subr.bf16.mxu0 %v2286_v0  ;;  %1893 = vmatprep.subr.bf16.mxu1 %v2286_v0 }
  0xbc   : > { %1874 = vmatpush3.bf16.msra.mxu0 %v2106_v59  ;;  %1894 = vmatpush3.bf16.msra.mxu1 %v2107_v60 }
  0xbd   : > { %1899 = vmatprep.subr.bf16.mxu0 %v2286_v0  ;;  %1919 = vmatprep.subr.bf16.mxu1 %v2286_v0 }
  0xbf   : > { %1876 = vmatmul.mubr.bf16.vlgmr.msra.gmra.mrb[8].mxu0 %v1542_v61  ;;  %1896 = vmatmul.mubr.bf16.vlgmr.msra.gmra.mrb[8].mxu1 %v869_v63 }
  0xc0   : > { %1900 = vmatpush3.bf16.msra.mxu0 %v2108_v62  ;;  %1920 = vmatpush3.bf16.msra.mxu1 %v2109_v1 }
  0xc1   : > { %1901 = vmatprep.subr.bf16.mxu0 %v2286_v0  ;;  %1921 = vmatprep.subr.bf16.mxu1 %v2286_v0 }
  0xc2   : > { %1915 = vmatprep.mubr.msk.bf16.mxu0 %vm2287_vm0, %v2286_v0  ;;  %1935 = vmatprep.mubr.msk.bf16.mxu1 %vm2287_vm0, %v2286_v0 }
  0xc4   : > { %1902 = vmatpush3.bf16.msra.mxu0 %v2110_v2  ;;  %1922 = vmatpush3.bf16.msra.mxu1 %v2111_v3 }
  0xc5   : > { %1903 = vmatprep.subr.bf16.mxu0 %v2286_v0  ;;  %1923 = vmatprep.subr.bf16.mxu1 %v2286_v0 }
  0xc8   : > { %1904 = vmatpush3.bf16.msra.mxu0 %v2112_v4  ;;  %1924 = vmatpush3.bf16.msra.mxu1 %v2113_v5 }
  0xc9   : > { %1905 = vmatprep.subr.bf16.mxu0 %v2286_v0  ;;  %1925 = vmatprep.subr.bf16.mxu1 %v2286_v0 }
  0xcc   : > { %1906 = vmatpush3.bf16.msra.mxu0 %v2114_v6  ;;  %1926 = vmatpush3.bf16.msra.mxu1 %v2115_v7  ;;  %v1695_v7 = vld [vmem:[%s242_s27] ss:$0 sm:$0xff] }
  0xcd   : > { %1907 = vmatprep.subr.bf16.mxu0 %v2286_v0  ;;  %1927 = vmatprep.subr.bf16.mxu1 %v2286_v0 }
  0xd0   : > { %1908 = vmatpush3.bf16.msra.mxu0 %v2116_v8  ;;  %1928 = vmatpush3.bf16.msra.mxu1 %v2117_v9 }
  0xd1   : > { %1909 = vmatprep.subr.bf16.mxu0 %v2286_v0  ;;  %1929 = vmatprep.subr.bf16.mxu1 %v2286_v0 }
  0xd4   : > { %1910 = vmatpush3.bf16.msra.mxu0 %v2118_v10  ;;  %1930 = vmatpush3.bf16.msra.mxu1 %v2119_v11 }
  0xd5   : > { %1911 = vmatprep.subr.bf16.mxu0 %v2286_v0  ;;  %1931 = vmatprep.subr.bf16.mxu1 %v2286_v0 }
  0xd8   : > { %1912 = vmatpush3.bf16.msra.mxu0 %v2120_v12  ;;  %1932 = vmatpush3.bf16.msra.mxu1 %v2121_v13 }
  0xd9   : > { %1913 = vmatprep.subr.bf16.mxu0 %v2286_v0  ;;  %1933 = vmatprep.subr.bf16.mxu1 %v2286_v0 }
  0xdc   : > { %1914 = vmatpush3.bf16.msra.mxu0 %v2122_v14  ;;  %1934 = vmatpush3.bf16.msra.mxu1 %v2123_v15 }
  0xdd   : > { %1939 = vmatprep.subr.bf16.mxu0 %v2286_v0 }
  0xdf   : > { %1916 = vmatmul.mubr.bf16.vlgmr.msra.gmra.mrb[12].mxu0 %v1618_v16  ;;  %1936 = vmatmul.mubr.bf16.vlgmr.msra.gmra.mrb[12].mxu1 %v1621_v18 }
  0xe0   : > { %1940 = vmatpush3.bf16.msra.mxu0 %v2125_v17  ;;  %1955 = vmatprep.mubr.msk.bf16.mxu0 %vm2287_vm0, %v2286_v0 }
  0xe1   : > { %1941 = vmatprep.subr.bf16.mxu0 %v2286_v0 }
  0xe4   : > { %1942 = vmatpush3.bf16.msra.mxu0 %v2126_v19 }
  0xe5   : > { %1943 = vmatprep.subr.bf16.mxu0 %v2286_v0 }
  0xe8   : > { %1944 = vmatpush3.bf16.msra.mxu0 %v2127_v20 }
  0xe9   : > { %1945 = vmatprep.subr.bf16.mxu0 %v2286_v0 }
  0xec   : > { %1946 = vmatpush3.bf16.msra.mxu0 %v2128_v21 }
  0xed   : > { %1947 = vmatprep.subr.bf16.mxu0 %v2286_v0 }
  0xf0   : > { %1948 = vmatpush3.bf16.msra.mxu0 %v2129_v22 }
  0xf1   : > { %1949 = vmatprep.subr.bf16.mxu0 %v2286_v0 }
  0xf4   : > { %1950 = vmatpush3.bf16.msra.mxu0 %v2130_v24 }
  0xf5   : > { %1951 = vmatprep.subr.bf16.mxu0 %v2286_v0 }
  0xf8   : > { %1952 = vmatpush3.bf16.msra.mxu0 %v2131_v26 }
  0xf9   : > { %1953 = vmatprep.subr.bf16.mxu0 %v2286_v0 }
  0xfc   : > { %1954 = vmatpush3.bf16.msra.mxu0 %v2132_v29 }
  0xff   : > { %1956 = vmatmul.mubr.bf16.vlgmr.msra.gmra.mrb[16].mxu0 %v1205_v30 }
 0x152   : > { %v413_v31 = vpop.f32.mrb[0].mxu0  ;;  %v501_v33 = vpop.f32.mrb[0].mxu1 }
 0x153   : > { %v1797_v32 = vpop.f32.mrb[1].mxu0  ;;  %v502_v34 = vadd.f32 %v501_v33, %v413_v31  ;;  %v1817_v36 = vpop.f32.mrb[1].mxu1 }
 0x154   : > { %v416_v35 = vpop.f32.mrb[2].mxu0  ;;  %v504_v38 = vpop.f32.mrb[2].mxu1 }
 0x155   : > { %v1798_v37 = vpop.f32.mrb[3].mxu0  ;;  %v1818_v39 = vpop.f32.mrb[3].mxu1 }
 0x172   : > { %v617_v40 = vpop.f32.mrb[4].mxu0  ;;  %v730_v43 = vpop.f32.mrb[4].mxu1 }
 0x173   : > { %v623_v41 = vadd.f32 %v617_v40, %v502_v34  ;;  %v1837_v42 = vpop.f32.mrb[5].mxu0  ;;  %v1857_v45 = vpop.f32.mrb[5].mxu1 }
 0x174   : > { %v620_v44 = vpop.f32.mrb[6].mxu0  ;;  %v733_v47 = vpop.f32.mrb[6].mxu1 }
 0x175   : > { %v736_v46 = vadd.f32 %v730_v43, %v623_v41  ;;  %v1838_v0 = vpop.f32.mrb[7].mxu0  ;;  %v1858_v48 = vpop.f32.mrb[7].mxu1 }
 0x192   : > { %v836_v49 = vpop.f32.mrb[8].mxu0  ;;  %v953_v52 = vpop.f32.mrb[8].mxu1 }
 0x193   : > { %v842_v50 = vadd.f32 %v836_v49, %v736_v46  ;;  %v1877_v51 = vpop.f32.mrb[9].mxu0  ;;  %v1897_v54 = vpop.f32.mrb[9].mxu1 }
 0x194   : > { %v839_v53 = vpop.f32.mrb[10].mxu0  ;;  %v956_v57 = vpop.f32.mrb[10].mxu1 }
 0x195   : > { %v959_v55 = vadd.f32 %v953_v52, %v842_v50  ;;  %v1878_v56 = vpop.f32.mrb[11].mxu0  ;;  %v1898_v58 = vpop.f32.mrb[11].mxu1 }
 0x1b2   : > { %v1066_v59 = vpop.f32.mrb[12].mxu0  ;;  %v1172_v62 = vpop.f32.mrb[12].mxu1 }
 0x1b3   : > { %v1072_v60 = vadd.f32 %v1066_v59, %v959_v55  ;;  %v1917_v61 = vpop.f32.mrb[13].mxu0  ;;  %v1937_v1 = vpop.f32.mrb[13].mxu1 }
 0x1b4   : > { %v1069_v63 = vpop.f32.mrb[14].mxu0  ;;  %v1175_v4 = vpop.f32.mrb[14].mxu1 }
 0x1b5   : > { %v1178_v2 = vadd.f32 %v1172_v62, %v1072_v60  ;;  %v1918_v3 = vpop.f32.mrb[15].mxu0  ;;  %v1938_v5 = vpop.f32.mrb[15].mxu1 }
 0x1d2   : > { %v1289_v6 = vpop.f32.mrb[16].mxu0 }
 0x1d3   : > { %v1295_v8 = vadd.f32 %v1289_v6, %v1178_v2  ;;  %v1957_v9 = vpop.f32.mrb[17].mxu0 }
 0x1d4   : > { %v1292_v10 = vpop.f32.mrb[18].mxu0 }
 0x1d5   : > { %v1303_v11 = vadd.f32 %v1695_v7, %v1295_v8  ;;  %v1958_v12 = vpop.f32.mrb[19].mxu0 }
 0x1d7   : > { %v1304_v13 = vmax.f32 %v1303_v11, 0.0 }
 0x1d9   : > { %v1305_v14 = vpack.c.bf16 %v1304_v13, %v1304_v13 }
 0x1db   : > { %1306 = vst [vmem:[%s285_s18] sm:$0x3] %v1305_v14 }
 0x1dc PF: > { %s20_s24 = sadd.s32 1, %s2279_s24   ;;  %s2729_s14 = sld [smem:[#allocation8_spill]] }
 0x1dd   : > { %p17_p6 = scmp.ge.s32.totalorder %s20_s24, 18   ;;  %s2730_s27 = sld [smem:[#allocation9_spill]] }
 0x1de   : > { %s2731_s15 = smov %s2247_s16  ;;  %s2732_s16 = smov %s2251_s17 }
 0x1df   : > { %s2733_s17 = smov %s2406_s25  ;;  %s2734_s18 = smov %s2267_s21 }
 0x1e0   : > { %s2735_s19 = smov %s2271_s22  ;;  %s2736_s20 = smov %s2275_s23 }
 0x1e1   : > { %s2737_s21 = smov %s2741_s26  ;;  %19 = sbr.rel (!%p17_p6) target bundleno = 10 (0xa), region = 103 }
 0x1e2   : > { %s2738_s22 = smov %s2729_s14 }
 0x1e3   : > { %s2739_s23 = smov %s2730_s27 }
 0x1e8   :  { %1340 = vsyncpa [#allocation3], 1 }
 0x1e9   :  { %1342 = vsyncpa [#allocation3 + $0x1], 1 }
 0x1ea   :  { %1343 = vsyncpa [#allocation5], 1 }
 0x1eb   :  { %1345 = vsyncpa [#allocation5 + $0x1], 1 }

// kernel: encoder_forward.10
= control target key start
LH: loop header
LB: loop body
LE: loop exit
PB: predicated region body
PF: predicated region fallthrough
CT: control target
= control target key end

     0   :  { %s3465_s0 = inlined_call_operand.vmem [shape: bf16[12,6,256], index: 0, kind: input, shape index: {}]   ;;  %s3466_s1 = inlined_call_operand.hbm [shape: bf16[9,256,512], index: 1, kind: input, shape index: {}]   ;;  %s3467_s2 = inlined_call_operand.hbm [shape: f32[1,512], index: 2, kind: input, shape index: {}]   ;;  %s3468_s3 = inlined_call_operand.vmem [shape: bf16[8,4,512], index: 3, kind: output, shape index: {}]  }
   0x1   :  { %3471 = sst [smem:[#allocation9_spill]] %s3466_s1 }
   0x2   :  { %8 = vsyncpa [#allocation3], 0 }
   0x3   :  { %10 = vsyncpa [#allocation3 + $0x1], 0 }
   0x4   :  { %11 = vsyncpa [#allocation5], 0 }
   0x5   :  { %13 = vsyncpa [#allocation5 + $0x1], 0  ;;  %s3081_s12 = smov 0   ;;  %s3083_s13 = smov 0  }
   0x6   :  { %s3085_s14 = smov 0   ;;  %s3087_s15 = smov 0  }
   0x7   :  { %s3089_s16 = smov 0   ;;  %s3091_s17 = smov 0  }
   0x8   :  { %s3093_s18 = smov 0   ;;  %s3095_s19 = smov 0  }
   0x9   :  { %s3097_s20 = smov 0   ;;  %s3099_s21 = smov 0  }
   0xa LB: > { %s2035_s22 = sadd.s32 4294967295, %s3054_s21   ;;  %s31_s23 = sadd.s32 1, %s3042_s18  ;;  %s3054_s21 = sphi %s3099_s21, %s19_s21   ;;  %s3050_s20 = sphi %s3097_s20, %s3491_s20   ;;  %s3046_s19 = sphi %s3095_s19, %s3490_s19   ;;  %s3042_s18 = sphi %s3093_s18, %s3489_s18   ;;  %s3038_s17 = sphi %s3091_s17, %s3488_s17   ;;  %s3034_s16 = sphi %s3089_s16, %s3487_s16   ;;  %s3030_s15 = sphi %s3087_s15, %s3486_s15   ;;  %s3026_s14 = sphi %s3085_s14, %s3485_s14   ;;  %s3022_s13 = sphi %s3083_s13, %s3484_s13   ;;  %s3018_s12 = sphi %s3081_s12, %s3483_s12  }
   0xb   : > { %p32_p0 = scmp.ge.s32.totalorder %s31_s23, 4  ;;  %s34_s24 = sadd.s32 1, %s3046_s19 }
   0xc   : > { %s38_s25 = sadd.s32 1, %s3050_s20  ;;  %s66_s26 = sadd.s32 1, %s3026_s14 }
   0xd   : > { %s3493_s23 = smov (%p32_p0, %s31_s23), 0  ;;  %s3495_s24 = smov (!%p32_p0, %s34_s24), %s3046_s19 }
   0xe   : > { %p73_p1 = scmp.ne.s32.totalorder %s3026_s14, %s3022_s13  ;;  %p74_p2 = scmp.eq.s32.totalorder %s3054_s21, 0 }
   0xf   : > { %p36_p3 = scmp.ge.s32.totalorder %s3495_s24, 2  ;;  %p79_p4 = scmp.ne.s32.totalorder %s3022_s13, %s3018_s12 }
  0x10   : > { %p3141_p5 = por %p74_p2, %p73_p1  ;;  %p80_p6 = scmp.eq.s32.totalorder %s2035_s22, 0 }
  0x11   : > { %s3497_s24 = smov (%p36_p3, %s3495_s24), 0  ;;  %s3499_s25 = smov (!%p36_p3, %s38_s25), %s3050_s20 }
  0x12   : > { %p3148_p7 = por %p80_p6, %p79_p4  ;;  %p40_p8 = scmp.ge.s32.totalorder %s3499_s25, 4 }
  0x13   : > { %p2674_p9 = scmp.lt.s32.totalorder %s3054_s21, 32  ;;  %s3154_s29 = sand.u32 1, %s3026_s14  }
  0x14   : > { %s3473_s28 = scalar_select %p3148_p7, 1, 0 }
  0x15   : > { %s2041_s30 = sshll.u32 %s3050_s20, 6  ;;  %s3501_s25 = smov (%p40_p8, %s3499_s25), 0 }
  0x16   : > { %3474 = sst [smem:[#allocation8_spill]] %s3501_s25  ;;  %s2661_s4 = smul.u32 1152, %s3154_s29 }
  0x17   : > { %s63_s5 = ssub.s32 %s3050_s20, %s3501_s25  ;;  %s3475_s1 = sld [smem:[#allocation9_spill]] }
  0x18   : > { %p64_p10 = scmp.eq.s32.totalorder %s63_s5, 0  ;;  %s168_s9 = scalar_lea.vmem [#allocation2], %s2661_s4 }
  0x19   : > { %s174_s10 = sshll.u32 %s168_s9, 4  ;;  %p3169_p11 = pnand %p2674_p9, %p3141_p5  ;;  %s3176_s10 = int_to_ptr.vmem [resolvable:$true] %s174_s10 }
  0x1a   : > { %s3174_s12 = scalar_select %p64_p10, %s3026_s14, %s66_s26  }
  0x1b   : > { %s165_s22 = scalar_lea.sflag [#allocation3], %s3154_s29  ;;  %p2910_p0 = pneg %p3169_p11 }
  0x1d   : > { %s3165_s8 = scalar_lea.hbm %s3475_s1, %s2041_s30  ;;  %s2913_s5 = scalar_lea.hbm %s3475_s1, 73728 }
  0x1e   : > { %s2908_s30 = scalar_lea.hbm %s3165_s8, 18432  ;;  %p2914_p3 = scmp.lt.u32.totalorder %s3165_s8, %s3475_s1 }
  0x1f   : > { %p2909_p13 = scmp.ne.s32.totalorder %s3165_s8, %s2908_s30  ;;  %p2915_p4 = scmp.lt.u32.totalorder %s2913_s5, %s2908_s30 }
  0x20   : > { %p2917_p6 = scmp.lt.u32.totalorder %s2908_s30, %s3165_s8 }
  0x21   : > { %p2911_p1 = pnand %p2910_p0, %p2909_p13  ;;  %p2916_p5 = por %p2915_p4, %p2914_p3 }
  0x23   : > { %p2912_p2 = pneg %p2911_p1  ;;  %p2918_p8 = por %p2917_p6, %p2916_p5 }
  0x25   : > { %p2919_p9 = pnand %p2918_p8, %p2912_p2 }
  0x27   : > { %2922 = shalt.err (!%p2919_p9)
}
  0x28   : > { %s2923_s26 = scalar_lea.vmem %s3176_s10, 18432  ;;  %s3056_s9 = smov [#allocation2]  }
  0x29   : > { %p2924_p10 = scmp.ne.s32.totalorder %s3176_s10, %s2923_s26  ;;  %s2928_s27 = sshll.u32 %s3056_s9, 4  ;;  %s2929_s27 = int_to_ptr.vmem [resolvable:$false] %s2928_s27 }
  0x2a   : > { %s2930_s4 = scalar_lea.vmem %s2929_s27, 36864  ;;  %p2931_p12 = scmp.lt.s32.totalorder %s3176_s10, %s2929_s27 }
  0x2b   : > { %p2926_p13 = pnand %p2924_p10, %p2910_p0  ;;  %p2932_p3 = scmp.lt.s32.totalorder %s2930_s4, %s2923_s26 }
  0x2d   : > { %p2927_p1 = pneg %p2926_p13  ;;  %p2933_p4 = por %p2932_p3, %p2931_p12 }
  0x2f   : > { %p2934_p5 = pnand %p2933_p4, %p2927_p1 }
  0x31   : > { %2937 = shalt.err (!%p2934_p5)
}
  0x32   : > { %s3057_s30 = smov 256   ;;  %s3058_s5 = smov 64  }
  0x33   : > { %s3059_s6 = smov 4   ;;  %p199_p2 = scmp.lt.s32.totalorder %s3054_s21, 33 }
  0x34   : > { %2670 = dma.hbm_to_vmem [thread:$0]  (!%p3169_p11), %s3165_s8, 18432, %s3176_s10, %s165_s22, %s3057_s30, %s3058_s5, %s3059_s6  }
  0x35   : > { %s2042_s7 = sshll.u32 %s3050_s20, 4  ;;  %p3477_p12 = scmp.ge.s32.totalorder %s3054_s21, 1 }
  0x36   : > { %s3218_s4 = scalar_lea.hbm %s3467_s2, %s2042_s7  ;;  %s187_s1 = scalar_lea.vmem [#allocation4], %s3154_s29 }
  0x37   : > { %p3211_p6 = pnand %p3477_p12, %p199_p2  ;;  %s194_s25 = sshll.u32 %s187_s1, 4  ;;  %s195_s25 = int_to_ptr.vmem [resolvable:$true] %s194_s25 }
  0x38   : > { %s185_s8 = scalar_lea.sflag [#allocation5], %s3154_s29  ;;  %s2938_s10 = scalar_lea.hbm %s3218_s4, 16 }
  0x39   : > { %s3478_s26 = scalar_select %p3211_p6, 1, 0 }
  0x3a   : > { %p2939_p8 = scmp.ne.s32.totalorder %s3218_s4, %s2938_s10  ;;  %s2943_s5 = scalar_lea.hbm %s3467_s2, 64 }
  0x3b   : > { %p2944_p13 = scmp.lt.u32.totalorder %s3218_s4, %s3467_s2  ;;  %p2945_p1 = scmp.lt.u32.totalorder %s2943_s5, %s2938_s10 }
  0x3c   : > { %p2941_p9 = pnand %p2939_p8, %p2910_p0  ;;  %p2947_p4 = scmp.lt.u32.totalorder %s2938_s10, %s3218_s4 }
  0x3d   : > { %p2946_p3 = por %p2945_p1, %p2944_p13 }
  0x3e   : > { %p2942_p10 = pneg %p2941_p9 }
  0x3f   : > { %p2948_p5 = por %p2947_p4, %p2946_p3 }
  0x41   : > { %p2949_p2 = pnand %p2948_p5, %p2942_p10 }
  0x43   : > { %2952 = shalt.err (!%p2949_p2)
}
  0x44   : > { %s2953_s1 = scalar_lea.vmem %s195_s25, 16  ;;  %s3060_s29 = smov [#allocation4]  }
  0x45   : > { %p2954_p12 = scmp.ne.s32.totalorder %s195_s25, %s2953_s1  ;;  %s2958_s9 = sshll.u32 %s3060_s29, 4  ;;  %s2959_s9 = int_to_ptr.vmem [resolvable:$false] %s2958_s9 }
  0x46   : > { %s2960_s27 = scalar_lea.vmem %s2959_s9, 32  ;;  %p2961_p7 = scmp.lt.s32.totalorder %s195_s25, %s2959_s9 }
  0x47   : > { %p2956_p8 = pnand %p2954_p12, %p2910_p0  ;;  %p2962_p6 = scmp.lt.s32.totalorder %s2960_s27, %s2953_s1 }
  0x49   : > { %p2957_p9 = pneg %p2956_p8  ;;  %p2963_p1 = por %p2962_p6, %p2961_p7 }
  0x4b   : > { %p2964_p13 = pnand %p2963_p1, %p2957_p9 }
  0x4d   : > { %2967 = shalt.err (!%p2964_p13)
}
  0x4e   : > { %2673 = dma.hbm_to_vmem [thread:$0]  (!%p3169_p11), %s3218_s4, 16, %s195_s25, %s185_s8  }
  0x4f   : > { %p3479_p10 = scmp.ne.s32.totalorder %s3478_s26, 0 }
  0x50   : > { %s3244_s10 = sand.u32 (!%p3479_p10), 1, %s3022_s13   ;;  %p3480_p7 = scmp.ne.s32.totalorder (!%p3479_p10), %s3473_s28, 0 }
  0x51   : > { %203 = sbr.rel (%p3479_p10) target bundleno = 477 (0x1dd), region = 32  ;;  %s206_s30 = scalar_lea.sflag (!%p3479_p10), [#allocation3], %s3244_s10 }
  0x52   : > { %s2662_s22 = smul.u32 (!%p3479_p10), 1152, %s3244_s10 }
  0x54   : > { %s3248_s5 = scalar_lea.vmem (!%p3479_p10), [#allocation2], %s2662_s22 }
  0x58   : > { %3009 = dma.done.wait (%p3480_p7), %s206_s30, 18432  }
  0x59   : > { %3011 = vsyncadd (%p3480_p7), %s206_s30, 4294948864  ;;  %s215_s25 = scalar_lea.sflag [#allocation5], %s3244_s10  ;;  %s217_s11 = scalar_lea.vmem [#allocation4], %s3244_s10 }
  0x5a   : > { %3013 = dma.done.wait (%p3480_p7), %s215_s25, 16  }
  0x5b   : > { %3015 = vsyncadd (%p3480_p7), %s215_s25, 4294967280  ;;  %v2758_v0 = vld [vmem:[%s3248_s5 + $0xc0] sm:$0xff]   ;;  %v2762_v4 = vld [vmem:[%s3248_s5 + $0xc8] sm:$0xff]   ;;  %s262_s28 = smul.u32 6, %s3034_s16  ;;  %s2044_s1 = sshll.u32 %s3034_s16, 2 }
  0x5c   : > { %v2759_v1 = vld [vmem:[%s3248_s5 + $0x40] sm:$0xff]   ;;  %2463 = vmatprep.subr.bf16.mxu0 %v2758_v0  ;;  %v2763_v5 = vld [vmem:[%s3248_s5 + $0x48] sm:$0xff]   ;;  %v2766_v8 = vld [vmem:[%s3248_s5 + $0xd0] sm:$0xff]   ;;  %s250_s29 = sadd.s32 %s3030_s15, %s2044_s1  ;;  %p253_p0 = scmp.lt.s32.totalorder %s3038_s17, 3 }
  0x5d   : > { %v2760_v2 = vld [vmem:[%s3248_s5 + $0x80] sm:$0xff]   ;;  %2485 = vmatprep.subr.bf16.mxu1 %v2759_v1  ;;  %v2764_v6 = vld [vmem:[%s3248_s5 + $0x88] sm:$0xff]   ;;  %v2767_v9 = vld [vmem:[%s3248_s5 + $0x50] sm:$0xff]   ;;  %s263_s26 = sadd.s32 %s3030_s15, %s262_s28  ;;  %p251_p11 = scmp.lt.s32.totalorder %s250_s29, 7 }
  0x5e   : > { %v2761_v3 = vld [vmem:[%s3248_s5] sm:$0xff]   ;;  %2464 = vmatpush3.bf16.msra.mxu0 %v2760_v2  ;;  %v2765_v7 = vld [vmem:[%s3248_s5 + $0x8] sm:$0xff]   ;;  %v2768_v10 = vld [vmem:[%s3248_s5 + $0x90] sm:$0xff]   ;;  %s2462_s4 = sshll.u32 %s263_s26, 3  ;;  %s3505_s17 = smov (!%p253_p0, %s3038_s17), 3 }
  0x5f   : > { %2486 = vmatpush3.bf16.msra.mxu1 %v2761_v3  ;;  %2465 = vmatprep.subr.bf16.mxu0 %v2762_v4  ;;  %v2769_v11 = vld [vmem:[%s3248_s5 + $0x10] sm:$0xff]   ;;  %v2770_v12 = vld [vmem:[%s3248_s5 + $0xd8] sm:$0xff]   ;;  %v2774_v16 = vld [vmem:[%s3248_s5 + $0xe0] sm:$0xff]   ;;  %s3295_s7 = scalar_lea.vmem %s3465_s0, %s2462_s4  ;;  %s3503_s29 = smov (!%p251_p11, %s250_s29), 7 }
  0x60   : > { %2487 = vmatprep.subr.bf16.mxu1 %v2763_v5  ;;  %v2771_v13 = vld [vmem:[%s3248_s5 + $0x58] sm:$0xff]   ;;  %v2775_v17 = vld [vmem:[%s3248_s5 + $0x60] sm:$0xff]   ;;  %v2778_v20 = vld [vmem:[%s3248_s5 + $0xe8] sm:$0xff]   ;;  %s2045_s9 = sshll.u32 %s3503_s29, 2 }
  0x61   : > { %v2772_v14 = vld [vmem:[%s3248_s5 + $0x98] sm:$0xff]   ;;  %v2776_v18 = vld [vmem:[%s3248_s5 + $0xa0] sm:$0xff]   ;;  %v2779_v21 = vld [vmem:[%s3248_s5 + $0x68] sm:$0xff]   ;;  %s256_s27 = sadd.s32 %s2045_s9, %s3505_s17 }
  0x62   : > { %2466 = vmatpush3.bf16.msra.mxu0 %v2764_v6  ;;  %v2773_v15 = vld [vmem:[%s3248_s5 + $0x18] sm:$0xff]   ;;  %v2777_v19 = vld [vmem:[%s3248_s5 + $0x20] sm:$0xff]   ;;  %v2780_v22 = vld [vmem:[%s3248_s5 + $0xa8] sm:$0xff]   ;;  %s2046_s22 = sshll.u32 %s256_s27, 1 }
  0x63   : > { %2488 = vmatpush3.bf16.msra.mxu1 %v2765_v7  ;;  %2467 = vmatprep.subr.bf16.mxu0 %v2766_v8  ;;  %v2781_v23 = vld [vmem:[%s3248_s5 + $0x28] sm:$0xff]   ;;  %v2782_v24 = vld [vmem:[%s3248_s5 + $0xf0] sm:$0xff]   ;;  %v2786_v28 = vld [vmem:[%s3248_s5 + $0xf8] sm:$0xff]   ;;  %s258_s15 = scalar_lea.vmem %s3468_s3, %s2046_s22 }
  0x64   : > { %2489 = vmatprep.subr.bf16.mxu1 %v2767_v9  ;;  %v2783_v25 = vld [vmem:[%s3248_s5 + $0x70] sm:$0xff]   ;;  %v2787_v29 = vld [vmem:[%s3248_s5 + $0x78] sm:$0xff]   ;;  %v267_v32 = vld [vmem:[%s3295_s7] sm:$0x77] }
  0x65   : > { %v2784_v26 = vld [vmem:[%s3248_s5 + $0xb0] sm:$0xff]   ;;  %v2788_v30 = vld [vmem:[%s3248_s5 + $0xb8] sm:$0xff]   ;;  %v3300_v33 = vcombine.low %v267_v32, %v267_v32  ;;  %v2082_v34 = vcombine.high %v267_v32, %v267_v32  ;;  %v2792_v35 = vld [vmem:[%s3248_s5 + $0x140] sm:$0xff]  }
  0x66   : > { %2468 = vmatpush3.bf16.msra.mxu0 %v2768_v10  ;;  %v2785_v27 = vld [vmem:[%s3248_s5 + $0x30] sm:$0xff]   ;;  %v2789_v31 = vld [vmem:[%s3248_s5 + $0x38] sm:$0xff]   ;;  %v2794_v40 = vld [vmem:[%s3248_s5 + $0x1c0] sm:$0xff]  }
  0x67   : > { %2490 = vmatpush3.bf16.msra.mxu1 %v2769_v11  ;;  %2469 = vmatprep.subr.bf16.mxu0 %v2770_v12  ;;  %v346_v36 = vshrl.u32 %v2082_v34, 16  ;;  %v348_v37 = vshll.u32 %v2082_v34, 16  ;;  %v339_v38 = vshrl.u32 %v3300_v33, 16  ;;  %v341_v39 = vshll.u32 %v3300_v33, 16  ;;  %v2795_v41 = vld [vmem:[%s3248_s5 + $0x180] sm:$0xff]   ;;  %v2796_v45 = vld [vmem:[%s3248_s5 + $0x148] sm:$0xff]  }
  0x68   : > { %2491 = vmatprep.subr.bf16.mxu1 %v2771_v13  ;;  %620 = vmatprep.mubr.bf16.mxu1 %v2082_v34  ;;  %v2793_v44 = vld [vmem:[%s3248_s5 + $0x100] sm:$0xff]   ;;  %v2798_v48 = vld [vmem:[%s3248_s5 + $0x1c8] sm:$0xff]   ;;  %v662_v49 = vrot.slane %v2082_v34, 1  ;;  %v2800_v52 = vld [vmem:[%s3248_s5 + $0x150] sm:$0xff]  }
  0x69   : > { %v350_v42 = vrot.slane %v348_v37, 1  ;;  %v343_v43 = vrot.slane %v341_v39, 1  ;;  %v2799_v50 = vld [vmem:[%s3248_s5 + $0x188] sm:$0xff]   ;;  %v2802_v53 = vld [vmem:[%s3248_s5 + $0x1d0] sm:$0xff]   ;;  %v2804_v56 = vld [vmem:[%s3248_s5 + $0x158] sm:$0xff]  }
  0x6a   : > { %2470 = vmatpush3.bf16.msra.mxu0 %v2772_v14  ;;  %v2797_v51 = vld [vmem:[%s3248_s5 + $0x108] sm:$0xff]   ;;  %v2803_v54 = vld [vmem:[%s3248_s5 + $0x190] sm:$0xff]   ;;  %v2806_v57 = vld [vmem:[%s3248_s5 + $0x1d8] sm:$0xff]  }
  0x6b   : > { %2492 = vmatpush3.bf16.msra.mxu1 %v2773_v15  ;;  %2471 = vmatprep.subr.bf16.mxu0 %v2774_v16  ;;  %v351_v46 = vor.u32 %v350_v42, %v346_v36  ;;  %v344_v47 = vor.u32 %v343_v43, %v339_v38  ;;  %v2801_v55 = vld [vmem:[%s3248_s5 + $0x110] sm:$0xff]   ;;  %v2807_v58 = vld [vmem:[%s3248_s5 + $0x198] sm:$0xff]   ;;  %v2808_v60 = vld [vmem:[%s3248_s5 + $0x160] sm:$0xff]  }
  0x6c   : > { %2493 = vmatprep.subr.bf16.mxu1 %v2775_v17  ;;  %v2805_v59 = vld [vmem:[%s3248_s5 + $0x118] sm:$0xff]   ;;  %v2810_v61 = vld [vmem:[%s3248_s5 + $0x1e0] sm:$0xff]   ;;  %v2812_v0 = vld [vmem:[%s3248_s5 + $0x168] sm:$0xff]  }
  0x6d   : > { %482 = vmatprep.mubr.bf16.mxu0 %v351_v46  ;;  %v2811_v62 = vld [vmem:[%s3248_s5 + $0x1a0] sm:$0xff]   ;;  %v2814_v1 = vld [vmem:[%s3248_s5 + $0x1e8] sm:$0xff]   ;;  %v2816_v4 = vld [vmem:[%s3248_s5 + $0x170] sm:$0xff]  }
  0x6e   : > { %2472 = vmatpush3.bf16.msra.mxu0 %v2776_v18  ;;  %v2809_v63 = vld [vmem:[%s3248_s5 + $0x120] sm:$0xff]   ;;  %v2815_v2 = vld [vmem:[%s3248_s5 + $0x1a8] sm:$0xff]   ;;  %v2818_v5 = vld [vmem:[%s3248_s5 + $0x1f0] sm:$0xff]  }
  0x6f   : > { %2494 = vmatpush3.bf16.msra.mxu1 %v2777_v19  ;;  %2473 = vmatprep.subr.bf16.mxu0 %v2778_v20  ;;  %v2813_v3 = vld [vmem:[%s3248_s5 + $0x128] sm:$0xff]   ;;  %v2819_v6 = vld [vmem:[%s3248_s5 + $0x1b0] sm:$0xff]   ;;  %v2820_v8 = vld [vmem:[%s3248_s5 + $0x178] sm:$0xff]  }
  0x70   : > { %2495 = vmatprep.subr.bf16.mxu1 %v2779_v21  ;;  %v2817_v7 = vld [vmem:[%s3248_s5 + $0x130] sm:$0xff]   ;;  %v2822_v9 = vld [vmem:[%s3248_s5 + $0x1f8] sm:$0xff]   ;;  %v2164_v12 = vld [vmem:[%s3295_s7 + $0x8] sm:$0x77]  ;;  %v661_v21 = vrot.slane %v3300_v33, 1 }
  0x71   : > { %v2823_v10 = vld [vmem:[%s3248_s5 + $0x1b8] sm:$0xff]   ;;  %v2824_v13 = vld [vmem:[%s3248_s5 + $0x240] sm:$0xff]   ;;  %v2198_v14 = vcombine.high %v2164_v12, %v2164_v12  ;;  %v3339_v15 = vcombine.low %v2164_v12, %v2164_v12  ;;  %v2835_v32 = vld [vmem:[%s3248_s5 + $0x210] sm:$0xff]  }
  0x72   : > { %2474 = vmatpush3.bf16.msra.mxu0 %v2780_v22  ;;  %v2821_v11 = vld [vmem:[%s3248_s5 + $0x138] sm:$0xff]   ;;  %v2828_v16 = vld [vmem:[%s3248_s5 + $0x2c0] sm:$0xff]   ;;  %v2830_v22 = vld [vmem:[%s3248_s5 + $0x248] sm:$0xff]  }
  0x73   : > { %2496 = vmatpush3.bf16.msra.mxu1 %v2781_v23  ;;  %2475 = vmatprep.subr.bf16.mxu0 %v2782_v24  ;;  %v2829_v17 = vld [vmem:[%s3248_s5 + $0x280] sm:$0xff]   ;;  %v1025_v19 = vshrl.u32 %v2198_v14, 16  ;;  %v1027_v20 = vshll.u32 %v2198_v14, 16  ;;  %v2832_v23 = vld [vmem:[%s3248_s5 + $0x2c8] sm:$0xff]   ;;  %v2840_v34 = vld [vmem:[%s3248_s5 + $0x2d8] sm:$0xff]  }
  0x74   : > { %2497 = vmatprep.subr.bf16.mxu1 %v2783_v25  ;;  %v2826_v18 = vld [vmem:[%s3248_s5 + $0x200] sm:$0xff]   ;;  %v2833_v25 = vld [vmem:[%s3248_s5 + $0x288] sm:$0xff]   ;;  %v2839_v36 = vld [vmem:[%s3248_s5 + $0x218] sm:$0xff]  }
  0x75   : > { %v1029_v24 = vrot.slane %v1027_v20, 1  ;;  %v2842_v37 = vld [vmem:[%s3248_s5 + $0x260] sm:$0xff]   ;;  %v2848_v42 = vld [vmem:[%s3248_s5 + $0x2e8] sm:$0xff]   ;;  %v2852_v46 = vld [vmem:[%s3248_s5 + $0x2f0] sm:$0xff]  }
  0x76   : > { %2476 = vmatpush3.bf16.msra.mxu0 %v2784_v26  ;;  %v2831_v26 = vld [vmem:[%s3248_s5 + $0x208] sm:$0xff]   ;;  %v2844_v38 = vld [vmem:[%s3248_s5 + $0x2e0] sm:$0xff]   ;;  %v2885_v20 = vld [vmem:[%s3248_s5 + $0x3b0] sm:$0xff]  }
  0x77   : > { %2498 = vmatpush3.bf16.msra.mxu1 %v2785_v27  ;;  %2477 = vmatprep.subr.bf16.mxu0 %v2786_v28  ;;  %v1030_v27 = vor.u32 %v1029_v24, %v1025_v19  ;;  %v1204_v28 = vrot.slane %v2198_v14, 1  ;;  %v2845_v39 = vld [vmem:[%s3248_s5 + $0x2a0] sm:$0xff]   ;;  %v2849_v43 = vld [vmem:[%s3248_s5 + $0x2a8] sm:$0xff]   ;;  %v2884_v19 = vld [vmem:[%s3248_s5 + $0x3f0] sm:$0xff]  }
  0x78   : > { %2499 = vmatprep.subr.bf16.mxu1 %v2787_v29  ;;  %v2834_v29 = vld [vmem:[%s3248_s5 + $0x250] sm:$0xff]   ;;  %v2877_v12 = vld [vmem:[%s3248_s5 + $0x3a0] sm:$0xff]  }
  0x79   : > { %v2312_v24 = vld [vmem:[%s3295_s7 + $0x10] sm:$0x77] }
  0x7a   : > { %2478 = vmatpush3.bf16.msra.mxu0 %v2788_v30  ;;  %v2836_v30 = vld [vmem:[%s3248_s5 + $0x2d0] sm:$0xff]  }
  0x7b   : > { %2500 = vmatpush3.bf16.msra.mxu1 %v2789_v31  ;;  %2507 = vmatprep.subr.bf16.mxu0 %v2792_v35  ;;  %v2837_v31 = vld [vmem:[%s3248_s5 + $0x290] sm:$0xff]   ;;  %v2841_v35 = vld [vmem:[%s3248_s5 + $0x298] sm:$0xff]  }
  0x7c   : > { %2529 = vmatprep.subr.bf16.mxu1 %v2794_v40  ;;  %v2843_v40 = vld [vmem:[%s3248_s5 + $0x220] sm:$0xff]  }
  0x7d   : > { %483 = vmatmul.mubr.bf16.vlgmr.msra.gmra.mrb[0].mxu0 %v344_v47  ;;  %v2853_v47 = vld [vmem:[%s3248_s5 + $0x2b0] sm:$0xff]  }
  0x7e   : > { %621 = vmatmul.mubr.bf16.vlgmr.msra.gmra.mrb[0].mxu1 %v3300_v33  ;;  %2508 = vmatpush3.bf16.msra.mxu0 %v2793_v44  ;;  %v2838_v33 = vld [vmem:[%s3248_s5 + $0x258] sm:$0xff]   ;;  %v2847_v44 = vld [vmem:[%s3248_s5 + $0x228] sm:$0xff]  }
  0x7f   : > { %2530 = vmatpush3.bf16.msra.mxu1 %v2795_v41  ;;  %793 = vmatprep.mubr.bf16.mxu0 %v662_v49  ;;  %v2846_v41 = vld [vmem:[%s3248_s5 + $0x268] sm:$0xff]   ;;  %v2854_v49 = vld [vmem:[%s3248_s5 + $0x278] sm:$0xff]  }
  0x80   : > { %2531 = vmatprep.subr.bf16.mxu1 %v2798_v48  ;;  %2509 = vmatprep.subr.bf16.mxu0 %v2796_v45  ;;  %v2850_v45 = vld [vmem:[%s3248_s5 + $0x270] sm:$0xff]  }
  0x81   : > { %975 = vmatprep.mubr.bf16.mxu1 %v2198_v14  ;;  %v2851_v48 = vld [vmem:[%s3248_s5 + $0x230] sm:$0xff]   ;;  %v2878_v14 = vld [vmem:[%s3248_s5 + $0x368] sm:$0xff]  }
  0x82   : > { %2510 = vmatpush3.bf16.msra.mxu0 %v2797_v51  ;;  %v2856_v51 = vld [vmem:[%s3248_s5 + $0x2f8] sm:$0xff]  }
  0x83   : > { %2532 = vmatpush3.bf16.msra.mxu1 %v2799_v50  ;;  %2511 = vmatprep.subr.bf16.mxu0 %v2800_v52  ;;  %v1020_v50 = vshll.u32 %v3339_v15, 16  ;;  %v2857_v52 = vld [vmem:[%s3248_s5 + $0x2b8] sm:$0xff]  }
  0x84   : > { %2533 = vmatprep.subr.bf16.mxu1 %v2802_v53  ;;  %v1018_v53 = vshrl.u32 %v3339_v15, 16 }
  0x86   : > { %2512 = vmatpush3.bf16.msra.mxu0 %v2801_v55  ;;  %v1203_v55 = vrot.slane %v3339_v15, 1 }
  0x87   : > { %2534 = vmatpush3.bf16.msra.mxu1 %v2803_v54  ;;  %2513 = vmatprep.subr.bf16.mxu0 %v2804_v56  ;;  %v2855_v54 = vld [vmem:[%s3248_s5 + $0x238] sm:$0xff]   ;;  %v1022_v56 = vrot.slane %v1020_v50, 1  ;;  %v2904_v50 = vld [vmem:[%s3248_s5 + $0x470] sm:$0xff]  }
  0x88   : > { %2535 = vmatprep.subr.bf16.mxu1 %v2806_v57  ;;  %v2858_v57 = vld [vmem:[%s3248_s5 + $0x340] sm:$0xff]  }
  0x8a   : > { %2514 = vmatpush3.bf16.msra.mxu0 %v2805_v59  ;;  %v2861_v59 = vld [vmem:[%s3248_s5 + $0x380] sm:$0xff]  }
  0x8b   : > { %2536 = vmatpush3.bf16.msra.mxu1 %v2807_v58  ;;  %2515 = vmatprep.subr.bf16.mxu0 %v2808_v60  ;;  %v2860_v58 = vld [vmem:[%s3248_s5 + $0x3c0] sm:$0xff]  }
  0x8c   : > { %2537 = vmatprep.subr.bf16.mxu1 %v2810_v61  ;;  %v2859_v60 = vld [vmem:[%s3248_s5 + $0x300] sm:$0xff]   ;;  %v1023_v61 = vor.u32 %v1022_v56, %v1018_v53  ;;  %v2907_v53 = vld [vmem:[%s3248_s5 + $0x438] sm:$0xff]  }
  0x8e   : > { %2516 = vmatpush3.bf16.msra.mxu0 %v2809_v63  ;;  %v2864_v63 = vld [vmem:[%s3248_s5 + $0x3c8] sm:$0xff]  }
  0x8f   : > { %2538 = vmatpush3.bf16.msra.mxu1 %v2811_v62  ;;  %2517 = vmatprep.subr.bf16.mxu0 %v2812_v0  ;;  %v2862_v62 = vld [vmem:[%s3248_s5 + $0x348] sm:$0xff]  }
  0x90   : > { %2539 = vmatprep.subr.bf16.mxu1 %v2814_v1  ;;  %v2865_v0 = vld [vmem:[%s3248_s5 + $0x388] sm:$0xff]  }
  0x91   : > { %v2863_v1 = vld [vmem:[%s3248_s5 + $0x308] sm:$0xff]  }
  0x92   : > { %2518 = vmatpush3.bf16.msra.mxu0 %v2813_v3  ;;  %v2868_v3 = vld [vmem:[%s3248_s5 + $0x3d0] sm:$0xff]  }
  0x93   : > { %2540 = vmatpush3.bf16.msra.mxu1 %v2815_v2  ;;  %2519 = vmatprep.subr.bf16.mxu0 %v2816_v4  ;;  %v2866_v2 = vld [vmem:[%s3248_s5 + $0x350] sm:$0xff]  }
  0x94   : > { %2541 = vmatprep.subr.bf16.mxu1 %v2818_v5  ;;  %v2869_v4 = vld [vmem:[%s3248_s5 + $0x390] sm:$0xff]  }
  0x95   : > { %v2867_v5 = vld [vmem:[%s3248_s5 + $0x310] sm:$0xff]  }
  0x96   : > { %2520 = vmatpush3.bf16.msra.mxu0 %v2817_v7  ;;  %v2872_v7 = vld [vmem:[%s3248_s5 + $0x3d8] sm:$0xff]  }
  0x97   : > { %2542 = vmatpush3.bf16.msra.mxu1 %v2819_v6  ;;  %2521 = vmatprep.subr.bf16.mxu0 %v2820_v8  ;;  %v2870_v6 = vld [vmem:[%s3248_s5 + $0x358] sm:$0xff]  }
  0x98   : > { %2543 = vmatprep.subr.bf16.mxu1 %v2822_v9  ;;  %v2873_v8 = vld [vmem:[%s3248_s5 + $0x398] sm:$0xff]  }
  0x99   : > { %v2871_v9 = vld [vmem:[%s3248_s5 + $0x318] sm:$0xff]  }
  0x9a   : > { %2522 = vmatpush3.bf16.msra.mxu0 %v2821_v11  ;;  %v2876_v11 = vld [vmem:[%s3248_s5 + $0x3e0] sm:$0xff]  }
  0x9b   : > { %2544 = vmatpush3.bf16.msra.mxu1 %v2823_v10  ;;  %2551 = vmatprep.subr.bf16.mxu0 %v2824_v13  ;;  %v2874_v10 = vld [vmem:[%s3248_s5 + $0x360] sm:$0xff]  }
  0x9c   : > { %2573 = vmatprep.subr.bf16.mxu1 %v2828_v16  ;;  %v2875_v13 = vld [vmem:[%s3248_s5 + $0x320] sm:$0xff]   ;;  %v2881_v16 = vld [vmem:[%s3248_s5 + $0x3a8] sm:$0xff]  }
  0x9d   : > { %794 = vmatmul.mubr.bf16.vlgmr.msra.gmra.mrb[4].mxu0 %v661_v21  ;;  %v2883_v21 = vld [vmem:[%s3248_s5 + $0x330] sm:$0xff]  }
  0x9e   : > { %976 = vmatmul.mubr.bf16.vlgmr.msra.gmra.mrb[4].mxu1 %v3339_v15  ;;  %2552 = vmatpush3.bf16.msra.mxu0 %v2826_v18  ;;  %v2880_v15 = vld [vmem:[%s3248_s5 + $0x3e8] sm:$0xff]   ;;  %v2882_v18 = vld [vmem:[%s3248_s5 + $0x370] sm:$0xff]  }
  0x9f   : > { %2574 = vmatpush3.bf16.msra.mxu1 %v2829_v17  ;;  %1161 = vmatprep.mubr.bf16.mxu0 %v1030_v27  ;;  %v2879_v17 = vld [vmem:[%s3248_s5 + $0x328] sm:$0xff]   ;;  %v2345_v27 = vcombine.low %v2312_v24, %v2312_v24 }
  0xa0   : > { %2575 = vmatprep.subr.bf16.mxu1 %v2832_v23  ;;  %2553 = vmatprep.subr.bf16.mxu0 %v2830_v22  ;;  %v2886_v22 = vld [vmem:[%s3248_s5 + $0x378] sm:$0xff]  }
  0xa1   : > { %1335 = vmatprep.mubr.bf16.mxu1 %v1204_v28  ;;  %v2888_v23 = vld [vmem:[%s3248_s5 + $0x3f8] sm:$0xff]  }
  0xa2   : > { %2554 = vmatpush3.bf16.msra.mxu0 %v2831_v26  ;;  %v2890_v26 = vld [vmem:[%s3248_s5 + $0x3b8] sm:$0xff]  }
  0xa3   : > { %2576 = vmatpush3.bf16.msra.mxu1 %v2833_v25  ;;  %2555 = vmatprep.subr.bf16.mxu0 %v2834_v29  ;;  %v2346_v25 = vcombine.high %v2312_v24, %v2312_v24  ;;  %v2887_v28 = vld [vmem:[%s3248_s5 + $0x338] sm:$0xff]   ;;  %v2892_v29 = vld [vmem:[%s3248_s5 + $0x440] sm:$0xff]  }
  0xa4   : > { %2577 = vmatprep.subr.bf16.mxu1 %v2836_v30 }
  0xa5   : > { %v1567_v30 = vshrl.u32 %v2346_v25, 16 }
  0xa6   : > { %2556 = vmatpush3.bf16.msra.mxu0 %v2835_v32  ;;  %v1560_v32 = vshrl.u32 %v2345_v27, 16 }
  0xa7   : > { %2578 = vmatpush3.bf16.msra.mxu1 %v2837_v31  ;;  %2557 = vmatprep.subr.bf16.mxu0 %v2838_v33  ;;  %v1569_v31 = vshll.u32 %v2346_v25, 16  ;;  %v1562_v33 = vshll.u32 %v2345_v27, 16 }
  0xa8   : > { %2579 = vmatprep.subr.bf16.mxu1 %v2840_v34 }
  0xa9   : > { %v1571_v34 = vrot.slane %v1569_v31, 1 }
  0xaa   : > { %2558 = vmatpush3.bf16.msra.mxu0 %v2839_v36 }
  0xab   : > { %2580 = vmatpush3.bf16.msra.mxu1 %v2841_v35  ;;  %2559 = vmatprep.subr.bf16.mxu0 %v2842_v37  ;;  %v1564_v35 = vrot.slane %v1562_v33, 1  ;;  %v1572_v36 = vor.u32 %v1571_v34, %v1567_v30  ;;  %v2893_v37 = vld [vmem:[%s3248_s5 + $0x400] sm:$0xff]  }
  0xac   : > { %2581 = vmatprep.subr.bf16.mxu1 %v2844_v38 }
  0xad   : > { %v1565_v38 = vor.u32 %v1564_v35, %v1560_v32 }
  0xae   : > { %2560 = vmatpush3.bf16.msra.mxu0 %v2843_v40  ;;  %v2894_v40 = vld [vmem:[%s3248_s5 + $0x448] sm:$0xff]  }
  0xaf   : > { %2582 = vmatpush3.bf16.msra.mxu1 %v2845_v39  ;;  %2561 = vmatprep.subr.bf16.mxu0 %v2846_v41  ;;  %v1746_v39 = vrot.slane %v2346_v25, 1  ;;  %v2895_v41 = vld [vmem:[%s3248_s5 + $0x408] sm:$0xff]  }
  0xb0   : > { %2583 = vmatprep.subr.bf16.mxu1 %v2848_v42  ;;  %v2896_v42 = vld [vmem:[%s3248_s5 + $0x450] sm:$0xff]  }
  0xb2   : > { %2562 = vmatpush3.bf16.msra.mxu0 %v2847_v44  ;;  %v2898_v44 = vld [vmem:[%s3248_s5 + $0x458] sm:$0xff]  }
  0xb3   : > { %2584 = vmatpush3.bf16.msra.mxu1 %v2849_v43  ;;  %2563 = vmatprep.subr.bf16.mxu0 %v2850_v45  ;;  %v2897_v43 = vld [vmem:[%s3248_s5 + $0x410] sm:$0xff]   ;;  %v2899_v45 = vld [vmem:[%s3248_s5 + $0x418] sm:$0xff]  }
  0xb4   : > { %2585 = vmatprep.subr.bf16.mxu1 %v2852_v46  ;;  %v2900_v46 = vld [vmem:[%s3248_s5 + $0x460] sm:$0xff]  }
  0xb6   : > { %2564 = vmatpush3.bf16.msra.mxu0 %v2851_v48  ;;  %v2902_v48 = vld [vmem:[%s3248_s5 + $0x468] sm:$0xff]  }
  0xb7   : > { %2586 = vmatpush3.bf16.msra.mxu1 %v2853_v47  ;;  %2565 = vmatprep.subr.bf16.mxu0 %v2854_v49  ;;  %v2901_v47 = vld [vmem:[%s3248_s5 + $0x420] sm:$0xff]   ;;  %v2903_v49 = vld [vmem:[%s3248_s5 + $0x428] sm:$0xff]  }
  0xb8   : > { %2587 = vmatprep.subr.bf16.mxu1 %v2856_v51  ;;  %v2905_v51 = vld [vmem:[%s3248_s5 + $0x430] sm:$0xff]  }
  0xba   : > { %2566 = vmatpush3.bf16.msra.mxu0 %v2855_v54  ;;  %v1745_v54 = vrot.slane %v2345_v27, 1 }
  0xbb   : > { %2588 = vmatpush3.bf16.msra.mxu1 %v2857_v52  ;;  %2595 = vmatprep.subr.bf16.mxu0 %v2858_v57  ;;  %v2906_v52 = vld [vmem:[%s3248_s5 + $0x478] sm:$0xff]  }
  0xbc   : > { %2617 = vmatprep.subr.bf16.mxu1 %v2860_v58 }
  0xbd   : > { %1162 = vmatmul.mubr.bf16.vlgmr.msra.gmra.mrb[8].mxu0 %v1023_v61 }
  0xbe   : > { %1336 = vmatmul.mubr.bf16.vlgmr.msra.gmra.mrb[8].mxu1 %v1203_v55  ;;  %2596 = vmatpush3.bf16.msra.mxu0 %v2859_v60 }
  0xbf   : > { %2618 = vmatpush3.bf16.msra.mxu1 %v2861_v59  ;;  %2597 = vmatprep.subr.bf16.mxu0 %v2862_v62 }
  0xc0   : > { %2619 = vmatprep.subr.bf16.mxu1 %v2864_v63  ;;  %1517 = vmatprep.mubr.bf16.mxu0 %v2346_v25 }
  0xc1   : > { %1703 = vmatprep.mubr.bf16.mxu1 %v1572_v36 }
  0xc2   : > { %2598 = vmatpush3.bf16.msra.mxu0 %v2863_v1 }
  0xc3   : > { %2620 = vmatpush3.bf16.msra.mxu1 %v2865_v0  ;;  %2599 = vmatprep.subr.bf16.mxu0 %v2866_v2 }
  0xc4   : > { %2621 = vmatprep.subr.bf16.mxu1 %v2868_v3 }
  0xc6   : > { %2600 = vmatpush3.bf16.msra.mxu0 %v2867_v5 }
  0xc7   : > { %2622 = vmatpush3.bf16.msra.mxu1 %v2869_v4  ;;  %2601 = vmatprep.subr.bf16.mxu0 %v2870_v6 }
  0xc8   : > { %2623 = vmatprep.subr.bf16.mxu1 %v2872_v7 }
  0xca   : > { %2602 = vmatpush3.bf16.msra.mxu0 %v2871_v9 }
  0xcb   : > { %2624 = vmatpush3.bf16.msra.mxu1 %v2873_v8  ;;  %2603 = vmatprep.subr.bf16.mxu0 %v2874_v10 }
  0xcc   : > { %2625 = vmatprep.subr.bf16.mxu1 %v2876_v11 }
  0xce   : > { %2604 = vmatpush3.bf16.msra.mxu0 %v2875_v13 }
  0xcf   : > { %2626 = vmatpush3.bf16.msra.mxu1 %v2877_v12  ;;  %2605 = vmatprep.subr.bf16.mxu0 %v2878_v14 }
  0xd0   : > { %2627 = vmatprep.subr.bf16.mxu1 %v2880_v15 }
  0xd2   : > { %2606 = vmatpush3.bf16.msra.mxu0 %v2879_v17 }
  0xd3   : > { %2628 = vmatpush3.bf16.msra.mxu1 %v2881_v16  ;;  %2607 = vmatprep.subr.bf16.mxu0 %v2882_v18 }
  0xd4   : > { %2629 = vmatprep.subr.bf16.mxu1 %v2884_v19 }
  0xd6   : > { %2608 = vmatpush3.bf16.msra.mxu0 %v2883_v21 }
  0xd7   : > { %2630 = vmatpush3.bf16.msra.mxu1 %v2885_v20  ;;  %2609 = vmatprep.subr.bf16.mxu0 %v2886_v22 }
  0xd8   : > { %2631 = vmatprep.subr.bf16.mxu1 %v2888_v23 }
  0xda   : > { %2610 = vmatpush3.bf16.msra.mxu0 %v2887_v28 }
  0xdb   : > { %2632 = vmatpush3.bf16.msra.mxu1 %v2890_v26  ;;  %2639 = vmatprep.subr.bf16.mxu0 %v2892_v29 }
  0xdd   : > { %1518 = vmatmul.mubr.bf16.vlgmr.msra.gmra.mrb[12].mxu0 %v2345_v27 }
  0xde   : > { %1704 = vmatmul.mubr.bf16.vlgmr.msra.gmra.mrb[12].mxu1 %v1565_v38  ;;  %2640 = vmatpush3.bf16.msra.mxu0 %v2893_v37 }
  0xdf   : > { %1877 = vmatprep.mubr.bf16.mxu0 %v1746_v39  ;;  %2641 = vmatprep.subr.bf16.mxu0 %v2894_v40 }
  0xe2   : > { %2642 = vmatpush3.bf16.msra.mxu0 %v2895_v41 }
  0xe3   : > { %2643 = vmatprep.subr.bf16.mxu0 %v2896_v42  ;;  %v2459_v42 = vld [vmem:[%s217_s11] ss:$0 sm:$0xff] }
  0xe6   : > { %2644 = vmatpush3.bf16.msra.mxu0 %v2897_v43 }
  0xe7   : > { %2645 = vmatprep.subr.bf16.mxu0 %v2898_v44 }
  0xea   : > { %2646 = vmatpush3.bf16.msra.mxu0 %v2899_v45 }
  0xeb   : > { %2647 = vmatprep.subr.bf16.mxu0 %v2900_v46 }
  0xee   : > { %2648 = vmatpush3.bf16.msra.mxu0 %v2901_v47 }
  0xef   : > { %2649 = vmatprep.subr.bf16.mxu0 %v2902_v48 }
  0xf2   : > { %2650 = vmatpush3.bf16.msra.mxu0 %v2903_v49 }
  0xf3   : > { %2651 = vmatprep.subr.bf16.mxu0 %v2904_v50 }
  0xf6   : > { %2652 = vmatpush3.bf16.msra.mxu0 %v2905_v51 }
  0xf7   : > { %2653 = vmatprep.subr.bf16.mxu0 %v2906_v52 }
  0xfa   : > { %2654 = vmatpush3.bf16.msra.mxu0 %v2907_v53 }
  0xfd   : > { %1878 = vmatmul.mubr.bf16.vlgmr.msra.gmra.mrb[16].mxu0 %v1745_v54 }
 0x150   : > { %v2479_v60 = vpop.f32.mrb[0].mxu0 }
 0x151   : > { %v2501_v55 = vpop.f32.mrb[0].mxu1  ;;  %v2480_v61 = vpop.f32.mrb[1].mxu0 }
 0x152   : > { %v2502_v56 = vpop.f32.mrb[1].mxu1  ;;  %v2481_v62 = vadd.f32 %v2480_v61, %v2479_v60  ;;  %v2482_v63 = vpop.f32.mrb[2].mxu0 }
 0x153   : > { %v2503_v57 = vadd.f32 %v2502_v56, %v2501_v55  ;;  %v2504_v58 = vpop.f32.mrb[2].mxu1  ;;  %v2483_v0 = vpop.f32.mrb[3].mxu0 }
 0x154   : > { %v2505_v59 = vpop.f32.mrb[3].mxu1 }
 0x155   : > { %v623_v1 = vadd.f32 %v2503_v57, %v2481_v62 }
 0x170   : > { %v2523_v7 = vpop.f32.mrb[4].mxu0 }
 0x171   : > { %v2545_v2 = vpop.f32.mrb[4].mxu1  ;;  %v2524_v8 = vpop.f32.mrb[5].mxu0 }
 0x172   : > { %v2546_v3 = vpop.f32.mrb[5].mxu1  ;;  %v2525_v9 = vadd.f32 %v2524_v8, %v2523_v7  ;;  %v2526_v10 = vpop.f32.mrb[6].mxu0 }
 0x173   : > { %v2547_v4 = vadd.f32 %v2546_v3, %v2545_v2  ;;  %v2548_v5 = vpop.f32.mrb[6].mxu1  ;;  %v2527_v11 = vpop.f32.mrb[7].mxu0 }
 0x174   : > { %v2549_v6 = vpop.f32.mrb[7].mxu1  ;;  %v801_v12 = vadd.f32 %v2525_v9, %v623_v1 }
 0x176   : > { %v983_v13 = vadd.f32 %v2547_v4, %v801_v12 }
 0x190   : > { %v2567_v19 = vpop.f32.mrb[8].mxu0 }
 0x191   : > { %v2589_v14 = vpop.f32.mrb[8].mxu1  ;;  %v2568_v20 = vpop.f32.mrb[9].mxu0 }
 0x192   : > { %v2590_v15 = vpop.f32.mrb[9].mxu1  ;;  %v2569_v21 = vadd.f32 %v2568_v20, %v2567_v19  ;;  %v2570_v22 = vpop.f32.mrb[10].mxu0 }
 0x193   : > { %v2591_v16 = vadd.f32 %v2590_v15, %v2589_v14  ;;  %v2592_v17 = vpop.f32.mrb[10].mxu1  ;;  %v2571_v23 = vpop.f32.mrb[11].mxu0 }
 0x194   : > { %v2593_v18 = vpop.f32.mrb[11].mxu1  ;;  %v1169_v24 = vadd.f32 %v2569_v21, %v983_v13 }
 0x196   : > { %v1343_v25 = vadd.f32 %v2591_v16, %v1169_v24 }
 0x1b0   : > { %v2611_v26 = vpop.f32.mrb[12].mxu0 }
 0x1b1   : > { %v2633_v27 = vpop.f32.mrb[12].mxu1  ;;  %v2612_v28 = vpop.f32.mrb[13].mxu0 }
 0x1b2   : > { %v2634_v29 = vpop.f32.mrb[13].mxu1  ;;  %v2613_v30 = vadd.f32 %v2612_v28, %v2611_v26  ;;  %v2614_v31 = vpop.f32.mrb[14].mxu0 }
 0x1b3   : > { %v2635_v32 = vadd.f32 %v2634_v29, %v2633_v27  ;;  %v2636_v33 = vpop.f32.mrb[14].mxu1  ;;  %v2615_v34 = vpop.f32.mrb[15].mxu0 }
 0x1b4   : > { %v2637_v35 = vpop.f32.mrb[15].mxu1  ;;  %v1525_v36 = vadd.f32 %v2613_v30, %v1343_v25 }
 0x1b6   : > { %v1711_v37 = vadd.f32 %v2635_v32, %v1525_v36 }
 0x1d0   : > { %v2655_v38 = vpop.f32.mrb[16].mxu0 }
 0x1d1   : > { %v2656_v39 = vpop.f32.mrb[17].mxu0 }
 0x1d2   : > { %v2657_v40 = vadd.f32 %v2656_v39, %v2655_v38  ;;  %v2658_v41 = vpop.f32.mrb[18].mxu0 }
 0x1d3   : > { %v2659_v43 = vpop.f32.mrb[19].mxu0 }
 0x1d4   : > { %v1885_v44 = vadd.f32 %v2657_v40, %v1711_v37 }
 0x1d6   : > { %v1893_v45 = vadd.f32 %v2459_v42, %v1885_v44 }
 0x1d8   : > { %v1894_v46 = vmax.f32 %v1893_v45, 0.0 }
 0x1da   : > { %v1895_v47 = vpack.c.bf16 %v1894_v46, %v1894_v46 }
 0x1dc   : > { %1896 = vst [vmem:[%s258_s15] sm:$0x3] %v1895_v47 }
 0x1dd PF: > { %s19_s21 = sadd.s32 1, %s3054_s21   ;;  %s3481_s17 = smov %s3174_s12 }
 0x1de   : > { %p16_p6 = scmp.ge.s32.totalorder %s19_s21, 34   ;;  %s3482_s10 = sld [smem:[#allocation8_spill]] }
 0x1df   : > { %s3483_s12 = smov %s3022_s13  ;;  %s3484_s13 = smov %s3026_s14 }
 0x1e0   : > { %s3485_s14 = smov %s3481_s17  ;;  %s3486_s15 = smov %s3042_s18 }
 0x1e1   : > { %s3487_s16 = smov %s3046_s19  ;;  %s3488_s17 = smov %s3050_s20 }
 0x1e2   : > { %s3489_s18 = smov %s3493_s23  ;;  %s3490_s19 = smov %s3497_s24 }
 0x1e3   :  { %18 = sbr.rel (!%p16_p6) target bundleno = 10 (0xa), region = 96 }
 0x1e4   : > { %s3491_s20 = smov %s3482_s10 }
 0x1ea   :  { %1930 = vsyncpa [#allocation3], 1 }
 0x1eb   :  { %1932 = vsyncpa [#allocation3 + $0x1], 1 }
 0x1ec   :  { %1933 = vsyncpa [#allocation5], 1 }
 0x1ed   :  { %1935 = vsyncpa [#allocation5 + $0x1], 1 }

// kernel: encoder_forward.11
= control target key start
LH: loop header
LB: loop body
LE: loop exit
PB: predicated region body
PF: predicated region fallthrough
CT: control target
= control target key end

     0   :  { %s6325_s0 = inlined_call_operand.vmem [shape: bf16[12,3,512], index: 0, kind: input, shape index: {}]   ;;  %s6326_s1 = inlined_call_operand.vmem [shape: bf16[12,3,512], index: 1, kind: input, shape index: {}]   ;;  %s6327_s2 = inlined_call_operand.hbm [shape: bf16[9,512,1024], index: 2, kind: input, shape index: {}]   ;;  %s6328_s3 = inlined_call_operand.hbm [shape: f32[1,1024], index: 3, kind: input, shape index: {}]   ;;  %s6329_s4 = inlined_call_operand.hbm [shape: f32[4,2,1024], index: 4, kind: output, shape index: {}]  }
   0x1   :  { %6338 = sst [smem:[#allocation19_spill]] %s6327_s2 }
   0x2   :  { %9 = vsyncpa [#allocation3], 0 }
   0x3   :  { %11 = vsyncpa [#allocation3 + $0x1], 0 }
   0x4   :  { %12 = vsyncpa [#allocation6], 0 }
   0x5   :  { %14 = vsyncpa [#allocation6 + $0x1], 0 }
   0x6   :  { %15 = vsyncpa [#allocation4], 0 }
   0x7   :  { %17 = vsyncpa [#allocation4 + $0x1], 0  ;;  %s5632_s15 = smov 0   ;;  %s5634_s16 = smov 0  }
   0x8   :  { %s5636_s17 = smov 0   ;;  %s5638_s18 = smov 0  }
   0x9   :  { %s5640_s19 = smov 0   ;;  %s5642_s20 = smov 0  }
   0xa   :  { %s5644_s21 = smov 0   ;;  %s5646_s22 = smov 0  }
   0xb   :  { %s5648_s23 = smov 0   ;;  %s5650_s24 = smov 0  }
   0xc   :  { %s5652_s25 = smov 0   ;;  %s5654_s26 = smov 0  }
   0xd   :  { %s5656_s27 = smov 0  }
   0xe LB: > { %6339 = sst [smem:[#allocation11_spill]] %s5570_s20  ;;  %s3742_s28 = sadd.s32 4294967295, %s5598_s27   ;;  %s5598_s27 = sphi %s5656_s27, %s23_s27   ;;  %s5594_s26 = sphi %s5654_s26, %s6379_s26   ;;  %s5590_s25 = sphi %s5652_s25, %s6378_s25   ;;  %s5586_s24 = sphi %s5650_s24, %s6365_s24   ;;  %s5582_s23 = sphi %s5648_s23, %s6377_s23   ;;  %s5578_s22 = sphi %s5646_s22, %s6376_s22   ;;  %s5574_s21 = sphi %s5644_s21, %s6375_s21   ;;  %s5570_s20 = sphi %s5642_s20, %s6374_s20   ;;  %s5566_s19 = sphi %s5640_s19, %s6373_s19   ;;  %s5562_s18 = sphi %s5638_s18, %s6372_s18   ;;  %s5558_s17 = sphi %s5636_s17, %s6371_s17   ;;  %s5554_s16 = sphi %s5634_s16, %s6370_s16   ;;  %s5550_s15 = sphi %s5632_s15, %s6369_s15  }
   0xf   : > { %6340 = sst [smem:[#allocation12_spill]] %s5586_s24  ;;  %s35_s30 = sadd.s32 1, %s5586_s24 }
  0x10   : > { %6341 = sst [smem:[#allocation13_spill]] %s5590_s25  ;;  %s38_s5 = sadd.s32 1, %s5590_s25 }
  0x11   : > { %p36_p0 = scmp.ge.s32.totalorder %s35_s30, 2  ;;  %s42_s6 = sadd.s32 1, %s5594_s26 }
  0x12   : > { %s91_s7 = sadd.s32 1, %s5570_s20  ;;  %p98_p1 = scmp.ne.s32.totalorder %s5570_s20, %s5566_s19 }
  0x13   : > { %s6381_s30 = smov (%p36_p0, %s35_s30), 0  ;;  %s6383_s5 = smov (!%p36_p0, %s38_s5), %s5590_s25 }
  0x14   : > { %6342 = sst [smem:[#allocation14_spill]] %s6381_s30  ;;  %p99_p2 = scmp.eq.s32.totalorder %s5598_s27, 0 }
  0x15   : > { %p104_p3 = scmp.ne.s32.totalorder %s5566_s19, %s5562_s18  ;;  %p40_p4 = scmp.ge.s32.totalorder %s6383_s5, 2 }
  0x16   : > { %p105_p5 = scmp.eq.s32.totalorder %s3742_s28, 0  ;;  %p5708_p6 = por %p99_p2, %p98_p1 }
  0x17   : > { %s3744_s9 = sshll.u32 %s5590_s25, 1  ;;  %s6385_s5 = smov (%p40_p4, %s6383_s5), 0 }
  0x18   : > { %6344 = sst [smem:[#allocation15_spill]] %s6385_s5  ;;  %s6387_s6 = smov (!%p40_p4, %s42_s6), %s5594_s26 }
  0x19   : > { %p5716_p7 = por %p105_p5, %p104_p3  ;;  %s141_s11 = sadd.s32 %s5586_s24, %s3744_s9 }
  0x1a   : > { %p44_p8 = scmp.ge.s32.totalorder %s6387_s6, 8  ;;  %s3745_s12 = sshll.u32 %s6385_s5, 1 }
  0x1b   : > { %s6345_s10 = scalar_select %p5716_p7, 1, 0 }
  0x1c   : > { %s143_s13 = sadd.s32 %s3745_s12, %s6381_s30  ;;  %s149_s14 = sadd.s32 1, %s5558_s17 }
  0x1d   : > { %s6389_s6 = smov (%p44_p8, %s6387_s6), 0  ;;  %s144_s18 = ssub.s32 %s141_s11, %s143_s13 }
  0x1e   : > { %6346 = sst [smem:[#allocation16_spill]] %s6389_s6  ;;  %p159_p9 = scmp.ne.s32.totalorder %s5558_s17, %s5554_s16 }
  0x1f   : > { %s88_s29 = ssub.s32 %s5594_s26, %s6389_s6  ;;  %p160_p10 = scmp.eq.s32.totalorder %s3742_s28, 31 }
  0x20   : > { %p89_p11 = scmp.eq.s32.totalorder %s88_s29, 0  ;;  %s146_s9 = sor.u32 %s144_s18, %s88_s29 }
  0x21   : > { %p147_p12 = scmp.eq.s32.totalorder %s146_s9, 0  ;;  %p5730_p13 = por %p160_p10, %p159_p9 }
  0x22   : > { %s5735_s5 = scalar_select %p89_p11, %s5570_s20, %s91_s7  }
  0x23   : > { %s6347_s25 = scalar_select %p5730_p13, 1, 0 }
  0x24   : > { %6348 = sst [smem:[#allocation17_spill]] %s5735_s5  ;;  %p165_p0 = scmp.ne.s32.totalorder %s5554_s16, %s5550_s15 }
  0x25   : > { %s5738_s12 = scalar_select %p147_p12, %s5558_s17, %s149_s14  }
  0x26   : > { %s6350_s30 = sadd.s32 4294967294, %s5598_s27   ;;  %p4992_p2 = scmp.lt.s32.totalorder %s5598_s27, 32 }
  0x27   : > { %6349 = sst [smem:[#allocation18_spill]] %s5738_s12  ;;  %p166_p1 = scmp.eq.s32.totalorder %s6350_s30, 31 }
  0x28   : > { %s5750_s28 = sand.u32 1, %s5570_s20   ;;  %s3748_s13 = sshll.u32 %s5594_s26, 6 }
  0x29   : > { %p5745_p3 = por %p166_p1, %p165_p0  ;;  %s4973_s29 = smul.u32 2304, %s5750_s28 }
  0x2a   : > { %p5756_p4 = pnand %p4992_p2, %p5708_p6  ;;  %s6353_s2 = sld [smem:[#allocation19_spill]] }
  0x2b   : > { %s6351_s11 = scalar_select %p5745_p3, 1, 0 }
  0x2c   : > { %s196_s9 = scalar_lea.vmem [#allocation2], %s4973_s29  ;;  %s193_s8 = scalar_lea.sflag [#allocation3], %s5750_s28 }
  0x2d   : > { %s202_s6 = sshll.u32 %s196_s9, 4  ;;  %p5398_p6 = pneg %p5756_p4  ;;  %s5765_s6 = int_to_ptr.vmem [resolvable:$true] %s202_s6 }
  0x30   : > { %s5763_s30 = scalar_lea.hbm %s6353_s2, %s3748_s13  ;;  %s5401_s18 = scalar_lea.hbm %s6353_s2, 294912 }
  0x31   : > { %s5396_s24 = scalar_lea.hbm %s5763_s30, 36864  ;;  %p5402_p10 = scmp.lt.u32.totalorder %s5763_s30, %s6353_s2 }
  0x32   : > { %p5397_p5 = scmp.ne.s32.totalorder %s5763_s30, %s5396_s24  ;;  %p5403_p11 = scmp.lt.u32.totalorder %s5401_s18, %s5396_s24 }
  0x33   : > { %p5405_p0 = scmp.lt.u32.totalorder %s5396_s24, %s5763_s30 }
  0x34   : > { %p5399_p8 = pnand %p5398_p6, %p5397_p5  ;;  %p5404_p12 = por %p5403_p11, %p5402_p10 }
  0x36   : > { %p5400_p9 = pneg %p5399_p8  ;;  %p5406_p1 = por %p5405_p0, %p5404_p12 }
  0x38   : > { %p5407_p2 = pnand %p5406_p1, %p5400_p9 }
  0x3a   : > { %5410 = shalt.err (!%p5407_p2)
}
  0x3b   : > { %s5411_s29 = scalar_lea.vmem %s5765_s6, 36864  ;;  %s5600_s9 = smov [#allocation2]  }
  0x3c   : > { %p5412_p5 = scmp.ne.s32.totalorder %s5765_s6, %s5411_s29  ;;  %s5416_s14 = sshll.u32 %s5600_s9, 4  ;;  %s5417_s14 = int_to_ptr.vmem [resolvable:$false] %s5416_s14 }
  0x3d   : > { %s5418_s20 = scalar_lea.vmem %s5417_s14, 73728  ;;  %p5419_p13 = scmp.lt.s32.totalorder %s5765_s6, %s5417_s14 }
  0x3e   : > { %p5414_p8 = pnand %p5412_p5, %p5398_p6  ;;  %p5420_p10 = scmp.lt.s32.totalorder %s5418_s20, %s5411_s29 }
  0x40   : > { %p5415_p3 = pneg %p5414_p8  ;;  %p5421_p11 = por %p5420_p10, %p5419_p13 }
  0x42   : > { %p5422_p12 = pnand %p5421_p11, %p5415_p3 }
  0x44   : > { %5425 = shalt.err (!%p5422_p12)
}
  0x45   : > { %s5601_s24 = smov 512   ;;  %s5602_s5 = smov 64  }
  0x46   : > { %s5603_s13 = smov 4   ;;  %p3750_p9 = scmp.ge.s32.totalorder %s5598_s27, 1 }
  0x47   : > { %4984 = dma.hbm_to_vmem [thread:$0]  (!%p5756_p4), %s5763_s30, 36864, %s5765_s6, %s193_s8, %s5601_s24, %s5602_s5, %s5603_s13  }
  0x48   : > { %p227_p13 = scmp.lt.s32.totalorder %s5598_s27, 33  ;;  %s3749_s29 = sshll.u32 %s5594_s26, 4 }
  0x49   : > { %s5805_s20 = scalar_lea.hbm %s6328_s3, %s3749_s29  ;;  %s215_s2 = scalar_lea.vmem [#allocation5], %s5750_s28 }
  0x4a   : > { %p5797_p3 = pnand %p3750_p9, %p227_p13  ;;  %s222_s12 = sshll.u32 %s215_s2, 4  ;;  %s223_s12 = int_to_ptr.vmem [resolvable:$true] %s222_s12 }
  0x4b   : > { %s213_s6 = scalar_lea.sflag [#allocation6], %s5750_s28  ;;  %s5426_s30 = scalar_lea.hbm %s5805_s20, 16 }
  0x4c   : > { %s6354_s18 = scalar_select %p5797_p3, 1, 0 }
  0x4d   : > { %p5427_p0 = scmp.ne.s32.totalorder %s5805_s20, %s5426_s30  ;;  %s5431_s5 = scalar_lea.hbm %s6328_s3, 128 }
  0x4e   : > { %p5432_p5 = scmp.lt.u32.totalorder %s5805_s20, %s6328_s3  ;;  %p5433_p8 = scmp.lt.u32.totalorder %s5431_s5, %s5426_s30 }
  0x4f   : > { %p5429_p1 = pnand %p5427_p0, %p5398_p6  ;;  %p5435_p11 = scmp.lt.u32.totalorder %s5426_s30, %s5805_s20 }
  0x50   : > { %p5434_p10 = por %p5433_p8, %p5432_p5 }
  0x51   : > { %p5430_p2 = pneg %p5429_p1 }
  0x52   : > { %p5436_p12 = por %p5435_p11, %p5434_p10 }
  0x54   : > { %p5437_p9 = pnand %p5436_p12, %p5430_p2 }
  0x56   : > { %5440 = shalt.err (!%p5437_p9)
}
  0x57   : > { %s5441_s2 = scalar_lea.vmem %s223_s12, 16  ;;  %s5604_s28 = smov [#allocation5]  }
  0x58   : > { %p5442_p13 = scmp.ne.s32.totalorder %s223_s12, %s5441_s2  ;;  %s5446_s9 = sshll.u32 %s5604_s28, 4  ;;  %s5447_s9 = int_to_ptr.vmem [resolvable:$false] %s5446_s9 }
  0x59   : > { %s5448_s14 = scalar_lea.vmem %s5447_s9, 32  ;;  %p5449_p7 = scmp.lt.s32.totalorder %s223_s12, %s5447_s9 }
  0x5a   : > { %p5444_p0 = pnand %p5442_p13, %p5398_p6  ;;  %p5450_p3 = scmp.lt.s32.totalorder %s5448_s14, %s5441_s2 }
  0x5c   : > { %p5445_p1 = pneg %p5444_p0  ;;  %p5451_p5 = por %p5450_p3, %p5449_p7 }
  0x5e   : > { %p5452_p8 = pnand %p5451_p5, %p5445_p1 }
  0x60   : > { %5455 = shalt.err (!%p5452_p8)
}
  0x61   : > { %4987 = dma.hbm_to_vmem [thread:$0]  (!%p5756_p4), %s5805_s20, 16, %s223_s12, %s213_s6  }
  0x62   : > { %p6355_p2 = scmp.ne.s32.totalorder %s6354_s18, 0 }
  0x63   : > { %s5831_s30 = sand.u32 (!%p6355_p2), 1, %s5566_s19   ;;  %p6356_p7 = scmp.ne.s32.totalorder (!%p6355_p2), %s6345_s10, 0 }
  0x64   : > { %231 = sbr.rel (%p6355_p2) target bundleno = 637 (0x27d), region = 36  ;;  %s234_s24 = scalar_lea.sflag (!%p6355_p2), [#allocation3], %s5831_s30 }
  0x65   : > { %s4974_s8 = smul.u32 (!%p6355_p2), 2304, %s5831_s30 }
  0x67   : > { %s5835_s5 = scalar_lea.vmem (!%p6355_p2), [#allocation2], %s4974_s8 }
  0x6b   : > { %5537 = dma.done.wait (%p6356_p7), %s234_s24, 36864  }
  0x6c   : > { %5539 = vsyncadd (%p6356_p7), %s234_s24, 4294930432  ;;  %s243_s12 = scalar_lea.sflag [#allocation6], %s5831_s30  ;;  %s245_s7 = scalar_lea.vmem [#allocation5], %s5831_s30 }
  0x6d   : > { %5541 = dma.done.wait (%p6356_p7), %s243_s12, 16  }
  0x6e   : > { %5543 = vsyncadd (%p6356_p7), %s243_s12, 4294967280  ;;  %v5102_v0 = vld [vmem:[%s5835_s5 + $0x140] sm:$0xff]   ;;  %v5106_v4 = vld [vmem:[%s5835_s5 + $0x148] sm:$0xff]   ;;  %s277_s10 = smul.u32 6, %s5578_s22  ;;  %s3752_s18 = sshll.u32 %s5574_s21, 1  ;;  %v421_v24 = vlaneseq }
  0x6f   : > { %v5103_v1 = vld [vmem:[%s5835_s5 + $0x1c0] sm:$0xff]   ;;  %4577 = vmatprep.subr.bf16.mxu0 %v5102_v0  ;;  %v5107_v5 = vld [vmem:[%s5835_s5 + $0x1c8] sm:$0xff]   ;;  %v5110_v8 = vld [vmem:[%s5835_s5 + $0x150] sm:$0xff]   ;;  %v5605_v22 = vmov 1983009808   ;;  %s4570_s8 = sshll.u32 %s5578_s22, 1 }
  0x70   : > { %v5104_v2 = vld [vmem:[%s5835_s5 + $0x100] sm:$0xff]   ;;  %4599 = vmatprep.subr.bf16.mxu1 %v5103_v1  ;;  %v5108_v6 = vld [vmem:[%s5835_s5 + $0x108] sm:$0xff]   ;;  %v5111_v9 = vld [vmem:[%s5835_s5 + $0x1d0] sm:$0xff]   ;;  %v419_v23 = vunpack.c.l.s4 %v5605_v22  ;;  %s279_s20 = sadd.s32 %s3752_s18, %s277_s10  ;;  %v422_v30 = vshrl.u32 %v421_v24, 7  ;;  %s271_s24 = sand.u32 1, %s5554_s16  }
  0x71   : > { %v5105_v3 = vld [vmem:[%s5835_s5 + $0x180] sm:$0xff]   ;;  %4578 = vmatpush3.bf16.msra.mxu0 %v5104_v2  ;;  %v5109_v7 = vld [vmem:[%s5835_s5 + $0x188] sm:$0xff]   ;;  %v5112_v10 = vld [vmem:[%s5835_s5 + $0x110] sm:$0xff]   ;;  %s4575_s6 = sshll.u32 %s279_s20, 3  ;;  %s3751_s12 = sshll.u32 %s271_s24, 1 }
  0x72   : > { %4600 = vmatpush3.bf16.msra.mxu1 %v5105_v3  ;;  %4579 = vmatprep.subr.bf16.mxu0 %v5106_v4  ;;  %v5113_v11 = vld [vmem:[%s5835_s5 + $0x190] sm:$0xff]   ;;  %v5114_v12 = vld [vmem:[%s5835_s5 + $0x158] sm:$0xff]   ;;  %v5118_v16 = vld [vmem:[%s5835_s5 + $0x160] sm:$0xff]   ;;  %v420_v29 = vunpack.c.0.s8 %v419_v23  ;;  %s5882_s2 = scalar_lea.vmem %s6325_s0, %s4575_s6  ;;  %s5887_s14 = scalar_lea.vmem %s6326_s1, %s4575_s6 }
  0x73   : > { %4601 = vmatprep.subr.bf16.mxu1 %v5107_v5  ;;  %v5115_v13 = vld [vmem:[%s5835_s5 + $0x1d8] sm:$0xff]   ;;  %v5119_v17 = vld [vmem:[%s5835_s5 + $0x1e0] sm:$0xff]   ;;  %v5122_v20 = vld [vmem:[%s5835_s5 + $0x168] sm:$0xff]   ;;  %s273_s20 = scalar_lea.vmem [#allocation7], %s3751_s12  ;;  %p6357_p6 = scmp.ne.s32.totalorder %s6347_s25, 0 }
  0x74   : > { %v5116_v14 = vld [vmem:[%s5835_s5 + $0x118] sm:$0xff]   ;;  %v5120_v18 = vld [vmem:[%s5835_s5 + $0x120] sm:$0xff]   ;;  %v5123_v21 = vld [vmem:[%s5835_s5 + $0x1e8] sm:$0xff]   ;;  %v5889_v35 = vsub.s32 %v420_v29, %v422_v30  ;;  %s5606_s30 = smov [#allocation7]  }
  0x75   : > { %4580 = vmatpush3.bf16.msra.mxu0 %v5108_v6  ;;  %v5117_v15 = vld [vmem:[%s5835_s5 + $0x198] sm:$0xff]   ;;  %v5121_v19 = vld [vmem:[%s5835_s5 + $0x1a0] sm:$0xff]   ;;  %v5124_v25 = vld [vmem:[%s5835_s5 + $0x128] sm:$0xff]  }
  0x76   : > { %4602 = vmatpush3.bf16.msra.mxu1 %v5109_v7  ;;  %4581 = vmatprep.subr.bf16.mxu0 %v5110_v8  ;;  %v5125_v26 = vld [vmem:[%s5835_s5 + $0x1a8] sm:$0xff]   ;;  %v5126_v27 = vld [vmem:[%s5835_s5 + $0x170] sm:$0xff]   ;;  %v5130_v33 = vld [vmem:[%s5835_s5 + $0x178] sm:$0xff]  }
  0x77   : > { %4603 = vmatprep.subr.bf16.mxu1 %v5111_v9  ;;  %v5127_v28 = vld [vmem:[%s5835_s5 + $0x1f0] sm:$0xff]   ;;  %v5131_v34 = vld [vmem:[%s5835_s5 + $0x1f8] sm:$0xff]   ;;  %v283_v38 = vld [vmem:[%s5882_s2] sm:$0xff] }
  0x78   : > { %v5128_v31 = vld [vmem:[%s5835_s5 + $0x130] sm:$0xff]   ;;  %v5132_v36 = vld [vmem:[%s5835_s5 + $0x138] sm:$0xff]   ;;  %v286_v39 = vld [vmem:[%s5887_s14] sm:$0xff]  ;;  %v711_v41 = vcombine.high %v283_v38, %v283_v38  ;;  %v5897_v42 = vrot.slane %v283_v38, %v5889_v35 }
  0x79   : > { %4582 = vmatpush3.bf16.msra.mxu0 %v5112_v10  ;;  %v5129_v32 = vld [vmem:[%s5835_s5 + $0x1b0] sm:$0xff]   ;;  %v5133_v37 = vld [vmem:[%s5835_s5 + $0x1b8] sm:$0xff]   ;;  %v424_v40 = vrot.slane %v286_v39, %v5889_v35  ;;  %v417_v43 = vcombine.high %v286_v39, %v286_v39  ;;  %v5138_v44 = vld [vmem:[%s5835_s5 + $0x40] sm:$0xff]  }
  0x7a   : > { %4604 = vmatpush3.bf16.msra.mxu1 %v5113_v11  ;;  %4583 = vmatprep.subr.bf16.mxu0 %v5114_v12  ;;  %v5139_v46 = vld [vmem:[%s5835_s5 + $0xc0] sm:$0xff]   ;;  %v5903_v47 = vcombine.high %v5897_v42, %v5897_v42  ;;  %v5906_v48 = vrot.slane %v711_v41, %v5889_v35  ;;  %v5142_v53 = vld [vmem:[%s5835_s5 + $0x48] sm:$0xff]   ;;  %v5146_v58 = vld [vmem:[%s5835_s5 + $0x50] sm:$0xff]  }
  0x7b   : > { %4605 = vmatprep.subr.bf16.mxu1 %v5115_v13  ;;  %v432_v45 = vcombine.high %v424_v40, %v424_v40  ;;  %v431_v49 = vrot.slane %v417_v43, %v5889_v35  ;;  %v5140_v50 = vld [vmem:[%s5835_s5] sm:$0xff]   ;;  %v5143_v55 = vld [vmem:[%s5835_s5 + $0xc8] sm:$0xff]   ;;  %v5147_v59 = vld [vmem:[%s5835_s5 + $0xd0] sm:$0xff]  }
  0x7c   : > { %v5141_v51 = vld [vmem:[%s5835_s5 + $0x80] sm:$0xff]   ;;  %v5914_v54 = vcombine.high %v5906_v48, %v5906_v48  ;;  %v5144_v56 = vld [vmem:[%s5835_s5 + $0x8] sm:$0xff]   ;;  %v5148_v60 = vld [vmem:[%s5835_s5 + $0x10] sm:$0xff]   ;;  %v1079_v13 = vshll.u32 %v5903_v47, 16 }
  0x7d   : > { %4584 = vmatpush3.bf16.msra.mxu0 %v5116_v14  ;;  %662 = vmatprep.mubr.bf16.mxu0 %v432_v45  ;;  %v433_v52 = vcombine.high %v431_v49, %v431_v49  ;;  %v5145_v57 = vld [vmem:[%s5835_s5 + $0x88] sm:$0xff]   ;;  %v5149_v61 = vld [vmem:[%s5835_s5 + $0x90] sm:$0xff]   ;;  %v5150_v62 = vld [vmem:[%s5835_s5 + $0x58] sm:$0xff]  }
  0x7e   : > { %4606 = vmatpush3.bf16.msra.mxu1 %v5117_v15  ;;  %4585 = vmatprep.subr.bf16.mxu0 %v5118_v16  ;;  %v5151_v63 = vld [vmem:[%s5835_s5 + $0xd8] sm:$0xff]   ;;  %v5154_v2 = vld [vmem:[%s5835_s5 + $0x60] sm:$0xff]   ;;  %v5158_v6 = vld [vmem:[%s5835_s5 + $0x68] sm:$0xff]   ;;  %v1093_v16 = vshll.u32 %v5914_v54, 16  ;;  %v1091_v22 = vshrl.u32 %v5914_v54, 16 }
  0x7f   : > { %4607 = vmatprep.subr.bf16.mxu1 %v5119_v17  ;;  %702 = vmatprep.mubr.bf16.mxu1 %v433_v52  ;;  %v5152_v0 = vld [vmem:[%s5835_s5 + $0x18] sm:$0xff]   ;;  %v5155_v3 = vld [vmem:[%s5835_s5 + $0xe0] sm:$0xff]   ;;  %v5159_v7 = vld [vmem:[%s5835_s5 + $0xe8] sm:$0xff]  }
  0x80   : > { %v5153_v1 = vld [vmem:[%s5835_s5 + $0x98] sm:$0xff]   ;;  %v5156_v4 = vld [vmem:[%s5835_s5 + $0x20] sm:$0xff]   ;;  %v5160_v8 = vld [vmem:[%s5835_s5 + $0x28] sm:$0xff]   ;;  %v1095_v24 = vrot.slane %v1093_v16, 1 }
  0x81   : > { %4586 = vmatpush3.bf16.msra.mxu0 %v5120_v18  ;;  %v5157_v5 = vld [vmem:[%s5835_s5 + $0xa0] sm:$0xff]   ;;  %v5161_v9 = vld [vmem:[%s5835_s5 + $0xa8] sm:$0xff]   ;;  %v5162_v10 = vld [vmem:[%s5835_s5 + $0x70] sm:$0xff]   ;;  %v1077_v18 = vshrl.u32 %v5903_v47, 16 }
  0x82   : > { %4608 = vmatpush3.bf16.msra.mxu1 %v5121_v19  ;;  %4587 = vmatprep.subr.bf16.mxu0 %v5122_v20  ;;  %v5163_v11 = vld [vmem:[%s5835_s5 + $0xf0] sm:$0xff]   ;;  %v5166_v15 = vld [vmem:[%s5835_s5 + $0x78] sm:$0xff]   ;;  %v1081_v20 = vrot.slane %v1079_v13, 1  ;;  %v5170_v23 = vld [vmem:[%s5835_s5 + $0x240] sm:$0xff]   ;;  %v1096_v30 = vor.u32 %v1095_v24, %v1091_v22 }
  0x83   : > { %4609 = vmatprep.subr.bf16.mxu1 %v5123_v21  ;;  %v5164_v12 = vld [vmem:[%s5835_s5 + $0x30] sm:$0xff]   ;;  %v5167_v17 = vld [vmem:[%s5835_s5 + $0xf8] sm:$0xff]   ;;  %v5174_v29 = vld [vmem:[%s5835_s5 + $0x248] sm:$0xff]  }
  0x84   : > { %v5165_v14 = vld [vmem:[%s5835_s5 + $0xb0] sm:$0xff]   ;;  %v5168_v19 = vld [vmem:[%s5835_s5 + $0x38] sm:$0xff]   ;;  %v5187_v45 = vld [vmem:[%s5835_s5 + $0x2e0] sm:$0xff]  }
  0x85   : > { %4588 = vmatpush3.bf16.msra.mxu0 %v5124_v25  ;;  %v5169_v21 = vld [vmem:[%s5835_s5 + $0xb8] sm:$0xff]   ;;  %v5171_v25 = vld [vmem:[%s5835_s5 + $0x2c0] sm:$0xff]   ;;  %v5181_v38 = vld [vmem:[%s5835_s5 + $0x290] sm:$0xff]  }
  0x86   : > { %4610 = vmatpush3.bf16.msra.mxu1 %v5125_v26  ;;  %4589 = vmatprep.subr.bf16.mxu0 %v5126_v27  ;;  %v5172_v26 = vld [vmem:[%s5835_s5 + $0x200] sm:$0xff]   ;;  %v1082_v27 = vor.u32 %v1081_v20, %v1077_v18  ;;  %v5182_v39 = vld [vmem:[%s5835_s5 + $0x258] sm:$0xff]   ;;  %v3982_v52 = vld [vmem:[%s5882_s2 + $0x8] sm:$0xff] }
  0x87   : > { %4611 = vmatprep.subr.bf16.mxu1 %v5127_v28  ;;  %v5173_v28 = vld [vmem:[%s5835_s5 + $0x280] sm:$0xff]   ;;  %v5184_v41 = vld [vmem:[%s5835_s5 + $0x218] sm:$0xff]   ;;  %v5209_v16 = vld [vmem:[%s5835_s5 + $0x388] sm:$0xff]  }
  0x88   : > { %v5185_v43 = vld [vmem:[%s5835_s5 + $0x298] sm:$0xff]   ;;  %v5211_v18 = vld [vmem:[%s5835_s5 + $0x3d0] sm:$0xff]  }
  0x89   : > { %4590 = vmatpush3.bf16.msra.mxu0 %v5128_v31  ;;  %v5175_v31 = vld [vmem:[%s5835_s5 + $0x2c8] sm:$0xff]   ;;  %v5213_v20 = vld [vmem:[%s5835_s5 + $0x390] sm:$0xff]   ;;  %v5215_v22 = vld [vmem:[%s5835_s5 + $0x3d8] sm:$0xff]  }
  0x8a   : > { %4612 = vmatpush3.bf16.msra.mxu1 %v5129_v32  ;;  %4591 = vmatprep.subr.bf16.mxu0 %v5130_v33  ;;  %v5176_v32 = vld [vmem:[%s5835_s5 + $0x208] sm:$0xff]   ;;  %v5217_v24 = vld [vmem:[%s5835_s5 + $0x398] sm:$0xff]  }
  0x8b   : > { %4613 = vmatprep.subr.bf16.mxu1 %v5131_v34  ;;  %v5177_v33 = vld [vmem:[%s5835_s5 + $0x288] sm:$0xff]   ;;  %v5178_v34 = vld [vmem:[%s5835_s5 + $0x250] sm:$0xff]  }
  0x8d   : > { %4592 = vmatpush3.bf16.msra.mxu0 %v5132_v36  ;;  %v5179_v36 = vld [vmem:[%s5835_s5 + $0x2d0] sm:$0xff]  }
  0x8e   : > { %4614 = vmatpush3.bf16.msra.mxu1 %v5133_v37  ;;  %4621 = vmatprep.subr.bf16.mxu0 %v5138_v44  ;;  %v5180_v37 = vld [vmem:[%s5835_s5 + $0x210] sm:$0xff]   ;;  %v5186_v44 = vld [vmem:[%s5835_s5 + $0x260] sm:$0xff]  }
  0x8f   : > { %4643 = vmatprep.subr.bf16.mxu1 %v5139_v46  ;;  %v5188_v46 = vld [vmem:[%s5835_s5 + $0x220] sm:$0xff]  }
  0x90   : > { %663 = vmatmul.mubr.bf16.vlgmr.msra.gmra.mrb[0].mxu0 %v424_v40  ;;  %v5183_v40 = vld [vmem:[%s5835_s5 + $0x2d8] sm:$0xff]  }
  0x91   : > { %4622 = vmatpush3.bf16.msra.mxu0 %v5140_v50  ;;  %956 = vmatprep.mubr.bf16.mxu0 %v5903_v47  ;;  %v5189_v47 = vld [vmem:[%s5835_s5 + $0x2a0] sm:$0xff]   ;;  %v5191_v50 = vld [vmem:[%s5835_s5 + $0x2e8] sm:$0xff]  }
  0x92   : > { %4623 = vmatprep.subr.bf16.mxu0 %v5142_v53  ;;  %703 = vmatmul.mubr.bf16.vlgmr.msra.gmra.mrb[0].mxu1 %v431_v49  ;;  %v5190_v49 = vld [vmem:[%s5835_s5 + $0x268] sm:$0xff]  }
  0x93   : > { %4644 = vmatpush3.bf16.msra.mxu1 %v5141_v51  ;;  %996 = vmatprep.mubr.bf16.mxu1 %v5914_v54  ;;  %v5192_v51 = vld [vmem:[%s5835_s5 + $0x228] sm:$0xff]   ;;  %v5194_v54 = vld [vmem:[%s5835_s5 + $0x270] sm:$0xff]  }
  0x94   : > { %4645 = vmatprep.subr.bf16.mxu1 %v5143_v55  ;;  %v5193_v53 = vld [vmem:[%s5835_s5 + $0x2a8] sm:$0xff]   ;;  %v1072_v55 = vshll.u32 %v5897_v42, 16 }
  0x95   : > { %4624 = vmatpush3.bf16.msra.mxu0 %v5144_v56  ;;  %v5195_v56 = vld [vmem:[%s5835_s5 + $0x2f0] sm:$0xff]  }
  0x96   : > { %4625 = vmatprep.subr.bf16.mxu0 %v5146_v58  ;;  %v1070_v58 = vshrl.u32 %v5897_v42, 16 }
  0x97   : > { %4646 = vmatpush3.bf16.msra.mxu1 %v5145_v57  ;;  %v5196_v57 = vld [vmem:[%s5835_s5 + $0x230] sm:$0xff]  }
  0x98   : > { %4647 = vmatprep.subr.bf16.mxu1 %v5147_v59  ;;  %v5197_v59 = vld [vmem:[%s5835_s5 + $0x2b0] sm:$0xff]  }
  0x99   : > { %4626 = vmatpush3.bf16.msra.mxu0 %v5148_v60  ;;  %v1086_v60 = vshll.u32 %v5906_v48, 16 }
  0x9a   : > { %4627 = vmatprep.subr.bf16.mxu0 %v5150_v62  ;;  %v5198_v62 = vld [vmem:[%s5835_s5 + $0x278] sm:$0xff]  }
  0x9b   : > { %4648 = vmatpush3.bf16.msra.mxu1 %v5149_v61  ;;  %v1448_v61 = vcombine.high %v3982_v52, %v3982_v52 }
  0x9c   : > { %4649 = vmatprep.subr.bf16.mxu1 %v5151_v63  ;;  %v1074_v63 = vrot.slane %v1072_v55, 1  ;;  %v5245_v55 = vld [vmem:[%s5835_s5 + $0x490] sm:$0xff]  }
  0x9d   : > { %4628 = vmatpush3.bf16.msra.mxu0 %v5152_v0  ;;  %v5199_v0 = vld [vmem:[%s5835_s5 + $0x2f8] sm:$0xff]  }
  0x9e   : > { %4629 = vmatprep.subr.bf16.mxu0 %v5154_v2  ;;  %v5200_v2 = vld [vmem:[%s5835_s5 + $0x238] sm:$0xff]  }
  0x9f   : > { %4650 = vmatpush3.bf16.msra.mxu1 %v5153_v1  ;;  %v5986_v1 = vrot.slane %v3982_v52, %v5889_v35  ;;  %v5242_v52 = vld [vmem:[%s5835_s5 + $0x450] sm:$0xff]  }
  0xa0   : > { %4651 = vmatprep.subr.bf16.mxu1 %v5155_v3  ;;  %v5201_v3 = vld [vmem:[%s5835_s5 + $0x2b8] sm:$0xff]  }
  0xa1   : > { %4630 = vmatpush3.bf16.msra.mxu0 %v5156_v4  ;;  %v1088_v4 = vrot.slane %v1086_v60, 1  ;;  %v5250_v60 = vld [vmem:[%s5835_s5 + $0x460] sm:$0xff]  }
  0xa2   : > { %4631 = vmatprep.subr.bf16.mxu0 %v5158_v6  ;;  %v5202_v6 = vld [vmem:[%s5835_s5 + $0x340] sm:$0xff]  }
  0xa3   : > { %4652 = vmatpush3.bf16.msra.mxu1 %v5157_v5  ;;  %v1075_v5 = vor.u32 %v1074_v63, %v1070_v58  ;;  %v5248_v58 = vld [vmem:[%s5835_s5 + $0x418] sm:$0xff]   ;;  %v5253_v63 = vld [vmem:[%s5835_s5 + $0x4a0] sm:$0xff]  }
  0xa4   : > { %4653 = vmatprep.subr.bf16.mxu1 %v5159_v7  ;;  %v5993_v7 = vrot.slane %v1448_v61, %v5889_v35  ;;  %v5251_v61 = vld [vmem:[%s5835_s5 + $0x4e0] sm:$0xff]  }
  0xa5   : > { %4632 = vmatpush3.bf16.msra.mxu0 %v5160_v8  ;;  %v5203_v8 = vld [vmem:[%s5835_s5 + $0x3c0] sm:$0xff]  }
  0xa6   : > { %4633 = vmatprep.subr.bf16.mxu0 %v5162_v10  ;;  %v6005_v13 = vcombine.high %v5993_v7, %v5993_v7 }
  0xa7   : > { %4654 = vmatpush3.bf16.msra.mxu1 %v5161_v9  ;;  %v5204_v9 = vld [vmem:[%s5835_s5 + $0x300] sm:$0xff]  }
  0xa8   : > { %4655 = vmatprep.subr.bf16.mxu1 %v5163_v11  ;;  %v5205_v11 = vld [vmem:[%s5835_s5 + $0x380] sm:$0xff]  }
  0xa9   : > { %4634 = vmatpush3.bf16.msra.mxu0 %v5164_v12  ;;  %v5206_v12 = vld [vmem:[%s5835_s5 + $0x348] sm:$0xff]  }
  0xaa   : > { %4635 = vmatprep.subr.bf16.mxu0 %v5166_v15  ;;  %v5208_v15 = vld [vmem:[%s5835_s5 + $0x308] sm:$0xff]  }
  0xab   : > { %4656 = vmatpush3.bf16.msra.mxu1 %v5165_v14  ;;  %v5207_v14 = vld [vmem:[%s5835_s5 + $0x3c8] sm:$0xff]  }
  0xac   : > { %4657 = vmatprep.subr.bf16.mxu1 %v5167_v17  ;;  %v5210_v17 = vld [vmem:[%s5835_s5 + $0x350] sm:$0xff]  }
  0xad   : > { %4636 = vmatpush3.bf16.msra.mxu0 %v5168_v19  ;;  %v5212_v19 = vld [vmem:[%s5835_s5 + $0x310] sm:$0xff]  }
  0xae   : > { %4665 = vmatprep.subr.bf16.mxu0 %v5170_v23  ;;  %v5216_v23 = vld [vmem:[%s5835_s5 + $0x318] sm:$0xff]  }
  0xaf   : > { %4658 = vmatpush3.bf16.msra.mxu1 %v5169_v21  ;;  %v5214_v21 = vld [vmem:[%s5835_s5 + $0x358] sm:$0xff]  }
  0xb0   : > { %957 = vmatmul.mubr.bf16.vlgmr.msra.gmra.mrb[4].mxu0 %v5897_v42  ;;  %4687 = vmatprep.subr.bf16.mxu1 %v5171_v25  ;;  %v1084_v42 = vshrl.u32 %v5906_v48, 16  ;;  %v5218_v25 = vld [vmem:[%s5835_s5 + $0x360] sm:$0xff]  }
  0xb1   : > { %4666 = vmatpush3.bf16.msra.mxu0 %v5172_v26  ;;  %1325 = vmatprep.mubr.bf16.mxu0 %v1082_v27  ;;  %v5219_v26 = vld [vmem:[%s5835_s5 + $0x3e0] sm:$0xff]  }
  0xb2   : > { %4667 = vmatprep.subr.bf16.mxu0 %v5174_v29  ;;  %997 = vmatmul.mubr.bf16.vlgmr.msra.gmra.mrb[4].mxu1 %v5906_v48  ;;  %v5999_v48 = vcombine.high %v5986_v1, %v5986_v1  ;;  %v1089_v10 = vor.u32 %v1088_v4, %v1084_v42  ;;  %v5220_v27 = vld [vmem:[%s5835_s5 + $0x320] sm:$0xff]   ;;  %v5222_v29 = vld [vmem:[%s5835_s5 + $0x368] sm:$0xff]   ;;  %v5258_v4 = vld [vmem:[%s5835_s5 + $0x470] sm:$0xff]  }
  0xb3   : > { %4688 = vmatpush3.bf16.msra.mxu1 %v5173_v28  ;;  %1365 = vmatprep.mubr.bf16.mxu1 %v1096_v30  ;;  %v5221_v28 = vld [vmem:[%s5835_s5 + $0x3a0] sm:$0xff]   ;;  %v5223_v30 = vld [vmem:[%s5835_s5 + $0x3e8] sm:$0xff]  }
  0xb4   : > { %4689 = vmatprep.subr.bf16.mxu1 %v5175_v31  ;;  %v5224_v31 = vld [vmem:[%s5835_s5 + $0x328] sm:$0xff]  }
  0xb5   : > { %4668 = vmatpush3.bf16.msra.mxu0 %v5176_v32  ;;  %v5225_v32 = vld [vmem:[%s5835_s5 + $0x3a8] sm:$0xff]  }
  0xb6   : > { %4669 = vmatprep.subr.bf16.mxu0 %v5178_v34  ;;  %v5227_v34 = vld [vmem:[%s5835_s5 + $0x3f0] sm:$0xff]   ;;  %v5256_v42 = vld [vmem:[%s5835_s5 + $0x428] sm:$0xff]  }
  0xb7   : > { %4690 = vmatpush3.bf16.msra.mxu1 %v5177_v33  ;;  %v5226_v33 = vld [vmem:[%s5835_s5 + $0x370] sm:$0xff]  }
  0xb8   : > { %4691 = vmatprep.subr.bf16.mxu1 %v5179_v36  ;;  %v5228_v36 = vld [vmem:[%s5835_s5 + $0x330] sm:$0xff]  }
  0xb9   : > { %4670 = vmatpush3.bf16.msra.mxu0 %v5180_v37  ;;  %v5229_v37 = vld [vmem:[%s5835_s5 + $0x3b0] sm:$0xff]  }
  0xba   : > { %4671 = vmatprep.subr.bf16.mxu0 %v5182_v39  ;;  %v5231_v39 = vld [vmem:[%s5835_s5 + $0x3f8] sm:$0xff]  }
  0xbb   : > { %4692 = vmatpush3.bf16.msra.mxu1 %v5181_v38  ;;  %v5230_v38 = vld [vmem:[%s5835_s5 + $0x378] sm:$0xff]  }
  0xbc   : > { %4693 = vmatprep.subr.bf16.mxu1 %v5183_v40  ;;  %v5232_v40 = vld [vmem:[%s5835_s5 + $0x338] sm:$0xff]  }
  0xbd   : > { %4672 = vmatpush3.bf16.msra.mxu0 %v5184_v41  ;;  %v5233_v41 = vld [vmem:[%s5835_s5 + $0x3b8] sm:$0xff]  }
  0xbe   : > { %4673 = vmatprep.subr.bf16.mxu0 %v5186_v44  ;;  %v5235_v44 = vld [vmem:[%s5835_s5 + $0x4c0] sm:$0xff]  }
  0xbf   : > { %4694 = vmatpush3.bf16.msra.mxu1 %v5185_v43  ;;  %v5234_v43 = vld [vmem:[%s5835_s5 + $0x440] sm:$0xff]  }
  0xc0   : > { %4695 = vmatprep.subr.bf16.mxu1 %v5187_v45  ;;  %v5236_v45 = vld [vmem:[%s5835_s5 + $0x400] sm:$0xff]  }
  0xc1   : > { %4674 = vmatpush3.bf16.msra.mxu0 %v5188_v46  ;;  %v5237_v46 = vld [vmem:[%s5835_s5 + $0x480] sm:$0xff]  }
  0xc2   : > { %4675 = vmatprep.subr.bf16.mxu0 %v5190_v49  ;;  %v5239_v49 = vld [vmem:[%s5835_s5 + $0x4c8] sm:$0xff]  }
  0xc3   : > { %4696 = vmatpush3.bf16.msra.mxu1 %v5189_v47  ;;  %v5238_v47 = vld [vmem:[%s5835_s5 + $0x448] sm:$0xff]  }
  0xc4   : > { %4697 = vmatprep.subr.bf16.mxu1 %v5191_v50  ;;  %v5240_v50 = vld [vmem:[%s5835_s5 + $0x408] sm:$0xff]  }
  0xc5   : > { %4676 = vmatpush3.bf16.msra.mxu0 %v5192_v51  ;;  %v5241_v51 = vld [vmem:[%s5835_s5 + $0x488] sm:$0xff]  }
  0xc6   : > { %4677 = vmatprep.subr.bf16.mxu0 %v5194_v54  ;;  %v5244_v54 = vld [vmem:[%s5835_s5 + $0x410] sm:$0xff]  }
  0xc7   : > { %4698 = vmatpush3.bf16.msra.mxu1 %v5193_v53  ;;  %v5243_v53 = vld [vmem:[%s5835_s5 + $0x4d0] sm:$0xff]  }
  0xc8   : > { %4699 = vmatprep.subr.bf16.mxu1 %v5195_v56  ;;  %v5246_v56 = vld [vmem:[%s5835_s5 + $0x458] sm:$0xff]  }
  0xc9   : > { %4678 = vmatpush3.bf16.msra.mxu0 %v5196_v57  ;;  %v5247_v57 = vld [vmem:[%s5835_s5 + $0x4d8] sm:$0xff]  }
  0xca   : > { %4679 = vmatprep.subr.bf16.mxu0 %v5198_v62  ;;  %v5252_v62 = vld [vmem:[%s5835_s5 + $0x420] sm:$0xff]  }
  0xcb   : > { %4700 = vmatpush3.bf16.msra.mxu1 %v5197_v59  ;;  %v5249_v59 = vld [vmem:[%s5835_s5 + $0x498] sm:$0xff]  }
  0xcc   : > { %4701 = vmatprep.subr.bf16.mxu1 %v5199_v0  ;;  %v5254_v0 = vld [vmem:[%s5835_s5 + $0x468] sm:$0xff]  }
  0xcd   : > { %4680 = vmatpush3.bf16.msra.mxu0 %v5200_v2  ;;  %v5255_v2 = vld [vmem:[%s5835_s5 + $0x4e8] sm:$0xff]  }
  0xce   : > { %4709 = vmatprep.subr.bf16.mxu0 %v5202_v6  ;;  %v5260_v6 = vld [vmem:[%s5835_s5 + $0x430] sm:$0xff]  }
  0xcf   : > { %4702 = vmatpush3.bf16.msra.mxu1 %v5201_v3  ;;  %v5257_v3 = vld [vmem:[%s5835_s5 + $0x4a8] sm:$0xff]  }
  0xd0   : > { %1326 = vmatmul.mubr.bf16.vlgmr.msra.gmra.mrb[8].mxu0 %v1075_v5  ;;  %4731 = vmatprep.subr.bf16.mxu1 %v5203_v8  ;;  %v5259_v5 = vld [vmem:[%s5835_s5 + $0x4f0] sm:$0xff]  }
  0xd1   : > { %4710 = vmatpush3.bf16.msra.mxu0 %v5204_v9  ;;  %1693 = vmatprep.mubr.bf16.mxu0 %v5999_v48  ;;  %v5261_v8 = vld [vmem:[%s5835_s5 + $0x4b0] sm:$0xff]   ;;  %v2177_v9 = vshll.u32 %v5999_v48, 16 }
  0xd2   : > { %4711 = vmatprep.subr.bf16.mxu0 %v5206_v12  ;;  %1366 = vmatmul.mubr.bf16.vlgmr.msra.gmra.mrb[8].mxu1 %v1089_v10  ;;  %v5262_v10 = vld [vmem:[%s5835_s5 + $0x478] sm:$0xff]   ;;  %v2191_v12 = vshll.u32 %v6005_v13, 16 }
  0xd3   : > { %4732 = vmatpush3.bf16.msra.mxu1 %v5205_v11  ;;  %1733 = vmatprep.mubr.bf16.mxu1 %v6005_v13  ;;  %v5263_v11 = vld [vmem:[%s5835_s5 + $0x4f8] sm:$0xff]  }
  0xd4   : > { %4733 = vmatprep.subr.bf16.mxu1 %v5207_v14  ;;  %v5264_v14 = vld [vmem:[%s5835_s5 + $0x438] sm:$0xff]  }
  0xd5   : > { %4712 = vmatpush3.bf16.msra.mxu0 %v5208_v15  ;;  %v5265_v15 = vld [vmem:[%s5835_s5 + $0x4b8] sm:$0xff]  }
  0xd6   : > { %4713 = vmatprep.subr.bf16.mxu0 %v5210_v17  ;;  %v2175_v17 = vshrl.u32 %v5999_v48, 16  ;;  %v5269_v48 = vld [vmem:[%s5835_s5 + $0x500] sm:$0xff]  }
  0xd7   : > { %4734 = vmatpush3.bf16.msra.mxu1 %v5209_v16  ;;  %v3985_v16 = vld [vmem:[%s5887_s14 + $0x8] sm:$0xff] }
  0xd8   : > { %4735 = vmatprep.subr.bf16.mxu1 %v5211_v18  ;;  %v2179_v18 = vrot.slane %v2177_v9, 1  ;;  %v5300_v9 = vld [vmem:[%s5835_s5 + $0x6c0] sm:$0xff]  }
  0xd9   : > { %4714 = vmatpush3.bf16.msra.mxu0 %v5212_v19  ;;  %v1815_v19 = vrot.slane %v3985_v16, %v5889_v35 }
  0xda   : > { %4715 = vmatprep.subr.bf16.mxu0 %v5214_v21  ;;  %v5267_v21 = vld [vmem:[%s5835_s5 + $0x540] sm:$0xff]  }
  0xdb   : > { %4736 = vmatpush3.bf16.msra.mxu1 %v5213_v20  ;;  %v1808_v20 = vcombine.high %v3985_v16, %v3985_v16  ;;  %v5304_v16 = vld [vmem:[%s5835_s5 + $0x6c8] sm:$0xff]  }
  0xdc   : > { %4737 = vmatprep.subr.bf16.mxu1 %v5215_v22  ;;  %v2189_v22 = vshrl.u32 %v6005_v13, 16  ;;  %v2180_v13 = vor.u32 %v2179_v18, %v2175_v17  ;;  %v5305_v17 = vld [vmem:[%s5835_s5 + $0x608] sm:$0xff]  }
  0xdd   : > { %4716 = vmatpush3.bf16.msra.mxu0 %v5216_v23  ;;  %v5268_v23 = vld [vmem:[%s5835_s5 + $0x5c0] sm:$0xff]   ;;  %v5306_v18 = vld [vmem:[%s5835_s5 + $0x688] sm:$0xff]  }
  0xde   : > { %4717 = vmatprep.subr.bf16.mxu0 %v5218_v25  ;;  %v1823_v25 = vcombine.high %v1815_v19, %v1815_v19 }
  0xdf   : > { %4738 = vmatpush3.bf16.msra.mxu1 %v5217_v24  ;;  %v2193_v24 = vrot.slane %v2191_v12, 1  ;;  %v5302_v12 = vld [vmem:[%s5835_s5 + $0x680] sm:$0xff]  }
  0xe0   : > { %4739 = vmatprep.subr.bf16.mxu1 %v5219_v26  ;;  %v1822_v26 = vrot.slane %v1808_v20, %v5889_v35  ;;  %v5308_v20 = vld [vmem:[%s5835_s5 + $0x6d0] sm:$0xff]  }
  0xe1   : > { %4718 = vmatpush3.bf16.msra.mxu0 %v5220_v27  ;;  %v5270_v27 = vld [vmem:[%s5835_s5 + $0x580] sm:$0xff]  }
  0xe2   : > { %4719 = vmatprep.subr.bf16.mxu0 %v5222_v29  ;;  %v5271_v29 = vld [vmem:[%s5835_s5 + $0x548] sm:$0xff]  }
  0xe3   : > { %4740 = vmatpush3.bf16.msra.mxu1 %v5221_v28  ;;  %v1824_v28 = vcombine.high %v1822_v26, %v1822_v26 }
  0xe4   : > { %4741 = vmatprep.subr.bf16.mxu1 %v5223_v30  ;;  %v5272_v30 = vld [vmem:[%s5835_s5 + $0x5c8] sm:$0xff]  }
  0xe5   : > { %4720 = vmatpush3.bf16.msra.mxu0 %v5224_v31  ;;  %v2194_v31 = vor.u32 %v2193_v24, %v2189_v22  ;;  %v5310_v22 = vld [vmem:[%s5835_s5 + $0x690] sm:$0xff]   ;;  %v5312_v24 = vld [vmem:[%s5835_s5 + $0x6d8] sm:$0xff]  }
  0xe6   : > { %4721 = vmatprep.subr.bf16.mxu0 %v5226_v33  ;;  %v5274_v33 = vld [vmem:[%s5835_s5 + $0x588] sm:$0xff]  }
  0xe7   : > { %4742 = vmatpush3.bf16.msra.mxu1 %v5225_v32  ;;  %v5273_v32 = vld [vmem:[%s5835_s5 + $0x508] sm:$0xff]  }
  0xe8   : > { %4743 = vmatprep.subr.bf16.mxu1 %v5227_v34  ;;  %v5275_v34 = vld [vmem:[%s5835_s5 + $0x550] sm:$0xff]  }
  0xe9   : > { %4722 = vmatpush3.bf16.msra.mxu0 %v5228_v36  ;;  %v5276_v36 = vld [vmem:[%s5835_s5 + $0x5d0] sm:$0xff]  }
  0xea   : > { %4723 = vmatprep.subr.bf16.mxu0 %v5230_v38  ;;  %v5278_v38 = vld [vmem:[%s5835_s5 + $0x590] sm:$0xff]  }
  0xeb   : > { %4744 = vmatpush3.bf16.msra.mxu1 %v5229_v37  ;;  %v5277_v37 = vld [vmem:[%s5835_s5 + $0x510] sm:$0xff]  }
  0xec   : > { %4745 = vmatprep.subr.bf16.mxu1 %v5231_v39  ;;  %v5279_v39 = vld [vmem:[%s5835_s5 + $0x558] sm:$0xff]  }
  0xed   : > { %4724 = vmatpush3.bf16.msra.mxu0 %v5232_v40  ;;  %v5280_v40 = vld [vmem:[%s5835_s5 + $0x5d8] sm:$0xff]  }
  0xee   : > { %4753 = vmatprep.subr.bf16.mxu0 %v5234_v43  ;;  %v5282_v43 = vld [vmem:[%s5835_s5 + $0x598] sm:$0xff]  }
  0xef   : > { %4746 = vmatpush3.bf16.msra.mxu1 %v5233_v41  ;;  %v5281_v41 = vld [vmem:[%s5835_s5 + $0x518] sm:$0xff]  }
  0xf0   : > { %1694 = vmatmul.mubr.bf16.vlgmr.msra.gmra.mrb[12].mxu0 %v5986_v1  ;;  %4775 = vmatprep.subr.bf16.mxu1 %v5235_v44  ;;  %v5283_v44 = vld [vmem:[%s5835_s5 + $0x560] sm:$0xff]  }
  0xf1   : > { %4754 = vmatpush3.bf16.msra.mxu0 %v5236_v45  ;;  %2053 = vmatprep.mubr.bf16.mxu0 %v1823_v25  ;;  %v5284_v45 = vld [vmem:[%s5835_s5 + $0x5e0] sm:$0xff]   ;;  %v5313_v25 = vld [vmem:[%s5835_s5 + $0x618] sm:$0xff]  }
  0xf2   : > { %4755 = vmatprep.subr.bf16.mxu0 %v5238_v47  ;;  %1734 = vmatmul.mubr.bf16.vlgmr.msra.gmra.mrb[12].mxu1 %v5993_v7  ;;  %v5286_v47 = vld [vmem:[%s5835_s5 + $0x5a0] sm:$0xff]  }
  0xf3   : > { %4776 = vmatpush3.bf16.msra.mxu1 %v5237_v46  ;;  %2093 = vmatprep.mubr.bf16.mxu1 %v1824_v28  ;;  %v5285_v46 = vld [vmem:[%s5835_s5 + $0x520] sm:$0xff]  }
  0xf4   : > { %4777 = vmatprep.subr.bf16.mxu1 %v5239_v49  ;;  %v5287_v49 = vld [vmem:[%s5835_s5 + $0x568] sm:$0xff]   ;;  %v5317_v28 = vld [vmem:[%s5835_s5 + $0x620] sm:$0xff]  }
  0xf5   : > { %4756 = vmatpush3.bf16.msra.mxu0 %v5240_v50  ;;  %v5288_v50 = vld [vmem:[%s5835_s5 + $0x5e8] sm:$0xff]  }
  0xf6   : > { %4757 = vmatprep.subr.bf16.mxu0 %v5242_v52  ;;  %v4276_v52 = vld [vmem:[%s5882_s2 + $0x10] sm:$0xff] }
  0xf7   : > { %4778 = vmatpush3.bf16.msra.mxu1 %v5241_v51  ;;  %v5289_v51 = vld [vmem:[%s5835_s5 + $0x528] sm:$0xff]  }
  0xf8   : > { %4779 = vmatprep.subr.bf16.mxu1 %v5243_v53  ;;  %v5290_v53 = vld [vmem:[%s5835_s5 + $0x5a8] sm:$0xff]  }
  0xf9   : > { %4758 = vmatpush3.bf16.msra.mxu0 %v5244_v54  ;;  %v5291_v54 = vld [vmem:[%s5835_s5 + $0x570] sm:$0xff]  }
  0xfa   : > { %4759 = vmatprep.subr.bf16.mxu0 %v5246_v56  ;;  %v2170_v56 = vshll.u32 %v5986_v1, 16 }
  0xfb   : > { %4780 = vmatpush3.bf16.msra.mxu1 %v5245_v55  ;;  %v5292_v55 = vld [vmem:[%s5835_s5 + $0x5f0] sm:$0xff]  }
  0xfc   : > { %4781 = vmatprep.subr.bf16.mxu1 %v5247_v57  ;;  %v5293_v57 = vld [vmem:[%s5835_s5 + $0x530] sm:$0xff]  }
  0xfd   : > { %4760 = vmatpush3.bf16.msra.mxu0 %v5248_v58  ;;  %v5294_v58 = vld [vmem:[%s5835_s5 + $0x5b0] sm:$0xff]  }
  0xfe   : > { %4761 = vmatprep.subr.bf16.mxu0 %v5250_v60  ;;  %v2546_v60 = vcombine.high %v4276_v52, %v4276_v52 }
  0xff   : > { %4782 = vmatpush3.bf16.msra.mxu1 %v5249_v59  ;;  %v2184_v59 = vshll.u32 %v5993_v7, 16 }
 0x100   : > { %4783 = vmatprep.subr.bf16.mxu1 %v5251_v61  ;;  %v5295_v61 = vld [vmem:[%s5835_s5 + $0x578] sm:$0xff]  }
 0x101   : > { %4762 = vmatpush3.bf16.msra.mxu0 %v5252_v62  ;;  %v2168_v62 = vshrl.u32 %v5986_v1, 16  ;;  %v6119_v1 = vrot.slane %v2546_v60, %v5889_v35  ;;  %v5347_v60 = vld [vmem:[%s5835_s5 + $0x760] sm:$0xff]  }
 0x102   : > { %4763 = vmatprep.subr.bf16.mxu0 %v5254_v0  ;;  %v2172_v0 = vrot.slane %v2170_v56, 1  ;;  %v5343_v56 = vld [vmem:[%s5835_s5 + $0x758] sm:$0xff]  }
 0x103   : > { %4784 = vmatpush3.bf16.msra.mxu1 %v5253_v63  ;;  %v5296_v63 = vld [vmem:[%s5835_s5 + $0x5f8] sm:$0xff]  }
 0x104   : > { %4785 = vmatprep.subr.bf16.mxu1 %v5255_v2  ;;  %v6112_v2 = vrot.slane %v4276_v52, %v5889_v35  ;;  %v5339_v52 = vld [vmem:[%s5835_s5 + $0x750] sm:$0xff]  }
 0x105   : > { %4764 = vmatpush3.bf16.msra.mxu0 %v5256_v42  ;;  %v5297_v42 = vld [vmem:[%s5835_s5 + $0x538] sm:$0xff]  }
 0x106   : > { %4765 = vmatprep.subr.bf16.mxu0 %v5258_v4  ;;  %v5298_v4 = vld [vmem:[%s5835_s5 + $0x5b8] sm:$0xff]  }
 0x107   : > { %4786 = vmatpush3.bf16.msra.mxu1 %v5257_v3  ;;  %v2182_v3 = vshrl.u32 %v5993_v7, 16  ;;  %v6125_v7 = vcombine.high %v6112_v2, %v6112_v2 }
 0x108   : > { %4787 = vmatprep.subr.bf16.mxu1 %v5259_v5  ;;  %v2186_v5 = vrot.slane %v2184_v59, 1  ;;  %v5346_v59 = vld [vmem:[%s5835_s5 + $0x798] sm:$0xff]  }
 0x109   : > { %4766 = vmatpush3.bf16.msra.mxu0 %v5260_v6  ;;  %v5299_v6 = vld [vmem:[%s5835_s5 + $0x640] sm:$0xff]  }
 0x10a   : > { %4767 = vmatprep.subr.bf16.mxu0 %v5262_v10  ;;  %v5301_v10 = vld [vmem:[%s5835_s5 + $0x600] sm:$0xff]  }
 0x10b   : > { %4788 = vmatpush3.bf16.msra.mxu1 %v5261_v8  ;;  %v2173_v8 = vor.u32 %v2172_v0, %v2168_v62  ;;  %v5349_v62 = vld [vmem:[%s5835_s5 + $0x720] sm:$0xff]   ;;  %v5351_v0 = vld [vmem:[%s5835_s5 + $0x768] sm:$0xff]  }
 0x10c   : > { %4789 = vmatprep.subr.bf16.mxu1 %v5263_v11  ;;  %v2187_v11 = vor.u32 %v2186_v5, %v2182_v3  ;;  %v3275_v3 = vshll.u32 %v6125_v7, 16 }
 0x10d   : > { %4768 = vmatpush3.bf16.msra.mxu0 %v5264_v14  ;;  %v5303_v14 = vld [vmem:[%s5835_s5 + $0x648] sm:$0xff]  }
 0x10e   : > { %4797 = vmatprep.subr.bf16.mxu0 %v5267_v21  ;;  %v5309_v21 = vld [vmem:[%s5835_s5 + $0x610] sm:$0xff]  }
 0x10f   : > { %4790 = vmatpush3.bf16.msra.mxu1 %v5265_v15  ;;  %v6131_v15 = vcombine.high %v6119_v1, %v6119_v1 }
 0x110   : > { %2054 = vmatmul.mubr.bf16.vlgmr.msra.gmra.mrb[16].mxu0 %v1815_v19  ;;  %4819 = vmatprep.subr.bf16.mxu1 %v5268_v23  ;;  %v5307_v19 = vld [vmem:[%s5835_s5 + $0x650] sm:$0xff]   ;;  %v5311_v23 = vld [vmem:[%s5835_s5 + $0x658] sm:$0xff]  }
 0x111   : > { %4798 = vmatpush3.bf16.msra.mxu0 %v5269_v48  ;;  %2423 = vmatprep.mubr.bf16.mxu0 %v2180_v13  ;;  %v5315_v48 = vld [vmem:[%s5835_s5 + $0x660] sm:$0xff]   ;;  %v5319_v13 = vld [vmem:[%s5835_s5 + $0x668] sm:$0xff]   ;;  %v3289_v5 = vshll.u32 %v6131_v15, 16 }
 0x112   : > { %2094 = vmatmul.mubr.bf16.vlgmr.msra.gmra.mrb[16].mxu1 %v1822_v26  ;;  %4799 = vmatprep.subr.bf16.mxu0 %v5271_v29  ;;  %v5314_v26 = vld [vmem:[%s5835_s5 + $0x698] sm:$0xff]   ;;  %v5318_v29 = vld [vmem:[%s5835_s5 + $0x6a0] sm:$0xff]  }
 0x113   : > { %4820 = vmatpush3.bf16.msra.mxu1 %v5270_v27  ;;  %2463 = vmatprep.mubr.bf16.mxu1 %v2194_v31  ;;  %v5316_v27 = vld [vmem:[%s5835_s5 + $0x6e0] sm:$0xff]   ;;  %v5321_v31 = vld [vmem:[%s5835_s5 + $0x628] sm:$0xff]  }
 0x114   : > { %4821 = vmatprep.subr.bf16.mxu1 %v5272_v30  ;;  %v5320_v30 = vld [vmem:[%s5835_s5 + $0x6e8] sm:$0xff]  }
 0x115   : > { %4800 = vmatpush3.bf16.msra.mxu0 %v5273_v32  ;;  %v5322_v32 = vld [vmem:[%s5835_s5 + $0x6a8] sm:$0xff]  }
 0x116   : > { %4801 = vmatprep.subr.bf16.mxu0 %v5275_v34  ;;  %v5324_v34 = vld [vmem:[%s5835_s5 + $0x6f0] sm:$0xff]  }
 0x117   : > { %4822 = vmatpush3.bf16.msra.mxu1 %v5274_v33  ;;  %v5323_v33 = vld [vmem:[%s5835_s5 + $0x670] sm:$0xff]  }
 0x118   : > { %4823 = vmatprep.subr.bf16.mxu1 %v5276_v36  ;;  %v5325_v36 = vld [vmem:[%s5835_s5 + $0x630] sm:$0xff]  }
 0x119   : > { %4802 = vmatpush3.bf16.msra.mxu0 %v5277_v37  ;;  %v5326_v37 = vld [vmem:[%s5835_s5 + $0x6b0] sm:$0xff]  }
 0x11a   : > { %4803 = vmatprep.subr.bf16.mxu0 %v5279_v39  ;;  %v5328_v39 = vld [vmem:[%s5835_s5 + $0x6f8] sm:$0xff]  }
 0x11b   : > { %4824 = vmatpush3.bf16.msra.mxu1 %v5278_v38  ;;  %v5327_v38 = vld [vmem:[%s5835_s5 + $0x678] sm:$0xff]  }
 0x11c   : > { %4825 = vmatprep.subr.bf16.mxu1 %v5280_v40  ;;  %v5329_v40 = vld [vmem:[%s5835_s5 + $0x638] sm:$0xff]  }
 0x11d   : > { %4804 = vmatpush3.bf16.msra.mxu0 %v5281_v41  ;;  %v5330_v41 = vld [vmem:[%s5835_s5 + $0x6b8] sm:$0xff]  }
 0x11e   : > { %4805 = vmatprep.subr.bf16.mxu0 %v5283_v44  ;;  %v5332_v44 = vld [vmem:[%s5835_s5 + $0x7c0] sm:$0xff]  }
 0x11f   : > { %4826 = vmatpush3.bf16.msra.mxu1 %v5282_v43  ;;  %v5331_v43 = vld [vmem:[%s5835_s5 + $0x740] sm:$0xff]  }
 0x120   : > { %4827 = vmatprep.subr.bf16.mxu1 %v5284_v45  ;;  %v5333_v45 = vld [vmem:[%s5835_s5 + $0x700] sm:$0xff]  }
 0x121   : > { %4806 = vmatpush3.bf16.msra.mxu0 %v5285_v46  ;;  %v5334_v46 = vld [vmem:[%s5835_s5 + $0x780] sm:$0xff]  }
 0x122   : > { %4807 = vmatprep.subr.bf16.mxu0 %v5287_v49  ;;  %v5336_v49 = vld [vmem:[%s5835_s5 + $0x7c8] sm:$0xff]  }
 0x123   : > { %4828 = vmatpush3.bf16.msra.mxu1 %v5286_v47  ;;  %v5335_v47 = vld [vmem:[%s5835_s5 + $0x748] sm:$0xff]  }
 0x124   : > { %4829 = vmatprep.subr.bf16.mxu1 %v5288_v50  ;;  %v5337_v50 = vld [vmem:[%s5835_s5 + $0x708] sm:$0xff]  }
 0x125   : > { %4808 = vmatpush3.bf16.msra.mxu0 %v5289_v51  ;;  %v5338_v51 = vld [vmem:[%s5835_s5 + $0x788] sm:$0xff]  }
 0x126   : > { %4809 = vmatprep.subr.bf16.mxu0 %v5291_v54  ;;  %v5341_v54 = vld [vmem:[%s5835_s5 + $0x710] sm:$0xff]  }
 0x127   : > { %4830 = vmatpush3.bf16.msra.mxu1 %v5290_v53  ;;  %v5340_v53 = vld [vmem:[%s5835_s5 + $0x7d0] sm:$0xff]  }
 0x128   : > { %4831 = vmatprep.subr.bf16.mxu1 %v5292_v55  ;;  %v5342_v55 = vld [vmem:[%s5835_s5 + $0x790] sm:$0xff]  }
 0x129   : > { %4810 = vmatpush3.bf16.msra.mxu0 %v5293_v57  ;;  %v5344_v57 = vld [vmem:[%s5835_s5 + $0x7d8] sm:$0xff]  }
 0x12a   : > { %4811 = vmatprep.subr.bf16.mxu0 %v5295_v61  ;;  %v5348_v61 = vld [vmem:[%s5835_s5 + $0x7e0] sm:$0xff]  }
 0x12b   : > { %4832 = vmatpush3.bf16.msra.mxu1 %v5294_v58  ;;  %v5345_v58 = vld [vmem:[%s5835_s5 + $0x718] sm:$0xff]  }
 0x12c   : > { %4833 = vmatprep.subr.bf16.mxu1 %v5296_v63  ;;  %v5350_v63 = vld [vmem:[%s5835_s5 + $0x7a0] sm:$0xff]  }
 0x12d   : > { %4812 = vmatpush3.bf16.msra.mxu0 %v5297_v42  ;;  %v5352_v42 = vld [vmem:[%s5835_s5 + $0x7e8] sm:$0xff]  }
 0x12e   : > { %4841 = vmatprep.subr.bf16.mxu0 %v5299_v6 }
 0x12f   : > { %4834 = vmatpush3.bf16.msra.mxu1 %v5298_v4  ;;  %v5353_v4 = vld [vmem:[%s5835_s5 + $0x728] sm:$0xff]  }
 0x130   : > { %2424 = vmatmul.mubr.bf16.vlgmr.msra.gmra.mrb[20].mxu0 %v2173_v8  ;;  %4863 = vmatprep.subr.bf16.mxu1 %v5300_v9  ;;  %v5354_v8 = vld [vmem:[%s5835_s5 + $0x7a8] sm:$0xff]  }
 0x131   : > { %4842 = vmatpush3.bf16.msra.mxu0 %v5301_v10  ;;  %2791 = vmatprep.mubr.bf16.mxu0 %v6125_v7  ;;  %v5355_v10 = vld [vmem:[%s5835_s5 + $0x770] sm:$0xff]  }
 0x132   : > { %2464 = vmatmul.mubr.bf16.vlgmr.msra.gmra.mrb[20].mxu1 %v2187_v11  ;;  %4843 = vmatprep.subr.bf16.mxu0 %v5303_v14  ;;  %v5356_v14 = vld [vmem:[%s5835_s5 + $0x7f0] sm:$0xff]  }
 0x133   : > { %4864 = vmatpush3.bf16.msra.mxu1 %v5302_v12  ;;  %2831 = vmatprep.mubr.bf16.mxu1 %v6131_v15 }
 0x134   : > { %4865 = vmatprep.subr.bf16.mxu1 %v5304_v16 }
 0x135   : > { %4844 = vmatpush3.bf16.msra.mxu0 %v5305_v17 }
 0x136   : > { %4845 = vmatprep.subr.bf16.mxu0 %v5307_v19  ;;  %v5358_v19 = vld [vmem:[%s5835_s5 + $0x7b0] sm:$0xff]  }
 0x137   : > { %4866 = vmatpush3.bf16.msra.mxu1 %v5306_v18  ;;  %v5357_v18 = vld [vmem:[%s5835_s5 + $0x730] sm:$0xff]  }
 0x138   : > { %4867 = vmatprep.subr.bf16.mxu1 %v5308_v20 }
 0x139   : > { %4846 = vmatpush3.bf16.msra.mxu0 %v5309_v21  ;;  %v5359_v21 = vld [vmem:[%s5835_s5 + $0x778] sm:$0xff]  }
 0x13a   : > { %4847 = vmatprep.subr.bf16.mxu0 %v5311_v23 }
 0x13b   : > { %4868 = vmatpush3.bf16.msra.mxu1 %v5310_v22 }
 0x13c   : > { %4869 = vmatprep.subr.bf16.mxu1 %v5312_v24  ;;  %v5360_v24 = vld [vmem:[%s5835_s5 + $0x7f8] sm:$0xff]  }
 0x13d   : > { %4848 = vmatpush3.bf16.msra.mxu0 %v5313_v25 }
 0x13e   : > { %4849 = vmatprep.subr.bf16.mxu0 %v5315_v48 }
 0x13f   : > { %4870 = vmatpush3.bf16.msra.mxu1 %v5314_v26  ;;  %v5361_v26 = vld [vmem:[%s5835_s5 + $0x738] sm:$0xff]  }
 0x140   : > { %4871 = vmatprep.subr.bf16.mxu1 %v5316_v27  ;;  %v5362_v27 = vld [vmem:[%s5835_s5 + $0x7b8] sm:$0xff]  }
 0x141   : > { %4850 = vmatpush3.bf16.msra.mxu0 %v5317_v28  ;;  %v4279_v28 = vld [vmem:[%s5887_s14 + $0x10] sm:$0xff] }
 0x142   : > { %4851 = vmatprep.subr.bf16.mxu0 %v5319_v13  ;;  %v3277_v13 = vrot.slane %v3275_v3, 1 }
 0x143   : > { %4872 = vmatpush3.bf16.msra.mxu1 %v5318_v29  ;;  %v3273_v29 = vshrl.u32 %v6125_v7, 16  ;;  %v5367_v7 = vld [vmem:[%s5835_s5 + $0x880] sm:$0xff]  }
 0x144   : > { %4873 = vmatprep.subr.bf16.mxu1 %v5320_v30  ;;  %v2913_v30 = vrot.slane %v4279_v28, %v5889_v35 }
 0x145   : > { %4852 = vmatpush3.bf16.msra.mxu0 %v5321_v31  ;;  %v2906_v31 = vcombine.high %v4279_v28, %v4279_v28 }
 0x146   : > { %4853 = vmatprep.subr.bf16.mxu0 %v5323_v33  ;;  %v3287_v33 = vshrl.u32 %v6131_v15, 16  ;;  %v3278_v15 = vor.u32 %v3277_v13, %v3273_v29 }
 0x147   : > { %4874 = vmatpush3.bf16.msra.mxu1 %v5322_v32  ;;  %v5364_v32 = vld [vmem:[%s5835_s5 + $0x840] sm:$0xff]  }
 0x148   : > { %4875 = vmatprep.subr.bf16.mxu1 %v5324_v34  ;;  %v5365_v34 = vld [vmem:[%s5835_s5 + $0x8c0] sm:$0xff]  }
 0x149   : > { %4854 = vmatpush3.bf16.msra.mxu0 %v5325_v36  ;;  %v3291_v36 = vrot.slane %v3289_v5, 1 }
 0x14a   : > { %4855 = vmatprep.subr.bf16.mxu0 %v5327_v38  ;;  %v2920_v38 = vrot.slane %v2906_v31, %v5889_v35  ;;  %v5370_v35 = vld [vmem:[%s5835_s5 + $0x808] sm:$0xff]  }
 0x14b   : > { %4876 = vmatpush3.bf16.msra.mxu1 %v5326_v37  ;;  %v2921_v37 = vcombine.high %v2913_v30, %v2913_v30 }
 0x14c   : > { %4877 = vmatprep.subr.bf16.mxu1 %v5328_v39  ;;  %v5366_v39 = vld [vmem:[%s5835_s5 + $0x800] sm:$0xff]  }
 0x14d   : > { %4856 = vmatpush3.bf16.msra.mxu0 %v5329_v40  ;;  %v2922_v40 = vcombine.high %v2920_v38, %v2920_v38 }
 0x14e   : > { %4885 = vmatprep.subr.bf16.mxu0 %v5331_v43  ;;  %v5369_v43 = vld [vmem:[%s5835_s5 + $0x8c8] sm:$0xff]  }
 0x14f   : > { %4878 = vmatpush3.bf16.msra.mxu1 %v5330_v41  ;;  %v5368_v41 = vld [vmem:[%s5835_s5 + $0x848] sm:$0xff]  }
 0x150   : > { %2792 = vmatmul.mubr.bf16.vlgmr.msra.gmra.mrb[24].mxu0 %v6112_v2  ;;  %4907 = vmatprep.subr.bf16.mxu1 %v5332_v44  ;;  %v3292_v44 = vor.u32 %v3291_v36, %v3287_v33 }
 0x151   : > { %4886 = vmatpush3.bf16.msra.mxu0 %v5333_v45  ;;  %3151 = vmatprep.mubr.bf16.mxu0 %v2921_v37  ;;  %v5371_v45 = vld [vmem:[%s5835_s5 + $0x888] sm:$0xff]  }
 0x152   : > { %2832 = vmatmul.mubr.bf16.vlgmr.msra.gmra.mrb[24].mxu1 %v6119_v1  ;;  %4887 = vmatprep.subr.bf16.mxu0 %v5335_v47  ;;  %v5373_v47 = vld [vmem:[%s5835_s5 + $0x8d0] sm:$0xff]  }
 0x153   : > { %4908 = vmatpush3.bf16.msra.mxu1 %v5334_v46  ;;  %3191 = vmatprep.mubr.bf16.mxu1 %v2922_v40  ;;  %v5372_v46 = vld [vmem:[%s5835_s5 + $0x850] sm:$0xff]  }
 0x154   : > { %4909 = vmatprep.subr.bf16.mxu1 %v5336_v49  ;;  %v5374_v49 = vld [vmem:[%s5835_s5 + $0x810] sm:$0xff]  }
 0x155   : > { %4888 = vmatpush3.bf16.msra.mxu0 %v5337_v50  ;;  %v5375_v50 = vld [vmem:[%s5835_s5 + $0x890] sm:$0xff]  }
 0x156   : > { %4889 = vmatprep.subr.bf16.mxu0 %v5339_v52  ;;  %v5377_v52 = vld [vmem:[%s5835_s5 + $0x8d8] sm:$0xff]  }
 0x157   : > { %4910 = vmatpush3.bf16.msra.mxu1 %v5338_v51  ;;  %v5376_v51 = vld [vmem:[%s5835_s5 + $0x858] sm:$0xff]  }
 0x158   : > { %4911 = vmatprep.subr.bf16.mxu1 %v5340_v53  ;;  %v5378_v53 = vld [vmem:[%s5835_s5 + $0x818] sm:$0xff]  }
 0x159   : > { %4890 = vmatpush3.bf16.msra.mxu0 %v5341_v54  ;;  %v5379_v54 = vld [vmem:[%s5835_s5 + $0x898] sm:$0xff]  }
 0x15a   : > { %4891 = vmatprep.subr.bf16.mxu0 %v5343_v56  ;;  %v5381_v56 = vld [vmem:[%s5835_s5 + $0x8e0] sm:$0xff]  }
 0x15b   : > { %4912 = vmatpush3.bf16.msra.mxu1 %v5342_v55  ;;  %v5380_v55 = vld [vmem:[%s5835_s5 + $0x860] sm:$0xff]  }
 0x15c   : > { %4913 = vmatprep.subr.bf16.mxu1 %v5344_v57  ;;  %v3268_v57 = vshll.u32 %v6112_v2, 16 }
 0x15d   : > { %4892 = vmatpush3.bf16.msra.mxu0 %v5345_v58  ;;  %v5382_v58 = vld [vmem:[%s5835_s5 + $0x820] sm:$0xff]  }
 0x15e   : > { %4893 = vmatprep.subr.bf16.mxu0 %v5347_v60  ;;  %v5384_v60 = vld [vmem:[%s5835_s5 + $0x868] sm:$0xff]  }
 0x15f   : > { %4914 = vmatpush3.bf16.msra.mxu1 %v5346_v59  ;;  %v5383_v59 = vld [vmem:[%s5835_s5 + $0x8a0] sm:$0xff]  }
 0x160   : > { %4915 = vmatprep.subr.bf16.mxu1 %v5348_v61  ;;  %v3266_v61 = vshrl.u32 %v6112_v2, 16 }
 0x161   : > { %4894 = vmatpush3.bf16.msra.mxu0 %v5349_v62  ;;  %v5385_v62 = vld [vmem:[%s5835_s5 + $0x8e8] sm:$0xff]  }
 0x162   : > { %4895 = vmatprep.subr.bf16.mxu0 %v5351_v0  ;;  %v5386_v0 = vld [vmem:[%s5835_s5 + $0x828] sm:$0xff]  }
 0x163   : > { %v4593_v6 = vpop.f32.mrb[0].mxu0  ;;  %4916 = vmatpush3.bf16.msra.mxu1 %v5350_v63  ;;  %v3270_v63 = vrot.slane %v3268_v57, 1 }
 0x164   : > { %v4594_v9 = vpop.f32.mrb[1].mxu0  ;;  %4917 = vmatprep.subr.bf16.mxu1 %v5352_v42  ;;  %v3282_v42 = vshll.u32 %v6119_v1, 16 }
 0x165   : > { %v4595_v11 = vadd.f32 %v4594_v9, %v4593_v6  ;;  %v4596_v12 = vpop.f32.mrb[2].mxu0  ;;  %v4615_v16 = vpop.f32.mrb[0].mxu1  ;;  %4896 = vmatpush3.bf16.msra.mxu0 %v5353_v4  ;;  %v5387_v4 = vld [vmem:[%s5835_s5 + $0x8a8] sm:$0xff]   ;;  %v5388_v6 = vld [vmem:[%s5835_s5 + $0x870] sm:$0xff]  }
 0x166   : > { %v4597_v17 = vpop.f32.mrb[3].mxu0  ;;  %v4616_v20 = vpop.f32.mrb[1].mxu1  ;;  %4897 = vmatprep.subr.bf16.mxu0 %v5355_v10  ;;  %v5389_v9 = vld [vmem:[%s5835_s5 + $0x8f0] sm:$0xff]  }
 0x167   : > { %v4617_v22 = vadd.f32 %v4616_v20, %v4615_v16  ;;  %v4618_v23 = vpop.f32.mrb[2].mxu1  ;;  %4918 = vmatpush3.bf16.msra.mxu1 %v5354_v8  ;;  %v5390_v16 = vld [vmem:[%s5835_s5 + $0x830] sm:$0xff]  }
 0x168   : > { %v4619_v25 = vpop.f32.mrb[3].mxu1  ;;  %4919 = vmatprep.subr.bf16.mxu1 %v5356_v14  ;;  %v5393_v23 = vld [vmem:[%s5835_s5 + $0x8f8] sm:$0xff]  }
 0x169   : > { %v6197_v48 = vadd.f32 %v4617_v22, %v4595_v11  ;;  %4898 = vmatpush3.bf16.msra.mxu0 %v5357_v18  ;;  %v5394_v25 = vld [vmem:[%s5835_s5 + $0x838] sm:$0xff]  }
 0x16a   : > { %4899 = vmatprep.subr.bf16.mxu0 %v5359_v21  ;;  %v5392_v21 = vld [vmem:[%s5835_s5 + $0x878] sm:$0xff]  }
 0x16b   : > { %4920 = vmatpush3.bf16.msra.mxu1 %v5358_v19  ;;  %v5391_v19 = vld [vmem:[%s5835_s5 + $0x8b0] sm:$0xff]  }
 0x16c   : > { %4921 = vmatprep.subr.bf16.mxu1 %v5360_v24  ;;  %v3280_v24 = vshrl.u32 %v6119_v1, 16 }
 0x16d   : > { %4900 = vmatpush3.bf16.msra.mxu0 %v5361_v26  ;;  %v3284_v26 = vrot.slane %v3282_v42, 1 }
 0x16e   : > { %4929 = vmatprep.subr.bf16.mxu0 %v5364_v32 }
 0x16f   : > { %4922 = vmatpush3.bf16.msra.mxu1 %v5362_v27  ;;  %v3271_v27 = vor.u32 %v3270_v63, %v3266_v61  ;;  %v3285_v28 = vor.u32 %v3284_v26, %v3280_v24 }
 0x170   : > { %3152 = vmatmul.mubr.bf16.vlgmr.msra.gmra.mrb[28].mxu0 %v2913_v30  ;;  %4951 = vmatprep.subr.bf16.mxu1 %v5365_v34 }
 0x171   : > { %4930 = vmatpush3.bf16.msra.mxu0 %v5366_v39  ;;  %3521 = vmatprep.mubr.bf16.mxu0 %v3278_v15 }
 0x172   : > { %3192 = vmatmul.mubr.bf16.vlgmr.msra.gmra.mrb[28].mxu1 %v2920_v38  ;;  %4931 = vmatprep.subr.bf16.mxu0 %v5368_v41 }
 0x173   : > { %4952 = vmatpush3.bf16.msra.mxu1 %v5367_v7  ;;  %3561 = vmatprep.mubr.bf16.mxu1 %v3292_v44 }
 0x174   : > { %4953 = vmatprep.subr.bf16.mxu1 %v5369_v43 }
 0x175   : > { %4932 = vmatpush3.bf16.msra.mxu0 %v5370_v35 }
 0x176   : > { %4933 = vmatprep.subr.bf16.mxu0 %v5372_v46 }
 0x177   : > { %4954 = vmatpush3.bf16.msra.mxu1 %v5371_v45 }
 0x178   : > { %4955 = vmatprep.subr.bf16.mxu1 %v5373_v47 }
 0x179   : > { %4934 = vmatpush3.bf16.msra.mxu0 %v5374_v49 }
 0x17a   : > { %4935 = vmatprep.subr.bf16.mxu0 %v5376_v51 }
 0x17b   : > { %4956 = vmatpush3.bf16.msra.mxu1 %v5375_v50 }
 0x17c   : > { %4957 = vmatprep.subr.bf16.mxu1 %v5377_v52 }
 0x17d   : > { %4936 = vmatpush3.bf16.msra.mxu0 %v5378_v53 }
 0x17e   : > { %4937 = vmatprep.subr.bf16.mxu0 %v5380_v55 }
 0x17f   : > { %4958 = vmatpush3.bf16.msra.mxu1 %v5379_v54 }
 0x180   : > { %4959 = vmatprep.subr.bf16.mxu1 %v5381_v56 }
 0x181   : > { %4938 = vmatpush3.bf16.msra.mxu0 %v5382_v58 }
 0x182   : > { %4939 = vmatprep.subr.bf16.mxu0 %v5384_v60 }
 0x183   : > { %v4637_v3 = vpop.f32.mrb[4].mxu0  ;;  %4960 = vmatpush3.bf16.msra.mxu1 %v5383_v59 }
 0x184   : > { %v4638_v5 = vpop.f32.mrb[5].mxu0  ;;  %4961 = vmatprep.subr.bf16.mxu1 %v5385_v62 }
 0x185   : > { %v4639_v8 = vadd.f32 %v4638_v5, %v4637_v3  ;;  %v4640_v2 = vpop.f32.mrb[6].mxu0  ;;  %v4659_v10 = vpop.f32.mrb[4].mxu1  ;;  %4940 = vmatpush3.bf16.msra.mxu0 %v5386_v0 }
 0x186   : > { %v4641_v11 = vpop.f32.mrb[7].mxu0  ;;  %v4660_v14 = vpop.f32.mrb[5].mxu1  ;;  %4941 = vmatprep.subr.bf16.mxu0 %v5388_v6 }
 0x187   : > { %v959_v12 = vadd.f32 %v4639_v8, %v6197_v48  ;;  %v4661_v17 = vadd.f32 %v4660_v14, %v4659_v10  ;;  %v4662_v18 = vpop.f32.mrb[6].mxu1  ;;  %4962 = vmatpush3.bf16.msra.mxu1 %v5387_v4  ;;  %v5395_v48 = vld [vmem:[%s5835_s5 + $0x8b8] sm:$0xff]   ;;  %s3588_s5 = sadd.s32 %s5574_s21, %s4570_s8  ;;  %s3597_s21 = sshll.u32 %s273_s20, 4  ;;  %s6253_s21 = int_to_ptr.vmem [resolvable:$true] %s3597_s21 }
 0x188   : > { %v4663_v20 = vpop.f32.mrb[7].mxu1  ;;  %4963 = vmatprep.subr.bf16.mxu1 %v5389_v9  ;;  %s4571_s10 = sshll.u32 %s3588_s5, 3  ;;  %s5456_s2 = scalar_lea.vmem %s6253_s21, 32 }
 0x189   : > { %v999_v22 = vadd.f32 %v4661_v17, %v959_v12  ;;  %4942 = vmatpush3.bf16.msra.mxu0 %v5390_v16  ;;  %s3593_s18 = sadd.s32 %s5582_s23, %s4571_s10  ;;  %s3580_s23 = scalar_lea.sflag [#allocation4], %s271_s24 }
 0x18a   : > { %4943 = vmatprep.subr.bf16.mxu0 %v5392_v21  ;;  %s4572_s22 = sshll.u32 %s3593_s18, 5  ;;  %p5457_p4 = scmp.ne.s32.totalorder %s6253_s21, %s5456_s2 }
 0x18b   : > { %4964 = vmatpush3.bf16.msra.mxu1 %v5391_v19  ;;  %s6251_s29 = scalar_lea.hbm %s6329_s4, %s4572_s22 }
 0x18c   : > { %4965 = vmatprep.subr.bf16.mxu1 %v5393_v23  ;;  %p5458_p3 = pnand %p5457_p4, %p6357_p6 }
 0x18d   : > { %4944 = vmatpush3.bf16.msra.mxu0 %v5394_v25 }
 0x18e   : > { %p5459_p10 = pneg %p5458_p3 }
 0x18f   : > { %4966 = vmatpush3.bf16.msra.mxu1 %v5395_v48 }
 0x190   : > { %3522 = vmatmul.mubr.bf16.vlgmr.msra.gmra.mrb[32].mxu0 %v3271_v27 }
 0x192   : > { %3562 = vmatmul.mubr.bf16.vlgmr.msra.gmra.mrb[32].mxu1 %v3285_v28 }
 0x1a3   : > { %v4681_v29 = vpop.f32.mrb[8].mxu0 }
 0x1a4   : > { %v4682_v13 = vpop.f32.mrb[9].mxu0 }
 0x1a5   : > { %v4683_v30 = vadd.f32 %v4682_v13, %v4681_v29  ;;  %v4684_v31 = vpop.f32.mrb[10].mxu0  ;;  %v4703_v32 = vpop.f32.mrb[8].mxu1 }
 0x1a6   : > { %v4685_v33 = vpop.f32.mrb[11].mxu0  ;;  %v4704_v34 = vpop.f32.mrb[9].mxu1 }
 0x1a7   : > { %v4705_v1 = vadd.f32 %v4704_v34, %v4703_v32  ;;  %v4706_v36 = vpop.f32.mrb[10].mxu1 }
 0x1a8   : > { %v4707_v37 = vpop.f32.mrb[11].mxu1 }
 0x1a9   : > { %v1368_v38 = vadd.f32 %v4705_v1, %v4683_v30 }
 0x1ab   : > { %v1373_v39 = vadd.f32 %v1368_v38, %v999_v22 }
 0x1c3   : > { %v4725_v7 = vpop.f32.mrb[12].mxu0 }
 0x1c4   : > { %v4726_v40 = vpop.f32.mrb[13].mxu0 }
 0x1c5   : > { %v4727_v41 = vadd.f32 %v4726_v40, %v4725_v7  ;;  %v4728_v15 = vpop.f32.mrb[14].mxu0  ;;  %v4747_v43 = vpop.f32.mrb[12].mxu1 }
 0x1c6   : > { %v4729_v44 = vpop.f32.mrb[15].mxu0  ;;  %v4748_v35 = vpop.f32.mrb[13].mxu1 }
 0x1c7   : > { %v4749_v45 = vadd.f32 %v4748_v35, %v4747_v43  ;;  %v4750_v46 = vpop.f32.mrb[14].mxu1 }
 0x1c8   : > { %v4751_v47 = vpop.f32.mrb[15].mxu1 }
 0x1c9   : > { %v1736_v49 = vadd.f32 %v4749_v45, %v4727_v41  ;;  %v4568_v45 = vld [vmem:[%s245_s7] ss:$0 sm:$0xff]  ;;  %s5460_s7 = sshll.u32 %s5606_s30, 4  ;;  %s5461_s7 = int_to_ptr.vmem [resolvable:$false] %s5460_s7 }
 0x1ca   : > { %s5462_s28 = scalar_lea.vmem %s5461_s7, 64  ;;  %p5463_p11 = scmp.lt.s32.totalorder %s6253_s21, %s5461_s7 }
 0x1cb   : > { %v1741_v50 = vadd.f32 %v1736_v49, %v1373_v39  ;;  %p5464_p12 = scmp.lt.s32.totalorder %s5462_s28, %s5456_s2 }
 0x1cd   : > { %p5465_p9 = por %p5464_p12, %p5463_p11 }
 0x1cf   : > { %p5466_p13 = pnand %p5465_p9, %p5459_p10 }
 0x1e3   : > { %v4769_v51 = vpop.f32.mrb[16].mxu0 }
 0x1e4   : > { %v4770_v52 = vpop.f32.mrb[17].mxu0 }
 0x1e5   : > { %v4791_v53 = vpop.f32.mrb[16].mxu1  ;;  %v4771_v54 = vadd.f32 %v4770_v52, %v4769_v51  ;;  %v4772_v55 = vpop.f32.mrb[18].mxu0 }
 0x1e6   : > { %v4792_v56 = vpop.f32.mrb[17].mxu1  ;;  %v4773_v57 = vpop.f32.mrb[19].mxu0 }
 0x1e7   : > { %v4793_v58 = vadd.f32 %v4792_v56, %v4791_v53  ;;  %v4794_v59 = vpop.f32.mrb[18].mxu1 }
 0x1e8   : > { %v4795_v60 = vpop.f32.mrb[19].mxu1 }
 0x1e9   : > { %v2096_v61 = vadd.f32 %v4793_v58, %v4771_v54 }
 0x1eb   : > { %v2101_v62 = vadd.f32 %v2096_v61, %v1741_v50 }
 0x203   : > { %v4813_v63 = vpop.f32.mrb[20].mxu0 }
 0x204   : > { %v4814_v0 = vpop.f32.mrb[21].mxu0 }
 0x205   : > { %v4835_v42 = vpop.f32.mrb[20].mxu1  ;;  %v4815_v3 = vadd.f32 %v4814_v0, %v4813_v63  ;;  %v4816_v4 = vpop.f32.mrb[22].mxu0 }
 0x206   : > { %v4836_v5 = vpop.f32.mrb[21].mxu1  ;;  %v4817_v6 = vpop.f32.mrb[23].mxu0 }
 0x207   : > { %v4837_v8 = vadd.f32 %v4836_v5, %v4835_v42  ;;  %v4838_v2 = vpop.f32.mrb[22].mxu1 }
 0x208   : > { %v4839_v9 = vpop.f32.mrb[23].mxu1 }
 0x209   : > { %v2466_v10 = vadd.f32 %v4837_v8, %v4815_v3 }
 0x20b   : > { %v2471_v11 = vadd.f32 %v2466_v10, %v2101_v62 }
 0x223   : > { %v4857_v12 = vpop.f32.mrb[24].mxu0 }
 0x224   : > { %v4858_v14 = vpop.f32.mrb[25].mxu0 }
 0x225   : > { %v4879_v16 = vpop.f32.mrb[24].mxu1  ;;  %v4859_v17 = vadd.f32 %v4858_v14, %v4857_v12  ;;  %v4860_v18 = vpop.f32.mrb[26].mxu0 }
 0x226   : > { %v4880_v19 = vpop.f32.mrb[25].mxu1  ;;  %v4861_v20 = vpop.f32.mrb[27].mxu0 }
 0x227   : > { %v4881_v21 = vadd.f32 %v4880_v19, %v4879_v16  ;;  %v4882_v22 = vpop.f32.mrb[26].mxu1 }
 0x228   : > { %v4883_v23 = vpop.f32.mrb[27].mxu1 }
 0x229   : > { %v2834_v24 = vadd.f32 %v4881_v21, %v4859_v17 }
 0x22b   : > { %v2839_v25 = vadd.f32 %v2834_v24, %v2471_v11 }
 0x243   : > { %v4901_v26 = vpop.f32.mrb[28].mxu0 }
 0x244   : > { %v4902_v48 = vpop.f32.mrb[29].mxu0 }
 0x245   : > { %v4923_v27 = vpop.f32.mrb[28].mxu1  ;;  %v4903_v28 = vadd.f32 %v4902_v48, %v4901_v26  ;;  %v4904_v29 = vpop.f32.mrb[30].mxu0 }
 0x246   : > { %v4924_v13 = vpop.f32.mrb[29].mxu1  ;;  %v4905_v30 = vpop.f32.mrb[31].mxu0 }
 0x247   : > { %v4925_v31 = vadd.f32 %v4924_v13, %v4923_v27  ;;  %v4926_v32 = vpop.f32.mrb[30].mxu1 }
 0x248   : > { %v4927_v33 = vpop.f32.mrb[31].mxu1 }
 0x249   : > { %v3194_v34 = vadd.f32 %v4925_v31, %v4903_v28 }
 0x24b   : > { %v3199_v1 = vadd.f32 %v3194_v34, %v2839_v25 }
 0x263   : > { %v4945_v36 = vpop.f32.mrb[32].mxu0 }
 0x264   : > { %v4946_v37 = vpop.f32.mrb[33].mxu0 }
 0x265   : > { %v4967_v38 = vpop.f32.mrb[32].mxu1  ;;  %v4947_v39 = vadd.f32 %v4946_v37, %v4945_v36  ;;  %v4948_v7 = vpop.f32.mrb[34].mxu0 }
 0x266   : > { %v4968_v40 = vpop.f32.mrb[33].mxu1  ;;  %v4949_v41 = vpop.f32.mrb[35].mxu0 }
 0x267   : > { %v4969_v15 = vadd.f32 %v4968_v40, %v4967_v38  ;;  %v4970_v43 = vpop.f32.mrb[34].mxu1 }
 0x268   : > { %v4971_v44 = vpop.f32.mrb[35].mxu1 }
 0x269   : > { %v3564_v35 = vadd.f32 %v4969_v15, %v4947_v39 }
 0x26b   : > { %v3569_v46 = vadd.f32 %v3564_v35, %v3199_v1 }
 0x26d   : > { %v3577_v47 = vadd.f32 %v4568_v45, %v3569_v46 }
 0x26f   : > { %3578 = vst [vmem:[%s273_s20] sm:$0x3] %v3577_v47 }
 0x270   : > { %5469 = shalt.err (!%p5466_p13)
}
 0x271   : > { %s5470_s9 = scalar_lea.hbm %s6251_s29, 32  ;;  %s5474_s24 = scalar_lea.hbm %s6329_s4, 1024 }
 0x272   : > { %p5471_p0 = scmp.ne.s32.totalorder %s6251_s29, %s5470_s9  ;;  %p5475_p8 = scmp.lt.u32.totalorder %s6251_s29, %s6329_s4 }
 0x273   : > { %p5476_p2 = scmp.lt.u32.totalorder %s5474_s24, %s5470_s9  ;;  %p5478_p4 = scmp.lt.u32.totalorder %s5470_s9, %s6251_s29 }
 0x274   : > { %p5472_p1 = pnand %p5471_p0, %p6357_p6 }
 0x275   : > { %p5477_p7 = por %p5476_p2, %p5475_p8 }
 0x276   : > { %p5473_p5 = pneg %p5472_p1 }
 0x277   : > { %p5479_p3 = por %p5478_p4, %p5477_p7 }
 0x279   : > { %p5480_p10 = pnand %p5479_p3, %p5473_p5 }
 0x27b   : > { %5483 = shalt.err (!%p5480_p10)
}
 0x27c   : > { %4979 = dma.vmem_to_hbm [thread:$0]  (%p6357_p6), %s6253_s21, 32, %s6251_s29, %s3580_s23  }
 0x27d PF: > { %p4993_p11 = scmp.ge.s32.totalorder %s5598_s27, 2  ;;  %s3609_s10 = sand.u32 1, %s5550_s15  }
 0x27e   : > { %p6358_p12 = scmp.ne.s32.totalorder %s6351_s11, 0  ;;  %s3610_s18 = scalar_lea.sflag [#allocation4], %s3609_s10 }
 0x280   : > { %p4989_p9 = pnand %p4993_p11, %p6358_p12 }
 0x282   : > { %5545 = dma.done.wait (!%p4989_p9), %s3610_s18, 32  }
 0x283   : > { %5547 = vsyncadd (!%p4989_p9), %s3610_s18, 4294967264  ;;  %s23_s27 = sadd.s32 1, %s5598_s27   ;;  %s6360_s25 = sld [smem:[#allocation18_spill]] }
 0x284   : > { %p6281_p13 = scmp.ge.s32.totalorder %s23_s27, 34   ;;  %s6361_s20 = sld [smem:[#allocation11_spill]] }
 0x285   : > { %s6362_s21 = sld [smem:[#allocation17_spill]]  ;;  %s6363_s6 = sld [smem:[#allocation12_spill]] }
 0x286   : > { %s6364_s13 = sld [smem:[#allocation13_spill]]  ;;  %s6365_s24 = sld [smem:[#allocation14_spill]] }
 0x287   : > { %s6366_s11 = sld [smem:[#allocation15_spill]]  ;;  %s6367_s29 = sld [smem:[#allocation16_spill]] }
 0x288   : > { %s6369_s15 = smov %s5554_s16  ;;  %s6370_s16 = smov %s5558_s17 }
 0x289   : > { %s6371_s17 = smov %s6360_s25  ;;  %s6372_s18 = smov %s5566_s19 }
 0x28a   : > { %s6373_s19 = smov %s6361_s20  ;;  %s6377_s23 = smov %s5594_s26 }
 0x28b   : > { %s6374_s20 = smov %s6362_s21  ;;  %s6375_s21 = smov %s6363_s6 }
 0x28c   : > { %s6376_s22 = smov %s6364_s13  ;;  %22 = sbr.rel (!%p6281_p13) target bundleno = 14 (0xe), region = 108 }
 0x28d   : > { %s6378_s25 = smov %s6366_s11  ;;  %s6379_s26 = smov %s6367_s29 }
 0x293   :  { %3615 = vsyncpa [#allocation3], 1 }
 0x294   :  { %3617 = vsyncpa [#allocation3 + $0x1], 1 }
 0x295   :  { %3618 = vsyncpa [#allocation6], 1 }
 0x296   :  { %3620 = vsyncpa [#allocation6 + $0x1], 1 }
 0x297   :  { %3621 = vsyncpa [#allocation4], 1 }
 0x298   :  { %3623 = vsyncpa [#allocation4 + $0x1], 1 }

</bundles_post_ra>
